<compile_context>
chip_gen: v7x
topology: tpu7x:2x2x1
jax: 0.10.0
libtpu: 0.0.40
codegen_flags: <defaults>
</compile_context>

<pallas_src>
import functools

import jax
import jax.numpy as jnp
from jax.experimental import pallas as pl
from jax.experimental.pallas import tpu as pltpu

LEAKY_SLOPE = 0.2
BN_EPS = 1e-5


def _round_up(x, m):
    return (x + m - 1) // m * m


def _pick_tile(M, row_bytes):
    """Largest M-tile (<=512, divisor of M) that fits comfortably in VMEM and
    leaves >= 2 grid steps when possible (so both v7x TensorCores get work)."""
    cap = min(512, max(16, (4 * 1024 * 1024) // max(row_bytes, 1)))
    single = None
    for d in (512, 256, 128, 64, 32, 16):
        if d <= cap and M % d == 0:
            if M // d >= 2:
                return d
            if single is None:
                single = d
    return single if single is not None else M


# --------------------------------------------------------------------------
# Pallas kernels
# --------------------------------------------------------------------------
def _matmul_kernel(a_ref, b_ref, o_ref, *, leaky):
    acc = jnp.dot(a_ref[...], b_ref[...], preferred_element_type=jnp.float32)
    if leaky:
        acc = jnp.maximum(acc, LEAKY_SLOPE * acc)
    o_ref[...] = acc.astype(o_ref.dtype)


def _matmul_stats_kernel(a_ref, b_ref, y_ref, st_ref):
    acc = jnp.dot(a_ref[...], b_ref[...], preferred_element_type=jnp.float32)
    y_ref[...] = acc.astype(y_ref.dtype)
    s0 = jnp.sum(acc, axis=0, keepdims=True)          # (1, C)
    s1 = jnp.sum(acc * acc, axis=0, keepdims=True)    # (1, C)
    st_ref[...] = jnp.concatenate([s0, s1], axis=0).reshape(1, 2, -1)


def _scale_shift_leaky_kernel(y_ref, sc_ref, sh_ref, o_ref):
    y = y_ref[...].astype(jnp.float32)
    z = y * sc_ref[...] + sh_ref[...]
    o_ref[...] = jnp.maximum(z, LEAKY_SLOPE * z).astype(o_ref.dtype)


# --------------------------------------------------------------------------
# Pallas wrappers
# --------------------------------------------------------------------------
def matmul(a, b, *, leaky, out_dtype):
    """(M, K) @ (K, C) -> (M, C); optional fused LeakyReLU(0.2). bf16 in, f32 acc."""
    M, K = a.shape
    _, C = b.shape
    tm = _pick_tile(M, K * a.dtype.itemsize + C * jnp.dtype(out_dtype).itemsize)
    cost = pl.CostEstimate(
        flops=2 * M * K * C, transcendentals=0,
        bytes_accessed=M * K * a.dtype.itemsize + K * C * b.dtype.itemsize
        + M * C * jnp.dtype(out_dtype).itemsize)
    return pl.pallas_call(
        functools.partial(_matmul_kernel, leaky=leaky),
        out_shape=jax.ShapeDtypeStruct((M, C), out_dtype),
        grid=(M // tm,),
        in_specs=[pl.BlockSpec((tm, K), lambda i: (i, 0)),
                  pl.BlockSpec((K, C), lambda i: (0, 0))],
        out_specs=pl.BlockSpec((tm, C), lambda i: (i, 0)),
        compiler_params=pltpu.CompilerParams(dimension_semantics=("parallel",)),
        cost_estimate=cost,
    )(a, b)


def matmul_stats(a, b, *, out_dtype=jnp.bfloat16):
    """Matmul that also emits per-tile column sums / sums-of-squares (for BN)."""
    M, K = a.shape
    _, C = b.shape
    tm = _pick_tile(M, K * a.dtype.itemsize + C * jnp.dtype(out_dtype).itemsize)
    nt = M // tm
    cost = pl.CostEstimate(
        flops=2 * M * K * C + 3 * M * C, transcendentals=0,
        bytes_accessed=M * K * a.dtype.itemsize + K * C * b.dtype.itemsize
        + M * C * jnp.dtype(out_dtype).itemsize + nt * 2 * C * 4)
    return pl.pallas_call(
        _matmul_stats_kernel,
        out_shape=(jax.ShapeDtypeStruct((M, C), out_dtype),
                   jax.ShapeDtypeStruct((nt, 2, C), jnp.float32)),
        grid=(nt,),
        in_specs=[pl.BlockSpec((tm, K), lambda i: (i, 0)),
                  pl.BlockSpec((K, C), lambda i: (0, 0))],
        out_specs=(pl.BlockSpec((tm, C), lambda i: (i, 0)),
                   pl.BlockSpec((1, 2, C), lambda i: (i, 0, 0))),
        compiler_params=pltpu.CompilerParams(dimension_semantics=("parallel",)),
        cost_estimate=cost,
    )(a, b)


def scale_shift_leaky(y, scale, shift, *, out_dtype=jnp.bfloat16):
    """Tiled o = LeakyReLU(y * scale + shift) over (M, C)."""
    M, C = y.shape
    tm = _pick_tile(M, C * y.dtype.itemsize + C * jnp.dtype(out_dtype).itemsize)
    sc = scale.reshape(1, C).astype(jnp.float32)
    sh = shift.reshape(1, C).astype(jnp.float32)
    return pl.pallas_call(
        _scale_shift_leaky_kernel,
        out_shape=jax.ShapeDtypeStruct((M, C), out_dtype),
        grid=(M // tm,),
        in_specs=[pl.BlockSpec((tm, C), lambda i: (i, 0)),
                  pl.BlockSpec((1, C), lambda i: (0, 0)),
                  pl.BlockSpec((1, C), lambda i: (0, 0))],
        out_specs=pl.BlockSpec((tm, C), lambda i: (i, 0)),
        compiler_params=pltpu.CompilerParams(dimension_semantics=("parallel",)),
    )(y, sc, sh)


# --------------------------------------------------------------------------
# Conv lowering glue + weight pre-packing
# --------------------------------------------------------------------------
def _im2col_k4s2p1(x):
    """x: (N, H, W, Cp) -> A (N*OH*OW, 16*Cp), column order (kh, kw, c)."""
    N, H, W, Cp = x.shape
    OH, OW = H // 2, W // 2
    xp = jnp.pad(x, ((0, 0), (1, 1), (1, 1), (0, 0)))
    cols = [xp[:, kh:kh + 2 * OH:2, kw:kw + 2 * OW:2, :]
            for kh in range(4) for kw in range(4)]
    a = jnp.stack(cols, axis=3)                                  # (N, OH, OW, 16, Cp)
    return a.reshape(N * OH * OW, 16 * Cp), (N, OH, OW)


def _conv_weight_matrix(w, cin_pad, cout_pad):
    """PyTorch Conv2d weight (Co, Ci, 4, 4) -> bf16 (16*cin_pad, cout_pad)."""
    Co, Ci, KH, KW = w.shape
    wt = jnp.transpose(w, (2, 3, 1, 0))                          # (kh, kw, ci, co)
    wt = jnp.pad(wt, ((0, 0), (0, 0), (0, cin_pad - Ci), (0, cout_pad - Co)))
    return wt.reshape(KH * KW * cin_pad, cout_pad).astype(jnp.bfloat16)


def _fc_weight_matrix(wfc, c_real, c_pad, out_pad):
    """PyTorch Linear weight (O, c_real*4*4), NCHW .view order (c, h, w)
    -> bf16 (4*4*c_pad, out_pad) matching our NHWC-flattened (h, w, c) features."""
    O = wfc.shape[0]
    w4 = wfc.reshape(O, c_real, 4, 4)                            # (o, c, h, w)
    w4 = jnp.transpose(w4, (2, 3, 1, 0))                         # (h, w, c, o)
    w4 = jnp.pad(w4, ((0, 0), (0, 0), (0, c_pad - c_real), (0, out_pad - O)))
    return w4.reshape(4 * 4 * c_pad, out_pad).astype(jnp.bfloat16)


# --------------------------------------------------------------------------
# _netD model
# --------------------------------------------------------------------------
def init_params(key, nc, ndf, num_classes):
    ks = jax.random.split(key, 12)
    nc_pad = _round_up(nc, 8)                  # 16 * nc_pad = 128-lane K for conv1
    chans = (ndf, ndf * 2, ndf * 4, ndf * 8)
    cpads = tuple(_round_up(c, 128) for c in chans)
    n_out = num_classes + 1
    out_pad = _round_up(n_out, 128)

    def convw(k, co, ci):
        return 0.02 * jax.random.normal(k, (co, ci, 4, 4), jnp.float32)

    w1 = convw(ks[0], chans[0], nc)
    w2 = convw(ks[1], chans[1], chans[0])
    w3 = convw(ks[2], chans[2], chans[1])
    w4 = convw(ks[3], chans[3], chans[2])
    wfc = 0.02 * jax.random.normal(ks[4], (n_out, chans[3] * 4 * 4), jnp.float32)

    params = {
        "B1": _conv_weight_matrix(w1, nc_pad, cpads[0]),
        "B2": _conv_weight_matrix(w2, cpads[0], cpads[1]),
        "B3": _conv_weight_matrix(w3, cpads[1], cpads[2]),
        "B4": _conv_weight_matrix(w4, cpads[2], cpads[3]),
        "Bfc": _fc_weight_matrix(wfc, chans[3], cpads[3], out_pad),
    }
    # BN affine params (blocks 2..4); pad channels get gamma = beta = 0 so the
    # padded lanes stay identically zero through the whole network.
    for i, (c, cp) in enumerate(zip(chans[1:], cpads[1:]), start=2):
        g = jnp.ones((c,), jnp.float32) + 0.1 * jax.random.normal(
            ks[3 + i], (c,), jnp.float32)
        params[f"gamma{i}"] = jnp.pad(g, (0, cp - c))
        params[f"beta{i}"] = jnp.zeros((cp,), jnp.float32)
    return params


def netD_forward(x_nchw, params, *, num_classes):
    """Input (N, nc, 64, 64) NCHW -> logits (N, num_classes+1), as PyTorch _netD.forward.
    BatchNorm uses training-mode batch statistics (module default)."""
    N, nc = x_nchw.shape[0], x_nchw.shape[1]
    nc_pad = params["B1"].shape[0] // 16

    x = jnp.transpose(x_nchw, (0, 2, 3, 1)).astype(jnp.bfloat16)      # NHWC
    x = jnp.pad(x, ((0, 0), (0, 0), (0, 0), (0, nc_pad - nc)))

    # Block 1: Conv(4,2,1) + LeakyReLU(0.2) fused in the matmul epilogue.
    # TODO(synk): im2col is still materialized in HBM (4x inflation for k=4,s=2);
    # an in-kernel im2col over a (kh,kw) reduction grid axis would remove it.
    A, (n, oh, ow) = _im2col_k4s2p1(x)
    y = matmul(A, params["B1"], leaky=True, out_dtype=jnp.bfloat16)
    x = y.reshape(n, oh, ow, params["B1"].shape[1])

    # Blocks 2-4: Conv(4,2,1) + BatchNorm(batch stats) + LeakyReLU(0.2).
    for i in (2, 3, 4):
        B = params[f"B{i}"]
        A, (n, oh, ow) = _im2col_k4s2p1(x)
        y, st = matmul_stats(A, B)                     # y bf16, st f32 partial sums
        M = y.shape[0]
        s = jnp.sum(st[:, 0, :], axis=0)
        sq = jnp.sum(st[:, 1, :], axis=0)
        mean = s / M
        var = jnp.maximum(sq / M - mean * mean, 0.0)   # biased var (PyTorch training)
        inv = jax.lax.rsqrt(var + BN_EPS)
        scale = params[f"gamma{i}"] * inv
        shift = params[f"beta{i}"] - mean * scale
        act = scale_shift_leaky(y, scale, shift, out_dtype=jnp.bfloat16)
        x = act.reshape(n, oh, ow, B.shape[1])

    # fc: Linear(ndf*8*4*4 -> num_classes+1, bias=False) on NHWC-flattened features
    # (weight permuted at init to match PyTorch's NCHW .view() ordering).
    feat = x.reshape(N, 4 * 4 * x.shape[-1])
    logits_pad = matmul(feat, params["Bfc"], leaky=False, out_dtype=jnp.float32)
    logits = logits_pad[:, :num_classes + 1]
    return jnp.squeeze(logits)                          # matches output.squeeze()


# --------------------------------------------------------------------------
if __name__ == "__main__":
    nc, ndf, num_classes, batch = 3, 8, 10, 2
    key = jax.random.PRNGKey(0)
    params = init_params(key, nc, ndf, num_classes)

    # 64x64 input is dictated by the module (fc expects ndf*8 x 4 x 4 features).
    x = jax.random.normal(jax.random.fold_in(key, 123),
                          (batch, nc, 64, 64), jnp.float32)

    fwd = jax.jit(functools.partial(netD_forward, num_classes=num_classes))
    out = jax.block_until_ready(fwd(x, params))

    assert out.shape == (batch, num_classes + 1), out.shape
    assert out.dtype == jnp.float32
    assert bool(jnp.isfinite(out).all())
    print("KERNEL_OK")
</pallas_src>

<mosaic_0001>
module attributes {stable_mosaic.version = 11 : i64} {
  func.func @_matmul_kernel(%arg0: i32, %arg1: memref<512x128xbf16, #tpu.memory_space<vmem>>, %arg2: memref<128x128xbf16, #tpu.memory_space<vmem>>, %arg3: memref<512x128xbf16, #tpu.memory_space<vmem>>) attributes {dimension_semantics = [#tpu.dimension_semantics<parallel>], iteration_bounds = array<i64: 4>, scalar_prefetch = 0 : i64, scratch_operands = 0 : i64, tpu.core_type = #tpu.core_type<tc>, window_params = [{transform_indices = @transform_0, window_bounds = array<i64: 512, 128>}, {pipeline_mode = #tpu.pipeline_mode<synchronous>, transform_indices = @transform_1, window_bounds = array<i64: 128, 128>}, {transform_indices = @transform_2, window_bounds = array<i64: 512, 128>}]} {
    %c0 = arith.constant 0 : index
    %c0_0 = arith.constant 0 : index
    %0 = vector.load %arg1[%c0, %c0_0] : memref<512x128xbf16, #tpu.memory_space<vmem>>, vector<512x128xbf16>
    %c0_1 = arith.constant 0 : index
    %c0_2 = arith.constant 0 : index
    %1 = vector.load %arg2[%c0_1, %c0_2] : memref<128x128xbf16, #tpu.memory_space<vmem>>, vector<128x128xbf16>
    %cst = arith.constant dense<0.000000e+00> : vector<512x128xf32>
    %2 = tpu.matmul %0, %1, %cst {dimension_numbers = #tpu.dot_dimension_numbers<[1], [0], [0], [1], [0, 0, 1, 1], [], []>} : vector<512x128xbf16>, vector<128x128xbf16>, vector<512x128xf32> -> vector<512x128xf32>
    %cst_3 = arith.constant 2.000000e-01 : f32
    %3 = vector.broadcast %cst_3 : f32 to vector<512x128xf32>
    %4 = arith.mulf %3, %2 : vector<512x128xf32>
    %5 = arith.maximumf %2, %4 : vector<512x128xf32>
    %6 = arith.truncf %5 : vector<512x128xf32> to vector<512x128xbf16>
    %c0_4 = arith.constant 0 : index
    %c0_5 = arith.constant 0 : index
    %7 = vector.load %arg3[%c0_4, %c0_5] : memref<512x128xbf16, #tpu.memory_space<vmem>>, vector<512x128xbf16>
    tpu.vector_store %arg3[%c0_4, %c0_5], %6 {strides = array<i32>} : memref<512x128xbf16, #tpu.memory_space<vmem>>, vector<512x128xbf16>,
    return
  }
  func.func @transform_0(%arg0: i32) -> (i32, i32) {
    %c0_i32 = arith.constant 0 : i32
    %c0_i32_0 = arith.constant 0 : i32
    return %arg0, %c0_i32 : i32, i32
  }
  func.func @transform_1(%arg0: i32) -> (i32, i32) {
    %c0_i32 = arith.constant 0 : i32
    %c0_i32_0 = arith.constant 0 : i32
    %c0_i32_1 = arith.constant 0 : i32
    return %c0_i32, %c0_i32_0 : i32, i32
  }
  func.func @transform_2(%arg0: i32) -> (i32, i32) {
    %c0_i32 = arith.constant 0 : i32
    %c0_i32_0 = arith.constant 0 : i32
    return %arg0, %c0_i32 : i32, i32
  }
}

module attributes {stable_mosaic.version = 11 : i64} {
  func.func @_matmul_stats_kernel(%arg0: i32, %arg1: memref<256x2048xbf16, #tpu.memory_space<vmem>>, %arg2: memref<2048x128xbf16, #tpu.memory_space<vmem>>, %arg3: memref<256x128xbf16, #tpu.memory_space<vmem>>, %arg4: memref<1x2x128xf32, #tpu.memory_space<vmem>>) attributes {dimension_semantics = [#tpu.dimension_semantics<parallel>], iteration_bounds = array<i64: 2>, scalar_prefetch = 0 : i64, scratch_operands = 0 : i64, tpu.core_type = #tpu.core_type<tc>, window_params = [{transform_indices = @transform_0, window_bounds = array<i64: 256, 2048>}, {pipeline_mode = #tpu.pipeline_mode<synchronous>, transform_indices = @transform_1, window_bounds = array<i64: 2048, 128>}, {transform_indices = @transform_2, window_bounds = array<i64: 256, 128>}, {transform_indices = @transform_3, window_bounds = array<i64: 1, 2, 128>}]} {
    %c0 = arith.constant 0 : index
    %c0_0 = arith.constant 0 : index
    %0 = vector.load %arg1[%c0, %c0_0] : memref<256x2048xbf16, #tpu.memory_space<vmem>>, vector<256x2048xbf16>
    %c0_1 = arith.constant 0 : index
    %c0_2 = arith.constant 0 : index
    %1 = vector.load %arg2[%c0_1, %c0_2] : memref<2048x128xbf16, #tpu.memory_space<vmem>>, vector<2048x128xbf16>
    %cst = arith.constant dense<0.000000e+00> : vector<256x128xf32>
    %2 = tpu.matmul %0, %1, %cst {dimension_numbers = #tpu.dot_dimension_numbers<[1], [0], [0], [1], [0, 0, 1, 1], [], []>} : vector<256x2048xbf16>, vector<2048x128xbf16>, vector<256x128xf32> -> vector<256x128xf32>
    %3 = arith.truncf %2 : vector<256x128xf32> to vector<256x128xbf16>
    %c0_3 = arith.constant 0 : index
    %c0_4 = arith.constant 0 : index
    %4 = vector.load %arg3[%c0_3, %c0_4] : memref<256x128xbf16, #tpu.memory_space<vmem>>, vector<256x128xbf16>
    tpu.vector_store %arg3[%c0_3, %c0_4], %3 {strides = array<i32>} : memref<256x128xbf16, #tpu.memory_space<vmem>>, vector<256x128xbf16>,
    %cst_5 = arith.constant dense<0.000000e+00> : vector<128xf32>
    %5 = vector.multi_reduction <add>, %2, %cst_5 [0] : vector<256x128xf32> to vector<128xf32>
    %6 = vector.shape_cast %5 : vector<128xf32> to vector<1x128xf32>
    %7 = arith.mulf %2, %2 : vector<256x128xf32>
    %cst_6 = arith.constant dense<0.000000e+00> : vector<128xf32>
    %8 = vector.multi_reduction <add>, %7, %cst_6 [0] : vector<256x128xf32> to vector<128xf32>
    %9 = vector.shape_cast %8 : vector<128xf32> to vector<1x128xf32>
    %10 = tpu.concatenate %6, %9 in 0 : vector<1x128xf32>, vector<1x128xf32> -> vector<2x128xf32>
    %11 = vector.shape_cast %10 : vector<2x128xf32> to vector<1x2x128xf32>
    %c0_7 = arith.constant 0 : index
    %c0_8 = arith.constant 0 : index
    %c0_9 = arith.constant 0 : index
    %12 = vector.load %arg4[%c0_7, %c0_8, %c0_9] : memref<1x2x128xf32, #tpu.memory_space<vmem>>, vector<1x2x128xf32>
    tpu.vector_store %arg4[%c0_7, %c0_8, %c0_9], %11 {strides = array<i32>} : memref<1x2x128xf32, #tpu.memory_space<vmem>>, vector<1x2x128xf32>,
    return
  }
  func.func @transform_0(%arg0: i32) -> (i32, i32) {
    %c0_i32 = arith.constant 0 : i32
    %c0_i32_0 = arith.constant 0 : i32
    return %arg0, %c0_i32 : i32, i32
  }
  func.func @transform_1(%arg0: i32) -> (i32, i32) {
    %c0_i32 = arith.constant 0 : i32
    %c0_i32_0 = arith.constant 0 : i32
    %c0_i32_1 = arith.constant 0 : i32
    return %c0_i32, %c0_i32_0 : i32, i32
  }
  func.func @transform_2(%arg0: i32) -> (i32, i32) {
    %c0_i32 = arith.constant 0 : i32
    %c0_i32_0 = arith.constant 0 : i32
    return %arg0, %c0_i32 : i32, i32
  }
  func.func @transform_3(%arg0: i32) -> (i32, i32, i32) {
    %c0_i32 = arith.constant 0 : i32
    %c0_i32_0 = arith.constant 0 : i32
    %c0_i32_1 = arith.constant 0 : i32
    return %arg0, %c0_i32, %c0_i32_0 : i32, i32, i32
  }
}

module attributes {stable_mosaic.version = 11 : i64} {
  func.func @_scale_shift_leaky_kernel(%arg0: i32, %arg1: memref<256x128xbf16, #tpu.memory_space<vmem>>, %arg2: memref<1x128xf32, #tpu.memory_space<vmem>>, %arg3: memref<1x128xf32, #tpu.memory_space<vmem>>, %arg4: memref<256x128xbf16, #tpu.memory_space<vmem>>) attributes {dimension_semantics = [#tpu.dimension_semantics<parallel>], iteration_bounds = array<i64: 2>, scalar_prefetch = 0 : i64, scratch_operands = 0 : i64, tpu.core_type = #tpu.core_type<tc>, window_params = [{transform_indices = @transform_0, window_bounds = array<i64: 256, 128>}, {pipeline_mode = #tpu.pipeline_mode<synchronous>, transform_indices = @transform_1, window_bounds = array<i64: 1, 128>}, {pipeline_mode = #tpu.pipeline_mode<synchronous>, transform_indices = @transform_2, window_bounds = array<i64: 1, 128>}, {transform_indices = @transform_3, window_bounds = array<i64: 256, 128>}]} {
    %c0 = arith.constant 0 : index
    %c0_0 = arith.constant 0 : index
    %0 = vector.load %arg1[%c0, %c0_0] : memref<256x128xbf16, #tpu.memory_space<vmem>>, vector<256x128xbf16>
    %1 = arith.extf %0 : vector<256x128xbf16> to vector<256x128xf32>
    %c0_1 = arith.constant 0 : index
    %c0_2 = arith.constant 0 : index
    %2 = vector.load %arg2[%c0_1, %c0_2] : memref<1x128xf32, #tpu.memory_space<vmem>>, vector<1x128xf32>
    %3 = vector.broadcast %2 : vector<1x128xf32> to vector<256x128xf32>
    %4 = arith.mulf %1, %3 : vector<256x128xf32>
    %c0_3 = arith.constant 0 : index
    %c0_4 = arith.constant 0 : index
    %5 = vector.load %arg3[%c0_3, %c0_4] : memref<1x128xf32, #tpu.memory_space<vmem>>, vector<1x128xf32>
    %6 = vector.broadcast %5 : vector<1x128xf32> to vector<256x128xf32>
    %7 = arith.addf %4, %6 : vector<256x128xf32>
    %cst = arith.constant 2.000000e-01 : f32
    %8 = vector.broadcast %cst : f32 to vector<256x128xf32>
    %9 = arith.mulf %8, %7 : vector<256x128xf32>
    %10 = arith.maximumf %7, %9 : vector<256x128xf32>
    %11 = arith.truncf %10 : vector<256x128xf32> to vector<256x128xbf16>
    %c0_5 = arith.constant 0 : index
    %c0_6 = arith.constant 0 : index
    %12 = vector.load %arg4[%c0_5, %c0_6] : memref<256x128xbf16, #tpu.memory_space<vmem>>, vector<256x128xbf16>
    tpu.vector_store %arg4[%c0_5, %c0_6], %11 {strides = array<i32>} : memref<256x128xbf16, #tpu.memory_space<vmem>>, vector<256x128xbf16>,
    return
  }
  func.func @transform_0(%arg0: i32) -> (i32, i32) {
    %c0_i32 = arith.constant 0 : i32
    %c0_i32_0 = arith.constant 0 : i32
    return %arg0, %c0_i32 : i32, i32
  }
  func.func @transform_1(%arg0: i32) -> (i32, i32) {
    %c0_i32 = arith.constant 0 : i32
    %c0_i32_0 = arith.constant 0 : i32
    %c0_i32_1 = arith.constant 0 : i32
    return %c0_i32, %c0_i32_0 : i32, i32
  }
  func.func @transform_2(%arg0: i32) -> (i32, i32) {
    %c0_i32 = arith.constant 0 : i32
    %c0_i32_0 = arith.constant 0 : i32
    %c0_i32_1 = arith.constant 0 : i32
    return %c0_i32, %c0_i32_0 : i32, i32
  }
  func.func @transform_3(%arg0: i32) -> (i32, i32) {
    %c0_i32 = arith.constant 0 : i32
    %c0_i32_0 = arith.constant 0 : i32
    return %arg0, %c0_i32 : i32, i32
  }
}

module attributes {stable_mosaic.version = 11 : i64} {
  func.func @_matmul_stats_kernel(%arg0: i32, %arg1: memref<64x2048xbf16, #tpu.memory_space<vmem>>, %arg2: memref<2048x128xbf16, #tpu.memory_space<vmem>>, %arg3: memref<64x128xbf16, #tpu.memory_space<vmem>>, %arg4: memref<1x2x128xf32, #tpu.memory_space<vmem>>) attributes {dimension_semantics = [#tpu.dimension_semantics<parallel>], iteration_bounds = array<i64: 2>, scalar_prefetch = 0 : i64, scratch_operands = 0 : i64, tpu.core_type = #tpu.core_type<tc>, window_params = [{transform_indices = @transform_0, window_bounds = array<i64: 64, 2048>}, {pipeline_mode = #tpu.pipeline_mode<synchronous>, transform_indices = @transform_1, window_bounds = array<i64: 2048, 128>}, {transform_indices = @transform_2, window_bounds = array<i64: 64, 128>}, {transform_indices = @transform_3, window_bounds = array<i64: 1, 2, 128>}]} {
    %c0 = arith.constant 0 : index
    %c0_0 = arith.constant 0 : index
    %0 = vector.load %arg1[%c0, %c0_0] : memref<64x2048xbf16, #tpu.memory_space<vmem>>, vector<64x2048xbf16>
    %c0_1 = arith.constant 0 : index
    %c0_2 = arith.constant 0 : index
    %1 = vector.load %arg2[%c0_1, %c0_2] : memref<2048x128xbf16, #tpu.memory_space<vmem>>, vector<2048x128xbf16>
    %cst = arith.constant dense<0.000000e+00> : vector<64x128xf32>
    %2 = tpu.matmul %0, %1, %cst {dimension_numbers = #tpu.dot_dimension_numbers<[1], [0], [0], [1], [0, 0, 1, 1], [], []>} : vector<64x2048xbf16>, vector<2048x128xbf16>, vector<64x128xf32> -> vector<64x128xf32>
    %3 = arith.truncf %2 : vector<64x128xf32> to vector<64x128xbf16>
    %c0_3 = arith.constant 0 : index
    %c0_4 = arith.constant 0 : index
    %4 = vector.load %arg3[%c0_3, %c0_4] : memref<64x128xbf16, #tpu.memory_space<vmem>>, vector<64x128xbf16>
    tpu.vector_store %arg3[%c0_3, %c0_4], %3 {strides = array<i32>} : memref<64x128xbf16, #tpu.memory_space<vmem>>, vector<64x128xbf16>,
    %cst_5 = arith.constant dense<0.000000e+00> : vector<128xf32>
    %5 = vector.multi_reduction <add>, %2, %cst_5 [0] : vector<64x128xf32> to vector<128xf32>
    %6 = vector.shape_cast %5 : vector<128xf32> to vector<1x128xf32>
    %7 = arith.mulf %2, %2 : vector<64x128xf32>
    %cst_6 = arith.constant dense<0.000000e+00> : vector<128xf32>
    %8 = vector.multi_reduction <add>, %7, %cst_6 [0] : vector<64x128xf32> to vector<128xf32>
    %9 = vector.shape_cast %8 : vector<128xf32> to vector<1x128xf32>
    %10 = tpu.concatenate %6, %9 in 0 : vector<1x128xf32>, vector<1x128xf32> -> vector<2x128xf32>
    %11 = vector.shape_cast %10 : vector<2x128xf32> to vector<1x2x128xf32>
    %c0_7 = arith.constant 0 : index
    %c0_8 = arith.constant 0 : index
    %c0_9 = arith.constant 0 : index
    %12 = vector.load %arg4[%c0_7, %c0_8, %c0_9] : memref<1x2x128xf32, #tpu.memory_space<vmem>>, vector<1x2x128xf32>
    tpu.vector_store %arg4[%c0_7, %c0_8, %c0_9], %11 {strides = array<i32>} : memref<1x2x128xf32, #tpu.memory_space<vmem>>, vector<1x2x128xf32>,
    return
  }
  func.func @transform_0(%arg0: i32) -> (i32, i32) {
    %c0_i32 = arith.constant 0 : i32
    %c0_i32_0 = arith.constant 0 : i32
    return %arg0, %c0_i32 : i32, i32
  }
  func.func @transform_1(%arg0: i32) -> (i32, i32) {
    %c0_i32 = arith.constant 0 : i32
    %c0_i32_0 = arith.constant 0 : i32
    %c0_i32_1 = arith.constant 0 : i32
    return %c0_i32, %c0_i32_0 : i32, i32
  }
  func.func @transform_2(%arg0: i32) -> (i32, i32) {
    %c0_i32 = arith.constant 0 : i32
    %c0_i32_0 = arith.constant 0 : i32
    return %arg0, %c0_i32 : i32, i32
  }
  func.func @transform_3(%arg0: i32) -> (i32, i32, i32) {
    %c0_i32 = arith.constant 0 : i32
    %c0_i32_0 = arith.constant 0 : i32
    %c0_i32_1 = arith.constant 0 : i32
    return %arg0, %c0_i32, %c0_i32_0 : i32, i32, i32
  }
}

module attributes {stable_mosaic.version = 11 : i64} {
  func.func @_scale_shift_leaky_kernel(%arg0: i32, %arg1: memref<64x128xbf16, #tpu.memory_space<vmem>>, %arg2: memref<1x128xf32, #tpu.memory_space<vmem>>, %arg3: memref<1x128xf32, #tpu.memory_space<vmem>>, %arg4: memref<64x128xbf16, #tpu.memory_space<vmem>>) attributes {dimension_semantics = [#tpu.dimension_semantics<parallel>], iteration_bounds = array<i64: 2>, scalar_prefetch = 0 : i64, scratch_operands = 0 : i64, tpu.core_type = #tpu.core_type<tc>, window_params = [{transform_indices = @transform_0, window_bounds = array<i64: 64, 128>}, {pipeline_mode = #tpu.pipeline_mode<synchronous>, transform_indices = @transform_1, window_bounds = array<i64: 1, 128>}, {pipeline_mode = #tpu.pipeline_mode<synchronous>, transform_indices = @transform_2, window_bounds = array<i64: 1, 128>}, {transform_indices = @transform_3, window_bounds = array<i64: 64, 128>}]} {
    %c0 = arith.constant 0 : index
    %c0_0 = arith.constant 0 : index
    %0 = vector.load %arg1[%c0, %c0_0] : memref<64x128xbf16, #tpu.memory_space<vmem>>, vector<64x128xbf16>
    %1 = arith.extf %0 : vector<64x128xbf16> to vector<64x128xf32>
    %c0_1 = arith.constant 0 : index
    %c0_2 = arith.constant 0 : index
    %2 = vector.load %arg2[%c0_1, %c0_2] : memref<1x128xf32, #tpu.memory_space<vmem>>, vector<1x128xf32>
    %3 = vector.broadcast %2 : vector<1x128xf32> to vector<64x128xf32>
    %4 = arith.mulf %1, %3 : vector<64x128xf32>
    %c0_3 = arith.constant 0 : index
    %c0_4 = arith.constant 0 : index
    %5 = vector.load %arg3[%c0_3, %c0_4] : memref<1x128xf32, #tpu.memory_space<vmem>>, vector<1x128xf32>
    %6 = vector.broadcast %5 : vector<1x128xf32> to vector<64x128xf32>
    %7 = arith.addf %4, %6 : vector<64x128xf32>
    %cst = arith.constant 2.000000e-01 : f32
    %8 = vector.broadcast %cst : f32 to vector<64x128xf32>
    %9 = arith.mulf %8, %7 : vector<64x128xf32>
    %10 = arith.maximumf %7, %9 : vector<64x128xf32>
    %11 = arith.truncf %10 : vector<64x128xf32> to vector<64x128xbf16>
    %c0_5 = arith.constant 0 : index
    %c0_6 = arith.constant 0 : index
    %12 = vector.load %arg4[%c0_5, %c0_6] : memref<64x128xbf16, #tpu.memory_space<vmem>>, vector<64x128xbf16>
    tpu.vector_store %arg4[%c0_5, %c0_6], %11 {strides = array<i32>} : memref<64x128xbf16, #tpu.memory_space<vmem>>, vector<64x128xbf16>,
    return
  }
  func.func @transform_0(%arg0: i32) -> (i32, i32) {
    %c0_i32 = arith.constant 0 : i32
    %c0_i32_0 = arith.constant 0 : i32
    return %arg0, %c0_i32 : i32, i32
  }
  func.func @transform_1(%arg0: i32) -> (i32, i32) {
    %c0_i32 = arith.constant 0 : i32
    %c0_i32_0 = arith.constant 0 : i32
    %c0_i32_1 = arith.constant 0 : i32
    return %c0_i32, %c0_i32_0 : i32, i32
  }
  func.func @transform_2(%arg0: i32) -> (i32, i32) {
    %c0_i32 = arith.constant 0 : i32
    %c0_i32_0 = arith.constant 0 : i32
    %c0_i32_1 = arith.constant 0 : i32
    return %c0_i32, %c0_i32_0 : i32, i32
  }
  func.func @transform_3(%arg0: i32) -> (i32, i32) {
    %c0_i32 = arith.constant 0 : i32
    %c0_i32_0 = arith.constant 0 : i32
    return %arg0, %c0_i32 : i32, i32
  }
}

module attributes {stable_mosaic.version = 11 : i64} {
  func.func @_matmul_stats_kernel(%arg0: i32, %arg1: memref<16x2048xbf16, #tpu.memory_space<vmem>>, %arg2: memref<2048x128xbf16, #tpu.memory_space<vmem>>, %arg3: memref<16x128xbf16, #tpu.memory_space<vmem>>, %arg4: memref<1x2x128xf32, #tpu.memory_space<vmem>>) attributes {dimension_semantics = [#tpu.dimension_semantics<parallel>], iteration_bounds = array<i64: 2>, scalar_prefetch = 0 : i64, scratch_operands = 0 : i64, tpu.core_type = #tpu.core_type<tc>, window_params = [{transform_indices = @transform_0, window_bounds = array<i64: 16, 2048>}, {pipeline_mode = #tpu.pipeline_mode<synchronous>, transform_indices = @transform_1, window_bounds = array<i64: 2048, 128>}, {transform_indices = @transform_2, window_bounds = array<i64: 16, 128>}, {transform_indices = @transform_3, window_bounds = array<i64: 1, 2, 128>}]} {
    %c0 = arith.constant 0 : index
    %c0_0 = arith.constant 0 : index
    %0 = vector.load %arg1[%c0, %c0_0] : memref<16x2048xbf16, #tpu.memory_space<vmem>>, vector<16x2048xbf16>
    %c0_1 = arith.constant 0 : index
    %c0_2 = arith.constant 0 : index
    %1 = vector.load %arg2[%c0_1, %c0_2] : memref<2048x128xbf16, #tpu.memory_space<vmem>>, vector<2048x128xbf16>
    %cst = arith.constant dense<0.000000e+00> : vector<16x128xf32>
    %2 = tpu.matmul %0, %1, %cst {dimension_numbers = #tpu.dot_dimension_numbers<[1], [0], [0], [1], [0, 0, 1, 1], [], []>} : vector<16x2048xbf16>, vector<2048x128xbf16>, vector<16x128xf32> -> vector<16x128xf32>
    %3 = arith.truncf %2 : vector<16x128xf32> to vector<16x128xbf16>
    %c0_3 = arith.constant 0 : index
    %c0_4 = arith.constant 0 : index
    %4 = vector.load %arg3[%c0_3, %c0_4] : memref<16x128xbf16, #tpu.memory_space<vmem>>, vector<16x128xbf16>
    tpu.vector_store %arg3[%c0_3, %c0_4], %3 {strides = array<i32>} : memref<16x128xbf16, #tpu.memory_space<vmem>>, vector<16x128xbf16>,
    %cst_5 = arith.constant dense<0.000000e+00> : vector<128xf32>
    %5 = vector.multi_reduction <add>, %2, %cst_5 [0] : vector<16x128xf32> to vector<128xf32>
    %6 = vector.shape_cast %5 : vector<128xf32> to vector<1x128xf32>
    %7 = arith.mulf %2, %2 : vector<16x128xf32>
    %cst_6 = arith.constant dense<0.000000e+00> : vector<128xf32>
    %8 = vector.multi_reduction <add>, %7, %cst_6 [0] : vector<16x128xf32> to vector<128xf32>
    %9 = vector.shape_cast %8 : vector<128xf32> to vector<1x128xf32>
    %10 = tpu.concatenate %6, %9 in 0 : vector<1x128xf32>, vector<1x128xf32> -> vector<2x128xf32>
    %11 = vector.shape_cast %10 : vector<2x128xf32> to vector<1x2x128xf32>
    %c0_7 = arith.constant 0 : index
    %c0_8 = arith.constant 0 : index
    %c0_9 = arith.constant 0 : index
    %12 = vector.load %arg4[%c0_7, %c0_8, %c0_9] : memref<1x2x128xf32, #tpu.memory_space<vmem>>, vector<1x2x128xf32>
    tpu.vector_store %arg4[%c0_7, %c0_8, %c0_9], %11 {strides = array<i32>} : memref<1x2x128xf32, #tpu.memory_space<vmem>>, vector<1x2x128xf32>,
    return
  }
  func.func @transform_0(%arg0: i32) -> (i32, i32) {
    %c0_i32 = arith.constant 0 : i32
    %c0_i32_0 = arith.constant 0 : i32
    return %arg0, %c0_i32 : i32, i32
  }
  func.func @transform_1(%arg0: i32) -> (i32, i32) {
    %c0_i32 = arith.constant 0 : i32
    %c0_i32_0 = arith.constant 0 : i32
    %c0_i32_1 = arith.constant 0 : i32
    return %c0_i32, %c0_i32_0 : i32, i32
  }
  func.func @transform_2(%arg0: i32) -> (i32, i32) {
    %c0_i32 = arith.constant 0 : i32
    %c0_i32_0 = arith.constant 0 : i32
    return %arg0, %c0_i32 : i32, i32
  }
  func.func @transform_3(%arg0: i32) -> (i32, i32, i32) {
    %c0_i32 = arith.constant 0 : i32
    %c0_i32_0 = arith.constant 0 : i32
    %c0_i32_1 = arith.constant 0 : i32
    return %arg0, %c0_i32, %c0_i32_0 : i32, i32, i32
  }
}

module attributes {stable_mosaic.version = 11 : i64} {
  func.func @_scale_shift_leaky_kernel(%arg0: i32, %arg1: memref<16x128xbf16, #tpu.memory_space<vmem>>, %arg2: memref<1x128xf32, #tpu.memory_space<vmem>>, %arg3: memref<1x128xf32, #tpu.memory_space<vmem>>, %arg4: memref<16x128xbf16, #tpu.memory_space<vmem>>) attributes {dimension_semantics = [#tpu.dimension_semantics<parallel>], iteration_bounds = array<i64: 2>, scalar_prefetch = 0 : i64, scratch_operands = 0 : i64, tpu.core_type = #tpu.core_type<tc>, window_params = [{transform_indices = @transform_0, window_bounds = array<i64: 16, 128>}, {pipeline_mode = #tpu.pipeline_mode<synchronous>, transform_indices = @transform_1, window_bounds = array<i64: 1, 128>}, {pipeline_mode = #tpu.pipeline_mode<synchronous>, transform_indices = @transform_2, window_bounds = array<i64: 1, 128>}, {transform_indices = @transform_3, window_bounds = array<i64: 16, 128>}]} {
    %c0 = arith.constant 0 : index
    %c0_0 = arith.constant 0 : index
    %0 = vector.load %arg1[%c0, %c0_0] : memref<16x128xbf16, #tpu.memory_space<vmem>>, vector<16x128xbf16>
    %1 = arith.extf %0 : vector<16x128xbf16> to vector<16x128xf32>
    %c0_1 = arith.constant 0 : index
    %c0_2 = arith.constant 0 : index
    %2 = vector.load %arg2[%c0_1, %c0_2] : memref<1x128xf32, #tpu.memory_space<vmem>>, vector<1x128xf32>
    %3 = vector.broadcast %2 : vector<1x128xf32> to vector<16x128xf32>
    %4 = arith.mulf %1, %3 : vector<16x128xf32>
    %c0_3 = arith.constant 0 : index
    %c0_4 = arith.constant 0 : index
    %5 = vector.load %arg3[%c0_3, %c0_4] : memref<1x128xf32, #tpu.memory_space<vmem>>, vector<1x128xf32>
    %6 = vector.broadcast %5 : vector<1x128xf32> to vector<16x128xf32>
    %7 = arith.addf %4, %6 : vector<16x128xf32>
    %cst = arith.constant 2.000000e-01 : f32
    %8 = vector.broadcast %cst : f32 to vector<16x128xf32>
    %9 = arith.mulf %8, %7 : vector<16x128xf32>
    %10 = arith.maximumf %7, %9 : vector<16x128xf32>
    %11 = arith.truncf %10 : vector<16x128xf32> to vector<16x128xbf16>
    %c0_5 = arith.constant 0 : index
    %c0_6 = arith.constant 0 : index
    %12 = vector.load %arg4[%c0_5, %c0_6] : memref<16x128xbf16, #tpu.memory_space<vmem>>, vector<16x128xbf16>
    tpu.vector_store %arg4[%c0_5, %c0_6], %11 {strides = array<i32>} : memref<16x128xbf16, #tpu.memory_space<vmem>>, vector<16x128xbf16>,
    return
  }
  func.func @transform_0(%arg0: i32) -> (i32, i32) {
    %c0_i32 = arith.constant 0 : i32
    %c0_i32_0 = arith.constant 0 : i32
    return %arg0, %c0_i32 : i32, i32
  }
  func.func @transform_1(%arg0: i32) -> (i32, i32) {
    %c0_i32 = arith.constant 0 : i32
    %c0_i32_0 = arith.constant 0 : i32
    %c0_i32_1 = arith.constant 0 : i32
    return %c0_i32, %c0_i32_0 : i32, i32
  }
  func.func @transform_2(%arg0: i32) -> (i32, i32) {
    %c0_i32 = arith.constant 0 : i32
    %c0_i32_0 = arith.constant 0 : i32
    %c0_i32_1 = arith.constant 0 : i32
    return %c0_i32, %c0_i32_0 : i32, i32
  }
  func.func @transform_3(%arg0: i32) -> (i32, i32) {
    %c0_i32 = arith.constant 0 : i32
    %c0_i32_0 = arith.constant 0 : i32
    return %arg0, %c0_i32 : i32, i32
  }
}

module attributes {stable_mosaic.version = 11 : i64} {
  func.func @_matmul_kernel(%arg0: i32, %arg1: memref<2x2048xbf16, #tpu.memory_space<vmem>>, %arg2: memref<2048x128xbf16, #tpu.memory_space<vmem>>, %arg3: memref<2x128xf32, #tpu.memory_space<vmem>>) attributes {dimension_semantics = [#tpu.dimension_semantics<parallel>], iteration_bounds = array<i64: 1>, scalar_prefetch = 0 : i64, scratch_operands = 0 : i64, tpu.core_type = #tpu.core_type<tc>, window_params = [{transform_indices = @transform_0, window_bounds = array<i64: 2, 2048>}, {pipeline_mode = #tpu.pipeline_mode<synchronous>, transform_indices = @transform_1, window_bounds = array<i64: 2048, 128>}, {transform_indices = @transform_2, window_bounds = array<i64: 2, 128>}]} {
    %c0 = arith.constant 0 : index
    %c0_0 = arith.constant 0 : index
    %0 = vector.load %arg1[%c0, %c0_0] : memref<2x2048xbf16, #tpu.memory_space<vmem>>, vector<2x2048xbf16>
    %c0_1 = arith.constant 0 : index
    %c0_2 = arith.constant 0 : index
    %1 = vector.load %arg2[%c0_1, %c0_2] : memref<2048x128xbf16, #tpu.memory_space<vmem>>, vector<2048x128xbf16>
    %cst = arith.constant dense<0.000000e+00> : vector<2x128xf32>
    %2 = tpu.matmul %0, %1, %cst {dimension_numbers = #tpu.dot_dimension_numbers<[1], [0], [0], [1], [0, 0, 1, 1], [], []>} : vector<2x2048xbf16>, vector<2048x128xbf16>, vector<2x128xf32> -> vector<2x128xf32>
    %c0_3 = arith.constant 0 : index
    %c0_4 = arith.constant 0 : index
    %3 = vector.load %arg3[%c0_3, %c0_4] : memref<2x128xf32, #tpu.memory_space<vmem>>, vector<2x128xf32>
    tpu.vector_store %arg3[%c0_3, %c0_4], %2 {strides = array<i32>} : memref<2x128xf32, #tpu.memory_space<vmem>>, vector<2x128xf32>,
    return
  }
  func.func @transform_0(%arg0: i32) -> (i32, i32) {
    %c0_i32 = arith.constant 0 : i32
    %c0_i32_0 = arith.constant 0 : i32
    return %arg0, %c0_i32 : i32, i32
  }
  func.func @transform_1(%arg0: i32) -> (i32, i32) {
    %c0_i32 = arith.constant 0 : i32
    %c0_i32_0 = arith.constant 0 : i32
    %c0_i32_1 = arith.constant 0 : i32
    return %c0_i32, %c0_i32_0 : i32, i32
  }
  func.func @transform_2(%arg0: i32) -> (i32, i32) {
    %c0_i32 = arith.constant 0 : i32
    %c0_i32_0 = arith.constant 0 : i32
    return %arg0, %c0_i32 : i32, i32
  }
}

</mosaic_0001>

<bundles_post_ra>
// kernel: netD_forward.8
= control target key start
LH: loop header
LB: loop body
LE: loop exit
PB: predicated region body
PF: predicated region fallthrough
CT: control target
= control target key end

     0   :  { %s1838_s9 = smov 0   ;;  %s1954_s0 = inlined_call_operand.vmem [shape: bf16[2048,128], index: 0, kind: input, shape index: {}]   ;;  %s1955_s1 = inlined_call_operand.vmem [shape: bf16[128,128], index: 1, kind: input, shape index: {}]   ;;  %s1956_s2 = inlined_call_operand.vmem [shape: bf16[2048,128], index: 2, kind: output, shape index: {}]  }
   0x1 LB: > { %s1261_s10 = sadd.s32 4294967295, %s1821_s9   ;;  %p1265_p0 = scmp.ge.s32.totalorder %s1821_s9, 1  ;;  %s1821_s9 = sphi %s1838_s9, %s12_s9  }
   0x2   : > { %p113_p1 = scmp.lt.s32.totalorder %s1821_s9, 5 }
   0x4   : > { %p114_p2 = pnand %p1265_p0, %p113_p1 }
   0x5   : > { %v1775_v0 = vld [vmem:[%s1955_s1] sm:$0xff] (!%p114_p2)   ;;  %s1266_s13 = sshll.u32 (!%p114_p2), %s1261_s10, 6  ;;  %v1776_v1 = vld [vmem:[%s1955_s1 + $0x8] sm:$0xff] (!%p114_p2)   ;;  %v1777_v2 = vld [vmem:[%s1955_s1 + $0x10] sm:$0xff] (!%p114_p2)  }
   0x6   : > { %117 = sbr.rel (%p114_p2) target bundleno = 317 (0x13d), region = 28  ;;  %p136_p3 = scmp.lt.s32.totalorder (!%p114_p2), %s1266_s13, 255  ;;  %1671 = vmatprep.subr.bf16.mxu0 (!%p114_p2), %v1775_v0  ;;  %1751 = vmatprep.subr.bf16.mxu1 (!%p114_p2), %v1775_v0  ;;  %v1778_v3 = vld [vmem:[%s1955_s1 + $0x18] sm:$0xff] (!%p114_p2)   ;;  %v1779_v6 = vld [vmem:[%s1955_s1 + $0x20] sm:$0xff] (!%p114_p2)   ;;  %v1780_v7 = vld [vmem:[%s1955_s1 + $0x28] sm:$0xff] (!%p114_p2)  }
   0x7   : > { %1672 = vmatpush3.bf16.msra.mxu0 (!%p114_p2), %v1775_v0  ;;  %1759 = vmatpush3.bf16.msra.mxu1 (!%p114_p2), %v1775_v0  ;;  %v1781_v8 = vld [vmem:[%s1955_s1 + $0x30] sm:$0xff] (!%p114_p2)   ;;  %v1782_v9 = vld [vmem:[%s1955_s1 + $0x38] sm:$0xff] (!%p114_p2)  }
   0x8   : > { %1673 = vmatprep.subr.bf16.mxu0 (!%p114_p2), %v1776_v1  ;;  %1752 = vmatprep.subr.bf16.mxu1 (!%p114_p2), %v1776_v1 }
   0xb   : > { %1674 = vmatpush3.bf16.msra.mxu0 (!%p114_p2), %v1776_v1  ;;  %1760 = vmatpush3.bf16.msra.mxu1 (!%p114_p2), %v1776_v1 }
   0xc   : > { %1675 = vmatprep.subr.bf16.mxu0 (!%p114_p2), %v1777_v2  ;;  %1753 = vmatprep.subr.bf16.mxu1 (!%p114_p2), %v1777_v2 }
   0xd   : > { %s1958_s13 = smov (!%p136_p3, %s1266_s13), 255 }
   0xe   : > { %s1267_s18 = sshll.u32 %s1958_s13, 2 }
   0xf   : > { %s1863_s21 = scalar_lea.vmem %s1954_s0, %s1267_s18  ;;  %1676 = vmatpush3.bf16.msra.mxu0 %v1777_v2  ;;  %1761 = vmatpush3.bf16.msra.mxu1 %v1777_v2  ;;  %s1917_s6 = scalar_lea.vmem %s1956_s2, %s1267_s18 }
  0x10   : > { %v1783_v4 = vld [vmem:[%s1863_s21] sm:$0xff]   ;;  %1677 = vmatprep.subr.bf16.mxu0 %v1778_v3  ;;  %1754 = vmatprep.subr.bf16.mxu1 %v1778_v3  ;;  %v1785_v10 = vld [vmem:[%s1863_s21 + $0x8] sm:$0xff]   ;;  %v1787_v12 = vld [vmem:[%s1863_s21 + $0x10] sm:$0xff]  }
  0x11   : > { %v1784_v5 = vld [vmem:[%s1863_s21 + $0x80] sm:$0xff]   ;;  %1687 = vmatprep.mubr.bf16.mxu0 %v1783_v4  ;;  %v1786_v11 = vld [vmem:[%s1863_s21 + $0x88] sm:$0xff]   ;;  %v1788_v13 = vld [vmem:[%s1863_s21 + $0x90] sm:$0xff]  }
  0x12   : > { %1719 = vmatprep.mubr.bf16.mxu1 %v1784_v5  ;;  %v1789_v14 = vld [vmem:[%s1863_s21 + $0x18] sm:$0xff]   ;;  %v1791_v16 = vld [vmem:[%s1863_s21 + $0x20] sm:$0xff]   ;;  %v1793_v18 = vld [vmem:[%s1863_s21 + $0x28] sm:$0xff]  }
  0x13   : > { %1678 = vmatpush3.bf16.msra.mxu0 %v1778_v3  ;;  %1762 = vmatpush3.bf16.msra.mxu1 %v1778_v3  ;;  %v1790_v15 = vld [vmem:[%s1863_s21 + $0x98] sm:$0xff]   ;;  %v1792_v17 = vld [vmem:[%s1863_s21 + $0xa0] sm:$0xff]   ;;  %v1794_v19 = vld [vmem:[%s1863_s21 + $0xa8] sm:$0xff]  }
  0x14   : > { %1679 = vmatprep.subr.bf16.mxu0 %v1779_v6  ;;  %1755 = vmatprep.subr.bf16.mxu1 %v1779_v6  ;;  %v1795_v20 = vld [vmem:[%s1863_s21 + $0x30] sm:$0xff]   ;;  %v1797_v22 = vld [vmem:[%s1863_s21 + $0x38] sm:$0xff]   ;;  %v1799_v24 = vld [vmem:[%s1863_s21 + $0x40] sm:$0xff]  }
  0x15   : > { %v1796_v21 = vld [vmem:[%s1863_s21 + $0xb0] sm:$0xff]   ;;  %v1798_v23 = vld [vmem:[%s1863_s21 + $0xb8] sm:$0xff]   ;;  %v1800_v25 = vld [vmem:[%s1863_s21 + $0xc0] sm:$0xff]  }
  0x16   : > { %v1801_v26 = vld [vmem:[%s1863_s21 + $0x48] sm:$0xff]   ;;  %v1803_v28 = vld [vmem:[%s1863_s21 + $0x50] sm:$0xff]   ;;  %v1805_v30 = vld [vmem:[%s1863_s21 + $0x58] sm:$0xff]  }
  0x17   : > { %1680 = vmatpush3.bf16.msra.mxu0 %v1779_v6  ;;  %1763 = vmatpush3.bf16.msra.mxu1 %v1779_v6  ;;  %v1802_v27 = vld [vmem:[%s1863_s21 + $0xc8] sm:$0xff]   ;;  %v1804_v29 = vld [vmem:[%s1863_s21 + $0xd0] sm:$0xff]   ;;  %v1806_v31 = vld [vmem:[%s1863_s21 + $0xd8] sm:$0xff]  }
  0x18   : > { %1681 = vmatprep.subr.bf16.mxu0 %v1780_v7  ;;  %1756 = vmatprep.subr.bf16.mxu1 %v1780_v7  ;;  %v1807_v32 = vld [vmem:[%s1863_s21 + $0x60] sm:$0xff]   ;;  %v1809_v34 = vld [vmem:[%s1863_s21 + $0x68] sm:$0xff]   ;;  %v1811_v36 = vld [vmem:[%s1863_s21 + $0x70] sm:$0xff]  }
  0x19   : > { %v1808_v33 = vld [vmem:[%s1863_s21 + $0xe0] sm:$0xff]   ;;  %v1810_v35 = vld [vmem:[%s1863_s21 + $0xe8] sm:$0xff]   ;;  %v1812_v37 = vld [vmem:[%s1863_s21 + $0xf0] sm:$0xff]  }
  0x1a   : > { %v1813_v38 = vld [vmem:[%s1863_s21 + $0x78] sm:$0xff]  }
  0x1b   : > { %1682 = vmatpush3.bf16.msra.mxu0 %v1780_v7  ;;  %1764 = vmatpush3.bf16.msra.mxu1 %v1780_v7  ;;  %v1814_v39 = vld [vmem:[%s1863_s21 + $0xf8] sm:$0xff]  }
  0x1c   : > { %1683 = vmatprep.subr.bf16.mxu0 %v1781_v8  ;;  %1757 = vmatprep.subr.bf16.mxu1 %v1781_v8 }
  0x1f   : > { %1684 = vmatpush3.bf16.msra.mxu0 %v1781_v8  ;;  %1765 = vmatpush3.bf16.msra.mxu1 %v1781_v8 }
  0x20   : > { %1685 = vmatprep.subr.bf16.mxu0 %v1782_v9  ;;  %1758 = vmatprep.subr.bf16.mxu1 %v1782_v9 }
  0x23   : > { %1686 = vmatpush3.bf16.msra.mxu0 %v1782_v9  ;;  %1766 = vmatpush3.bf16.msra.mxu1 %v1782_v9 }
  0x26   : > { %1688 = vmatmul.mubr.bf16.vlgmr.msra.gmra.mrb[0].mxu0 %v1785_v10  ;;  %1720 = vmatmul.mubr.bf16.vlgmr.msra.gmra.mrb[0].mxu1 %v1786_v11 }
  0x27   : > { %1691 = vmatprep.mubr.bf16.mxu0 %v1787_v12  ;;  %1723 = vmatprep.mubr.bf16.mxu1 %v1788_v13 }
  0x2e   : > { %1692 = vmatmul.mubr.bf16.gmra.mrb[4].mxu0 %v1789_v14  ;;  %1724 = vmatmul.mubr.bf16.gmra.mrb[4].mxu1 %v1790_v15 }
  0x2f   : > { %1695 = vmatprep.mubr.bf16.mxu0 %v1791_v16  ;;  %1727 = vmatprep.mubr.bf16.mxu1 %v1792_v17 }
  0x36   : > { %1696 = vmatmul.mubr.bf16.gmra.mrb[8].mxu0 %v1793_v18  ;;  %1728 = vmatmul.mubr.bf16.gmra.mrb[8].mxu1 %v1794_v19 }
  0x37   : > { %1699 = vmatprep.mubr.bf16.mxu0 %v1795_v20  ;;  %1731 = vmatprep.mubr.bf16.mxu1 %v1796_v21 }
  0x3e   : > { %1700 = vmatmul.mubr.bf16.gmra.mrb[12].mxu0 %v1797_v22  ;;  %1732 = vmatmul.mubr.bf16.gmra.mrb[12].mxu1 %v1798_v23 }
  0x3f   : > { %1703 = vmatprep.mubr.bf16.mxu0 %v1799_v24  ;;  %1735 = vmatprep.mubr.bf16.mxu1 %v1800_v25 }
  0x46   : > { %1704 = vmatmul.mubr.bf16.gmra.mrb[16].mxu0 %v1801_v26  ;;  %1736 = vmatmul.mubr.bf16.gmra.mrb[16].mxu1 %v1802_v27 }
  0x47   : > { %1707 = vmatprep.mubr.bf16.mxu0 %v1803_v28  ;;  %1739 = vmatprep.mubr.bf16.mxu1 %v1804_v29 }
  0x4e   : > { %1708 = vmatmul.mubr.bf16.gmra.mrb[20].mxu0 %v1805_v30  ;;  %1740 = vmatmul.mubr.bf16.gmra.mrb[20].mxu1 %v1806_v31 }
  0x4f   : > { %1711 = vmatprep.mubr.bf16.mxu0 %v1807_v32  ;;  %1743 = vmatprep.mubr.bf16.mxu1 %v1808_v33 }
  0x56   : > { %1712 = vmatmul.mubr.bf16.gmra.mrb[24].mxu0 %v1809_v34  ;;  %1744 = vmatmul.mubr.bf16.gmra.mrb[24].mxu1 %v1810_v35 }
  0x57   : > { %1715 = vmatprep.mubr.bf16.mxu0 %v1811_v36  ;;  %1747 = vmatprep.mubr.bf16.mxu1 %v1812_v37 }
  0x5e   : > { %1716 = vmatmul.mubr.bf16.gmra.mrb[28].mxu0 %v1813_v38  ;;  %1748 = vmatmul.mubr.bf16.gmra.mrb[28].mxu1 %v1814_v39 }
  0xf9   : > { %v1689_v40 = vpop.f32.mrb[0].mxu0  ;;  %v1721_v41 = vpop.f32.mrb[0].mxu1 }
  0xfa   : > { %v759_v42 = vmul.f32 0.2, %v1689_v40  ;;  %v791_v43 = vmul.f32 0.2, %v1721_v41  ;;  %v502_v44 = vpop.f32.mrb[1].mxu0  ;;  %v630_v45 = vpop.f32.mrb[1].mxu1 }
  0xfb   : > { %v757_v46 = vmul.f32 0.2, %v502_v44  ;;  %v789_v47 = vmul.f32 0.2, %v630_v45  ;;  %v1690_v48 = vpop.f32.mrb[2].mxu0  ;;  %v1722_v49 = vpop.f32.mrb[2].mxu1 }
  0xfc   : > { %v760_v50 = vmul.f32 0.2, %v1690_v48  ;;  %v792_v51 = vmul.f32 0.2, %v1722_v49  ;;  %v505_v52 = vpop.f32.mrb[3].mxu0  ;;  %v633_v53 = vpop.f32.mrb[3].mxu1  ;;  %v823_v56 = vmax.f32 %v1689_v40, %v759_v42  ;;  %v855_v57 = vmax.f32 %v1721_v41, %v791_v43 }
  0xfd   : > { %v758_v54 = vmul.f32 0.2, %v505_v52  ;;  %v790_v55 = vmul.f32 0.2, %v633_v53  ;;  %v821_v60 = vmax.f32 %v502_v44, %v757_v46  ;;  %v853_v61 = vmax.f32 %v630_v45, %v789_v47 }
  0xfe   : > { %v824_v58 = vmax.f32 %v1690_v48, %v760_v50  ;;  %v856_v59 = vmax.f32 %v1722_v49, %v792_v51 }
  0xff   : > { %v822_v62 = vmax.f32 %v505_v52, %v758_v54  ;;  %v854_v63 = vmax.f32 %v633_v53, %v790_v55 }
 0x100   : > { %v1448_v0 = vpack.c.bf16 %v824_v58, %v823_v56  ;;  %v1528_v1 = vpack.c.bf16 %v856_v59, %v855_v57 }
 0x101   : > { %v1443_v2 = vpack.c.bf16 %v822_v62, %v821_v60  ;;  %v1523_v3 = vpack.c.bf16 %v854_v63, %v853_v61  ;;  %v1693_v4 = vpop.f32.mrb[4].mxu0  ;;  %v1725_v5 = vpop.f32.mrb[4].mxu1 }
 0x102   : > { %1600 = vst [vmem:[%s1917_s6 + $0x8] sm:$0xff] %v1448_v0   ;;  %1616 = vst [vmem:[%s1917_s6 + $0x88] sm:$0xff] %v1528_v1   ;;  %v763_v6 = vmul.f32 0.2, %v1693_v4  ;;  %v795_v7 = vmul.f32 0.2, %v1725_v5 }
 0x103   : > { %v518_v8 = vpop.f32.mrb[5].mxu0  ;;  %v646_v9 = vpop.f32.mrb[5].mxu1  ;;  %1444 = vst [vmem:[%s1917_s6] sm:$0xff] %v1443_v2   ;;  %1615 = vst [vmem:[%s1917_s6 + $0x80] sm:$0xff] %v1523_v3  }
 0x104   : > { %v761_v10 = vmul.f32 0.2, %v518_v8  ;;  %v793_v11 = vmul.f32 0.2, %v646_v9  ;;  %v1694_v12 = vpop.f32.mrb[6].mxu0  ;;  %v1726_v13 = vpop.f32.mrb[6].mxu1  ;;  %v827_v20 = vmax.f32 %v1693_v4, %v763_v6  ;;  %v859_v21 = vmax.f32 %v1725_v5, %v795_v7 }
 0x105   : > { %v764_v14 = vmul.f32 0.2, %v1694_v12  ;;  %v796_v15 = vmul.f32 0.2, %v1726_v13  ;;  %v521_v16 = vpop.f32.mrb[7].mxu0  ;;  %v649_v17 = vpop.f32.mrb[7].mxu1 }
 0x106   : > { %v762_v18 = vmul.f32 0.2, %v521_v16  ;;  %v794_v19 = vmul.f32 0.2, %v649_v17  ;;  %v825_v24 = vmax.f32 %v518_v8, %v761_v10  ;;  %v857_v25 = vmax.f32 %v646_v9, %v793_v11 }
 0x107   : > { %v828_v22 = vmax.f32 %v1694_v12, %v764_v14  ;;  %v860_v23 = vmax.f32 %v1726_v13, %v796_v15 }
 0x108   : > { %v826_v26 = vmax.f32 %v521_v16, %v762_v18  ;;  %v858_v27 = vmax.f32 %v649_v17, %v794_v19 }
 0x109   : > { %v1458_v28 = vpack.c.bf16 %v828_v22, %v827_v20  ;;  %v1538_v29 = vpack.c.bf16 %v860_v23, %v859_v21  ;;  %v1697_v32 = vpop.f32.mrb[8].mxu0  ;;  %v1729_v33 = vpop.f32.mrb[8].mxu1 }
 0x10a   : > { %v1453_v30 = vpack.c.bf16 %v826_v26, %v825_v24  ;;  %v1533_v31 = vpack.c.bf16 %v858_v27, %v857_v25  ;;  %v767_v34 = vmul.f32 0.2, %v1697_v32  ;;  %v799_v35 = vmul.f32 0.2, %v1729_v33  ;;  %v534_v36 = vpop.f32.mrb[9].mxu0  ;;  %v662_v37 = vpop.f32.mrb[9].mxu1 }
 0x10b   : > { %1602 = vst [vmem:[%s1917_s6 + $0x18] sm:$0xff] %v1458_v28   ;;  %1618 = vst [vmem:[%s1917_s6 + $0x98] sm:$0xff] %v1538_v29   ;;  %v765_v38 = vmul.f32 0.2, %v534_v36  ;;  %v797_v39 = vmul.f32 0.2, %v662_v37 }
 0x10c   : > { %1601 = vst [vmem:[%s1917_s6 + $0x10] sm:$0xff] %v1453_v30   ;;  %1617 = vst [vmem:[%s1917_s6 + $0x90] sm:$0xff] %v1533_v31   ;;  %v1698_v40 = vpop.f32.mrb[10].mxu0  ;;  %v1730_v41 = vpop.f32.mrb[10].mxu1  ;;  %v831_v48 = vmax.f32 %v1697_v32, %v767_v34  ;;  %v863_v49 = vmax.f32 %v1729_v33, %v799_v35 }
 0x10d   : > { %v768_v42 = vmul.f32 0.2, %v1698_v40  ;;  %v800_v43 = vmul.f32 0.2, %v1730_v41  ;;  %v537_v44 = vpop.f32.mrb[11].mxu0  ;;  %v665_v45 = vpop.f32.mrb[11].mxu1  ;;  %v829_v52 = vmax.f32 %v534_v36, %v765_v38  ;;  %v861_v53 = vmax.f32 %v662_v37, %v797_v39 }
 0x10e   : > { %v766_v46 = vmul.f32 0.2, %v537_v44  ;;  %v798_v47 = vmul.f32 0.2, %v665_v45 }
 0x10f   : > { %v832_v50 = vmax.f32 %v1698_v40, %v768_v42  ;;  %v864_v51 = vmax.f32 %v1730_v41, %v800_v43 }
 0x110   : > { %v830_v54 = vmax.f32 %v537_v44, %v766_v46  ;;  %v862_v55 = vmax.f32 %v665_v45, %v798_v47 }
 0x111   : > { %v1468_v56 = vpack.c.bf16 %v832_v50, %v831_v48  ;;  %v1548_v57 = vpack.c.bf16 %v864_v51, %v863_v49  ;;  %v1701_v60 = vpop.f32.mrb[12].mxu0  ;;  %v1733_v61 = vpop.f32.mrb[12].mxu1 }
 0x112   : > { %v1463_v58 = vpack.c.bf16 %v830_v54, %v829_v52  ;;  %v1543_v59 = vpack.c.bf16 %v862_v55, %v861_v53  ;;  %v771_v62 = vmul.f32 0.2, %v1701_v60  ;;  %v803_v63 = vmul.f32 0.2, %v1733_v61  ;;  %v550_v0 = vpop.f32.mrb[13].mxu0  ;;  %v678_v1 = vpop.f32.mrb[13].mxu1 }
 0x113   : > { %1604 = vst [vmem:[%s1917_s6 + $0x28] sm:$0xff] %v1468_v56   ;;  %1620 = vst [vmem:[%s1917_s6 + $0xa8] sm:$0xff] %v1548_v57   ;;  %v769_v2 = vmul.f32 0.2, %v550_v0  ;;  %v801_v3 = vmul.f32 0.2, %v678_v1 }
 0x114   : > { %1603 = vst [vmem:[%s1917_s6 + $0x20] sm:$0xff] %v1463_v58   ;;  %1619 = vst [vmem:[%s1917_s6 + $0xa0] sm:$0xff] %v1543_v59   ;;  %v1702_v4 = vpop.f32.mrb[14].mxu0  ;;  %v1734_v5 = vpop.f32.mrb[14].mxu1  ;;  %v835_v12 = vmax.f32 %v1701_v60, %v771_v62  ;;  %v867_v13 = vmax.f32 %v1733_v61, %v803_v63 }
 0x115   : > { %v772_v6 = vmul.f32 0.2, %v1702_v4  ;;  %v804_v7 = vmul.f32 0.2, %v1734_v5  ;;  %v553_v8 = vpop.f32.mrb[15].mxu0  ;;  %v681_v9 = vpop.f32.mrb[15].mxu1  ;;  %v833_v16 = vmax.f32 %v550_v0, %v769_v2  ;;  %v865_v17 = vmax.f32 %v678_v1, %v801_v3 }
 0x116   : > { %v770_v10 = vmul.f32 0.2, %v553_v8  ;;  %v802_v11 = vmul.f32 0.2, %v681_v9 }
 0x117   : > { %v836_v14 = vmax.f32 %v1702_v4, %v772_v6  ;;  %v868_v15 = vmax.f32 %v1734_v5, %v804_v7 }
 0x118   : > { %v834_v18 = vmax.f32 %v553_v8, %v770_v10  ;;  %v866_v19 = vmax.f32 %v681_v9, %v802_v11 }
 0x119   : > { %v1478_v20 = vpack.c.bf16 %v836_v14, %v835_v12  ;;  %v1558_v21 = vpack.c.bf16 %v868_v15, %v867_v13  ;;  %v1705_v24 = vpop.f32.mrb[16].mxu0  ;;  %v1737_v25 = vpop.f32.mrb[16].mxu1 }
 0x11a   : > { %v1473_v22 = vpack.c.bf16 %v834_v18, %v833_v16  ;;  %v1553_v23 = vpack.c.bf16 %v866_v19, %v865_v17  ;;  %v775_v26 = vmul.f32 0.2, %v1705_v24  ;;  %v807_v27 = vmul.f32 0.2, %v1737_v25  ;;  %v566_v28 = vpop.f32.mrb[17].mxu0  ;;  %v694_v29 = vpop.f32.mrb[17].mxu1 }
 0x11b   : > { %1606 = vst [vmem:[%s1917_s6 + $0x38] sm:$0xff] %v1478_v20   ;;  %1622 = vst [vmem:[%s1917_s6 + $0xb8] sm:$0xff] %v1558_v21   ;;  %v773_v30 = vmul.f32 0.2, %v566_v28  ;;  %v805_v31 = vmul.f32 0.2, %v694_v29 }
 0x11c   : > { %1605 = vst [vmem:[%s1917_s6 + $0x30] sm:$0xff] %v1473_v22   ;;  %1621 = vst [vmem:[%s1917_s6 + $0xb0] sm:$0xff] %v1553_v23   ;;  %v1706_v32 = vpop.f32.mrb[18].mxu0  ;;  %v1738_v33 = vpop.f32.mrb[18].mxu1  ;;  %v839_v40 = vmax.f32 %v1705_v24, %v775_v26  ;;  %v871_v41 = vmax.f32 %v1737_v25, %v807_v27 }
 0x11d   : > { %v776_v34 = vmul.f32 0.2, %v1706_v32  ;;  %v808_v35 = vmul.f32 0.2, %v1738_v33  ;;  %v569_v36 = vpop.f32.mrb[19].mxu0  ;;  %v697_v37 = vpop.f32.mrb[19].mxu1  ;;  %v837_v44 = vmax.f32 %v566_v28, %v773_v30  ;;  %v869_v45 = vmax.f32 %v694_v29, %v805_v31 }
 0x11e   : > { %v774_v38 = vmul.f32 0.2, %v569_v36  ;;  %v806_v39 = vmul.f32 0.2, %v697_v37 }
 0x11f   : > { %v840_v42 = vmax.f32 %v1706_v32, %v776_v34  ;;  %v872_v43 = vmax.f32 %v1738_v33, %v808_v35 }
 0x120   : > { %v838_v46 = vmax.f32 %v569_v36, %v774_v38  ;;  %v870_v47 = vmax.f32 %v697_v37, %v806_v39 }
 0x121   : > { %v1488_v48 = vpack.c.bf16 %v840_v42, %v839_v40  ;;  %v1568_v49 = vpack.c.bf16 %v872_v43, %v871_v41  ;;  %v1709_v52 = vpop.f32.mrb[20].mxu0  ;;  %v1741_v53 = vpop.f32.mrb[20].mxu1 }
 0x122   : > { %v1483_v50 = vpack.c.bf16 %v838_v46, %v837_v44  ;;  %v1563_v51 = vpack.c.bf16 %v870_v47, %v869_v45  ;;  %v779_v54 = vmul.f32 0.2, %v1709_v52  ;;  %v811_v55 = vmul.f32 0.2, %v1741_v53  ;;  %v582_v56 = vpop.f32.mrb[21].mxu0  ;;  %v710_v57 = vpop.f32.mrb[21].mxu1 }
 0x123   : > { %1608 = vst [vmem:[%s1917_s6 + $0x48] sm:$0xff] %v1488_v48   ;;  %1624 = vst [vmem:[%s1917_s6 + $0xc8] sm:$0xff] %v1568_v49   ;;  %v777_v58 = vmul.f32 0.2, %v582_v56  ;;  %v809_v59 = vmul.f32 0.2, %v710_v57 }
 0x124   : > { %1607 = vst [vmem:[%s1917_s6 + $0x40] sm:$0xff] %v1483_v50   ;;  %1623 = vst [vmem:[%s1917_s6 + $0xc0] sm:$0xff] %v1563_v51   ;;  %v1710_v60 = vpop.f32.mrb[22].mxu0  ;;  %v1742_v61 = vpop.f32.mrb[22].mxu1  ;;  %v843_v4 = vmax.f32 %v1709_v52, %v779_v54  ;;  %v875_v5 = vmax.f32 %v1741_v53, %v811_v55 }
 0x125   : > { %v780_v62 = vmul.f32 0.2, %v1710_v60  ;;  %v812_v63 = vmul.f32 0.2, %v1742_v61  ;;  %v585_v0 = vpop.f32.mrb[23].mxu0  ;;  %v713_v1 = vpop.f32.mrb[23].mxu1  ;;  %v841_v8 = vmax.f32 %v582_v56, %v777_v58  ;;  %v873_v9 = vmax.f32 %v710_v57, %v809_v59 }
 0x126   : > { %v778_v2 = vmul.f32 0.2, %v585_v0  ;;  %v810_v3 = vmul.f32 0.2, %v713_v1 }
 0x127   : > { %v844_v6 = vmax.f32 %v1710_v60, %v780_v62  ;;  %v876_v7 = vmax.f32 %v1742_v61, %v812_v63 }
 0x128   : > { %v842_v10 = vmax.f32 %v585_v0, %v778_v2  ;;  %v874_v11 = vmax.f32 %v713_v1, %v810_v3 }
 0x129   : > { %v1498_v12 = vpack.c.bf16 %v844_v6, %v843_v4  ;;  %v1578_v13 = vpack.c.bf16 %v876_v7, %v875_v5  ;;  %v1713_v16 = vpop.f32.mrb[24].mxu0  ;;  %v1745_v17 = vpop.f32.mrb[24].mxu1 }
 0x12a   : > { %v1493_v14 = vpack.c.bf16 %v842_v10, %v841_v8  ;;  %v1573_v15 = vpack.c.bf16 %v874_v11, %v873_v9  ;;  %v783_v18 = vmul.f32 0.2, %v1713_v16  ;;  %v815_v19 = vmul.f32 0.2, %v1745_v17  ;;  %v598_v20 = vpop.f32.mrb[25].mxu0  ;;  %v726_v21 = vpop.f32.mrb[25].mxu1 }
 0x12b   : > { %1610 = vst [vmem:[%s1917_s6 + $0x58] sm:$0xff] %v1498_v12   ;;  %1626 = vst [vmem:[%s1917_s6 + $0xd8] sm:$0xff] %v1578_v13   ;;  %v781_v22 = vmul.f32 0.2, %v598_v20  ;;  %v813_v23 = vmul.f32 0.2, %v726_v21 }
 0x12c   : > { %1609 = vst [vmem:[%s1917_s6 + $0x50] sm:$0xff] %v1493_v14   ;;  %1625 = vst [vmem:[%s1917_s6 + $0xd0] sm:$0xff] %v1573_v15   ;;  %v1714_v24 = vpop.f32.mrb[26].mxu0  ;;  %v1746_v25 = vpop.f32.mrb[26].mxu1  ;;  %v847_v32 = vmax.f32 %v1713_v16, %v783_v18  ;;  %v879_v33 = vmax.f32 %v1745_v17, %v815_v19 }
 0x12d   : > { %v784_v26 = vmul.f32 0.2, %v1714_v24  ;;  %v816_v27 = vmul.f32 0.2, %v1746_v25  ;;  %v601_v28 = vpop.f32.mrb[27].mxu0  ;;  %v729_v29 = vpop.f32.mrb[27].mxu1  ;;  %v845_v36 = vmax.f32 %v598_v20, %v781_v22  ;;  %v877_v37 = vmax.f32 %v726_v21, %v813_v23 }
 0x12e   : > { %v782_v30 = vmul.f32 0.2, %v601_v28  ;;  %v814_v31 = vmul.f32 0.2, %v729_v29 }
 0x12f   : > { %v848_v34 = vmax.f32 %v1714_v24, %v784_v26  ;;  %v880_v35 = vmax.f32 %v1746_v25, %v816_v27 }
 0x130   : > { %v846_v38 = vmax.f32 %v601_v28, %v782_v30  ;;  %v878_v39 = vmax.f32 %v729_v29, %v814_v31 }
 0x131   : > { %v1508_v40 = vpack.c.bf16 %v848_v34, %v847_v32  ;;  %v1588_v41 = vpack.c.bf16 %v880_v35, %v879_v33  ;;  %v1717_v44 = vpop.f32.mrb[28].mxu0  ;;  %v1749_v45 = vpop.f32.mrb[28].mxu1 }
 0x132   : > { %v1503_v42 = vpack.c.bf16 %v846_v38, %v845_v36  ;;  %v1583_v43 = vpack.c.bf16 %v878_v39, %v877_v37  ;;  %v787_v46 = vmul.f32 0.2, %v1717_v44  ;;  %v819_v47 = vmul.f32 0.2, %v1749_v45  ;;  %v614_v48 = vpop.f32.mrb[29].mxu0  ;;  %v742_v49 = vpop.f32.mrb[29].mxu1 }
 0x133   : > { %1612 = vst [vmem:[%s1917_s6 + $0x68] sm:$0xff] %v1508_v40   ;;  %1628 = vst [vmem:[%s1917_s6 + $0xe8] sm:$0xff] %v1588_v41   ;;  %v785_v50 = vmul.f32 0.2, %v614_v48  ;;  %v817_v51 = vmul.f32 0.2, %v742_v49 }
 0x134   : > { %1611 = vst [vmem:[%s1917_s6 + $0x60] sm:$0xff] %v1503_v42   ;;  %1627 = vst [vmem:[%s1917_s6 + $0xe0] sm:$0xff] %v1583_v43   ;;  %v1718_v52 = vpop.f32.mrb[30].mxu0  ;;  %v1750_v53 = vpop.f32.mrb[30].mxu1  ;;  %v851_v60 = vmax.f32 %v1717_v44, %v787_v46  ;;  %v883_v61 = vmax.f32 %v1749_v45, %v819_v47 }
 0x135   : > { %v788_v54 = vmul.f32 0.2, %v1718_v52  ;;  %v820_v55 = vmul.f32 0.2, %v1750_v53  ;;  %v617_v56 = vpop.f32.mrb[31].mxu0  ;;  %v745_v57 = vpop.f32.mrb[31].mxu1  ;;  %v849_v0 = vmax.f32 %v614_v48, %v785_v50  ;;  %v881_v1 = vmax.f32 %v742_v49, %v817_v51 }
 0x136   : > { %v786_v58 = vmul.f32 0.2, %v617_v56  ;;  %v818_v59 = vmul.f32 0.2, %v745_v57 }
 0x137   : > { %v852_v62 = vmax.f32 %v1718_v52, %v788_v54  ;;  %v884_v63 = vmax.f32 %v1750_v53, %v820_v55 }
 0x138   : > { %v850_v2 = vmax.f32 %v617_v56, %v786_v58  ;;  %v882_v3 = vmax.f32 %v745_v57, %v818_v59 }
 0x139   : > { %v1518_v4 = vpack.c.bf16 %v852_v62, %v851_v60  ;;  %v1598_v5 = vpack.c.bf16 %v884_v63, %v883_v61 }
 0x13a   : > { %v1513_v6 = vpack.c.bf16 %v850_v2, %v849_v0  ;;  %v1593_v7 = vpack.c.bf16 %v882_v3, %v881_v1 }
 0x13b   : > { %1614 = vst [vmem:[%s1917_s6 + $0x78] sm:$0xff] %v1518_v4   ;;  %1630 = vst [vmem:[%s1917_s6 + $0xf8] sm:$0xff] %v1598_v5  }
 0x13c   : > { %1613 = vst [vmem:[%s1917_s6 + $0x70] sm:$0xff] %v1513_v6   ;;  %1629 = vst [vmem:[%s1917_s6 + $0xf0] sm:$0xff] %v1593_v7  }
 0x13d PF: > { %s12_s9 = sadd.s32 1, %s1821_s9  }
 0x13e   : > { %p9_p4 = scmp.ge.s32.totalorder %s12_s9, 6  }
 0x140   :  { %11 = sbr.rel (!%p9_p4) target bundleno = 1 (0x1), region = 58 }

// kernel: netD_forward.9
= control target key start
LH: loop header
LB: loop body
LE: loop exit
PB: predicated region body
PF: predicated region fallthrough
CT: control target
= control target key end

     0   :  { %s6010_s12 = smov 0   ;;  %s7043_s0 = inlined_call_operand.vmem [shape: bf16[512,2048], index: 0, kind: input, shape index: {}]   ;;  %s7044_s1 = inlined_call_operand.vmem [shape: bf16[2048,128], index: 1, kind: input, shape index: {}]   ;;  %s7045_s2 = inlined_call_operand.vmem [shape: bf16[512,128], index: 2, kind: output, shape index: {0}]   ;;  %s7046_s3 = inlined_call_operand.vmem [shape: f32[2,2,128], index: 3, kind: output, shape index: {1}]  }
   0x1 LB: > { %s6016_s13 = sadd.s32 4294967295, %s5988_s12   ;;  %p4397_p0 = scmp.ge.s32.totalorder %s5988_s12, 1  ;;  %s5988_s12 = sphi %s6010_s12, %s14_s12  }
   0x2   : > { %p142_p1 = scmp.lt.s32.totalorder %s5988_s12, 3 }
   0x4   : > { %p143_p2 = pnand %p4397_p0, %p142_p1 }
   0x5   : > { %v5854_v0 = vld [vmem:[%s7044_s1 + $0x40] sm:$0xff] (!%p143_p2)   ;;  %v5858_v4 = vld [vmem:[%s7044_s1 + $0x48] sm:$0xff] (!%p143_p2)   ;;  %v5862_v8 = vld [vmem:[%s7044_s1 + $0x50] sm:$0xff] (!%p143_p2)   ;;  %s4398_s21 = sshll.u32 (!%p143_p2), %s6016_s13, 5  ;;  %p184_p4 = scmp.lt.s32.totalorder (!%p143_p2), %s6016_s13, 1  ;;  %vm4303_vm0 = vcmask (!%p143_p2), 1040384  }
   0x6   : > { %146 = sbr.rel (%p143_p2) target bundleno = 782 (0x30e), region = 28  ;;  %v5855_v1 = vld [vmem:[%s7044_s1 + $0xc0] sm:$0xff] (!%p143_p2)   ;;  %4950 = vmatprep.subr.bf16.mxu0 (!%p143_p2), %v5854_v0  ;;  %v5859_v5 = vld [vmem:[%s7044_s1 + $0xc8] sm:$0xff] (!%p143_p2)   ;;  %v5863_v9 = vld [vmem:[%s7044_s1 + $0xd0] sm:$0xff] (!%p143_p2)   ;;  %p172_p3 = scmp.lt.s32.totalorder (!%p143_p2), %s4398_s21, 63 }
   0x7   : > { %v5856_v2 = vld [vmem:[%s7044_s1] sm:$0xff] (!%p143_p2)   ;;  %5062 = vmatprep.subr.bf16.mxu1 (!%p143_p2), %v5855_v1  ;;  %v5860_v6 = vld [vmem:[%s7044_s1 + $0x8] sm:$0xff] (!%p143_p2)   ;;  %v5864_v10 = vld [vmem:[%s7044_s1 + $0x10] sm:$0xff] (!%p143_p2)  }
   0x8   : > { %v5857_v3 = vld [vmem:[%s7044_s1 + $0x80] sm:$0xff] (!%p143_p2)   ;;  %4951 = vmatpush3.bf16.msra.mxu0 (!%p143_p2), %v5856_v2  ;;  %v5861_v7 = vld [vmem:[%s7044_s1 + $0x88] sm:$0xff] (!%p143_p2)   ;;  %v5865_v11 = vld [vmem:[%s7044_s1 + $0x90] sm:$0xff] (!%p143_p2)  }
   0x9   : > { %5063 = vmatpush3.bf16.msra.mxu1 (!%p143_p2), %v5857_v3  ;;  %4952 = vmatprep.subr.bf16.mxu0 (!%p143_p2), %v5858_v4  ;;  %v5866_v12 = vld [vmem:[%s7044_s1 + $0x58] sm:$0xff] (!%p143_p2)   ;;  %v5870_v16 = vld [vmem:[%s7044_s1 + $0x60] sm:$0xff] (!%p143_p2)   ;;  %v5874_v20 = vld [vmem:[%s7044_s1 + $0x68] sm:$0xff] (!%p143_p2)  }
   0xa   : > { %5064 = vmatprep.subr.bf16.mxu1 (!%p143_p2), %v5859_v5  ;;  %v5867_v13 = vld [vmem:[%s7044_s1 + $0xd8] sm:$0xff] (!%p143_p2)   ;;  %v5871_v17 = vld [vmem:[%s7044_s1 + $0xe0] sm:$0xff] (!%p143_p2)   ;;  %v5875_v21 = vld [vmem:[%s7044_s1 + $0xe8] sm:$0xff] (!%p143_p2)  }
   0xb   : > { %v5868_v14 = vld [vmem:[%s7044_s1 + $0x18] sm:$0xff] (!%p143_p2)   ;;  %v5872_v18 = vld [vmem:[%s7044_s1 + $0x20] sm:$0xff] (!%p143_p2)   ;;  %v5876_v22 = vld [vmem:[%s7044_s1 + $0x28] sm:$0xff] (!%p143_p2)  }
   0xc   : > { %4953 = vmatpush3.bf16.msra.mxu0 (!%p143_p2), %v5860_v6  ;;  %v5869_v15 = vld [vmem:[%s7044_s1 + $0x98] sm:$0xff] (!%p143_p2)   ;;  %v5873_v19 = vld [vmem:[%s7044_s1 + $0xa0] sm:$0xff] (!%p143_p2)   ;;  %v5877_v23 = vld [vmem:[%s7044_s1 + $0xa8] sm:$0xff] (!%p143_p2)  }
   0xd   : > { %5065 = vmatpush3.bf16.msra.mxu1 %v5861_v7  ;;  %4954 = vmatprep.subr.bf16.mxu0 %v5862_v8  ;;  %s7048_s21 = smov (!%p172_p3, %s4398_s21), 63  ;;  %v5878_v24 = vld [vmem:[%s7044_s1 + $0x70] sm:$0xff]   ;;  %v5882_v28 = vld [vmem:[%s7044_s1 + $0x78] sm:$0xff]   ;;  %v5886_v40 = vld [vmem:[%s7044_s1 + $0x140] sm:$0xff]   ;;  %s7050_s13 = smov (!%p184_p4, %s6016_s13), 1 }
   0xe   : > { %5066 = vmatprep.subr.bf16.mxu1 %v5863_v9  ;;  %v5879_v25 = vld [vmem:[%s7044_s1 + $0xf0] sm:$0xff]   ;;  %s4822_s19 = sshll.u32 %s7048_s21, 6  ;;  %v5883_v29 = vld [vmem:[%s7044_s1 + $0xf8] sm:$0xff]   ;;  %v5887_v41 = vld [vmem:[%s7044_s1 + $0x100] sm:$0xff]  }
   0xf   : > { %v5880_v26 = vld [vmem:[%s7044_s1 + $0x30] sm:$0xff]   ;;  %s6117_s29 = scalar_lea.vmem %s7043_s0, %s4822_s19  ;;  %v5884_v30 = vld [vmem:[%s7044_s1 + $0x38] sm:$0xff]   ;;  %v5888_v42 = vld [vmem:[%s7044_s1 + $0x1c0] sm:$0xff]  }
  0x10   : > { %4955 = vmatpush3.bf16.msra.mxu0 %v5864_v10  ;;  %v5881_v27 = vld [vmem:[%s7044_s1 + $0xb0] sm:$0xff]   ;;  %v5885_v31 = vld [vmem:[%s7044_s1 + $0xb8] sm:$0xff]   ;;  %v189_v32 = vld [vmem:[%s6117_s29] sm:$0xff] }
  0x11   : > { %5067 = vmatpush3.bf16.msra.mxu1 %v5865_v11  ;;  %4956 = vmatprep.subr.bf16.mxu0 %v5866_v12  ;;  %v197_v33 = vld [vmem:[%s6117_s29 + $0x40] sm:$0xff]  ;;  %v190_v34 = vld [vmem:[%s6117_s29 + $0x8] sm:$0xff]  ;;  %v5894_v2 = vld [vmem:[%s7044_s1 + $0x150] sm:$0xff]  }
  0x12   : > { %5068 = vmatprep.subr.bf16.mxu1 %v5867_v13  ;;  %v4404_v35 = vcombine.low %v189_v32, %v197_v33  ;;  %v4405_v36 = vcombine.high %v189_v32, %v197_v33  ;;  %v198_v37 = vld [vmem:[%s6117_s29 + $0x48] sm:$0xff]  ;;  %v5889_v43 = vld [vmem:[%s7044_s1 + $0x180] sm:$0xff]   ;;  %v5895_v4 = vld [vmem:[%s7044_s1 + $0x110] sm:$0xff]  }
  0x13   : > { %v4406_v38 = vcombine.low %v190_v34, %v198_v37  ;;  %v4407_v39 = vcombine.high %v190_v34, %v198_v37  ;;  %v205_v44 = vld [vmem:[%s6117_s29 + $0x80] sm:$0xff]  ;;  %v206_v47 = vld [vmem:[%s6117_s29 + $0x88] sm:$0xff]  ;;  %v5896_v7 = vld [vmem:[%s7044_s1 + $0x1d0] sm:$0xff]  }
  0x14   : > { %4957 = vmatpush3.bf16.msra.mxu0 %v5868_v14  ;;  %2781 = vmatprep.mubr.bf16.mxu0 %v4405_v36  ;;  %v213_v45 = vld [vmem:[%s6117_s29 + $0xc0] sm:$0xff]  ;;  %v214_v48 = vld [vmem:[%s6117_s29 + $0xc8] sm:$0xff]  ;;  %v5897_v9 = vld [vmem:[%s7044_s1 + $0x190] sm:$0xff]  }
  0x15   : > { %5069 = vmatpush3.bf16.msra.mxu1 %v5869_v15  ;;  %4958 = vmatprep.subr.bf16.mxu0 %v5870_v16  ;;  %v4421_v46 = vcombine.high %v205_v44, %v213_v45  ;;  %v221_v49 = vld [vmem:[%s6117_s29 + $0x100] sm:$0xff]  ;;  %v4423_v50 = vcombine.high %v206_v47, %v214_v48  ;;  %v222_v52 = vld [vmem:[%s6117_s29 + $0x108] sm:$0xff]  ;;  %v4420_v54 = vcombine.low %v205_v44, %v213_v45  ;;  %v5898_v14 = vld [vmem:[%s7044_s1 + $0x158] sm:$0xff]  }
  0x16   : > { %5070 = vmatprep.subr.bf16.mxu1 %v5871_v17  ;;  %2942 = vmatprep.mubr.bf16.mxu1 %v4407_v39  ;;  %v229_v51 = vld [vmem:[%s6117_s29 + $0x140] sm:$0xff]  ;;  %v230_v53 = vld [vmem:[%s6117_s29 + $0x148] sm:$0xff]  ;;  %v4422_v56 = vcombine.low %v206_v47, %v214_v48  ;;  %v5899_v15 = vld [vmem:[%s7044_s1 + $0x118] sm:$0xff]  }
  0x17   : > { %v5890_v55 = vld [vmem:[%s7044_s1 + $0x148] sm:$0xff]   ;;  %v4437_v57 = vcombine.high %v221_v49, %v229_v51  ;;  %v4439_v59 = vcombine.high %v222_v52, %v230_v53  ;;  %v237_v62 = vld [vmem:[%s6117_s29 + $0x180] sm:$0xff]  ;;  %v4436_v3 = vcombine.low %v221_v49, %v229_v51  ;;  %v4438_v5 = vcombine.low %v222_v52, %v230_v53  ;;  %v5900_v17 = vld [vmem:[%s7044_s1 + $0x1d8] sm:$0xff]  }
  0x18   : > { %4959 = vmatpush3.bf16.msra.mxu0 %v5872_v18  ;;  %v5891_v58 = vld [vmem:[%s7044_s1 + $0x108] sm:$0xff]   ;;  %v245_v63 = vld [vmem:[%s6117_s29 + $0x1c0] sm:$0xff]  ;;  %v5911_v47 = vld [vmem:[%s7044_s1 + $0x130] sm:$0xff]  }
  0x19   : > { %5071 = vmatpush3.bf16.msra.mxu1 %v5873_v19  ;;  %4960 = vmatprep.subr.bf16.mxu0 %v5874_v20  ;;  %v5892_v60 = vld [vmem:[%s7044_s1 + $0x1c8] sm:$0xff]   ;;  %v4453_v6 = vcombine.high %v237_v62, %v245_v63  ;;  %v253_v10 = vld [vmem:[%s6117_s29 + $0x200] sm:$0xff]  ;;  %v4452_v16 = vcombine.low %v237_v62, %v245_v63  ;;  %v5901_v20 = vld [vmem:[%s7044_s1 + $0x198] sm:$0xff]  }
  0x1a   : > { %5072 = vmatprep.subr.bf16.mxu1 %v5875_v21  ;;  %v5893_v61 = vld [vmem:[%s7044_s1 + $0x188] sm:$0xff]   ;;  %v261_v11 = vld [vmem:[%s6117_s29 + $0x240] sm:$0xff]  ;;  %v5912_v48 = vld [vmem:[%s7044_s1 + $0x1f0] sm:$0xff]  }
  0x1b   : > { %v238_v0 = vld [vmem:[%s6117_s29 + $0x188] sm:$0xff]  ;;  %v4469_v19 = vcombine.high %v253_v10, %v261_v11  ;;  %v5913_v49 = vld [vmem:[%s7044_s1 + $0x1b0] sm:$0xff]   ;;  %v309_v51 = vld [vmem:[%s6117_s29 + $0x3c0] sm:$0xff] }
  0x1c   : > { %4961 = vmatpush3.bf16.msra.mxu0 %v5876_v22  ;;  %v246_v1 = vld [vmem:[%s6117_s29 + $0x1c8] sm:$0xff]  ;;  %v269_v22 = vld [vmem:[%s6117_s29 + $0x280] sm:$0xff] }
  0x1d   : > { %5073 = vmatpush3.bf16.msra.mxu1 %v5877_v23  ;;  %4962 = vmatprep.subr.bf16.mxu0 %v5878_v24  ;;  %v4455_v8 = vcombine.high %v238_v0, %v246_v1  ;;  %v254_v12 = vld [vmem:[%s6117_s29 + $0x208] sm:$0xff]  ;;  %v4454_v18 = vcombine.low %v238_v0, %v246_v1  ;;  %v277_v23 = vld [vmem:[%s6117_s29 + $0x2c0] sm:$0xff] }
  0x1e   : > { %5074 = vmatprep.subr.bf16.mxu1 %v5879_v25  ;;  %v262_v13 = vld [vmem:[%s6117_s29 + $0x248] sm:$0xff]  ;;  %v5902_v24 = vld [vmem:[%s7044_s1 + $0x160] sm:$0xff]   ;;  %v4485_v32 = vcombine.high %v269_v22, %v277_v23 }
  0x1f   : > { %v4471_v21 = vcombine.high %v254_v12, %v262_v13  ;;  %v270_v25 = vld [vmem:[%s6117_s29 + $0x288] sm:$0xff]  ;;  %v317_v62 = vld [vmem:[%s6117_s29 + $0x400] sm:$0xff] }
  0x20   : > { %4963 = vmatpush3.bf16.msra.mxu0 %v5880_v26  ;;  %v278_v26 = vld [vmem:[%s6117_s29 + $0x2c8] sm:$0xff]  ;;  %v325_v63 = vld [vmem:[%s6117_s29 + $0x440] sm:$0xff] }
  0x21   : > { %5075 = vmatpush3.bf16.msra.mxu1 %v5881_v27  ;;  %4964 = vmatprep.subr.bf16.mxu0 %v5882_v28  ;;  %v5903_v27 = vld [vmem:[%s7044_s1 + $0x120] sm:$0xff]   ;;  %v4487_v33 = vcombine.high %v270_v25, %v278_v26  ;;  %v5906_v34 = vld [vmem:[%s7044_s1 + $0x168] sm:$0xff]  }
  0x22   : > { %5076 = vmatprep.subr.bf16.mxu1 %v5883_v29  ;;  %v5904_v28 = vld [vmem:[%s7044_s1 + $0x1e0] sm:$0xff]   ;;  %v5907_v36 = vld [vmem:[%s7044_s1 + $0x128] sm:$0xff]  }
  0x23   : > { %v5905_v29 = vld [vmem:[%s7044_s1 + $0x1a0] sm:$0xff]   ;;  %v5908_v37 = vld [vmem:[%s7044_s1 + $0x1e8] sm:$0xff]  }
  0x24   : > { %4965 = vmatpush3.bf16.msra.mxu0 %v5884_v30  ;;  %v4468_v30 = vcombine.low %v253_v10, %v261_v11  ;;  %v5909_v39 = vld [vmem:[%s7044_s1 + $0x1a8] sm:$0xff]  }
  0x25   : > { %5077 = vmatpush3.bf16.msra.mxu1 %v5885_v31  ;;  %5174 = vmatprep.subr.bf16.mxu0 %v5886_v40  ;;  %v4470_v31 = vcombine.low %v254_v12, %v262_v13  ;;  %v286_v40 = vld [vmem:[%s6117_s29 + $0x308] sm:$0xff]  ;;  %v4532_v12 = vcombine.low %v317_v62, %v325_v63 }
  0x26   : > { %5286 = vmatprep.subr.bf16.mxu1 %v5888_v42  ;;  %v4484_v42 = vcombine.low %v269_v22, %v277_v23  ;;  %v302_v52 = vld [vmem:[%s6117_s29 + $0x388] sm:$0xff] }
  0x27   : > { %2782 = vmatmul.mubr.bf16.vlgmr.msra.gmra.mrb[0].mxu0 %v4404_v35  ;;  %v285_v35 = vld [vmem:[%s6117_s29 + $0x300] sm:$0xff]  ;;  %v310_v53 = vld [vmem:[%s6117_s29 + $0x3c8] sm:$0xff] }
  0x28   : > { %2943 = vmatmul.mubr.bf16.vlgmr.msra.gmra.mrb[0].mxu1 %v4406_v38  ;;  %5175 = vmatpush3.bf16.msra.mxu0 %v5887_v41  ;;  %v293_v38 = vld [vmem:[%s6117_s29 + $0x340] sm:$0xff]  ;;  %v294_v41 = vld [vmem:[%s6117_s29 + $0x348] sm:$0xff] }
  0x29   : > { %5287 = vmatpush3.bf16.msra.mxu1 %v5889_v43  ;;  %2789 = vmatprep.mubr.bf16.mxu0 %v4421_v46  ;;  %v4486_v43 = vcombine.low %v270_v25, %v278_v26  ;;  %v4501_v44 = vcombine.high %v285_v35, %v293_v38  ;;  %v4503_v45 = vcombine.high %v286_v40, %v294_v41  ;;  %v5910_v46 = vld [vmem:[%s7044_s1 + $0x170] sm:$0xff]   ;;  %v318_v0 = vld [vmem:[%s6117_s29 + $0x408] sm:$0xff]  ;;  %v373_v25 = vld [vmem:[%s6117_s29 + $0x5c0] sm:$0xff] }
  0x2a   : > { %2950 = vmatprep.mubr.bf16.mxu1 %v4423_v50  ;;  %5176 = vmatprep.subr.bf16.mxu0 %v5890_v55  ;;  %v301_v50 = vld [vmem:[%s6117_s29 + $0x380] sm:$0xff]  ;;  %v5914_v55 = vld [vmem:[%s7044_s1 + $0x178] sm:$0xff]   ;;  %v326_v1 = vld [vmem:[%s6117_s29 + $0x448] sm:$0xff] }
  0x2b   : > { %5288 = vmatprep.subr.bf16.mxu1 %v5892_v60  ;;  %v5916_v60 = vld [vmem:[%s7044_s1 + $0x1f8] sm:$0xff]   ;;  %v334_v10 = vld [vmem:[%s6117_s29 + $0x488] sm:$0xff]  ;;  %v4534_v13 = vcombine.low %v318_v0, %v326_v1 }
  0x2c   : > { %5177 = vmatpush3.bf16.msra.mxu0 %v5891_v58  ;;  %v5915_v58 = vld [vmem:[%s7044_s1 + $0x138] sm:$0xff]   ;;  %v342_v11 = vld [vmem:[%s6117_s29 + $0x4c8] sm:$0xff] }
  0x2d   : > { %5289 = vmatpush3.bf16.msra.mxu1 %v5893_v61  ;;  %5178 = vmatprep.subr.bf16.mxu0 %v5894_v2  ;;  %v5917_v61 = vld [vmem:[%s7044_s1 + $0x1b8] sm:$0xff]   ;;  %v5918_v2 = vld [vmem:[%s7044_s1 + $0x240] sm:$0xff]   ;;  %v366_v26 = vld [vmem:[%s6117_s29 + $0x588] sm:$0xff] }
  0x2e   : > { %5290 = vmatprep.subr.bf16.mxu1 %v5896_v7  ;;  %v4535_v7 = vcombine.high %v318_v0, %v326_v1  ;;  %v191_v0 = vld [vmem:[%s6117_s29 + $0x10] sm:$0xff] }
  0x2f   : > { %2790 = vmatmul.mubr.bf16.gmra.mrb[4].mxu0 %v4420_v54  ;;  %v4500_v54 = vcombine.low %v285_v35, %v293_v38  ;;  %v390_v35 = vld [vmem:[%s6117_s29 + $0x648] sm:$0xff]  ;;  %v199_v1 = vld [vmem:[%s6117_s29 + $0x50] sm:$0xff] }
  0x30   : > { %2951 = vmatmul.mubr.bf16.gmra.mrb[4].mxu1 %v4422_v56  ;;  %2797 = vmatprep.mubr.bf16.mxu0 %v4437_v57  ;;  %v4502_v56 = vcombine.low %v286_v40, %v294_v41  ;;  %v4517_v57 = vcombine.high %v301_v50, %v309_v51  ;;  %v397_v40 = vld [vmem:[%s6117_s29 + $0x680] sm:$0xff] }
  0x31   : > { %2958 = vmatprep.mubr.bf16.mxu1 %v4439_v59  ;;  %5179 = vmatpush3.bf16.msra.mxu0 %v5895_v4  ;;  %v4519_v59 = vcombine.high %v302_v52, %v310_v53  ;;  %v4518_v4 = vcombine.low %v302_v52, %v310_v53  ;;  %v405_v41 = vld [vmem:[%s6117_s29 + $0x6c0] sm:$0xff] }
  0x32   : > { %5291 = vmatpush3.bf16.msra.mxu1 %v5897_v9  ;;  %5180 = vmatprep.subr.bf16.mxu0 %v5898_v14  ;;  %v341_v9 = vld [vmem:[%s6117_s29 + $0x4c0] sm:$0xff]  ;;  %v4612_v52 = vcombine.low %v397_v40, %v405_v41 }
  0x33   : > { %5292 = vmatprep.subr.bf16.mxu1 %v5900_v17  ;;  %v357_v17 = vld [vmem:[%s6117_s29 + $0x540] sm:$0xff] }
  0x35   : > { %5181 = vmatpush3.bf16.msra.mxu0 %v5899_v15  ;;  %v4551_v15 = vcombine.high %v334_v10, %v342_v11 }
  0x36   : > { %5293 = vmatpush3.bf16.msra.mxu1 %v5901_v20  ;;  %5182 = vmatprep.subr.bf16.mxu0 %v5902_v24  ;;  %v365_v24 = vld [vmem:[%s6117_s29 + $0x580] sm:$0xff] }
  0x37   : > { %2798 = vmatmul.mubr.bf16.gmra.mrb[8].mxu0 %v4436_v3  ;;  %5294 = vmatprep.subr.bf16.mxu1 %v5904_v28  ;;  %v4516_v3 = vcombine.low %v301_v50, %v309_v51  ;;  %v414_v50 = vld [vmem:[%s6117_s29 + $0x708] sm:$0xff] }
  0x38   : > { %2959 = vmatmul.mubr.bf16.gmra.mrb[8].mxu1 %v4438_v5  ;;  %2805 = vmatprep.mubr.bf16.mxu0 %v4453_v6  ;;  %v4533_v5 = vcombine.high %v317_v62, %v325_v63  ;;  %v5920_v6 = vld [vmem:[%s7044_s1 + $0x2c0] sm:$0xff]   ;;  %v422_v51 = vld [vmem:[%s6117_s29 + $0x748] sm:$0xff] }
  0x39   : > { %2966 = vmatprep.mubr.bf16.mxu1 %v4455_v8  ;;  %5183 = vmatpush3.bf16.msra.mxu0 %v5903_v27  ;;  %v333_v8 = vld [vmem:[%s6117_s29 + $0x480] sm:$0xff]  ;;  %v374_v27 = vld [vmem:[%s6117_s29 + $0x5c8] sm:$0xff] }
  0x3a   : > { %5295 = vmatpush3.bf16.msra.mxu1 %v5905_v29  ;;  %5184 = vmatprep.subr.bf16.mxu0 %v5906_v34  ;;  %v4549_v14 = vcombine.high %v333_v8, %v341_v9  ;;  %v4548_v20 = vcombine.low %v333_v8, %v341_v9  ;;  %v382_v34 = vld [vmem:[%s6117_s29 + $0x608] sm:$0xff]  ;;  %v207_v8 = vld [vmem:[%s6117_s29 + $0x90] sm:$0xff] }
  0x3b   : > { %5296 = vmatprep.subr.bf16.mxu1 %v5908_v37  ;;  %v4582_v37 = vcombine.low %v366_v26, %v374_v27  ;;  %v215_v9 = vld [vmem:[%s6117_s29 + $0xd0] sm:$0xff] }
  0x3d   : > { %5185 = vmatpush3.bf16.msra.mxu0 %v5907_v36  ;;  %v4580_v36 = vcombine.low %v365_v24, %v373_v25 }
  0x3e   : > { %5297 = vmatpush3.bf16.msra.mxu1 %v5909_v39  ;;  %5186 = vmatprep.subr.bf16.mxu0 %v5910_v46  ;;  %v4599_v39 = vcombine.high %v382_v34, %v390_v35  ;;  %v4613_v46 = vcombine.high %v397_v40, %v405_v41  ;;  %v248_v40 = vld [vmem:[%s6117_s29 + $0x1d8] sm:$0xff] }
  0x3f   : > { %2806 = vmatmul.mubr.bf16.gmra.mrb[12].mxu0 %v4452_v16  ;;  %5298 = vmatprep.subr.bf16.mxu1 %v5912_v48  ;;  %v349_v16 = vld [vmem:[%s6117_s29 + $0x500] sm:$0xff]  ;;  %v5933_v41 = vld [vmem:[%s7044_s1 + $0x298] sm:$0xff]  }
  0x40   : > { %2967 = vmatmul.mubr.bf16.gmra.mrb[12].mxu1 %v4454_v18  ;;  %2813 = vmatprep.mubr.bf16.mxu0 %v4469_v19  ;;  %v350_v18 = vld [vmem:[%s6117_s29 + $0x508] sm:$0xff]  ;;  %v4565_v22 = vcombine.high %v349_v16, %v357_v17  ;;  %v4564_v28 = vcombine.low %v349_v16, %v357_v17  ;;  %v413_v48 = vld [vmem:[%s6117_s29 + $0x700] sm:$0xff]  ;;  %v4425_v16 = vcombine.high %v207_v8, %v215_v9 }
  0x41   : > { %2974 = vmatprep.mubr.bf16.mxu1 %v4471_v21  ;;  %5187 = vmatpush3.bf16.msra.mxu0 %v5911_v47  ;;  %v358_v19 = vld [vmem:[%s6117_s29 + $0x548] sm:$0xff]  ;;  %v4550_v21 = vcombine.low %v334_v10, %v342_v11  ;;  %v4408_v10 = vcombine.low %v191_v0, %v199_v1  ;;  %v208_v11 = vld [vmem:[%s6117_s29 + $0x98] sm:$0xff] }
  0x42   : > { %5299 = vmatpush3.bf16.msra.mxu1 %v5913_v49  ;;  %5188 = vmatprep.subr.bf16.mxu0 %v5914_v55  ;;  %v4567_v23 = vcombine.high %v350_v18, %v358_v19  ;;  %v4566_v29 = vcombine.low %v350_v18, %v358_v19  ;;  %v421_v49 = vld [vmem:[%s6117_s29 + $0x740] sm:$0xff]  ;;  %v4631_v55 = vcombine.high %v414_v50, %v422_v51  ;;  %v5922_v18 = vld [vmem:[%s7044_s1 + $0x248] sm:$0xff]  }
  0x43   : > { %5300 = vmatprep.subr.bf16.mxu1 %v5916_v60  ;;  %v4628_v60 = vcombine.low %v413_v48, %v421_v49  ;;  %v5924_v19 = vld [vmem:[%s7044_s1 + $0x2c8] sm:$0xff]  }
  0x45   : > { %5189 = vmatpush3.bf16.msra.mxu0 %v5915_v58  ;;  %v430_v58 = vld [vmem:[%s6117_s29 + $0x788] sm:$0xff] }
  0x46   : > { %5301 = vmatpush3.bf16.msra.mxu1 %v5917_v61  ;;  %5398 = vmatprep.subr.bf16.mxu0 %v5918_v2  ;;  %v4630_v61 = vcombine.low %v414_v50, %v422_v51  ;;  %v192_v2 = vld [vmem:[%s6117_s29 + $0x18] sm:$0xff]  ;;  %v5938_v50 = vld [vmem:[%s7044_s1 + $0x268] sm:$0xff]  }
  0x47   : > { %2814 = vmatmul.mubr.bf16.gmra.mrb[16].mxu0 %v4468_v30  ;;  %5510 = vmatprep.subr.bf16.mxu1 %v5920_v6  ;;  %v4581_v30 = vcombine.high %v365_v24, %v373_v25  ;;  %v4409_v6 = vcombine.high %v191_v0, %v199_v1  ;;  %v5926_v24 = vld [vmem:[%s7044_s1 + $0x250] sm:$0xff]   ;;  %v224_v25 = vld [vmem:[%s6117_s29 + $0x118] sm:$0xff]  ;;  %v5940_v51 = vld [vmem:[%s7044_s1 + $0x2e8] sm:$0xff]  }
  0x48   : > { %2975 = vmatmul.mubr.bf16.gmra.mrb[16].mxu1 %v4470_v31  ;;  %2821 = vmatprep.mubr.bf16.mxu0 %v4485_v32  ;;  %v4583_v31 = vcombine.high %v366_v26, %v374_v27  ;;  %v381_v32 = vld [vmem:[%s6117_s29 + $0x600] sm:$0xff]  ;;  %v232_v26 = vld [vmem:[%s6117_s29 + $0x158] sm:$0xff]  ;;  %v5928_v27 = vld [vmem:[%s7044_s1 + $0x2d0] sm:$0xff]  }
  0x49   : > { %2982 = vmatprep.mubr.bf16.mxu1 %v4487_v33  ;;  %v389_v33 = vld [vmem:[%s6117_s29 + $0x640] sm:$0xff]  ;;  %v5943_v0 = vld [vmem:[%s7044_s1 + $0x230] sm:$0xff]  }
  0x4a   : > { %v4597_v38 = vcombine.high %v381_v32, %v389_v33  ;;  %v5945_v1 = vld [vmem:[%s7044_s1 + $0x2b0] sm:$0xff]  }
  0x4f   : > { %2822 = vmatmul.mubr.bf16.gmra.mrb[20].mxu0 %v4484_v42  ;;  %v398_v42 = vld [vmem:[%s6117_s29 + $0x688] sm:$0xff] }
  0x50   : > { %2983 = vmatmul.mubr.bf16.gmra.mrb[20].mxu1 %v4486_v43  ;;  %2829 = vmatprep.mubr.bf16.mxu0 %v4501_v44  ;;  %v406_v43 = vld [vmem:[%s6117_s29 + $0x6c8] sm:$0xff]  ;;  %v4596_v44 = vcombine.low %v381_v32, %v389_v33  ;;  %v5927_v32 = vld [vmem:[%s7044_s1 + $0x210] sm:$0xff]  }
  0x51   : > { %2990 = vmatprep.mubr.bf16.mxu1 %v4503_v45  ;;  %v4598_v45 = vcombine.low %v382_v34, %v390_v35  ;;  %v4615_v47 = vcombine.high %v398_v42, %v406_v43  ;;  %v4614_v53 = vcombine.low %v398_v42, %v406_v43  ;;  %v5929_v33 = vld [vmem:[%s7044_s1 + $0x290] sm:$0xff]   ;;  %v5930_v34 = vld [vmem:[%s7044_s1 + $0x258] sm:$0xff]   ;;  %v5934_v42 = vld [vmem:[%s7044_s1 + $0x260] sm:$0xff]  }
  0x52   : > { %v5932_v35 = vld [vmem:[%s7044_s1 + $0x2d8] sm:$0xff]  }
  0x57   : > { %2830 = vmatmul.mubr.bf16.gmra.mrb[24].mxu0 %v4500_v54  ;;  %v4629_v54 = vcombine.high %v413_v48, %v421_v49  ;;  %v5935_v48 = vld [vmem:[%s7044_s1 + $0x220] sm:$0xff]  }
  0x58   : > { %2991 = vmatmul.mubr.bf16.gmra.mrb[24].mxu1 %v4502_v56  ;;  %2837 = vmatprep.mubr.bf16.mxu0 %v4517_v57  ;;  %v429_v56 = vld [vmem:[%s6117_s29 + $0x780] sm:$0xff] }
  0x59   : > { %2998 = vmatprep.mubr.bf16.mxu1 %v4519_v59  ;;  %v437_v57 = vld [vmem:[%s6117_s29 + $0x7c0] sm:$0xff]  ;;  %v438_v59 = vld [vmem:[%s6117_s29 + $0x7c8] sm:$0xff] }
  0x5a   : > { %v4645_v62 = vcombine.high %v429_v56, %v437_v57  ;;  %v4647_v63 = vcombine.high %v430_v58, %v438_v59  ;;  %v5937_v49 = vld [vmem:[%s7044_s1 + $0x2a0] sm:$0xff]  }
  0x5f   : > { %2838 = vmatmul.mubr.bf16.gmra.mrb[28].mxu0 %v4516_v3  ;;  %v200_v3 = vld [vmem:[%s6117_s29 + $0x58] sm:$0xff] }
  0x60   : > { %2999 = vmatmul.mubr.bf16.gmra.mrb[28].mxu1 %v4518_v4  ;;  %2845 = vmatprep.mubr.bf16.mxu0 %v4533_v5  ;;  %v4644_v4 = vcombine.low %v429_v56, %v437_v57  ;;  %v4646_v5 = vcombine.low %v430_v58, %v438_v59  ;;  %v264_v56 = vld [vmem:[%s6117_s29 + $0x258] sm:$0xff]  ;;  %v5941_v57 = vld [vmem:[%s7044_s1 + $0x2a8] sm:$0xff]   ;;  %v5942_v58 = vld [vmem:[%s7044_s1 + $0x270] sm:$0xff]  }
  0x61   : > { %3006 = vmatprep.mubr.bf16.mxu1 %v4535_v7  ;;  %v4411_v7 = vcombine.high %v192_v2, %v200_v3 }
  0x67   : > { %2846 = vmatmul.mubr.bf16.gmra.mrb[32].mxu0 %v4532_v12  ;;  %v216_v12 = vld [vmem:[%s6117_s29 + $0xd8] sm:$0xff] }
  0x68   : > { %3007 = vmatmul.mubr.bf16.gmra.mrb[32].mxu1 %v4534_v13  ;;  %2853 = vmatprep.mubr.bf16.mxu0 %v4549_v14  ;;  %v4410_v13 = vcombine.low %v192_v2, %v200_v3  ;;  %v5919_v14 = vld [vmem:[%s7044_s1 + $0x200] sm:$0xff]   ;;  %v4427_v17 = vcombine.high %v208_v11, %v216_v12  ;;  %v5946_v2 = vld [vmem:[%s7044_s1 + $0x278] sm:$0xff]  }
  0x69   : > { %3014 = vmatprep.mubr.bf16.mxu1 %v4551_v15  ;;  %v5921_v15 = vld [vmem:[%s7044_s1 + $0x280] sm:$0xff]   ;;  %v5948_v3 = vld [vmem:[%s7044_s1 + $0x2f8] sm:$0xff]  }
  0x6f   : > { %2854 = vmatmul.mubr.bf16.gmra.mrb[36].mxu0 %v4548_v20  ;;  %v223_v20 = vld [vmem:[%s6117_s29 + $0x110] sm:$0xff] }
  0x70   : > { %3015 = vmatmul.mubr.bf16.gmra.mrb[36].mxu1 %v4550_v21  ;;  %2861 = vmatprep.mubr.bf16.mxu0 %v4565_v22  ;;  %v5923_v21 = vld [vmem:[%s7044_s1 + $0x208] sm:$0xff]   ;;  %v231_v22 = vld [vmem:[%s6117_s29 + $0x150] sm:$0xff] }
  0x71   : > { %3022 = vmatprep.mubr.bf16.mxu1 %v4567_v23  ;;  %v5925_v23 = vld [vmem:[%s7044_s1 + $0x288] sm:$0xff]   ;;  %v4440_v43 = vcombine.low %v223_v20, %v231_v22 }
  0x77   : > { %2862 = vmatmul.mubr.bf16.gmra.mrb[40].mxu0 %v4564_v28  ;;  %v4424_v28 = vcombine.low %v207_v8, %v215_v9  ;;  %v280_v8 = vld [vmem:[%s6117_s29 + $0x2d8] sm:$0xff] }
  0x78   : > { %3023 = vmatmul.mubr.bf16.gmra.mrb[40].mxu1 %v4566_v29  ;;  %2869 = vmatprep.mubr.bf16.mxu0 %v4581_v30  ;;  %v4426_v29 = vcombine.low %v208_v11, %v216_v12  ;;  %v4441_v30 = vcombine.high %v223_v20, %v231_v22  ;;  %v5949_v9 = vld [vmem:[%s7044_s1 + $0x2b8] sm:$0xff]   ;;  %v5952_v12 = vld [vmem:[%s7044_s1 + $0x3c0] sm:$0xff]  }
  0x79   : > { %3030 = vmatprep.mubr.bf16.mxu1 %v4583_v31  ;;  %v4443_v31 = vcombine.high %v224_v25, %v232_v26 }
  0x7f   : > { %2870 = vmatmul.mubr.bf16.gmra.mrb[44].mxu0 %v4580_v36  ;;  %v239_v36 = vld [vmem:[%s6117_s29 + $0x190] sm:$0xff] }
  0x80   : > { %3031 = vmatmul.mubr.bf16.gmra.mrb[44].mxu1 %v4582_v37  ;;  %2877 = vmatprep.mubr.bf16.mxu0 %v4597_v38  ;;  %v247_v37 = vld [vmem:[%s6117_s29 + $0x1d0] sm:$0xff]  ;;  %v240_v38 = vld [vmem:[%s6117_s29 + $0x198] sm:$0xff] }
  0x81   : > { %3038 = vmatprep.mubr.bf16.mxu1 %v4599_v39  ;;  %v5931_v39 = vld [vmem:[%s7044_s1 + $0x218] sm:$0xff]   ;;  %v4456_v59 = vcombine.low %v239_v36, %v247_v37 }
  0x87   : > { %2878 = vmatmul.mubr.bf16.gmra.mrb[48].mxu0 %v4596_v44  ;;  %v5936_v44 = vld [vmem:[%s7044_s1 + $0x2e0] sm:$0xff]  }
  0x88   : > { %3039 = vmatmul.mubr.bf16.gmra.mrb[48].mxu1 %v4598_v45  ;;  %2885 = vmatprep.mubr.bf16.mxu0 %v4613_v46  ;;  %v4442_v45 = vcombine.low %v224_v25, %v232_v26  ;;  %v4457_v46 = vcombine.high %v239_v36, %v247_v37  ;;  %v311_v25 = vld [vmem:[%s6117_s29 + $0x3d0] sm:$0xff]  ;;  %v304_v26 = vld [vmem:[%s6117_s29 + $0x398] sm:$0xff] }
  0x89   : > { %3046 = vmatprep.mubr.bf16.mxu1 %v4615_v47  ;;  %v4459_v47 = vcombine.high %v240_v38, %v248_v40 }
  0x8f   : > { %2886 = vmatmul.mubr.bf16.gmra.mrb[52].mxu0 %v4612_v52  ;;  %v255_v52 = vld [vmem:[%s6117_s29 + $0x210] sm:$0xff] }
  0x90   : > { %3047 = vmatmul.mubr.bf16.gmra.mrb[52].mxu1 %v4614_v53  ;;  %2893 = vmatprep.mubr.bf16.mxu0 %v4629_v54  ;;  %v263_v53 = vld [vmem:[%s6117_s29 + $0x250] sm:$0xff]  ;;  %v256_v54 = vld [vmem:[%s6117_s29 + $0x218] sm:$0xff] }
  0x91   : > { %3054 = vmatprep.mubr.bf16.mxu1 %v4631_v55  ;;  %v5939_v55 = vld [vmem:[%s7044_s1 + $0x228] sm:$0xff]   ;;  %v4472_v11 = vcombine.low %v255_v52, %v263_v53 }
  0x97   : > { %2894 = vmatmul.mubr.bf16.gmra.mrb[56].mxu0 %v4628_v60  ;;  %v5944_v60 = vld [vmem:[%s7044_s1 + $0x2f0] sm:$0xff]  }
  0x98   : > { %3055 = vmatmul.mubr.bf16.gmra.mrb[56].mxu1 %v4630_v61  ;;  %2901 = vmatprep.mubr.bf16.mxu0 %v4645_v62  ;;  %v4458_v61 = vcombine.low %v240_v38, %v248_v40  ;;  %v4473_v62 = vcombine.high %v255_v52, %v263_v53  ;;  %v335_v40 = vld [vmem:[%s6117_s29 + $0x490] sm:$0xff] }
  0x99   : > { %3062 = vmatprep.mubr.bf16.mxu1 %v4647_v63  ;;  %v4475_v63 = vcombine.high %v256_v54, %v264_v56 }
  0x9f   : > { %2902 = vmatmul.mubr.bf16.gmra.mrb[60].mxu0 %v4644_v4  ;;  %v271_v4 = vld [vmem:[%s6117_s29 + $0x290] sm:$0xff] }
  0xa0   : > { %3063 = vmatmul.mubr.bf16.gmra.mrb[60].mxu1 %v4646_v5  ;;  %3103 = vmatprep.mubr.bf16.mxu0 %v4409_v6  ;;  %v279_v5 = vld [vmem:[%s6117_s29 + $0x2d0] sm:$0xff]  ;;  %v272_v6 = vld [vmem:[%s6117_s29 + $0x298] sm:$0xff] }
  0xa1   : > { %3264 = vmatprep.mubr.bf16.mxu1 %v4411_v7  ;;  %v5947_v7 = vld [vmem:[%s7044_s1 + $0x238] sm:$0xff]   ;;  %v4488_v20 = vcombine.low %v271_v4, %v279_v5 }
  0xa7   : > { %3104 = vmatmul.mubr.bf16.vlgmr.msra.gmra.mrb[64].mxu0 %v4408_v10  ;;  %v5950_v10 = vld [vmem:[%s7044_s1 + $0x340] sm:$0xff]  }
  0xa8   : > { %3265 = vmatmul.mubr.bf16.vlgmr.msra.gmra.mrb[64].mxu1 %v4410_v13  ;;  %5399 = vmatpush3.bf16.msra.mxu0 %v5919_v14  ;;  %v4474_v13 = vcombine.low %v256_v54, %v264_v56  ;;  %v4489_v14 = vcombine.high %v271_v4, %v279_v5  ;;  %v367_v56 = vld [vmem:[%s6117_s29 + $0x590] sm:$0xff]  ;;  %v392_v4 = vld [vmem:[%s6117_s29 + $0x658] sm:$0xff] }
  0xa9   : > { %5511 = vmatpush3.bf16.msra.mxu1 %v5921_v15  ;;  %3111 = vmatprep.mubr.bf16.mxu0 %v4425_v16  ;;  %v4491_v15 = vcombine.high %v272_v6, %v280_v8  ;;  %v287_v16 = vld [vmem:[%s6117_s29 + $0x310] sm:$0xff] }
  0xaa   : > { %3272 = vmatprep.mubr.bf16.mxu1 %v4427_v17  ;;  %5400 = vmatprep.subr.bf16.mxu0 %v5922_v18  ;;  %v295_v17 = vld [vmem:[%s6117_s29 + $0x350] sm:$0xff]  ;;  %v288_v18 = vld [vmem:[%s6117_s29 + $0x318] sm:$0xff] }
  0xab   : > { %5512 = vmatprep.subr.bf16.mxu1 %v5924_v19  ;;  %v296_v19 = vld [vmem:[%s6117_s29 + $0x358] sm:$0xff]  ;;  %v4505_v22 = vcombine.high %v287_v16, %v295_v17 }
  0xac   : > { %5401 = vmatpush3.bf16.msra.mxu0 %v5923_v21  ;;  %v4490_v21 = vcombine.low %v272_v6, %v280_v8 }
  0xad   : > { %5513 = vmatpush3.bf16.msra.mxu1 %v5925_v23  ;;  %5402 = vmatprep.subr.bf16.mxu0 %v5926_v24  ;;  %v4507_v23 = vcombine.high %v288_v18, %v296_v19  ;;  %v303_v24 = vld [vmem:[%s6117_s29 + $0x390] sm:$0xff] }
  0xae   : > { %5514 = vmatprep.subr.bf16.mxu1 %v5928_v27  ;;  %v312_v27 = vld [vmem:[%s6117_s29 + $0x3d8] sm:$0xff]  ;;  %v4520_v36 = vcombine.low %v303_v24, %v311_v25 }
  0xaf   : > { %3112 = vmatmul.mubr.bf16.gmra.mrb[68].mxu0 %v4424_v28  ;;  %v4504_v28 = vcombine.low %v287_v16, %v295_v17  ;;  %v4522_v37 = vcombine.low %v304_v26, %v312_v27 }
  0xb0   : > { %3273 = vmatmul.mubr.bf16.gmra.mrb[68].mxu1 %v4426_v29  ;;  %3119 = vmatprep.mubr.bf16.mxu0 %v4441_v30  ;;  %v4506_v29 = vcombine.low %v288_v18, %v296_v19  ;;  %v4521_v30 = vcombine.high %v303_v24, %v311_v25  ;;  %v400_v25 = vld [vmem:[%s6117_s29 + $0x698] sm:$0xff] }
  0xb1   : > { %3280 = vmatprep.mubr.bf16.mxu1 %v4443_v31  ;;  %5403 = vmatpush3.bf16.msra.mxu0 %v5927_v32  ;;  %v4523_v31 = vcombine.high %v304_v26, %v312_v27  ;;  %v319_v32 = vld [vmem:[%s6117_s29 + $0x410] sm:$0xff]  ;;  %v408_v26 = vld [vmem:[%s6117_s29 + $0x6d8] sm:$0xff] }
  0xb2   : > { %5515 = vmatpush3.bf16.msra.mxu1 %v5929_v33  ;;  %5404 = vmatprep.subr.bf16.mxu0 %v5930_v34  ;;  %v327_v33 = vld [vmem:[%s6117_s29 + $0x450] sm:$0xff]  ;;  %v320_v34 = vld [vmem:[%s6117_s29 + $0x418] sm:$0xff] }
  0xb3   : > { %5516 = vmatprep.subr.bf16.mxu1 %v5932_v35  ;;  %v328_v35 = vld [vmem:[%s6117_s29 + $0x458] sm:$0xff]  ;;  %v4537_v38 = vcombine.high %v319_v32, %v327_v33 }
  0xb5   : > { %5405 = vmatpush3.bf16.msra.mxu0 %v5931_v39  ;;  %v4539_v39 = vcombine.high %v320_v34, %v328_v35 }
  0xb6   : > { %5517 = vmatpush3.bf16.msra.mxu1 %v5933_v41  ;;  %5406 = vmatprep.subr.bf16.mxu0 %v5934_v42  ;;  %v343_v41 = vld [vmem:[%s6117_s29 + $0x4d0] sm:$0xff]  ;;  %v336_v42 = vld [vmem:[%s6117_s29 + $0x498] sm:$0xff] }
  0xb7   : > { %3120 = vmatmul.mubr.bf16.gmra.mrb[72].mxu0 %v4440_v43  ;;  %5518 = vmatprep.subr.bf16.mxu1 %v5936_v44  ;;  %v344_v43 = vld [vmem:[%s6117_s29 + $0x4d8] sm:$0xff]  ;;  %v4536_v44 = vcombine.low %v319_v32, %v327_v33  ;;  %v4552_v52 = vcombine.low %v335_v40, %v343_v41 }
  0xb8   : > { %3281 = vmatmul.mubr.bf16.gmra.mrb[72].mxu1 %v4442_v45  ;;  %3127 = vmatprep.mubr.bf16.mxu0 %v4457_v46  ;;  %v4538_v45 = vcombine.low %v320_v34, %v328_v35  ;;  %v4553_v46 = vcombine.high %v335_v40, %v343_v41  ;;  %v4554_v53 = vcombine.low %v336_v42, %v344_v43 }
  0xb9   : > { %3288 = vmatprep.mubr.bf16.mxu1 %v4459_v47  ;;  %5407 = vmatpush3.bf16.msra.mxu0 %v5935_v48  ;;  %v4555_v47 = vcombine.high %v336_v42, %v344_v43  ;;  %v351_v48 = vld [vmem:[%s6117_s29 + $0x510] sm:$0xff] }
  0xba   : > { %5519 = vmatpush3.bf16.msra.mxu1 %v5937_v49  ;;  %5408 = vmatprep.subr.bf16.mxu0 %v5938_v50  ;;  %v359_v49 = vld [vmem:[%s6117_s29 + $0x550] sm:$0xff]  ;;  %v352_v50 = vld [vmem:[%s6117_s29 + $0x518] sm:$0xff] }
  0xbb   : > { %5520 = vmatprep.subr.bf16.mxu1 %v5940_v51  ;;  %v360_v51 = vld [vmem:[%s6117_s29 + $0x558] sm:$0xff]  ;;  %v4569_v54 = vcombine.high %v351_v48, %v359_v49 }
  0xbd   : > { %5409 = vmatpush3.bf16.msra.mxu0 %v5939_v55  ;;  %v4571_v55 = vcombine.high %v352_v50, %v360_v51 }
  0xbe   : > { %5521 = vmatpush3.bf16.msra.mxu1 %v5941_v57  ;;  %5410 = vmatprep.subr.bf16.mxu0 %v5942_v58  ;;  %v375_v57 = vld [vmem:[%s6117_s29 + $0x5d0] sm:$0xff]  ;;  %v368_v58 = vld [vmem:[%s6117_s29 + $0x598] sm:$0xff] }
  0xbf   : > { %3128 = vmatmul.mubr.bf16.gmra.mrb[76].mxu0 %v4456_v59  ;;  %5522 = vmatprep.subr.bf16.mxu1 %v5944_v60  ;;  %v376_v59 = vld [vmem:[%s6117_s29 + $0x5d8] sm:$0xff]  ;;  %v4568_v60 = vcombine.low %v351_v48, %v359_v49 }
  0xc0   : > { %3289 = vmatmul.mubr.bf16.gmra.mrb[76].mxu1 %v4458_v61  ;;  %3135 = vmatprep.mubr.bf16.mxu0 %v4473_v62  ;;  %v4570_v61 = vcombine.low %v352_v50, %v360_v51  ;;  %v4585_v62 = vcombine.high %v367_v56, %v375_v57  ;;  %v424_v48 = vld [vmem:[%s6117_s29 + $0x758] sm:$0xff] }
  0xc1   : > { %3296 = vmatprep.mubr.bf16.mxu1 %v4475_v63  ;;  %5411 = vmatpush3.bf16.msra.mxu0 %v5943_v0  ;;  %v4587_v63 = vcombine.high %v368_v58, %v376_v59  ;;  %v383_v0 = vld [vmem:[%s6117_s29 + $0x610] sm:$0xff] }
  0xc2   : > { %5523 = vmatpush3.bf16.msra.mxu1 %v5945_v1  ;;  %5412 = vmatprep.subr.bf16.mxu0 %v5946_v2  ;;  %v391_v1 = vld [vmem:[%s6117_s29 + $0x650] sm:$0xff] }
  0xc3   : > { %5524 = vmatprep.subr.bf16.mxu1 %v5948_v3  ;;  %v384_v3 = vld [vmem:[%s6117_s29 + $0x618] sm:$0xff] }
  0xc4   : > { %v4603_v16 = vcombine.high %v384_v3, %v392_v4  ;;  %v4602_v33 = vcombine.low %v384_v3, %v392_v4  ;;  %v439_v3 = vld [vmem:[%s6117_s29 + $0x7d0] sm:$0xff] }
  0xc5   : > { %5413 = vmatpush3.bf16.msra.mxu0 %v5947_v7  ;;  %v4584_v7 = vcombine.low %v367_v56, %v375_v57 }
  0xc6   : > { %5525 = vmatpush3.bf16.msra.mxu1 %v5949_v9  ;;  %5622 = vmatprep.subr.bf16.mxu0 %v5950_v10 }
  0xc7   : > { %3136 = vmatmul.mubr.bf16.gmra.mrb[80].mxu0 %v4472_v11  ;;  %5734 = vmatprep.subr.bf16.mxu1 %v5952_v12  ;;  %v4586_v11 = vcombine.low %v368_v58, %v376_v59  ;;  %v4601_v12 = vcombine.high %v383_v0, %v391_v1 }
  0xc8   : > { %3297 = vmatmul.mubr.bf16.gmra.mrb[80].mxu1 %v4474_v13  ;;  %3143 = vmatprep.mubr.bf16.mxu0 %v4489_v14 }
  0xc9   : > { %3304 = vmatprep.mubr.bf16.mxu1 %v4491_v15 }
  0xcf   : > { %3144 = vmatmul.mubr.bf16.gmra.mrb[84].mxu0 %v4488_v20 }
  0xd0   : > { %3305 = vmatmul.mubr.bf16.gmra.mrb[84].mxu1 %v4490_v21  ;;  %3151 = vmatprep.mubr.bf16.mxu0 %v4505_v22  ;;  %v399_v22 = vld [vmem:[%s6117_s29 + $0x690] sm:$0xff] }
  0xd1   : > { %3312 = vmatprep.mubr.bf16.mxu1 %v4507_v23  ;;  %v407_v23 = vld [vmem:[%s6117_s29 + $0x6d0] sm:$0xff] }
  0xd2   : > { %v4617_v34 = vcombine.high %v399_v22, %v407_v23  ;;  %v4616_v51 = vcombine.low %v399_v22, %v407_v23 }
  0xd7   : > { %3152 = vmatmul.mubr.bf16.gmra.mrb[88].mxu0 %v4504_v28 }
  0xd8   : > { %3313 = vmatmul.mubr.bf16.gmra.mrb[88].mxu1 %v4506_v29  ;;  %3159 = vmatprep.mubr.bf16.mxu0 %v4521_v30  ;;  %v4600_v29 = vcombine.low %v383_v0, %v391_v1 }
  0xd9   : > { %3320 = vmatprep.mubr.bf16.mxu1 %v4523_v31 }
  0xdf   : > { %3160 = vmatmul.mubr.bf16.gmra.mrb[92].mxu0 %v4520_v36 }
  0xe0   : > { %3321 = vmatmul.mubr.bf16.gmra.mrb[92].mxu1 %v4522_v37  ;;  %3167 = vmatprep.mubr.bf16.mxu0 %v4537_v38  ;;  %v4619_v38 = vcombine.high %v400_v25, %v408_v26 }
  0xe1   : > { %3328 = vmatprep.mubr.bf16.mxu1 %v4539_v39 }
  0xe7   : > { %3168 = vmatmul.mubr.bf16.gmra.mrb[96].mxu0 %v4536_v44  ;;  %v415_v44 = vld [vmem:[%s6117_s29 + $0x710] sm:$0xff] }
  0xe8   : > { %3329 = vmatmul.mubr.bf16.gmra.mrb[96].mxu1 %v4538_v45  ;;  %3175 = vmatprep.mubr.bf16.mxu0 %v4553_v46  ;;  %v423_v45 = vld [vmem:[%s6117_s29 + $0x750] sm:$0xff] }
  0xe9   : > { %3336 = vmatprep.mubr.bf16.mxu1 %v4555_v47  ;;  %v416_v47 = vld [vmem:[%s6117_s29 + $0x718] sm:$0xff]  ;;  %v4633_v56 = vcombine.high %v415_v44, %v423_v45 }
  0xef   : > { %3176 = vmatmul.mubr.bf16.gmra.mrb[100].mxu0 %v4552_v52 }
  0xf0   : > { %3337 = vmatmul.mubr.bf16.gmra.mrb[100].mxu1 %v4554_v53  ;;  %3183 = vmatprep.mubr.bf16.mxu0 %v4569_v54 }
  0xf1   : > { %3344 = vmatprep.mubr.bf16.mxu1 %v4571_v55  ;;  %v4618_v55 = vcombine.low %v400_v25, %v408_v26  ;;  %v193_v26 = vld [vmem:[%s6117_s29 + $0x20] sm:$0xff] }
  0xf7   : > { %3184 = vmatmul.mubr.bf16.gmra.mrb[104].mxu0 %v4568_v60  ;;  %v4635_v60 = vcombine.high %v416_v47, %v424_v48 }
  0xf8   : > { %3345 = vmatmul.mubr.bf16.gmra.mrb[104].mxu1 %v4570_v61  ;;  %3191 = vmatprep.mubr.bf16.mxu0 %v4585_v62 }
  0xf9   : > { %3352 = vmatprep.mubr.bf16.mxu1 %v4587_v63 }
  0xfa   : > { %v4966_v2 = vpop.f32.mrb[0].mxu0 }
  0xfb   : > { %v5078_v5 = vpop.f32.mrb[0].mxu1  ;;  %v4967_v6 = vpop.f32.mrb[1].mxu0 }
  0xfc   : > { %v4968_v8 = vadd.f32 %v4967_v6, %v4966_v2  ;;  %v5079_v9 = vpop.f32.mrb[1].mxu1  ;;  %v4969_v10 = vpop.f32.mrb[2].mxu0  ;;  %v431_v2 = vld [vmem:[%s6117_s29 + $0x790] sm:$0xff]  ;;  %v440_v6 = vld [vmem:[%s6117_s29 + $0x7d8] sm:$0xff] }
  0xfd   : > { %v5080_v13 = vadd.f32 %v5079_v9, %v5078_v5  ;;  %v5081_v14 = vpop.f32.mrb[2].mxu1  ;;  %v4970_v15 = vpop.f32.mrb[3].mxu0  ;;  %v432_v5 = vld [vmem:[%s6117_s29 + $0x798] sm:$0xff]  ;;  %v4632_v9 = vcombine.low %v415_v44, %v423_v45 }
  0xfe   : > { %v4971_v17 = vadd.f32 %v4970_v15, %v4969_v10  ;;  %v5082_v18 = vpop.f32.mrb[3].mxu1 }
  0xff   : > { %v6439_v19 = vadd.f32 %v5080_v13, %v4968_v8  ;;  %v5083_v20 = vadd.f32 %v5082_v18, %v5081_v14  ;;  %3192 = vmatmul.mubr.bf16.gmra.mrb[108].mxu0 %v4584_v7  ;;  %v4634_v13 = vcombine.low %v416_v47, %v424_v48  ;;  %v4649_v14 = vcombine.high %v431_v2, %v439_v3 }
 0x100   : > { %3353 = vmatmul.mubr.bf16.gmra.mrb[108].mxu1 %v4586_v11  ;;  %3199 = vmatprep.mubr.bf16.mxu0 %v4601_v12  ;;  %v4651_v18 = vcombine.high %v432_v5, %v440_v6 }
 0x101   : > { %v6441_v21 = vadd.f32 %v5083_v20, %v4971_v17  ;;  %3360 = vmatprep.mubr.bf16.mxu1 %v4603_v16 }
 0x102   : > { %v4972_v24 = vpop.f32.mrb[4].mxu0 }
 0x103   : > { %v5084_v27 = vpop.f32.mrb[4].mxu1  ;;  %v4973_v28 = vpop.f32.mrb[5].mxu0 }
 0x104   : > { %v4974_v30 = vadd.f32 %v4973_v28, %v4972_v24  ;;  %v5085_v31 = vpop.f32.mrb[5].mxu1  ;;  %v4975_v32 = vpop.f32.mrb[6].mxu0 }
 0x105   : > { %v5086_v35 = vadd.f32 %v5085_v31, %v5084_v27  ;;  %v5087_v36 = vpop.f32.mrb[6].mxu1  ;;  %v4976_v37 = vpop.f32.mrb[7].mxu0  ;;  %v201_v27 = vld [vmem:[%s6117_s29 + $0x60] sm:$0xff] }
 0x106   : > { %v4977_v39 = vadd.f32 %v4976_v37, %v4975_v32  ;;  %v5088_v40 = vpop.f32.mrb[7].mxu1  ;;  %v4650_v37 = vcombine.low %v432_v5, %v440_v6 }
 0x107   : > { %v6447_v41 = vadd.f32 %v5086_v35, %v4974_v30  ;;  %v5089_v42 = vadd.f32 %v5088_v40, %v5087_v36  ;;  %3200 = vmatmul.mubr.bf16.gmra.mrb[112].mxu0 %v4600_v29  ;;  %v194_v29 = vld [vmem:[%s6117_s29 + $0x28] sm:$0xff] }
 0x108   : > { %3361 = vmatmul.mubr.bf16.gmra.mrb[112].mxu1 %v4602_v33  ;;  %3207 = vmatprep.mubr.bf16.mxu0 %v4617_v34  ;;  %v202_v30 = vld [vmem:[%s6117_s29 + $0x68] sm:$0xff]  ;;  %v4648_v33 = vcombine.low %v431_v2, %v439_v3 }
 0x109   : > { %v6449_v43 = vadd.f32 %v5089_v42, %v4977_v39  ;;  %3368 = vmatprep.mubr.bf16.mxu1 %v4619_v38  ;;  %v4413_v38 = vcombine.high %v193_v26, %v201_v27  ;;  %v4415_v44 = vcombine.high %v194_v29, %v202_v30 }
 0x10a   : > { %v4978_v46 = vpop.f32.mrb[8].mxu0 }
 0x10b   : > { %v5090_v49 = vpop.f32.mrb[8].mxu1  ;;  %v4979_v50 = vpop.f32.mrb[9].mxu0 }
 0x10c   : > { %v4980_v52 = vadd.f32 %v4979_v50, %v4978_v46  ;;  %v5091_v53 = vpop.f32.mrb[9].mxu1  ;;  %v4981_v54 = vpop.f32.mrb[10].mxu0 }
 0x10d   : > { %v5092_v57 = vadd.f32 %v5091_v53, %v5090_v49  ;;  %v5093_v58 = vpop.f32.mrb[10].mxu1  ;;  %v4982_v59 = vpop.f32.mrb[11].mxu0 }
 0x10e   : > { %v4983_v61 = vadd.f32 %v4982_v59, %v4981_v54  ;;  %v5094_v62 = vpop.f32.mrb[11].mxu1 }
 0x10f   : > { %v6455_v63 = vadd.f32 %v5092_v57, %v4980_v52  ;;  %v5095_v0 = vadd.f32 %v5094_v62, %v5093_v58  ;;  %3208 = vmatmul.mubr.bf16.gmra.mrb[116].mxu0 %v4616_v51  ;;  %v6476_v51 = vld [vmem:[%s6117_s29 + $0xa0] sm:$0xff]  ;;  %v218_v57 = vld [vmem:[%s6117_s29 + $0xe8] sm:$0xff] }
 0x110   : > { %3369 = vmatmul.mubr.bf16.gmra.mrb[116].mxu1 %v4618_v55  ;;  %3215 = vmatprep.mubr.bf16.mxu0 %v4633_v56  ;;  %v6479_v52 = vld [vmem:[%s6117_s29 + $0xe0] sm:$0xff]  ;;  %v4412_v55 = vcombine.low %v193_v26, %v201_v27  ;;  %v210_v56 = vld [vmem:[%s6117_s29 + $0xa8] sm:$0xff]  ;;  %v5960_v26 = vld [vmem:[%s7044_s1 + $0x3d0] sm:$0xff]  }
 0x111   : > { %v6457_v1 = vadd.f32 %v5095_v0, %v4983_v61  ;;  %3376 = vmatprep.mubr.bf16.mxu1 %v4635_v60  ;;  %v4414_v61 = vcombine.low %v194_v29, %v202_v30  ;;  %v5951_v62 = vld [vmem:[%s7044_s1 + $0x300] sm:$0xff]   ;;  %v4429_v5 = vcombine.high %v6476_v51, %v6479_v52  ;;  %v4428_v29 = vcombine.low %v6476_v51, %v6479_v52 }
 0x112   : > { %v4984_v4 = vpop.f32.mrb[12].mxu0  ;;  %v6546_v51 = vld [vmem:[%s6117_s29 + $0x1a0] sm:$0xff] }
 0x113   : > { %v5096_v7 = vpop.f32.mrb[12].mxu1  ;;  %v4985_v8 = vpop.f32.mrb[13].mxu0 }
 0x114   : > { %v4986_v10 = vadd.f32 %v4985_v8, %v4984_v4  ;;  %v5097_v11 = vpop.f32.mrb[13].mxu1  ;;  %v4987_v12 = vpop.f32.mrb[14].mxu0  ;;  %v5953_v4 = vld [vmem:[%s7044_s1 + $0x380] sm:$0xff]   ;;  %v4431_v8 = vcombine.high %v210_v56, %v218_v57 }
 0x115   : > { %v5098_v15 = vadd.f32 %v5097_v11, %v5096_v7  ;;  %v5099_v16 = vpop.f32.mrb[14].mxu1  ;;  %v4988_v17 = vpop.f32.mrb[15].mxu0 }
 0x116   : > { %v4989_v20 = vadd.f32 %v4988_v17, %v4987_v12  ;;  %v5100_v22 = vpop.f32.mrb[15].mxu1  ;;  %v5956_v12 = vld [vmem:[%s7044_s1 + $0x3c8] sm:$0xff]  }
 0x117   : > { %v6463_v23 = vadd.f32 %v5098_v15, %v4986_v10  ;;  %v5101_v24 = vadd.f32 %v5100_v22, %v5099_v16  ;;  %3216 = vmatmul.mubr.bf16.gmra.mrb[120].mxu0 %v4632_v9  ;;  %v5954_v9 = vld [vmem:[%s7044_s1 + $0x348] sm:$0xff]   ;;  %v6508_v16 = vld [vmem:[%s6117_s29 + $0x160] sm:$0xff] }
 0x118   : > { %3377 = vmatmul.mubr.bf16.gmra.mrb[120].mxu1 %v4634_v13  ;;  %3223 = vmatprep.mubr.bf16.mxu0 %v4649_v14  ;;  %v6500_v13 = vld [vmem:[%s6117_s29 + $0x120] sm:$0xff]  ;;  %v5955_v14 = vld [vmem:[%s7044_s1 + $0x308] sm:$0xff]  }
 0x119   : > { %v6465_v25 = vadd.f32 %v5101_v24, %v4989_v20  ;;  %3384 = vmatprep.mubr.bf16.mxu1 %v4651_v18  ;;  %v5957_v17 = vld [vmem:[%s7044_s1 + $0x388] sm:$0xff]   ;;  %v5958_v18 = vld [vmem:[%s7044_s1 + $0x350] sm:$0xff]  }
 0x11a   : > { %v4990_v28 = vpop.f32.mrb[16].mxu0  ;;  %v6517_v22 = vld [vmem:[%s6117_s29 + $0x128] sm:$0xff] }
 0x11b   : > { %v5102_v31 = vpop.f32.mrb[16].mxu1  ;;  %v4991_v32 = vpop.f32.mrb[17].mxu0  ;;  %v6520_v24 = vld [vmem:[%s6117_s29 + $0x168] sm:$0xff] }
 0x11c   : > { %v4992_v34 = vadd.f32 %v4991_v32, %v4990_v28  ;;  %v5103_v35 = vpop.f32.mrb[17].mxu1  ;;  %v4993_v36 = vpop.f32.mrb[18].mxu0 }
 0x11d   : > { %v5104_v39 = vadd.f32 %v5103_v35, %v5102_v31  ;;  %v5105_v40 = vpop.f32.mrb[18].mxu1  ;;  %v4994_v42 = vpop.f32.mrb[19].mxu0 }
 0x11e   : > { %v4995_v45 = vadd.f32 %v4994_v42, %v4993_v36  ;;  %v5106_v46 = vpop.f32.mrb[19].mxu1 }
 0x11f   : > { %v6471_v47 = vadd.f32 %v5104_v39, %v4992_v34  ;;  %v5107_v48 = vadd.f32 %v5106_v46, %v5105_v40  ;;  %3224 = vmatmul.mubr.bf16.gmra.mrb[124].mxu0 %v4648_v33  ;;  %v4430_v33 = vcombine.low %v210_v56, %v218_v57  ;;  %v4445_v34 = vcombine.high %v6500_v13, %v6508_v16  ;;  %v5959_v39 = vld [vmem:[%s7044_s1 + $0x310] sm:$0xff]   ;;  %v6560_v57 = vld [vmem:[%s6117_s29 + $0x1e8] sm:$0xff] }
 0x120   : > { %3385 = vmatmul.mubr.bf16.gmra.mrb[124].mxu1 %v4650_v37  ;;  %3425 = vmatprep.mubr.bf16.mxu0 %v4413_v38  ;;  %v4447_v38 = vcombine.high %v6517_v22, %v6520_v24 }
 0x121   : > { %v6473_v49 = vadd.f32 %v5107_v48, %v4995_v45  ;;  %3586 = vmatprep.mubr.bf16.mxu1 %v4415_v44  ;;  %v5961_v44 = vld [vmem:[%s7044_s1 + $0x390] sm:$0xff]   ;;  %v5962_v45 = vld [vmem:[%s7044_s1 + $0x358] sm:$0xff]  }
 0x122   : > { %v4996_v50 = vpop.f32.mrb[20].mxu0 }
 0x123   : > { %v5108_v53 = vpop.f32.mrb[20].mxu1  ;;  %v4997_v54 = vpop.f32.mrb[21].mxu0 }
 0x124   : > { %v4998_v58 = vadd.f32 %v4997_v54, %v4996_v50  ;;  %v5109_v59 = vpop.f32.mrb[21].mxu1  ;;  %v4999_v60 = vpop.f32.mrb[22].mxu0  ;;  %v5964_v50 = vld [vmem:[%s7044_s1 + $0x3d8] sm:$0xff]   ;;  %v6554_v54 = vld [vmem:[%s6117_s29 + $0x1a8] sm:$0xff] }
 0x125   : > { %v5110_v0 = vadd.f32 %v5109_v59, %v5108_v53  ;;  %v5111_v2 = vpop.f32.mrb[22].mxu1  ;;  %v5000_v3 = vpop.f32.mrb[23].mxu0  ;;  %v6551_v53 = vld [vmem:[%s6117_s29 + $0x1e0] sm:$0xff] }
 0x126   : > { %v5001_v6 = vadd.f32 %v5000_v3, %v4999_v60  ;;  %v5112_v7 = vpop.f32.mrb[23].mxu1  ;;  %v5966_v59 = vld [vmem:[%s7044_s1 + $0x360] sm:$0xff]  }
 0x127   : > { %v6494_v10 = vadd.f32 %v5110_v0, %v4998_v58  ;;  %v5113_v11 = vadd.f32 %v5112_v7, %v5111_v2  ;;  %3426 = vmatmul.mubr.bf16.vlgmr.msra.gmra.mrb[128].mxu0 %v4412_v55  ;;  %v5963_v55 = vld [vmem:[%s7044_s1 + $0x318] sm:$0xff]   ;;  %v5968_v0 = vld [vmem:[%s7044_s1 + $0x3e0] sm:$0xff]  }
 0x128   : > { %3587 = vmatmul.mubr.bf16.vlgmr.msra.gmra.mrb[128].mxu1 %v4414_v61  ;;  %5623 = vmatpush3.bf16.msra.mxu0 %v5951_v62  ;;  %v5965_v58 = vld [vmem:[%s7044_s1 + $0x398] sm:$0xff]   ;;  %v4444_v62 = vcombine.low %v6500_v13, %v6508_v16  ;;  %v5969_v16 = vld [vmem:[%s7044_s1 + $0x3a0] sm:$0xff]  }
 0x129   : > { %v6505_v15 = vadd.f32 %v5113_v11, %v5001_v6  ;;  %5735 = vmatpush3.bf16.msra.mxu1 %v5953_v4  ;;  %3433 = vmatprep.mubr.bf16.mxu0 %v4429_v5  ;;  %v4446_v5 = vcombine.low %v6517_v22, %v6520_v24  ;;  %v4461_v6 = vcombine.high %v6546_v51, %v6551_v53  ;;  %v5972_v22 = vld [vmem:[%s7044_s1 + $0x3e8] sm:$0xff]   ;;  %v6594_v24 = vld [vmem:[%s6117_s29 + $0x220] sm:$0xff] }
 0x12a   : > { %v5002_v20 = vpop.f32.mrb[24].mxu0  ;;  %3594 = vmatprep.mubr.bf16.mxu1 %v4431_v8  ;;  %5624 = vmatprep.subr.bf16.mxu0 %v5954_v9  ;;  %v4463_v11 = vcombine.high %v6554_v54, %v6560_v57 }
 0x12b   : > { %v5114_v27 = vpop.f32.mrb[24].mxu1  ;;  %v5003_v28 = vpop.f32.mrb[25].mxu0  ;;  %5736 = vmatprep.subr.bf16.mxu1 %v5956_v12  ;;  %v5967_v12 = vld [vmem:[%s7044_s1 + $0x320] sm:$0xff]  }
 0x12c   : > { %v5004_v30 = vadd.f32 %v5003_v28, %v5002_v20  ;;  %v5115_v31 = vpop.f32.mrb[25].mxu1  ;;  %v5005_v32 = vpop.f32.mrb[26].mxu0  ;;  %5625 = vmatpush3.bf16.msra.mxu0 %v5955_v14  ;;  %v6602_v28 = vld [vmem:[%s6117_s29 + $0x228] sm:$0xff] }
 0x12d   : > { %v5116_v35 = vadd.f32 %v5115_v31, %v5114_v27  ;;  %v5117_v36 = vpop.f32.mrb[26].mxu1  ;;  %v5006_v37 = vpop.f32.mrb[27].mxu0  ;;  %5737 = vmatpush3.bf16.msra.mxu1 %v5957_v17  ;;  %5626 = vmatprep.subr.bf16.mxu0 %v5958_v18  ;;  %v5970_v17 = vld [vmem:[%s7044_s1 + $0x368] sm:$0xff]   ;;  %v6599_v27 = vld [vmem:[%s6117_s29 + $0x260] sm:$0xff] }
 0x12e   : > { %v5007_v40 = vadd.f32 %v5006_v37, %v5005_v32  ;;  %v5118_v42 = vpop.f32.mrb[27].mxu1  ;;  %5738 = vmatprep.subr.bf16.mxu1 %v5960_v26  ;;  %v6608_v31 = vld [vmem:[%s6117_s29 + $0x268] sm:$0xff]  ;;  %v5976_v37 = vld [vmem:[%s7044_s1 + $0x3f0] sm:$0xff]  }
 0x12f   : > { %v6540_v46 = vadd.f32 %v5116_v35, %v5004_v30  ;;  %v5119_v48 = vadd.f32 %v5118_v42, %v5117_v36  ;;  %3434 = vmatmul.mubr.bf16.gmra.mrb[132].mxu0 %v4428_v29  ;;  %v5971_v29 = vld [vmem:[%s7044_s1 + $0x328] sm:$0xff]   ;;  %v4460_v36 = vcombine.low %v6546_v51, %v6551_v53  ;;  %v4462_v42 = vcombine.low %v6554_v54, %v6560_v57  ;;  %v5975_v53 = vld [vmem:[%s7044_s1 + $0x330] sm:$0xff]   ;;  %v5978_v57 = vld [vmem:[%s7044_s1 + $0x378] sm:$0xff]  }
 0x130   : > { %3595 = vmatmul.mubr.bf16.gmra.mrb[132].mxu1 %v4430_v33  ;;  %3441 = vmatprep.mubr.bf16.mxu0 %v4445_v34  ;;  %v5973_v32 = vld [vmem:[%s7044_s1 + $0x3a8] sm:$0xff]   ;;  %v5974_v33 = vld [vmem:[%s7044_s1 + $0x370] sm:$0xff]   ;;  %v4479_v51 = vcombine.high %v6602_v28, %v6608_v31 }
 0x131   : > { %v6548_v52 = vadd.f32 %v5119_v48, %v5007_v40  ;;  %3602 = vmatprep.mubr.bf16.mxu1 %v4447_v38  ;;  %5627 = vmatpush3.bf16.msra.mxu0 %v5959_v39  ;;  %v5977_v54 = vld [vmem:[%s7044_s1 + $0x3b0] sm:$0xff]  }
 0x132   : > { %v5008_v56 = vpop.f32.mrb[28].mxu0  ;;  %5739 = vmatpush3.bf16.msra.mxu1 %v5961_v44  ;;  %5628 = vmatprep.subr.bf16.mxu0 %v5962_v45  ;;  %v4477_v44 = vcombine.high %v6594_v24, %v6599_v27 }
 0x133   : > { %v5120_v60 = vpop.f32.mrb[28].mxu1  ;;  %v5009_v61 = vpop.f32.mrb[29].mxu0  ;;  %5740 = vmatprep.subr.bf16.mxu1 %v5964_v50 }
 0x134   : > { %v5010_v2 = vadd.f32 %v5009_v61, %v5008_v56  ;;  %v5121_v3 = vpop.f32.mrb[29].mxu1  ;;  %v5011_v4 = vpop.f32.mrb[30].mxu0 }
 0x135   : > { %v5122_v7 = vadd.f32 %v5121_v3, %v5120_v60  ;;  %v5123_v8 = vpop.f32.mrb[30].mxu1  ;;  %v5012_v9 = vpop.f32.mrb[31].mxu0  ;;  %5629 = vmatpush3.bf16.msra.mxu0 %v5963_v55  ;;  %v5980_v60 = vld [vmem:[%s7044_s1 + $0x3f8] sm:$0xff]  }
 0x136   : > { %v5013_v13 = vadd.f32 %v5012_v9, %v5011_v4  ;;  %v5124_v14 = vpop.f32.mrb[31].mxu1  ;;  %5741 = vmatpush3.bf16.msra.mxu1 %v5965_v58  ;;  %5630 = vmatprep.subr.bf16.mxu0 %v5966_v59  ;;  %v274_v4 = vld [vmem:[%s6117_s29 + $0x2a8] sm:$0xff]  ;;  %v4476_v9 = vcombine.low %v6594_v24, %v6599_v27 }
 0x137   : > { %v6588_v18 = vadd.f32 %v5122_v7, %v5010_v2  ;;  %v5125_v20 = vadd.f32 %v5124_v14, %v5123_v8  ;;  %3442 = vmatmul.mubr.bf16.gmra.mrb[136].mxu0 %v4444_v62  ;;  %5742 = vmatprep.subr.bf16.mxu1 %v5968_v0  ;;  %v273_v62 = vld [vmem:[%s6117_s29 + $0x2a0] sm:$0xff]  ;;  %v5979_v2 = vld [vmem:[%s7044_s1 + $0x338] sm:$0xff]   ;;  %v4478_v14 = vcombine.low %v6602_v28, %v6608_v31 }
 0x138   : > { %3603 = vmatmul.mubr.bf16.gmra.mrb[136].mxu1 %v4446_v5  ;;  %3449 = vmatprep.mubr.bf16.mxu0 %v4461_v6  ;;  %v281_v0 = vld [vmem:[%s6117_s29 + $0x2e0] sm:$0xff]  ;;  %v282_v5 = vld [vmem:[%s6117_s29 + $0x2e8] sm:$0xff]  ;;  %v5981_v6 = vld [vmem:[%s7044_s1 + $0x3b8] sm:$0xff]  }
 0x139   : > { %v6596_v26 = vadd.f32 %v5125_v20, %v5013_v13  ;;  %3610 = vmatprep.mubr.bf16.mxu1 %v4463_v11  ;;  %5631 = vmatpush3.bf16.msra.mxu0 %v5967_v12  ;;  %v289_v31 = vld [vmem:[%s6117_s29 + $0x320] sm:$0xff] }
 0x13a   : > { %v5014_v30 = vpop.f32.mrb[32].mxu0  ;;  %5743 = vmatpush3.bf16.msra.mxu1 %v5969_v16  ;;  %5632 = vmatprep.subr.bf16.mxu0 %v5970_v17  ;;  %v4493_v16 = vcombine.high %v273_v62, %v281_v0 }
 0x13b   : > { %v5126_v34 = vpop.f32.mrb[32].mxu1  ;;  %v5015_v35 = vpop.f32.mrb[33].mxu0  ;;  %5744 = vmatprep.subr.bf16.mxu1 %v5972_v22 }
 0x13c   : > { %v5016_v38 = vadd.f32 %v5015_v35, %v5014_v30  ;;  %v5127_v39 = vpop.f32.mrb[33].mxu1  ;;  %v5017_v40 = vpop.f32.mrb[34].mxu0  ;;  %v290_v35 = vld [vmem:[%s6117_s29 + $0x328] sm:$0xff] }
 0x13d   : > { %v5128_v45 = vadd.f32 %v5127_v39, %v5126_v34  ;;  %v5129_v48 = vpop.f32.mrb[34].mxu1  ;;  %v5018_v50 = vpop.f32.mrb[35].mxu0  ;;  %5633 = vmatpush3.bf16.msra.mxu0 %v5971_v29  ;;  %v4495_v29 = vcombine.high %v274_v4, %v282_v5  ;;  %v4492_v39 = vcombine.low %v273_v62, %v281_v0  ;;  %v305_v62 = vld [vmem:[%s6117_s29 + $0x3a0] sm:$0xff] }
 0x13e   : > { %v5019_v55 = vadd.f32 %v5018_v50, %v5017_v40  ;;  %v5130_v56 = vpop.f32.mrb[35].mxu1  ;;  %5745 = vmatpush3.bf16.msra.mxu1 %v5973_v32  ;;  %5634 = vmatprep.subr.bf16.mxu0 %v5974_v33  ;;  %v297_v33 = vld [vmem:[%s6117_s29 + $0x360] sm:$0xff] }
 0x13f   : > { %v6636_v58 = vadd.f32 %v5128_v45, %v5016_v38  ;;  %v5131_v59 = vadd.f32 %v5130_v56, %v5129_v48  ;;  %3450 = vmatmul.mubr.bf16.gmra.mrb[140].mxu0 %v4460_v36  ;;  %5746 = vmatprep.subr.bf16.mxu1 %v5976_v37  ;;  %v298_v36 = vld [vmem:[%s6117_s29 + $0x368] sm:$0xff]  ;;  %v4494_v45 = vcombine.low %v274_v4, %v282_v5  ;;  %v313_v0 = vld [vmem:[%s6117_s29 + $0x3e0] sm:$0xff] }
 0x140   : > { %3611 = vmatmul.mubr.bf16.gmra.mrb[140].mxu1 %v4462_v42  ;;  %3457 = vmatprep.mubr.bf16.mxu0 %v4477_v44  ;;  %v4509_v48 = vcombine.high %v289_v31, %v297_v33  ;;  %v314_v4 = vld [vmem:[%s6117_s29 + $0x3e8] sm:$0xff] }
 0x141   : > { %v6641_v61 = vadd.f32 %v5131_v59, %v5019_v55  ;;  %3618 = vmatprep.mubr.bf16.mxu1 %v4479_v51  ;;  %5635 = vmatpush3.bf16.msra.mxu0 %v5975_v53  ;;  %v4511_v55 = vcombine.high %v290_v35, %v298_v36 }
 0x142   : > { %v5020_v3 = vpop.f32.mrb[36].mxu0  ;;  %5747 = vmatpush3.bf16.msra.mxu1 %v5977_v54  ;;  %5636 = vmatprep.subr.bf16.mxu0 %v5978_v57 }
 0x143   : > { %v5132_v7 = vpop.f32.mrb[36].mxu1  ;;  %v5021_v8 = vpop.f32.mrb[37].mxu0  ;;  %5748 = vmatprep.subr.bf16.mxu1 %v5980_v60 }
 0x144   : > { %v5022_v11 = vadd.f32 %v5021_v8, %v5020_v3  ;;  %v5133_v12 = vpop.f32.mrb[37].mxu1  ;;  %v5023_v13 = vpop.f32.mrb[38].mxu0  ;;  %v306_v3 = vld [vmem:[%s6117_s29 + $0x3a8] sm:$0xff] }
 0x145   : > { %v5134_v17 = vadd.f32 %v5133_v12, %v5132_v7  ;;  %v5135_v20 = vpop.f32.mrb[38].mxu1  ;;  %v5024_v22 = vpop.f32.mrb[39].mxu0  ;;  %5637 = vmatpush3.bf16.msra.mxu0 %v5979_v2  ;;  %v4508_v7 = vcombine.low %v289_v31, %v297_v33  ;;  %v4510_v12 = vcombine.low %v290_v35, %v298_v36  ;;  %v321_v31 = vld [vmem:[%s6117_s29 + $0x420] sm:$0xff]  ;;  %v322_v35 = vld [vmem:[%s6117_s29 + $0x428] sm:$0xff] }
 0x146   : > { %v5025_v30 = vadd.f32 %v5024_v22, %v5023_v13  ;;  %v5136_v32 = vpop.f32.mrb[39].mxu1  ;;  %5749 = vmatpush3.bf16.msra.mxu1 %v5981_v6  ;;  %v4525_v13 = vcombine.high %v305_v62, %v313_v0  ;;  %v329_v33 = vld [vmem:[%s6117_s29 + $0x460] sm:$0xff]  ;;  %v330_v36 = vld [vmem:[%s6117_s29 + $0x468] sm:$0xff] }
 0x147   : > { %v6657_v24 = vadd.f32 %v5134_v17, %v5022_v11  ;;  %v5137_v27 = vadd.f32 %v5136_v32, %v5135_v20  ;;  %3458 = vmatmul.mubr.bf16.gmra.mrb[144].mxu0 %v4476_v9  ;;  %v4527_v20 = vcombine.high %v306_v3, %v314_v4 }
 0x148   : > { %3619 = vmatmul.mubr.bf16.gmra.mrb[144].mxu1 %v4478_v14  ;;  %3465 = vmatprep.mubr.bf16.mxu0 %v4493_v16 }
 0x149   : > { %v6659_v28 = vadd.f32 %v5137_v27, %v5025_v30  ;;  %3626 = vmatprep.mubr.bf16.mxu1 %v4495_v29 }
 0x14a   : > { %v5026_v34 = vpop.f32.mrb[40].mxu0 }
 0x14b   : > { %v5138_v37 = vpop.f32.mrb[40].mxu1  ;;  %v5027_v38 = vpop.f32.mrb[41].mxu0 }
 0x14c   : > { %v5028_v40 = vadd.f32 %v5027_v38, %v5026_v34  ;;  %v5139_v42 = vpop.f32.mrb[41].mxu1  ;;  %v5029_v44 = vpop.f32.mrb[42].mxu0 }
 0x14d   : > { %v5140_v50 = vadd.f32 %v5139_v42, %v5138_v37  ;;  %v5141_v51 = vpop.f32.mrb[42].mxu1  ;;  %v5030_v53 = vpop.f32.mrb[43].mxu0 }
 0x14e   : > { %v5031_v56 = vadd.f32 %v5030_v53, %v5029_v44  ;;  %v5142_v54 = vpop.f32.mrb[43].mxu1 }
 0x14f   : > { %v6665_v57 = vadd.f32 %v5140_v50, %v5028_v40  ;;  %v5143_v59 = vadd.f32 %v5142_v54, %v5141_v51  ;;  %3466 = vmatmul.mubr.bf16.gmra.mrb[148].mxu0 %v4492_v39  ;;  %v4524_v39 = vcombine.low %v305_v62, %v313_v0  ;;  %v337_v0 = vld [vmem:[%s6117_s29 + $0x4a0] sm:$0xff] }
 0x150   : > { %3627 = vmatmul.mubr.bf16.gmra.mrb[148].mxu1 %v4494_v45  ;;  %3473 = vmatprep.mubr.bf16.mxu0 %v4509_v48  ;;  %v4526_v45 = vcombine.low %v306_v3, %v314_v4  ;;  %v4541_v48 = vcombine.high %v321_v31, %v329_v33  ;;  %v345_v3 = vld [vmem:[%s6117_s29 + $0x4e0] sm:$0xff] }
 0x151   : > { %v6667_v60 = vadd.f32 %v5143_v59, %v5031_v56  ;;  %3634 = vmatprep.mubr.bf16.mxu1 %v4511_v55  ;;  %v4543_v55 = vcombine.high %v322_v35, %v330_v36 }
 0x152   : > { %v5032_v2 = vpop.f32.mrb[44].mxu0 }
 0x153   : > { %v5144_v5 = vpop.f32.mrb[44].mxu1  ;;  %v5033_v6 = vpop.f32.mrb[45].mxu0 }
 0x154   : > { %v5034_v8 = vadd.f32 %v5033_v6, %v5032_v2  ;;  %v5145_v9 = vpop.f32.mrb[45].mxu1  ;;  %v5035_v11 = vpop.f32.mrb[46].mxu0  ;;  %v346_v6 = vld [vmem:[%s6117_s29 + $0x4e8] sm:$0xff] }
 0x155   : > { %v5146_v14 = vadd.f32 %v5145_v9, %v5144_v5  ;;  %v5147_v16 = vpop.f32.mrb[46].mxu1  ;;  %v5036_v17 = vpop.f32.mrb[47].mxu0  ;;  %v338_v5 = vld [vmem:[%s6117_s29 + $0x4a8] sm:$0xff]  ;;  %v4540_v9 = vcombine.low %v321_v31, %v329_v33  ;;  %v353_v33 = vld [vmem:[%s6117_s29 + $0x520] sm:$0xff] }
 0x156   : > { %v5037_v22 = vadd.f32 %v5036_v17, %v5035_v11  ;;  %v5148_v29 = vpop.f32.mrb[47].mxu1 }
 0x157   : > { %v6673_v30 = vadd.f32 %v5146_v14, %v5034_v8  ;;  %v5149_v32 = vadd.f32 %v5148_v29, %v5147_v16  ;;  %3474 = vmatmul.mubr.bf16.gmra.mrb[152].mxu0 %v4508_v7  ;;  %v4542_v14 = vcombine.low %v322_v35, %v330_v36  ;;  %v4557_v16 = vcombine.high %v337_v0, %v345_v3  ;;  %v361_v35 = vld [vmem:[%s6117_s29 + $0x560] sm:$0xff] }
 0x158   : > { %3635 = vmatmul.mubr.bf16.gmra.mrb[152].mxu1 %v4510_v12  ;;  %3481 = vmatprep.mubr.bf16.mxu0 %v4525_v13  ;;  %v4559_v29 = vcombine.high %v338_v5, %v346_v6 }
 0x159   : > { %v6675_v27 = vadd.f32 %v5149_v32, %v5037_v22  ;;  %3642 = vmatprep.mubr.bf16.mxu1 %v4527_v20 }
 0x15a   : > { %v5038_v34 = vpop.f32.mrb[48].mxu0 }
 0x15b   : > { %v5150_v37 = vpop.f32.mrb[48].mxu1  ;;  %v5039_v38 = vpop.f32.mrb[49].mxu0 }
 0x15c   : > { %v5040_v40 = vadd.f32 %v5039_v38, %v5038_v34  ;;  %v5151_v42 = vpop.f32.mrb[49].mxu1  ;;  %v5041_v44 = vpop.f32.mrb[50].mxu0 }
 0x15d   : > { %v5152_v50 = vadd.f32 %v5151_v42, %v5150_v37  ;;  %v5153_v51 = vpop.f32.mrb[50].mxu1  ;;  %v5042_v53 = vpop.f32.mrb[51].mxu0 }
 0x15e   : > { %v5043_v56 = vadd.f32 %v5042_v53, %v5041_v44  ;;  %v5154_v54 = vpop.f32.mrb[51].mxu1  ;;  %v4558_v53 = vcombine.low %v338_v5, %v346_v6  ;;  %v377_v5 = vld [vmem:[%s6117_s29 + $0x5e0] sm:$0xff] }
 0x15f   : > { %v6681_v59 = vadd.f32 %v5152_v50, %v5040_v40  ;;  %v5155_v2 = vadd.f32 %v5154_v54, %v5153_v51  ;;  %3482 = vmatmul.mubr.bf16.gmra.mrb[156].mxu0 %v4524_v39  ;;  %v354_v39 = vld [vmem:[%s6117_s29 + $0x528] sm:$0xff] }
 0x160   : > { %3643 = vmatmul.mubr.bf16.gmra.mrb[156].mxu1 %v4526_v45  ;;  %3489 = vmatprep.mubr.bf16.mxu0 %v4541_v48  ;;  %v362_v40 = vld [vmem:[%s6117_s29 + $0x568] sm:$0xff]  ;;  %v4556_v45 = vcombine.low %v337_v0, %v345_v3  ;;  %v369_v3 = vld [vmem:[%s6117_s29 + $0x5a0] sm:$0xff] }
 0x161   : > { %v6683_v62 = vadd.f32 %v5155_v2, %v5043_v56  ;;  %3650 = vmatprep.mubr.bf16.mxu1 %v4543_v55  ;;  %v4573_v55 = vcombine.high %v353_v33, %v361_v35 }
 0x162   : > { %v5044_v4 = vpop.f32.mrb[52].mxu0 }
 0x163   : > { %v5156_v7 = vpop.f32.mrb[52].mxu1  ;;  %v5045_v8 = vpop.f32.mrb[53].mxu0 }
 0x164   : > { %v5046_v11 = vadd.f32 %v5045_v8, %v5044_v4  ;;  %v5157_v12 = vpop.f32.mrb[53].mxu1  ;;  %v5047_v13 = vpop.f32.mrb[54].mxu0  ;;  %v4575_v4 = vcombine.high %v354_v39, %v362_v40 }
 0x165   : > { %v5158_v17 = vadd.f32 %v5157_v12, %v5156_v7  ;;  %v5159_v20 = vpop.f32.mrb[54].mxu1  ;;  %v5048_v22 = vpop.f32.mrb[55].mxu0  ;;  %v370_v12 = vld [vmem:[%s6117_s29 + $0x5a8] sm:$0xff] }
 0x166   : > { %v5049_v32 = vadd.f32 %v5048_v22, %v5047_v13  ;;  %v5160_v34 = vpop.f32.mrb[55].mxu1  ;;  %v378_v13 = vld [vmem:[%s6117_s29 + $0x5e8] sm:$0xff] }
 0x167   : > { %v6689_v37 = vadd.f32 %v5158_v17, %v5046_v11  ;;  %v5161_v38 = vadd.f32 %v5160_v34, %v5159_v20  ;;  %3490 = vmatmul.mubr.bf16.gmra.mrb[160].mxu0 %v4540_v9  ;;  %v4572_v17 = vcombine.low %v353_v33, %v361_v35  ;;  %v4589_v34 = vcombine.high %v369_v3, %v377_v5  ;;  %v385_v35 = vld [vmem:[%s6117_s29 + $0x620] sm:$0xff] }
 0x168   : > { %3651 = vmatmul.mubr.bf16.gmra.mrb[160].mxu1 %v4542_v14  ;;  %3497 = vmatprep.mubr.bf16.mxu0 %v4557_v16 }
 0x169   : > { %v6691_v31 = vadd.f32 %v5161_v38, %v5049_v32  ;;  %3658 = vmatprep.mubr.bf16.mxu1 %v4559_v29  ;;  %v4574_v32 = vcombine.low %v354_v39, %v362_v40  ;;  %v393_v39 = vld [vmem:[%s6117_s29 + $0x660] sm:$0xff] }
 0x16a   : > { %v5050_v36 = vpop.f32.mrb[56].mxu0 }
 0x16b   : > { %v5162_v42 = vpop.f32.mrb[56].mxu1  ;;  %v5051_v44 = vpop.f32.mrb[57].mxu0 }
 0x16c   : > { %v5052_v48 = vadd.f32 %v5051_v44, %v5050_v36  ;;  %v5163_v50 = vpop.f32.mrb[57].mxu1  ;;  %v5053_v51 = vpop.f32.mrb[58].mxu0  ;;  %v4591_v44 = vcombine.high %v370_v12, %v378_v13 }
 0x16d   : > { %v5164_v56 = vadd.f32 %v5163_v50, %v5162_v42  ;;  %v5165_v54 = vpop.f32.mrb[58].mxu1  ;;  %v5054_v2 = vpop.f32.mrb[59].mxu0 }
 0x16e   : > { %v5055_v7 = vadd.f32 %v5054_v2, %v5053_v51  ;;  %v5166_v8 = vpop.f32.mrb[59].mxu1  ;;  %v4588_v2 = vcombine.low %v369_v3, %v377_v5 }
 0x16f   : > { %v6697_v9 = vadd.f32 %v5164_v56, %v5052_v48  ;;  %v5167_v11 = vadd.f32 %v5166_v8, %v5165_v54  ;;  %3498 = vmatmul.mubr.bf16.gmra.mrb[164].mxu0 %v4556_v45 }
 0x170   : > { %3659 = vmatmul.mubr.bf16.gmra.mrb[164].mxu1 %v4558_v53  ;;  %3505 = vmatprep.mubr.bf16.mxu0 %v4573_v55  ;;  %v386_v53 = vld [vmem:[%s6117_s29 + $0x628] sm:$0xff] }
 0x171   : > { %v6699_v0 = vadd.f32 %v5167_v11, %v5055_v7  ;;  %3666 = vmatprep.mubr.bf16.mxu1 %v4575_v4  ;;  %v394_v55 = vld [vmem:[%s6117_s29 + $0x668] sm:$0xff]  ;;  %v4590_v11 = vcombine.low %v370_v12, %v378_v13  ;;  %v401_v12 = vld [vmem:[%s6117_s29 + $0x6a0] sm:$0xff] }
 0x172   : > { %v5056_v6 = vpop.f32.mrb[60].mxu0  ;;  %v409_v13 = vld [vmem:[%s6117_s29 + $0x6e0] sm:$0xff] }
 0x173   : > { %v5168_v14 = vpop.f32.mrb[60].mxu1  ;;  %v5057_v16 = vpop.f32.mrb[61].mxu0 }
 0x174   : > { %v5058_v20 = vadd.f32 %v5057_v16, %v5056_v6  ;;  %v5169_v22 = vpop.f32.mrb[61].mxu1  ;;  %v5059_v29 = vpop.f32.mrb[62].mxu0  ;;  %v4605_v6 = vcombine.high %v385_v35, %v393_v39 }
 0x175   : > { %v5170_v38 = vadd.f32 %v5169_v22, %v5168_v14  ;;  %v5171_v36 = vpop.f32.mrb[62].mxu1  ;;  %v5060_v42 = vpop.f32.mrb[63].mxu0 }
 0x176   : > { %v5061_v45 = vadd.f32 %v5060_v42, %v5059_v29  ;;  %v5172_v48 = vpop.f32.mrb[63].mxu1  ;;  %v402_v42 = vld [vmem:[%s6117_s29 + $0x6a8] sm:$0xff] }
 0x177   : > { %v6705_v50 = vadd.f32 %v5170_v38, %v5058_v20  ;;  %v5173_v51 = vadd.f32 %v5172_v48, %v5171_v36  ;;  %3506 = vmatmul.mubr.bf16.gmra.mrb[168].mxu0 %v4572_v17  ;;  %v4607_v20 = vcombine.high %v386_v53, %v394_v55  ;;  %v4604_v48 = vcombine.low %v385_v35, %v393_v39 }
 0x178   : > { %3667 = vmatmul.mubr.bf16.gmra.mrb[168].mxu1 %v4574_v32  ;;  %3513 = vmatprep.mubr.bf16.mxu0 %v4589_v34 }
 0x179   : > { %v6707_v33 = vadd.f32 %v5173_v51, %v5061_v45  ;;  %3674 = vmatprep.mubr.bf16.mxu1 %v4591_v44  ;;  %v410_v44 = vld [vmem:[%s6117_s29 + $0x6e8] sm:$0xff] }
 0x17a   : > { %v5190_v40 = vpop.f32.mrb[64].mxu0 }
 0x17b   : > { %v5302_v56 = vpop.f32.mrb[64].mxu1  ;;  %v5191_v54 = vpop.f32.mrb[65].mxu0 }
 0x17c   : > { %v5192_v4 = vadd.f32 %v5191_v54, %v5190_v40  ;;  %v5303_v7 = vpop.f32.mrb[65].mxu1  ;;  %v5193_v8 = vpop.f32.mrb[66].mxu0  ;;  %v4606_v54 = vcombine.low %v386_v53, %v394_v55  ;;  %v417_v53 = vld [vmem:[%s6117_s29 + $0x720] sm:$0xff] }
 0x17d   : > { %v5304_v14 = vadd.f32 %v5303_v7, %v5302_v56  ;;  %v5305_v16 = vpop.f32.mrb[66].mxu1  ;;  %v5194_v17 = vpop.f32.mrb[67].mxu0  ;;  %v425_v55 = vld [vmem:[%s6117_s29 + $0x760] sm:$0xff] }
 0x17e   : > { %v3106_v22 = vadd.f32 %v5192_v4, %v6439_v19  ;;  %v5195_v29 = vadd.f32 %v5194_v17, %v5193_v8  ;;  %v5306_v32 = vpop.f32.mrb[67].mxu1  ;;  %v4623_v8 = vcombine.high %v402_v42, %v410_v44 }
 0x17f   : > { %v5307_v34 = vadd.f32 %v5306_v32, %v5305_v16  ;;  %3514 = vmatmul.mubr.bf16.gmra.mrb[172].mxu0 %v4588_v2  ;;  %v4621_v2 = vcombine.high %v401_v12, %v409_v13 }
 0x180   : > { %v6714_v3 = vadd.f32 %v5304_v14, %v3106_v22  ;;  %v3109_v5 = vadd.f32 %v5195_v29, %v6441_v21  ;;  %3675 = vmatmul.mubr.bf16.gmra.mrb[172].mxu1 %v4590_v11  ;;  %3521 = vmatprep.mubr.bf16.mxu0 %v4605_v6  ;;  %v418_v22 = vld [vmem:[%s6117_s29 + $0x728] sm:$0xff] }
 0x181   : > { %3682 = vmatprep.mubr.bf16.mxu1 %v4607_v20  ;;  %v426_v29 = vld [vmem:[%s6117_s29 + $0x768] sm:$0xff] }
 0x182   : > { %v6719_v38 = vadd.f32 %v5307_v34, %v3109_v5  ;;  %v5196_v36 = vpop.f32.mrb[68].mxu0  ;;  %v4620_v34 = vcombine.low %v401_v12, %v409_v13 }
 0x183   : > { %v5308_v45 = vpop.f32.mrb[68].mxu1  ;;  %v5197_v19 = vpop.f32.mrb[69].mxu0 }
 0x184   : > { %v5198_v51 = vadd.f32 %v5197_v19, %v5196_v36  ;;  %v5309_v40 = vpop.f32.mrb[69].mxu1  ;;  %v5199_v56 = vpop.f32.mrb[70].mxu0  ;;  %v4622_v19 = vcombine.low %v402_v42, %v410_v44  ;;  %v433_v42 = vld [vmem:[%s6117_s29 + $0x7a0] sm:$0xff] }
 0x185   : > { %v5310_v21 = vadd.f32 %v5309_v40, %v5308_v45  ;;  %v5311_v4 = vpop.f32.mrb[70].mxu1  ;;  %v5200_v7 = vpop.f32.mrb[71].mxu0  ;;  %v441_v44 = vld [vmem:[%s6117_s29 + $0x7e0] sm:$0xff] }
 0x186   : > { %v3114_v11 = vadd.f32 %v5198_v51, %v6447_v41  ;;  %v5201_v6 = vadd.f32 %v5200_v7, %v5199_v56  ;;  %v5312_v14 = vpop.f32.mrb[71].mxu1  ;;  %v4639_v56 = vcombine.high %v418_v22, %v426_v29 }
 0x187   : > { %v5313_v16 = vadd.f32 %v5312_v14, %v5311_v4  ;;  %3522 = vmatmul.mubr.bf16.gmra.mrb[176].mxu0 %v4604_v48  ;;  %v4637_v48 = vcombine.high %v417_v53, %v425_v55 }
 0x188   : > { %v6724_v35 = vadd.f32 %v5310_v21, %v3114_v11  ;;  %v3117_v39 = vadd.f32 %v5201_v6, %v6449_v43  ;;  %3683 = vmatmul.mubr.bf16.gmra.mrb[176].mxu1 %v4606_v54  ;;  %3529 = vmatprep.mubr.bf16.mxu0 %v4621_v2  ;;  %v434_v11 = vld [vmem:[%s6117_s29 + $0x7a8] sm:$0xff] }
 0x189   : > { %3690 = vmatprep.mubr.bf16.mxu1 %v4623_v8  ;;  %v442_v6 = vld [vmem:[%s6117_s29 + $0x7e8] sm:$0xff] }
 0x18a   : > { %v6729_v17 = vadd.f32 %v5313_v16, %v3117_v39  ;;  %v5202_v20 = vpop.f32.mrb[72].mxu0  ;;  %v4636_v16 = vcombine.low %v417_v53, %v425_v55 }
 0x18b   : > { %v5314_v32 = vpop.f32.mrb[72].mxu1  ;;  %v5203_v41 = vpop.f32.mrb[73].mxu0 }
 0x18c   : > { %v5204_v5 = vadd.f32 %v5203_v41, %v5202_v20  ;;  %v5315_v36 = vpop.f32.mrb[73].mxu1  ;;  %v5205_v45 = vpop.f32.mrb[74].mxu0  ;;  %v4638_v41 = vcombine.low %v418_v22, %v426_v29  ;;  %v195_v22 = vld [vmem:[%s6117_s29 + $0x30] sm:$0xff] }
 0x18d   : > { %v5316_v43 = vadd.f32 %v5315_v36, %v5314_v32  ;;  %v5317_v51 = vpop.f32.mrb[74].mxu1  ;;  %v5206_v40 = vpop.f32.mrb[75].mxu0  ;;  %v203_v29 = vld [vmem:[%s6117_s29 + $0x70] sm:$0xff] }
 0x18e   : > { %v3122_v54 = vadd.f32 %v5204_v5, %v6455_v63  ;;  %v5207_v2 = vadd.f32 %v5206_v40, %v5205_v45  ;;  %v5318_v21 = vpop.f32.mrb[75].mxu1  ;;  %v4655_v45 = vcombine.high %v434_v11, %v442_v6 }
 0x18f   : > { %v5319_v4 = vadd.f32 %v5318_v21, %v5317_v51  ;;  %3530 = vmatmul.mubr.bf16.gmra.mrb[180].mxu0 %v4620_v34  ;;  %v4653_v34 = vcombine.high %v433_v42, %v441_v44 }
 0x190   : > { %v6734_v12 = vadd.f32 %v5316_v43, %v3122_v54  ;;  %v3125_v13 = vadd.f32 %v5207_v2, %v6457_v1  ;;  %3691 = vmatmul.mubr.bf16.gmra.mrb[180].mxu1 %v4622_v19  ;;  %3537 = vmatprep.mubr.bf16.mxu0 %v4637_v48  ;;  %v196_v54 = vld [vmem:[%s6117_s29 + $0x38] sm:$0xff] }
 0x191   : > { %3698 = vmatprep.mubr.bf16.mxu1 %v4639_v56  ;;  %v204_v2 = vld [vmem:[%s6117_s29 + $0x78] sm:$0xff] }
 0x192   : > { %v6739_v7 = vadd.f32 %v5319_v4, %v3125_v13  ;;  %v5208_v8 = vpop.f32.mrb[76].mxu0  ;;  %v4652_v4 = vcombine.low %v433_v42, %v441_v44 }
 0x193   : > { %v5320_v14 = vpop.f32.mrb[76].mxu1  ;;  %v5209_v63 = vpop.f32.mrb[77].mxu0 }
 0x194   : > { %v5210_v39 = vadd.f32 %v5209_v63, %v5208_v8  ;;  %v5321_v20 = vpop.f32.mrb[77].mxu1  ;;  %v5211_v32 = vpop.f32.mrb[78].mxu0  ;;  %v4654_v63 = vcombine.low %v434_v11, %v442_v6  ;;  %v211_v11 = vld [vmem:[%s6117_s29 + $0xb0] sm:$0xff] }
 0x195   : > { %v5322_v1 = vadd.f32 %v5321_v20, %v5320_v14  ;;  %v5323_v5 = vpop.f32.mrb[78].mxu1  ;;  %v5212_v36 = vpop.f32.mrb[79].mxu0  ;;  %v219_v6 = vld [vmem:[%s6117_s29 + $0xf0] sm:$0xff] }
 0x196   : > { %v3130_v19 = vadd.f32 %v5210_v39, %v6463_v23  ;;  %v5213_v48 = vadd.f32 %v5212_v36, %v5211_v32  ;;  %v5324_v43 = vpop.f32.mrb[79].mxu1  ;;  %v4419_v32 = vcombine.high %v196_v54, %v204_v2 }
 0x197   : > { %v5325_v51 = vadd.f32 %v5324_v43, %v5323_v5  ;;  %3538 = vmatmul.mubr.bf16.gmra.mrb[184].mxu0 %v4636_v16  ;;  %v4417_v16 = vcombine.high %v195_v22, %v203_v29 }
 0x198   : > { %v6744_v53 = vadd.f32 %v5322_v1, %v3130_v19  ;;  %v3133_v55 = vadd.f32 %v5213_v48, %v6465_v25  ;;  %3699 = vmatmul.mubr.bf16.gmra.mrb[184].mxu1 %v4638_v41  ;;  %3545 = vmatprep.mubr.bf16.mxu0 %v4653_v34  ;;  %v212_v19 = vld [vmem:[%s6117_s29 + $0xb8] sm:$0xff] }
 0x199   : > { %3706 = vmatprep.mubr.bf16.mxu1 %v4655_v45  ;;  %v220_v48 = vld [vmem:[%s6117_s29 + $0xf8] sm:$0xff] }
 0x19a   : > { %v6749_v40 = vadd.f32 %v5325_v51, %v3133_v55  ;;  %v5214_v56 = vpop.f32.mrb[80].mxu0  ;;  %v4416_v51 = vcombine.low %v195_v22, %v203_v29 }
 0x19b   : > { %v5326_v21 = vpop.f32.mrb[80].mxu1  ;;  %v5215_v23 = vpop.f32.mrb[81].mxu0 }
 0x19c   : > { %v5216_v13 = vadd.f32 %v5215_v23, %v5214_v56  ;;  %v5327_v8 = vpop.f32.mrb[81].mxu1  ;;  %v5217_v14 = vpop.f32.mrb[82].mxu0  ;;  %v4418_v23 = vcombine.low %v196_v54, %v204_v2  ;;  %v227_v54 = vld [vmem:[%s6117_s29 + $0x130] sm:$0xff] }
 0x19d   : > { %v5328_v25 = vadd.f32 %v5327_v8, %v5326_v21  ;;  %v5329_v39 = vpop.f32.mrb[82].mxu1  ;;  %v5218_v20 = vpop.f32.mrb[83].mxu0  ;;  %v235_v2 = vld [vmem:[%s6117_s29 + $0x170] sm:$0xff] }
 0x19e   : > { %v3138_v41 = vadd.f32 %v5216_v13, %v6471_v47  ;;  %v5219_v34 = vadd.f32 %v5218_v20, %v5217_v14  ;;  %v5330_v1 = vpop.f32.mrb[83].mxu1  ;;  %v4435_v14 = vcombine.high %v212_v19, %v220_v48 }
 0x19f   : > { %v5331_v5 = vadd.f32 %v5330_v1, %v5329_v39  ;;  %3546 = vmatmul.mubr.bf16.gmra.mrb[188].mxu0 %v4652_v4  ;;  %v4433_v4 = vcombine.high %v211_v11, %v219_v6 }
 0x1a0   : > { %v6754_v42 = vadd.f32 %v5328_v25, %v3138_v41  ;;  %v3141_v44 = vadd.f32 %v5219_v34, %v6473_v49  ;;  %3707 = vmatmul.mubr.bf16.gmra.mrb[188].mxu1 %v4654_v63  ;;  %3747 = vmatprep.mubr.bf16.mxu0 %v4417_v16  ;;  %v228_v41 = vld [vmem:[%s6117_s29 + $0x138] sm:$0xff] }
 0x1a1   : > { %3908 = vmatprep.mubr.bf16.mxu1 %v4419_v32  ;;  %v236_v34 = vld [vmem:[%s6117_s29 + $0x178] sm:$0xff] }
 0x1a2   : > { %v6759_v36 = vadd.f32 %v5331_v5, %v3141_v44  ;;  %v5220_v45 = vpop.f32.mrb[84].mxu0  ;;  %v4432_v5 = vcombine.low %v211_v11, %v219_v6 }
 0x1a3   : > { %v5332_v43 = vpop.f32.mrb[84].mxu1  ;;  %v5221_v47 = vpop.f32.mrb[85].mxu0 }
 0x1a4   : > { %v5222_v55 = vadd.f32 %v5221_v47, %v5220_v45  ;;  %v5333_v56 = vpop.f32.mrb[85].mxu1  ;;  %v5223_v21 = vpop.f32.mrb[86].mxu0  ;;  %v4434_v47 = vcombine.low %v212_v19, %v220_v48  ;;  %v243_v19 = vld [vmem:[%s6117_s29 + $0x1b0] sm:$0xff] }
 0x1a5   : > { %v5334_v49 = vadd.f32 %v5333_v56, %v5332_v43  ;;  %v5335_v13 = vpop.f32.mrb[86].mxu1  ;;  %v5224_v8 = vpop.f32.mrb[87].mxu0  ;;  %v251_v48 = vld [vmem:[%s6117_s29 + $0x1f0] sm:$0xff] }
 0x1a6   : > { %v3146_v63 = vadd.f32 %v5222_v55, %v6494_v10  ;;  %v5225_v16 = vadd.f32 %v5224_v8, %v5223_v21  ;;  %v5336_v25 = vpop.f32.mrb[87].mxu1  ;;  %v4451_v21 = vcombine.high %v228_v41, %v236_v34 }
 0x1a7   : > { %v5337_v39 = vadd.f32 %v5336_v25, %v5335_v13  ;;  %3748 = vmatmul.mubr.bf16.vlgmr.msra.gmra.mrb[192].mxu0 %v4416_v51  ;;  %v4449_v51 = vcombine.high %v227_v54, %v235_v2 }
 0x1a8   : > { %v6764_v22 = vadd.f32 %v5334_v49, %v3146_v63  ;;  %v3149_v29 = vadd.f32 %v5225_v16, %v6505_v15  ;;  %3909 = vmatmul.mubr.bf16.vlgmr.msra.gmra.mrb[192].mxu1 %v4418_v23  ;;  %3755 = vmatprep.mubr.bf16.mxu0 %v4433_v4  ;;  %v244_v63 = vld [vmem:[%s6117_s29 + $0x1b8] sm:$0xff] }
 0x1a9   : > { %3916 = vmatprep.mubr.bf16.mxu1 %v4435_v14  ;;  %v252_v16 = vld [vmem:[%s6117_s29 + $0x1f8] sm:$0xff] }
 0x1aa   : > { %v6769_v20 = vadd.f32 %v5337_v39, %v3149_v29  ;;  %v5226_v32 = vpop.f32.mrb[88].mxu0  ;;  %v4448_v39 = vcombine.low %v227_v54, %v235_v2 }
 0x1ab   : > { %v5338_v1 = vpop.f32.mrb[88].mxu1  ;;  %v5227_v10 = vpop.f32.mrb[89].mxu0 }
 0x1ac   : > { %v5228_v44 = vadd.f32 %v5227_v10, %v5226_v32  ;;  %v5339_v45 = vpop.f32.mrb[89].mxu1  ;;  %v5229_v43 = vpop.f32.mrb[90].mxu0  ;;  %v4450_v10 = vcombine.low %v228_v41, %v236_v34  ;;  %v259_v41 = vld [vmem:[%s6117_s29 + $0x230] sm:$0xff] }
 0x1ad   : > { %v5340_v15 = vadd.f32 %v5339_v45, %v5338_v1  ;;  %v5341_v55 = vpop.f32.mrb[90].mxu1  ;;  %v5230_v56 = vpop.f32.mrb[91].mxu0  ;;  %v267_v34 = vld [vmem:[%s6117_s29 + $0x270] sm:$0xff] }
 0x1ae   : > { %v3154_v23 = vadd.f32 %v5228_v44, %v6540_v46  ;;  %v5231_v4 = vadd.f32 %v5230_v56, %v5229_v43  ;;  %v5342_v49 = vpop.f32.mrb[91].mxu1  ;;  %v4467_v43 = vcombine.high %v244_v63, %v252_v16 }
 0x1af   : > { %v5343_v13 = vadd.f32 %v5342_v49, %v5341_v55  ;;  %3756 = vmatmul.mubr.bf16.gmra.mrb[196].mxu0 %v4432_v5  ;;  %v4465_v5 = vcombine.high %v243_v19, %v251_v48 }
 0x1b0   : > { %v6774_v11 = vadd.f32 %v5340_v15, %v3154_v23  ;;  %v3157_v6 = vadd.f32 %v5231_v4, %v6548_v52  ;;  %3917 = vmatmul.mubr.bf16.gmra.mrb[196].mxu1 %v4434_v47  ;;  %3763 = vmatprep.mubr.bf16.mxu0 %v4449_v51  ;;  %v260_v23 = vld [vmem:[%s6117_s29 + $0x238] sm:$0xff] }
 0x1b1   : > { %3924 = vmatprep.mubr.bf16.mxu1 %v4451_v21  ;;  %v268_v4 = vld [vmem:[%s6117_s29 + $0x278] sm:$0xff] }
 0x1b2   : > { %v6779_v8 = vadd.f32 %v5343_v13, %v3157_v6  ;;  %v5232_v14 = vpop.f32.mrb[92].mxu0  ;;  %v4464_v13 = vcombine.low %v243_v19, %v251_v48 }
 0x1b3   : > { %v5344_v25 = vpop.f32.mrb[92].mxu1  ;;  %v5233_v46 = vpop.f32.mrb[93].mxu0 }
 0x1b4   : > { %v5234_v29 = vadd.f32 %v5233_v46, %v5232_v14  ;;  %v5345_v32 = vpop.f32.mrb[93].mxu1  ;;  %v5235_v1 = vpop.f32.mrb[94].mxu0  ;;  %v4466_v46 = vcombine.low %v244_v63, %v252_v16  ;;  %v275_v63 = vld [vmem:[%s6117_s29 + $0x2b0] sm:$0xff] }
 0x1b5   : > { %v5346_v52 = vadd.f32 %v5345_v32, %v5344_v25  ;;  %v5347_v44 = vpop.f32.mrb[94].mxu1  ;;  %v5236_v45 = vpop.f32.mrb[95].mxu0  ;;  %v283_v16 = vld [vmem:[%s6117_s29 + $0x2f0] sm:$0xff] }
 0x1b6   : > { %v3162_v47 = vadd.f32 %v5234_v29, %v6588_v18  ;;  %v5237_v51 = vadd.f32 %v5236_v45, %v5235_v1  ;;  %v5348_v15 = vpop.f32.mrb[95].mxu1  ;;  %v4483_v1 = vcombine.high %v260_v23, %v268_v4 }
 0x1b7   : > { %v5349_v55 = vadd.f32 %v5348_v15, %v5347_v44  ;;  %3764 = vmatmul.mubr.bf16.gmra.mrb[200].mxu0 %v4448_v39  ;;  %v4481_v39 = vcombine.high %v259_v41, %v267_v34 }
 0x1b8   : > { %v6784_v54 = vadd.f32 %v5346_v52, %v3162_v47  ;;  %v3165_v2 = vadd.f32 %v5237_v51, %v6596_v26  ;;  %3925 = vmatmul.mubr.bf16.gmra.mrb[200].mxu1 %v4450_v10  ;;  %3771 = vmatprep.mubr.bf16.mxu0 %v4465_v5  ;;  %v276_v47 = vld [vmem:[%s6117_s29 + $0x2b8] sm:$0xff] }
 0x1b9   : > { %3932 = vmatprep.mubr.bf16.mxu1 %v4467_v43  ;;  %v284_v51 = vld [vmem:[%s6117_s29 + $0x2f8] sm:$0xff] }
 0x1ba   : > { %v6789_v56 = vadd.f32 %v5349_v55, %v3165_v2  ;;  %v5238_v21 = vpop.f32.mrb[96].mxu0  ;;  %v4480_v55 = vcombine.low %v259_v41, %v267_v34 }
 0x1bb   : > { %v5350_v49 = vpop.f32.mrb[96].mxu1  ;;  %v5239_v18 = vpop.f32.mrb[97].mxu0 }
 0x1bc   : > { %v5240_v6 = vadd.f32 %v5239_v18, %v5238_v21  ;;  %v5351_v14 = vpop.f32.mrb[97].mxu1  ;;  %v5241_v25 = vpop.f32.mrb[98].mxu0  ;;  %v4482_v18 = vcombine.low %v260_v23, %v268_v4  ;;  %v291_v23 = vld [vmem:[%s6117_s29 + $0x330] sm:$0xff] }
 0x1bd   : > { %v5352_v26 = vadd.f32 %v5351_v14, %v5350_v49  ;;  %v5353_v29 = vpop.f32.mrb[98].mxu1  ;;  %v5242_v32 = vpop.f32.mrb[99].mxu0  ;;  %v299_v4 = vld [vmem:[%s6117_s29 + $0x370] sm:$0xff] }
 0x1be   : > { %v3170_v10 = vadd.f32 %v5240_v6, %v6636_v58  ;;  %v5243_v5 = vadd.f32 %v5242_v32, %v5241_v25  ;;  %v5354_v52 = vpop.f32.mrb[99].mxu1  ;;  %v4499_v25 = vcombine.high %v276_v47, %v284_v51 }
 0x1bf   : > { %v5355_v44 = vadd.f32 %v5354_v52, %v5353_v29  ;;  %3772 = vmatmul.mubr.bf16.gmra.mrb[204].mxu0 %v4464_v13  ;;  %v4497_v13 = vcombine.high %v275_v63, %v283_v16 }
 0x1c0   : > { %v6794_v19 = vadd.f32 %v5352_v26, %v3170_v10  ;;  %v3173_v48 = vadd.f32 %v5243_v5, %v6641_v61  ;;  %3933 = vmatmul.mubr.bf16.gmra.mrb[204].mxu1 %v4466_v46  ;;  %3779 = vmatprep.mubr.bf16.mxu0 %v4481_v39  ;;  %v292_v10 = vld [vmem:[%s6117_s29 + $0x338] sm:$0xff] }
 0x1c1   : > { %3940 = vmatprep.mubr.bf16.mxu1 %v4483_v1  ;;  %v300_v5 = vld [vmem:[%s6117_s29 + $0x378] sm:$0xff] }
 0x1c2   : > { %v6799_v45 = vadd.f32 %v5355_v44, %v3173_v48  ;;  %v5244_v43 = vpop.f32.mrb[100].mxu0  ;;  %v4496_v44 = vcombine.low %v275_v63, %v283_v16 }
 0x1c3   : > { %v5356_v15 = vpop.f32.mrb[100].mxu1  ;;  %v5245_v58 = vpop.f32.mrb[101].mxu0 }
 0x1c4   : > { %v5246_v2 = vadd.f32 %v5245_v58, %v5244_v43  ;;  %v5357_v21 = vpop.f32.mrb[101].mxu1  ;;  %v5247_v49 = vpop.f32.mrb[102].mxu0  ;;  %v4498_v58 = vcombine.low %v276_v47, %v284_v51  ;;  %v307_v47 = vld [vmem:[%s6117_s29 + $0x3b0] sm:$0xff] }
 0x1c5   : > { %v5358_v61 = vadd.f32 %v5357_v21, %v5356_v15  ;;  %v5359_v6 = vpop.f32.mrb[102].mxu1  ;;  %v5248_v14 = vpop.f32.mrb[103].mxu0  ;;  %v315_v51 = vld [vmem:[%s6117_s29 + $0x3f0] sm:$0xff] }
 0x1c6   : > { %v3178_v46 = vadd.f32 %v5246_v2, %v6657_v24  ;;  %v5249_v39 = vadd.f32 %v5248_v14, %v5247_v49  ;;  %v5360_v26 = vpop.f32.mrb[103].mxu1  ;;  %v4515_v49 = vcombine.high %v292_v10, %v300_v5 }
 0x1c7   : > { %v5361_v29 = vadd.f32 %v5360_v26, %v5359_v6  ;;  %3780 = vmatmul.mubr.bf16.gmra.mrb[208].mxu0 %v4480_v55  ;;  %v4513_v55 = vcombine.high %v291_v23, %v299_v4 }
 0x1c8   : > { %v6804_v41 = vadd.f32 %v5358_v61, %v3178_v46  ;;  %v3181_v34 = vadd.f32 %v5249_v39, %v6659_v28  ;;  %3941 = vmatmul.mubr.bf16.gmra.mrb[208].mxu1 %v4482_v18  ;;  %3787 = vmatprep.mubr.bf16.mxu0 %v4497_v13  ;;  %v308_v46 = vld [vmem:[%s6117_s29 + $0x3b8] sm:$0xff] }
 0x1c9   : > { %3948 = vmatprep.mubr.bf16.mxu1 %v4499_v25  ;;  %v316_v39 = vld [vmem:[%s6117_s29 + $0x3f8] sm:$0xff] }
 0x1ca   : > { %v6809_v32 = vadd.f32 %v5361_v29, %v3181_v34  ;;  %v5250_v1 = vpop.f32.mrb[104].mxu0  ;;  %v4512_v29 = vcombine.low %v291_v23, %v299_v4 }
 0x1cb   : > { %v5362_v52 = vpop.f32.mrb[104].mxu1  ;;  %v5251_v24 = vpop.f32.mrb[105].mxu0 }
 0x1cc   : > { %v5252_v48 = vadd.f32 %v5251_v24, %v5250_v1  ;;  %v5363_v43 = vpop.f32.mrb[105].mxu1  ;;  %v5253_v15 = vpop.f32.mrb[106].mxu0  ;;  %v4514_v24 = vcombine.low %v292_v10, %v300_v5  ;;  %v323_v10 = vld [vmem:[%s6117_s29 + $0x430] sm:$0xff] }
 0x1cd   : > { %v5364_v28 = vadd.f32 %v5363_v43, %v5362_v52  ;;  %v5365_v2 = vpop.f32.mrb[106].mxu1  ;;  %v5254_v21 = vpop.f32.mrb[107].mxu0  ;;  %v331_v5 = vld [vmem:[%s6117_s29 + $0x470] sm:$0xff] }
 0x1ce   : > { %v3186_v18 = vadd.f32 %v5252_v48, %v6665_v57  ;;  %v5255_v13 = vadd.f32 %v5254_v21, %v5253_v15  ;;  %v5366_v61 = vpop.f32.mrb[107].mxu1  ;;  %v4531_v15 = vcombine.high %v308_v46, %v316_v39 }
 0x1cf   : > { %v5367_v6 = vadd.f32 %v5366_v61, %v5365_v2  ;;  %3788 = vmatmul.mubr.bf16.gmra.mrb[212].mxu0 %v4496_v44  ;;  %v4529_v44 = vcombine.high %v307_v47, %v315_v51 }
 0x1d0   : > { %v6814_v63 = vadd.f32 %v5364_v28, %v3186_v18  ;;  %v3189_v16 = vadd.f32 %v5255_v13, %v6667_v60  ;;  %3949 = vmatmul.mubr.bf16.gmra.mrb[212].mxu1 %v4498_v58  ;;  %3795 = vmatprep.mubr.bf16.mxu0 %v4513_v55  ;;  %v324_v18 = vld [vmem:[%s6117_s29 + $0x438] sm:$0xff] }
 0x1d1   : > { %3956 = vmatprep.mubr.bf16.mxu1 %v4515_v49  ;;  %v332_v13 = vld [vmem:[%s6117_s29 + $0x478] sm:$0xff] }
 0x1d2   : > { %v6819_v14 = vadd.f32 %v5367_v6, %v3189_v16  ;;  %v5256_v25 = vpop.f32.mrb[108].mxu0  ;;  %v4528_v6 = vcombine.low %v307_v47, %v315_v51 }
 0x1d3   : > { %v5368_v26 = vpop.f32.mrb[108].mxu1  ;;  %v5257_v57 = vpop.f32.mrb[109].mxu0 }
 0x1d4   : > { %v5258_v34 = vadd.f32 %v5257_v57, %v5256_v25  ;;  %v5369_v1 = vpop.f32.mrb[109].mxu1  ;;  %v5259_v52 = vpop.f32.mrb[110].mxu0  ;;  %v4530_v57 = vcombine.low %v308_v46, %v316_v39  ;;  %v339_v46 = vld [vmem:[%s6117_s29 + $0x4b0] sm:$0xff] }
 0x1d5   : > { %v5370_v60 = vadd.f32 %v5369_v1, %v5368_v26  ;;  %v5371_v48 = vpop.f32.mrb[110].mxu1  ;;  %v5260_v43 = vpop.f32.mrb[111].mxu0  ;;  %v347_v39 = vld [vmem:[%s6117_s29 + $0x4f0] sm:$0xff] }
 0x1d6   : > { %v3194_v58 = vadd.f32 %v5258_v34, %v6673_v30  ;;  %v5261_v55 = vadd.f32 %v5260_v43, %v5259_v52  ;;  %v5372_v28 = vpop.f32.mrb[111].mxu1  ;;  %v4547_v52 = vcombine.high %v324_v18, %v332_v13 }
 0x1d7   : > { %v5373_v2 = vadd.f32 %v5372_v28, %v5371_v48  ;;  %3796 = vmatmul.mubr.bf16.gmra.mrb[216].mxu0 %v4512_v29  ;;  %v4545_v29 = vcombine.high %v323_v10, %v331_v5 }
 0x1d8   : > { %v6824_v23 = vadd.f32 %v5370_v60, %v3194_v58  ;;  %v3197_v4 = vadd.f32 %v5261_v55, %v6675_v27  ;;  %3957 = vmatmul.mubr.bf16.gmra.mrb[216].mxu1 %v4514_v24  ;;  %3803 = vmatprep.mubr.bf16.mxu0 %v4529_v44  ;;  %v340_v58 = vld [vmem:[%s6117_s29 + $0x4b8] sm:$0xff] }
 0x1d9   : > { %3964 = vmatprep.mubr.bf16.mxu1 %v4531_v15  ;;  %v348_v55 = vld [vmem:[%s6117_s29 + $0x4f8] sm:$0xff] }
 0x1da   : > { %v6829_v21 = vadd.f32 %v5373_v2, %v3197_v4  ;;  %v5262_v49 = vpop.f32.mrb[112].mxu0  ;;  %v4544_v2 = vcombine.low %v323_v10, %v331_v5 }
 0x1db   : > { %v5374_v61 = vpop.f32.mrb[112].mxu1  ;;  %v5263_v30 = vpop.f32.mrb[113].mxu0 }
 0x1dc   : > { %v5264_v16 = vadd.f32 %v5263_v30, %v5262_v49  ;;  %v5375_v25 = vpop.f32.mrb[113].mxu1  ;;  %v5265_v26 = vpop.f32.mrb[114].mxu0  ;;  %v4546_v30 = vcombine.low %v324_v18, %v332_v13  ;;  %v355_v18 = vld [vmem:[%s6117_s29 + $0x530] sm:$0xff] }
 0x1dd   : > { %v5376_v27 = vadd.f32 %v5375_v25, %v5374_v61  ;;  %v5377_v34 = vpop.f32.mrb[114].mxu1  ;;  %v5266_v1 = vpop.f32.mrb[115].mxu0  ;;  %v363_v13 = vld [vmem:[%s6117_s29 + $0x570] sm:$0xff] }
 0x1de   : > { %v3202_v24 = vadd.f32 %v5264_v16, %v6681_v59  ;;  %v5267_v44 = vadd.f32 %v5266_v1, %v5265_v26  ;;  %v5378_v60 = vpop.f32.mrb[115].mxu1  ;;  %v4563_v26 = vcombine.high %v340_v58, %v348_v55 }
 0x1df   : > { %v5379_v48 = vadd.f32 %v5378_v60, %v5377_v34  ;;  %3804 = vmatmul.mubr.bf16.gmra.mrb[220].mxu0 %v4528_v6  ;;  %v4561_v6 = vcombine.high %v339_v46, %v347_v39 }
 0x1e0   : > { %v6834_v47 = vadd.f32 %v5376_v27, %v3202_v24  ;;  %v3205_v51 = vadd.f32 %v5267_v44, %v6683_v62  ;;  %3965 = vmatmul.mubr.bf16.gmra.mrb[220].mxu1 %v4530_v57  ;;  %3811 = vmatprep.mubr.bf16.mxu0 %v4545_v29  ;;  %v356_v24 = vld [vmem:[%s6117_s29 + $0x538] sm:$0xff] }
 0x1e1   : > { %3972 = vmatprep.mubr.bf16.mxu1 %v4547_v52  ;;  %v364_v44 = vld [vmem:[%s6117_s29 + $0x578] sm:$0xff] }
 0x1e2   : > { %v6839_v43 = vadd.f32 %v5379_v48, %v3205_v51  ;;  %v5268_v15 = vpop.f32.mrb[116].mxu0  ;;  %v4560_v48 = vcombine.low %v339_v46, %v347_v39 }
 0x1e3   : > { %v5380_v28 = vpop.f32.mrb[116].mxu1  ;;  %v5269_v59 = vpop.f32.mrb[117].mxu0 }
 0x1e4   : > { %v5270_v4 = vadd.f32 %v5269_v59, %v5268_v15  ;;  %v5381_v49 = vpop.f32.mrb[117].mxu1  ;;  %v5271_v61 = vpop.f32.mrb[118].mxu0  ;;  %v4562_v59 = vcombine.low %v340_v58, %v348_v55  ;;  %v371_v58 = vld [vmem:[%s6117_s29 + $0x5b0] sm:$0xff] }
 0x1e5   : > { %v5382_v62 = vadd.f32 %v5381_v49, %v5380_v28  ;;  %v5383_v16 = vpop.f32.mrb[118].mxu1  ;;  %v5272_v25 = vpop.f32.mrb[119].mxu0  ;;  %v379_v55 = vld [vmem:[%s6117_s29 + $0x5f0] sm:$0xff] }
 0x1e6   : > { %v3210_v57 = vadd.f32 %v5270_v4, %v6689_v37  ;;  %v5273_v29 = vadd.f32 %v5272_v25, %v5271_v61  ;;  %v5384_v27 = vpop.f32.mrb[119].mxu1  ;;  %v4579_v61 = vcombine.high %v356_v24, %v364_v44 }
 0x1e7   : > { %v5385_v34 = vadd.f32 %v5384_v27, %v5383_v16  ;;  %3812 = vmatmul.mubr.bf16.gmra.mrb[224].mxu0 %v4544_v2  ;;  %v4577_v2 = vcombine.high %v355_v18, %v363_v13 }
 0x1e8   : > { %v6844_v10 = vadd.f32 %v5382_v62, %v3210_v57  ;;  %v3213_v5 = vadd.f32 %v5273_v29, %v6691_v31  ;;  %3973 = vmatmul.mubr.bf16.gmra.mrb[224].mxu1 %v4546_v30  ;;  %3819 = vmatprep.mubr.bf16.mxu0 %v4561_v6  ;;  %v372_v57 = vld [vmem:[%s6117_s29 + $0x5b8] sm:$0xff] }
 0x1e9   : > { %3980 = vmatprep.mubr.bf16.mxu1 %v4563_v26  ;;  %v380_v29 = vld [vmem:[%s6117_s29 + $0x5f8] sm:$0xff] }
 0x1ea   : > { %v6849_v1 = vadd.f32 %v5385_v34, %v3213_v5  ;;  %v5274_v52 = vpop.f32.mrb[120].mxu0  ;;  %v4576_v34 = vcombine.low %v355_v18, %v363_v13 }
 0x1eb   : > { %v5386_v60 = vpop.f32.mrb[120].mxu1  ;;  %v5275_v37 = vpop.f32.mrb[121].mxu0 }
 0x1ec   : > { %v5276_v51 = vadd.f32 %v5275_v37, %v5274_v52  ;;  %v5387_v15 = vpop.f32.mrb[121].mxu1  ;;  %v5277_v28 = vpop.f32.mrb[122].mxu0  ;;  %v4578_v37 = vcombine.low %v356_v24, %v364_v44  ;;  %v387_v24 = vld [vmem:[%s6117_s29 + $0x630] sm:$0xff] }
 0x1ed   : > { %v5388_v31 = vadd.f32 %v5387_v15, %v5386_v60  ;;  %v5389_v4 = vpop.f32.mrb[122].mxu1  ;;  %v5278_v49 = vpop.f32.mrb[123].mxu0  ;;  %v395_v44 = vld [vmem:[%s6117_s29 + $0x670] sm:$0xff] }
 0x1ee   : > { %v3218_v30 = vadd.f32 %v5276_v51, %v6697_v9  ;;  %v5279_v6 = vadd.f32 %v5278_v49, %v5277_v28  ;;  %v5390_v62 = vpop.f32.mrb[123].mxu1  ;;  %v4595_v28 = vcombine.high %v372_v57, %v380_v29 }
 0x1ef   : > { %v5391_v16 = vadd.f32 %v5390_v62, %v5389_v4  ;;  %3820 = vmatmul.mubr.bf16.gmra.mrb[228].mxu0 %v4560_v48  ;;  %v4593_v48 = vcombine.high %v371_v58, %v379_v55 }
 0x1f0   : > { %v6854_v46 = vadd.f32 %v5388_v31, %v3218_v30  ;;  %v3221_v39 = vadd.f32 %v5279_v6, %v6699_v0  ;;  %3981 = vmatmul.mubr.bf16.gmra.mrb[228].mxu1 %v4562_v59  ;;  %3827 = vmatprep.mubr.bf16.mxu0 %v4577_v2  ;;  %v388_v30 = vld [vmem:[%s6117_s29 + $0x638] sm:$0xff] }
 0x1f1   : > { %3988 = vmatprep.mubr.bf16.mxu1 %v4579_v61  ;;  %v396_v6 = vld [vmem:[%s6117_s29 + $0x678] sm:$0xff] }
 0x1f2   : > { %v6859_v25 = vadd.f32 %v5391_v16, %v3221_v39  ;;  %v5280_v26 = vpop.f32.mrb[124].mxu0  ;;  %v4592_v16 = vcombine.low %v371_v58, %v379_v55 }
 0x1f3   : > { %v5392_v27 = vpop.f32.mrb[124].mxu1  ;;  %v5281_v9 = vpop.f32.mrb[125].mxu0 }
 0x1f4   : > { %v5282_v5 = vadd.f32 %v5281_v9, %v5280_v26  ;;  %v5393_v52 = vpop.f32.mrb[125].mxu1  ;;  %v5283_v60 = vpop.f32.mrb[126].mxu0  ;;  %v4594_v9 = vcombine.low %v372_v57, %v380_v29  ;;  %v403_v57 = vld [vmem:[%s6117_s29 + $0x6b0] sm:$0xff] }
 0x1f5   : > { %v5394_v0 = vadd.f32 %v5393_v52, %v5392_v27  ;;  %v5395_v51 = vpop.f32.mrb[126].mxu1  ;;  %v5284_v15 = vpop.f32.mrb[127].mxu0  ;;  %v411_v29 = vld [vmem:[%s6117_s29 + $0x6f0] sm:$0xff] }
 0x1f6   : > { %v3226_v59 = vadd.f32 %v5282_v5, %v6705_v50  ;;  %v5285_v2 = vadd.f32 %v5284_v15, %v5283_v60  ;;  %v5396_v31 = vpop.f32.mrb[127].mxu1  ;;  %v4611_v60 = vcombine.high %v388_v30, %v396_v6 }
 0x1f7   : > { %v5397_v4 = vadd.f32 %v5396_v31, %v5395_v51  ;;  %3828 = vmatmul.mubr.bf16.gmra.mrb[232].mxu0 %v4576_v34  ;;  %v4609_v34 = vcombine.high %v387_v24, %v395_v44 }
 0x1f8   : > { %v6864_v18 = vadd.f32 %v5394_v0, %v3226_v59  ;;  %v3229_v13 = vadd.f32 %v5285_v2, %v6707_v33  ;;  %3989 = vmatmul.mubr.bf16.gmra.mrb[232].mxu1 %v4578_v37  ;;  %3835 = vmatprep.mubr.bf16.mxu0 %v4593_v48  ;;  %v404_v59 = vld [vmem:[%s6117_s29 + $0x6b8] sm:$0xff] }
 0x1f9   : > { %3996 = vmatprep.mubr.bf16.mxu1 %v4595_v28  ;;  %v412_v2 = vld [vmem:[%s6117_s29 + $0x6f8] sm:$0xff] }
 0x1fa   : > { %v6869_v49 = vadd.f32 %v5397_v4, %v3229_v13  ;;  %v5414_v61 = vpop.f32.mrb[128].mxu0  ;;  %v4608_v4 = vcombine.low %v387_v24, %v395_v44 }
 0x1fb   : > { %v5526_v62 = vpop.f32.mrb[128].mxu1  ;;  %v5415_v50 = vpop.f32.mrb[129].mxu0 }
 0x1fc   : > { %v5416_v39 = vadd.f32 %v5415_v50, %v5414_v61  ;;  %v5527_v26 = vpop.f32.mrb[129].mxu1  ;;  %v5417_v27 = vpop.f32.mrb[130].mxu0  ;;  %v4610_v50 = vcombine.low %v388_v30, %v396_v6  ;;  %v419_v30 = vld [vmem:[%s6117_s29 + $0x730] sm:$0xff] }
 0x1fd   : > { %v5528_v33 = vadd.f32 %v5527_v26, %v5526_v62  ;;  %v5529_v5 = vpop.f32.mrb[130].mxu1  ;;  %v5418_v52 = vpop.f32.mrb[131].mxu0  ;;  %v427_v6 = vld [vmem:[%s6117_s29 + $0x770] sm:$0xff] }
 0x1fe   : > { %v3428_v37 = vadd.f32 %v5416_v39, %v6714_v3  ;;  %v5419_v48 = vadd.f32 %v5418_v52, %v5417_v27  ;;  %v5530_v0 = vpop.f32.mrb[131].mxu1  ;;  %v4627_v27 = vcombine.high %v404_v59, %v412_v2 }
 0x1ff   : > { %v5531_v51 = vadd.f32 %v5530_v0, %v5529_v5  ;;  %3836 = vmatmul.mubr.bf16.gmra.mrb[236].mxu0 %v4592_v16  ;;  %v4625_v16 = vcombine.high %v403_v57, %v411_v29 }
 0x200   : > { %v6874_v58 = vadd.f32 %v5528_v33, %v3428_v37  ;;  %v3431_v55 = vadd.f32 %v5419_v48, %v6719_v38  ;;  %3997 = vmatmul.mubr.bf16.gmra.mrb[236].mxu1 %v4594_v9  ;;  %3843 = vmatprep.mubr.bf16.mxu0 %v4609_v34  ;;  %v420_v37 = vld [vmem:[%s6117_s29 + $0x738] sm:$0xff] }
 0x201   : > { %4004 = vmatprep.mubr.bf16.mxu1 %v4611_v60  ;;  %v428_v48 = vld [vmem:[%s6117_s29 + $0x778] sm:$0xff] }
 0x202   : > { %v6879_v15 = vadd.f32 %v5531_v51, %v3431_v55  ;;  %v5420_v28 = vpop.f32.mrb[132].mxu0  ;;  %v4624_v51 = vcombine.low %v403_v57, %v411_v29 }
 0x203   : > { %v5532_v31 = vpop.f32.mrb[132].mxu1  ;;  %v5421_v3 = vpop.f32.mrb[133].mxu0 }
 0x204   : > { %v5422_v13 = vadd.f32 %v5421_v3, %v5420_v28  ;;  %v5533_v61 = vpop.f32.mrb[133].mxu1  ;;  %v5423_v62 = vpop.f32.mrb[134].mxu0  ;;  %v4626_v3 = vcombine.low %v404_v59, %v412_v2  ;;  %v435_v59 = vld [vmem:[%s6117_s29 + $0x7b0] sm:$0xff] }
 0x205   : > { %v5534_v38 = vadd.f32 %v5533_v61, %v5532_v31  ;;  %v5535_v39 = vpop.f32.mrb[134].mxu1  ;;  %v5424_v26 = vpop.f32.mrb[135].mxu0  ;;  %v443_v2 = vld [vmem:[%s6117_s29 + $0x7f0] sm:$0xff] }
 0x206   : > { %v3436_v9 = vadd.f32 %v5422_v13, %v6724_v35  ;;  %v5425_v34 = vadd.f32 %v5424_v26, %v5423_v62  ;;  %v5536_v33 = vpop.f32.mrb[135].mxu1  ;;  %v4643_v62 = vcombine.high %v420_v37, %v428_v48 }
 0x207   : > { %v5537_v5 = vadd.f32 %v5536_v33, %v5535_v39  ;;  %3844 = vmatmul.mubr.bf16.gmra.mrb[240].mxu0 %v4608_v4  ;;  %v4641_v4 = vcombine.high %v419_v30, %v427_v6 }
 0x208   : > { %v6884_v24 = vadd.f32 %v5534_v38, %v3436_v9  ;;  %v3439_v44 = vadd.f32 %v5425_v34, %v6729_v17  ;;  %4005 = vmatmul.mubr.bf16.gmra.mrb[240].mxu1 %v4610_v50  ;;  %3851 = vmatprep.mubr.bf16.mxu0 %v4625_v16  ;;  %v436_v9 = vld [vmem:[%s6117_s29 + $0x7b8] sm:$0xff] }
 0x209   : > { %4012 = vmatprep.mubr.bf16.mxu1 %v4627_v27  ;;  %v444_v34 = vld [vmem:[%s6117_s29 + $0x7f8] sm:$0xff]  ;;  %s4402_s29 = sshll.u32 %s7048_s21, 2  ;;  %s4403_s21 = sshll.u32 %s7050_s13, 1 }
 0x20a   : > { %v6889_v52 = vadd.f32 %v5537_v5, %v3439_v44  ;;  %v5426_v60 = vpop.f32.mrb[136].mxu0  ;;  %v4640_v5 = vcombine.low %v419_v30, %v427_v6  ;;  %s6987_s19 = scalar_lea.vmem %s7045_s2, %s4402_s29  ;;  %s187_s23 = scalar_lea.vmem %s7046_s3, %s4403_s21 }
 0x20b   : > { %v5538_v0 = vpop.f32.mrb[136].mxu1  ;;  %v5427_v35 = vpop.f32.mrb[137].mxu0 }
 0x20c   : > { %v5428_v55 = vadd.f32 %v5427_v35, %v5426_v60  ;;  %v5539_v28 = vpop.f32.mrb[137].mxu1  ;;  %v5429_v31 = vpop.f32.mrb[138].mxu0  ;;  %v4642_v35 = vcombine.low %v420_v37, %v428_v48 }
 0x20d   : > { %v5540_v17 = vadd.f32 %v5539_v28, %v5538_v0  ;;  %v5541_v13 = vpop.f32.mrb[138].mxu1  ;;  %v5430_v61 = vpop.f32.mrb[139].mxu0 }
 0x20e   : > { %v3444_v50 = vadd.f32 %v5428_v55, %v6734_v12  ;;  %v5431_v16 = vadd.f32 %v5430_v61, %v5429_v31  ;;  %v5542_v38 = vpop.f32.mrb[139].mxu1  ;;  %v4659_v31 = vcombine.high %v436_v9, %v444_v34 }
 0x20f   : > { %v5543_v39 = vadd.f32 %v5542_v38, %v5541_v13  ;;  %3852 = vmatmul.mubr.bf16.gmra.mrb[244].mxu0 %v4624_v51  ;;  %v4657_v51 = vcombine.high %v435_v59, %v443_v2 }
 0x210   : > { %v6894_v57 = vadd.f32 %v5540_v17, %v3444_v50  ;;  %v3447_v29 = vadd.f32 %v5431_v16, %v6739_v7  ;;  %4013 = vmatmul.mubr.bf16.gmra.mrb[244].mxu1 %v4626_v3  ;;  %3859 = vmatprep.mubr.bf16.mxu0 %v4641_v4  ;;  %v4656_v50 = vcombine.low %v435_v59, %v443_v2 }
 0x211   : > { %4020 = vmatprep.mubr.bf16.mxu1 %v4643_v62 }
 0x212   : > { %v6899_v26 = vadd.f32 %v5543_v39, %v3447_v29  ;;  %v5432_v27 = vpop.f32.mrb[140].mxu0  ;;  %v4658_v39 = vcombine.low %v436_v9, %v444_v34 }
 0x213   : > { %v5544_v33 = vpop.f32.mrb[140].mxu1  ;;  %v5433_v12 = vpop.f32.mrb[141].mxu0 }
 0x214   : > { %v5434_v44 = vadd.f32 %v5433_v12, %v5432_v27  ;;  %v5545_v60 = vpop.f32.mrb[141].mxu1  ;;  %v5435_v0 = vpop.f32.mrb[142].mxu0 }
 0x215   : > { %v5546_v55 = vadd.f32 %v5545_v60, %v5544_v33  ;;  %v5547_v7 = vpop.f32.mrb[142].mxu1  ;;  %v5436_v28 = vpop.f32.mrb[143].mxu0 }
 0x216   : > { %v3452_v3 = vadd.f32 %v5434_v44, %v6744_v53  ;;  %v5437_v4 = vadd.f32 %v5436_v28, %v5435_v0  ;;  %v5548_v17 = vpop.f32.mrb[143].mxu1 }
 0x217   : > { %v5549_v13 = vadd.f32 %v5548_v17, %v5547_v7  ;;  %3860 = vmatmul.mubr.bf16.gmra.mrb[248].mxu0 %v4640_v5 }
 0x218   : > { %v6904_v61 = vadd.f32 %v5546_v55, %v3452_v3  ;;  %v3455_v62 = vadd.f32 %v5437_v4, %v6749_v40  ;;  %4021 = vmatmul.mubr.bf16.gmra.mrb[248].mxu1 %v4642_v35  ;;  %3867 = vmatprep.mubr.bf16.mxu0 %v4657_v51 }
 0x219   : > { %4028 = vmatprep.mubr.bf16.mxu1 %v4659_v31 }
 0x21a   : > { %v6907_v30 = vadd.f32 %v5549_v13, %v3455_v62  ;;  %v5438_v6 = vpop.f32.mrb[144].mxu0 }
 0x21b   : > { %v5550_v37 = vpop.f32.mrb[144].mxu1  ;;  %v5439_v48 = vpop.f32.mrb[145].mxu0 }
 0x21c   : > { %v5440_v16 = vadd.f32 %v5439_v48, %v5438_v6  ;;  %v5551_v38 = vpop.f32.mrb[145].mxu1  ;;  %v5441_v53 = vpop.f32.mrb[146].mxu0 }
 0x21d   : > { %v5552_v29 = vadd.f32 %v5551_v38, %v5550_v37  ;;  %v5553_v27 = vpop.f32.mrb[146].mxu1  ;;  %v5442_v33 = vpop.f32.mrb[147].mxu0 }
 0x21e   : > { %v3460_v12 = vadd.f32 %v5440_v16, %v6754_v42  ;;  %v5443_v5 = vadd.f32 %v5442_v33, %v5441_v53  ;;  %v5554_v40 = vpop.f32.mrb[147].mxu1 }
 0x21f   : > { %v5555_v44 = vadd.f32 %v5554_v40, %v5553_v27  ;;  %3868 = vmatmul.mubr.bf16.gmra.mrb[252].mxu0 %v4656_v50 }
 0x220   : > { %v6910_v60 = vadd.f32 %v5552_v29, %v3460_v12  ;;  %v3463_v0 = vadd.f32 %v5443_v5, %v6759_v36  ;;  %4029 = vmatmul.mubr.bf16.gmra.mrb[252].mxu1 %v4658_v39 }
 0x222   : > { %v6913_v35 = vadd.f32 %v5555_v44, %v3463_v0  ;;  %v5444_v59 = vpop.f32.mrb[148].mxu0 }
 0x223   : > { %v5556_v2 = vpop.f32.mrb[148].mxu1  ;;  %v5445_v51 = vpop.f32.mrb[149].mxu0 }
 0x224   : > { %v5446_v9 = vadd.f32 %v5445_v51, %v5444_v59  ;;  %v5557_v34 = vpop.f32.mrb[149].mxu1  ;;  %v5447_v55 = vpop.f32.mrb[150].mxu0 }
 0x225   : > { %v5558_v7 = vadd.f32 %v5557_v34, %v5556_v2  ;;  %v5559_v28 = vpop.f32.mrb[150].mxu1  ;;  %v5448_v42 = vpop.f32.mrb[151].mxu0 }
 0x226   : > { %v3468_v31 = vadd.f32 %v5446_v9, %v6764_v22  ;;  %v5449_v3 = vadd.f32 %v5448_v42, %v5447_v55  ;;  %v5560_v4 = vpop.f32.mrb[151].mxu1 }
 0x227   : > { %v5561_v17 = vadd.f32 %v5560_v4, %v5559_v28 }
 0x228   : > { %v6916_v13 = vadd.f32 %v5558_v7, %v3468_v31  ;;  %v3471_v36 = vadd.f32 %v5449_v3, %v6769_v20 }
 0x22a   : > { %v6919_v62 = vadd.f32 %v5561_v17, %v3471_v36  ;;  %v5450_v6 = vpop.f32.mrb[152].mxu0 }
 0x22b   : > { %v5562_v37 = vpop.f32.mrb[152].mxu1  ;;  %v5451_v48 = vpop.f32.mrb[153].mxu0 }
 0x22c   : > { %v5452_v50 = vadd.f32 %v5451_v48, %v5450_v6  ;;  %v5563_v16 = vpop.f32.mrb[153].mxu1  ;;  %v5453_v38 = vpop.f32.mrb[154].mxu0 }
 0x22d   : > { %v5564_v53 = vadd.f32 %v5563_v16, %v5562_v37  ;;  %v5565_v39 = vpop.f32.mrb[154].mxu1  ;;  %v5454_v29 = vpop.f32.mrb[155].mxu0 }
 0x22e   : > { %v3476_v22 = vadd.f32 %v5452_v50, %v6774_v11  ;;  %v5455_v27 = vadd.f32 %v5454_v29, %v5453_v38  ;;  %v5566_v33 = vpop.f32.mrb[155].mxu1 }
 0x22f   : > { %v5567_v12 = vadd.f32 %v5566_v33, %v5565_v39 }
 0x230   : > { %v6922_v5 = vadd.f32 %v5564_v53, %v3476_v22  ;;  %v3479_v20 = vadd.f32 %v5455_v27, %v6779_v8 }
 0x232   : > { %v6925_v40 = vadd.f32 %v5567_v12, %v3479_v20  ;;  %v5456_v44 = vpop.f32.mrb[156].mxu0 }
 0x233   : > { %v5568_v0 = vpop.f32.mrb[156].mxu1  ;;  %v5457_v59 = vpop.f32.mrb[157].mxu0 }
 0x234   : > { %v5458_v2 = vadd.f32 %v5457_v59, %v5456_v44  ;;  %v5569_v51 = vpop.f32.mrb[157].mxu1  ;;  %v5459_v9 = vpop.f32.mrb[158].mxu0 }
 0x235   : > { %v5570_v34 = vadd.f32 %v5569_v51, %v5568_v0  ;;  %v5571_v55 = vpop.f32.mrb[158].mxu1  ;;  %v5460_v7 = vpop.f32.mrb[159].mxu0 }
 0x236   : > { %v3484_v11 = vadd.f32 %v5458_v2, %v6784_v54  ;;  %v5461_v28 = vadd.f32 %v5460_v7, %v5459_v9  ;;  %v5572_v42 = vpop.f32.mrb[159].mxu1 }
 0x237   : > { %v5573_v31 = vadd.f32 %v5572_v42, %v5571_v55 }
 0x238   : > { %v6928_v3 = vadd.f32 %v5570_v34, %v3484_v11  ;;  %v3487_v8 = vadd.f32 %v5461_v28, %v6789_v56 }
 0x23a   : > { %v6931_v4 = vadd.f32 %v5573_v31, %v3487_v8  ;;  %v5462_v17 = vpop.f32.mrb[160].mxu0 }
 0x23b   : > { %v5574_v36 = vpop.f32.mrb[160].mxu1  ;;  %v5463_v6 = vpop.f32.mrb[161].mxu0 }
 0x23c   : > { %v5464_v37 = vadd.f32 %v5463_v6, %v5462_v17  ;;  %v5575_v48 = vpop.f32.mrb[161].mxu1  ;;  %v5465_v50 = vpop.f32.mrb[162].mxu0 }
 0x23d   : > { %v5576_v16 = vadd.f32 %v5575_v48, %v5574_v36  ;;  %v5577_v38 = vpop.f32.mrb[162].mxu1  ;;  %v5466_v53 = vpop.f32.mrb[163].mxu0 }
 0x23e   : > { %v3492_v54 = vadd.f32 %v5464_v37, %v6794_v19  ;;  %v5467_v39 = vadd.f32 %v5466_v53, %v5465_v50  ;;  %v5578_v29 = vpop.f32.mrb[163].mxu1 }
 0x23f   : > { %v5579_v22 = vadd.f32 %v5578_v29, %v5577_v38 }
 0x240   : > { %v6934_v27 = vadd.f32 %v5576_v16, %v3492_v54  ;;  %v3495_v56 = vadd.f32 %v5467_v39, %v6799_v45 }
 0x242   : > { %v6937_v33 = vadd.f32 %v5579_v22, %v3495_v56  ;;  %v5468_v12 = vpop.f32.mrb[164].mxu0 }
 0x243   : > { %v5580_v20 = vpop.f32.mrb[164].mxu1  ;;  %v5469_v44 = vpop.f32.mrb[165].mxu0 }
 0x244   : > { %v5470_v0 = vadd.f32 %v5469_v44, %v5468_v12  ;;  %v5581_v59 = vpop.f32.mrb[165].mxu1  ;;  %v5471_v2 = vpop.f32.mrb[166].mxu0 }
 0x245   : > { %v5582_v51 = vadd.f32 %v5581_v59, %v5580_v20  ;;  %v5583_v9 = vpop.f32.mrb[166].mxu1  ;;  %v5472_v34 = vpop.f32.mrb[167].mxu0 }
 0x246   : > { %v3500_v19 = vadd.f32 %v5470_v0, %v6804_v41  ;;  %v5473_v55 = vadd.f32 %v5472_v34, %v5471_v2  ;;  %v5584_v7 = vpop.f32.mrb[167].mxu1 }
 0x247   : > { %v5585_v11 = vadd.f32 %v5584_v7, %v5583_v9 }
 0x248   : > { %v6940_v28 = vadd.f32 %v5582_v51, %v3500_v19  ;;  %v3503_v45 = vadd.f32 %v5473_v55, %v6809_v32 }
 0x24a   : > { %v6943_v42 = vadd.f32 %v5585_v11, %v3503_v45  ;;  %v5474_v31 = vpop.f32.mrb[168].mxu0 }
 0x24b   : > { %v5586_v8 = vpop.f32.mrb[168].mxu1  ;;  %v5475_v17 = vpop.f32.mrb[169].mxu0 }
 0x24c   : > { %v5476_v36 = vadd.f32 %v5475_v17, %v5474_v31  ;;  %v5587_v6 = vpop.f32.mrb[169].mxu1  ;;  %v5477_v37 = vpop.f32.mrb[170].mxu0 }
 0x24d   : > { %v5588_v48 = vadd.f32 %v5587_v6, %v5586_v8  ;;  %v5589_v50 = vpop.f32.mrb[170].mxu1  ;;  %v5478_v16 = vpop.f32.mrb[171].mxu0 }
 0x24e   : > { %v3508_v41 = vadd.f32 %v5476_v36, %v6814_v63  ;;  %v5479_v38 = vadd.f32 %v5478_v16, %v5477_v37  ;;  %v5590_v53 = vpop.f32.mrb[171].mxu1 }
 0x24f   : > { %v5591_v54 = vadd.f32 %v5590_v53, %v5589_v50 }
 0x250   : > { %v6946_v39 = vadd.f32 %v5588_v48, %v3508_v41  ;;  %v3511_v32 = vadd.f32 %v5479_v38, %v6819_v14 }
 0x252   : > { %v6949_v29 = vadd.f32 %v5591_v54, %v3511_v32  ;;  %v5480_v22 = vpop.f32.mrb[172].mxu0 }
 0x253   : > { %v5592_v56 = vpop.f32.mrb[172].mxu1  ;;  %v5481_v12 = vpop.f32.mrb[173].mxu0 }
 0x254   : > { %v5482_v20 = vadd.f32 %v5481_v12, %v5480_v22  ;;  %v5593_v44 = vpop.f32.mrb[173].mxu1  ;;  %v5483_v0 = vpop.f32.mrb[174].mxu0 }
 0x255   : > { %v5594_v59 = vadd.f32 %v5593_v44, %v5592_v56  ;;  %v5595_v2 = vpop.f32.mrb[174].mxu1  ;;  %v5484_v51 = vpop.f32.mrb[175].mxu0 }
 0x256   : > { %v3516_v63 = vadd.f32 %v5482_v20, %v6824_v23  ;;  %v5485_v9 = vadd.f32 %v5484_v51, %v5483_v0  ;;  %v5596_v34 = vpop.f32.mrb[175].mxu1 }
 0x257   : > { %v5597_v19 = vadd.f32 %v5596_v34, %v5595_v2 }
 0x258   : > { %v6952_v55 = vadd.f32 %v5594_v59, %v3516_v63  ;;  %v3519_v14 = vadd.f32 %v5485_v9, %v6829_v21 }
 0x25a   : > { %v6955_v7 = vadd.f32 %v5597_v19, %v3519_v14  ;;  %v5486_v11 = vpop.f32.mrb[176].mxu0 }
 0x25b   : > { %v5598_v45 = vpop.f32.mrb[176].mxu1  ;;  %v5487_v31 = vpop.f32.mrb[177].mxu0 }
 0x25c   : > { %v5488_v8 = vadd.f32 %v5487_v31, %v5486_v11  ;;  %v5599_v17 = vpop.f32.mrb[177].mxu1  ;;  %v5489_v36 = vpop.f32.mrb[178].mxu0 }
 0x25d   : > { %v5600_v6 = vadd.f32 %v5599_v17, %v5598_v45  ;;  %v5601_v37 = vpop.f32.mrb[178].mxu1  ;;  %v5490_v48 = vpop.f32.mrb[179].mxu0 }
 0x25e   : > { %v3524_v23 = vadd.f32 %v5488_v8, %v6834_v47  ;;  %v5491_v50 = vadd.f32 %v5490_v48, %v5489_v36  ;;  %v5602_v16 = vpop.f32.mrb[179].mxu1 }
 0x25f   : > { %v5603_v41 = vadd.f32 %v5602_v16, %v5601_v37 }
 0x260   : > { %v6958_v38 = vadd.f32 %v5600_v6, %v3524_v23  ;;  %v3527_v21 = vadd.f32 %v5491_v50, %v6839_v43 }
 0x262   : > { %v6961_v53 = vadd.f32 %v5603_v41, %v3527_v21  ;;  %v5492_v54 = vpop.f32.mrb[180].mxu0 }
 0x263   : > { %v5604_v32 = vpop.f32.mrb[180].mxu1  ;;  %v5493_v22 = vpop.f32.mrb[181].mxu0 }
 0x264   : > { %v5494_v56 = vadd.f32 %v5493_v22, %v5492_v54  ;;  %v5605_v12 = vpop.f32.mrb[181].mxu1  ;;  %v5495_v20 = vpop.f32.mrb[182].mxu0 }
 0x265   : > { %v5606_v44 = vadd.f32 %v5605_v12, %v5604_v32  ;;  %v5607_v0 = vpop.f32.mrb[182].mxu1  ;;  %v5496_v59 = vpop.f32.mrb[183].mxu0 }
 0x266   : > { %v3532_v47 = vadd.f32 %v5494_v56, %v6844_v10  ;;  %v5497_v2 = vadd.f32 %v5496_v59, %v5495_v20  ;;  %v5608_v51 = vpop.f32.mrb[183].mxu1 }
 0x267   : > { %v5609_v63 = vadd.f32 %v5608_v51, %v5607_v0 }
 0x268   : > { %v6964_v9 = vadd.f32 %v5606_v44, %v3532_v47  ;;  %v3535_v43 = vadd.f32 %v5497_v2, %v6849_v1 }
 0x26a   : > { %v6967_v34 = vadd.f32 %v5609_v63, %v3535_v43  ;;  %v5498_v19 = vpop.f32.mrb[184].mxu0 }
 0x26b   : > { %v5610_v14 = vpop.f32.mrb[184].mxu1  ;;  %v5499_v11 = vpop.f32.mrb[185].mxu0 }
 0x26c   : > { %v5500_v45 = vadd.f32 %v5499_v11, %v5498_v19  ;;  %v5611_v31 = vpop.f32.mrb[185].mxu1  ;;  %v5501_v8 = vpop.f32.mrb[186].mxu0 }
 0x26d   : > { %v5612_v17 = vadd.f32 %v5611_v31, %v5610_v14  ;;  %v5613_v36 = vpop.f32.mrb[186].mxu1  ;;  %v5502_v6 = vpop.f32.mrb[187].mxu0 }
 0x26e   : > { %v3540_v10 = vadd.f32 %v5500_v45, %v6854_v46  ;;  %v5503_v37 = vadd.f32 %v5502_v6, %v5501_v8  ;;  %v5614_v48 = vpop.f32.mrb[187].mxu1 }
 0x26f   : > { %v5615_v23 = vadd.f32 %v5614_v48, %v5613_v36 }
 0x270   : > { %v6970_v50 = vadd.f32 %v5612_v17, %v3540_v10  ;;  %v3543_v1 = vadd.f32 %v5503_v37, %v6859_v25 }
 0x272   : > { %v6973_v16 = vadd.f32 %v5615_v23, %v3543_v1  ;;  %v5504_v41 = vpop.f32.mrb[188].mxu0 }
 0x273   : > { %v5616_v21 = vpop.f32.mrb[188].mxu1  ;;  %v5505_v54 = vpop.f32.mrb[189].mxu0 }
 0x274   : > { %v5506_v32 = vadd.f32 %v5505_v54, %v5504_v41  ;;  %v5617_v22 = vpop.f32.mrb[189].mxu1  ;;  %v5507_v56 = vpop.f32.mrb[190].mxu0 }
 0x275   : > { %v5618_v12 = vadd.f32 %v5617_v22, %v5616_v21  ;;  %v5619_v20 = vpop.f32.mrb[190].mxu1  ;;  %v5508_v44 = vpop.f32.mrb[191].mxu0 }
 0x276   : > { %v3548_v46 = vadd.f32 %v5506_v32, %v6864_v18  ;;  %v5509_v0 = vadd.f32 %v5508_v44, %v5507_v56  ;;  %v5620_v59 = vpop.f32.mrb[191].mxu1 }
 0x277   : > { %v5621_v47 = vadd.f32 %v5620_v59, %v5619_v20 }
 0x278   : > { %v6976_v2 = vadd.f32 %v5618_v12, %v3548_v46  ;;  %v3551_v25 = vadd.f32 %v5509_v0, %v6869_v49 }
 0x27a   : > { %v6979_v51 = vadd.f32 %v5621_v47, %v3551_v25  ;;  %v5638_v63 = vpop.f32.mrb[192].mxu0 }
 0x27b   : > { %v5750_v43 = vpop.f32.mrb[192].mxu1  ;;  %v5639_v19 = vpop.f32.mrb[193].mxu0 }
 0x27c   : > { %v5640_v14 = vadd.f32 %v5639_v19, %v5638_v63  ;;  %v5751_v11 = vpop.f32.mrb[193].mxu1  ;;  %v5641_v45 = vpop.f32.mrb[194].mxu0 }
 0x27d   : > { %v5752_v31 = vadd.f32 %v5751_v11, %v5750_v43  ;;  %v5753_v8 = vpop.f32.mrb[194].mxu1  ;;  %v5642_v17 = vpop.f32.mrb[195].mxu0 }
 0x27e   : > { %v3750_v18 = vadd.f32 %v5640_v14, %v6874_v58  ;;  %v5643_v36 = vadd.f32 %v5642_v17, %v5641_v45  ;;  %v5754_v6 = vpop.f32.mrb[195].mxu1 }
 0x27f   : > { %v5755_v10 = vadd.f32 %v5754_v6, %v5753_v8 }
 0x280   : > { %v3911_v37 = vadd.f32 %v5752_v31, %v3750_v18  ;;  %v3753_v49 = vadd.f32 %v5643_v36, %v6879_v15 }
 0x282   : > { %v3914_v48 = vadd.f32 %v5755_v10, %v3753_v49  ;;  %v5644_v23 = vpop.f32.mrb[196].mxu0  ;;  %v4234_v1 = vmul.f32 %v3911_v37, %v3911_v37 }
 0x283   : > { %v5756_v41 = vpop.f32.mrb[196].mxu1  ;;  %v5645_v21 = vpop.f32.mrb[197].mxu0 }
 0x284   : > { %v4858_v54 = vpack.c.bf16 %v3914_v48, %v3911_v37  ;;  %v4197_v58 = vadd.f32 %v3914_v48, %v3911_v37  ;;  %v4235_v32 = vmul.f32 %v3914_v48, %v3914_v48  ;;  %v5646_v22 = vadd.f32 %v5645_v21, %v5644_v23  ;;  %v5757_v56 = vpop.f32.mrb[197].mxu1  ;;  %v5647_v12 = vpop.f32.mrb[198].mxu0 }
 0x285   : > { %v5758_v20 = vadd.f32 %v5757_v56, %v5756_v41  ;;  %v5759_v15 = vpop.f32.mrb[198].mxu1  ;;  %v5648_v44 = vpop.f32.mrb[199].mxu0 }
 0x286   : > { %4859 = vst [vmem:[%s6987_s19] sm:$0xff] %v4858_v54   ;;  %v4266_v46 = vadd.f32 %v4235_v32, %v4234_v1  ;;  %v3758_v0 = vadd.f32 %v5646_v22, %v6884_v24  ;;  %v5649_v59 = vadd.f32 %v5648_v44, %v5647_v12  ;;  %v5760_v47 = vpop.f32.mrb[199].mxu1 }
 0x287   : > { %v5761_v25 = vadd.f32 %v5760_v47, %v5759_v15 }
 0x288   : > { %v3919_v63 = vadd.f32 %v5758_v20, %v3758_v0  ;;  %v3761_v43 = vadd.f32 %v5649_v59, %v6889_v52 }
 0x28a   : > { %v4198_v19 = vadd.f32 %v4197_v58, %v3919_v63  ;;  %v4236_v14 = vmul.f32 %v3919_v63, %v3919_v63  ;;  %v3922_v11 = vadd.f32 %v5761_v25, %v3761_v43  ;;  %v5650_v45 = vpop.f32.mrb[200].mxu0 }
 0x28b   : > { %v5762_v31 = vpop.f32.mrb[200].mxu1  ;;  %v5651_v8 = vpop.f32.mrb[201].mxu0 }
 0x28c   : > { %v4267_v17 = vadd.f32 %v4266_v46, %v4236_v14  ;;  %v4863_v18 = vpack.c.bf16 %v3922_v11, %v3919_v63  ;;  %v4199_v36 = vadd.f32 %v4198_v19, %v3922_v11  ;;  %v4237_v6 = vmul.f32 %v3922_v11, %v3922_v11  ;;  %v5763_v10 = vpop.f32.mrb[201].mxu1  ;;  %v5653_v37 = vpop.f32.mrb[202].mxu0 }
 0x28d   : > { %v5652_v24 = vadd.f32 %v5651_v8, %v5650_v45  ;;  %v5764_v49 = vadd.f32 %v5763_v10, %v5762_v31  ;;  %v5765_v48 = vpop.f32.mrb[202].mxu1  ;;  %v5654_v23 = vpop.f32.mrb[203].mxu0 }
 0x28e   : > { %4935 = vst [vmem:[%s6987_s19 + $0x8] sm:$0xff] %v4863_v18   ;;  %v4268_v1 = vadd.f32 %v4267_v17, %v4237_v6  ;;  %v5655_v52 = vadd.f32 %v5654_v23, %v5653_v37  ;;  %v5766_v41 = vpop.f32.mrb[203].mxu1 }
 0x28f   : > { %v3766_v21 = vadd.f32 %v5652_v24, %v6894_v57  ;;  %v5767_v54 = vadd.f32 %v5766_v41, %v5765_v48 }
 0x290   : > { %v3769_v58 = vadd.f32 %v5655_v52, %v6899_v26 }
 0x291   : > { %v3927_v32 = vadd.f32 %v5764_v49, %v3766_v21 }
 0x292   : > { %v3930_v22 = vadd.f32 %v5767_v54, %v3769_v58  ;;  %v5656_v56 = vpop.f32.mrb[204].mxu0 }
 0x293   : > { %v4200_v12 = vadd.f32 %v4199_v36, %v3927_v32  ;;  %v4238_v20 = vmul.f32 %v3927_v32, %v3927_v32  ;;  %v5768_v15 = vpop.f32.mrb[204].mxu1  ;;  %v5657_v44 = vpop.f32.mrb[205].mxu0 }
 0x294   : > { %v4868_v46 = vpack.c.bf16 %v3930_v22, %v3927_v32  ;;  %v4239_v0 = vmul.f32 %v3930_v22, %v3930_v22  ;;  %v5658_v59 = vadd.f32 %v5657_v44, %v5656_v56  ;;  %v5769_v47 = vpop.f32.mrb[205].mxu1  ;;  %v5659_v25 = vpop.f32.mrb[206].mxu0 }
 0x295   : > { %v4269_v63 = vadd.f32 %v4268_v1, %v4238_v20  ;;  %v4201_v43 = vadd.f32 %v4200_v12, %v3930_v22  ;;  %v5770_v19 = vadd.f32 %v5769_v47, %v5768_v15  ;;  %v5771_v57 = vpop.f32.mrb[206].mxu1  ;;  %v5660_v14 = vpop.f32.mrb[207].mxu0 }
 0x296   : > { %4936 = vst [vmem:[%s6987_s19 + $0x10] sm:$0xff] %v4868_v46   ;;  %v3774_v26 = vadd.f32 %v5658_v59, %v6904_v61  ;;  %v5661_v11 = vadd.f32 %v5660_v14, %v5659_v25  ;;  %v5772_v45 = vpop.f32.mrb[207].mxu1 }
 0x297   : > { %v4270_v31 = vadd.f32 %v4269_v63, %v4239_v0  ;;  %v5773_v8 = vadd.f32 %v5772_v45, %v5771_v57 }
 0x298   : > { %v3935_v17 = vadd.f32 %v5770_v19, %v3774_v26  ;;  %v3777_v18 = vadd.f32 %v5661_v11, %v6907_v30 }
 0x29a   : > { %v4202_v36 = vadd.f32 %v4201_v43, %v3935_v17  ;;  %v4240_v6 = vmul.f32 %v3935_v17, %v3935_v17  ;;  %v3938_v10 = vadd.f32 %v5773_v8, %v3777_v18  ;;  %v5662_v37 = vpop.f32.mrb[208].mxu0 }
 0x29b   : > { %v5774_v24 = vpop.f32.mrb[208].mxu1  ;;  %v5663_v49 = vpop.f32.mrb[209].mxu0 }
 0x29c   : > { %v4271_v48 = vadd.f32 %v4270_v31, %v4240_v6  ;;  %v4873_v23 = vpack.c.bf16 %v3938_v10, %v3935_v17  ;;  %v4203_v1 = vadd.f32 %v4202_v36, %v3938_v10  ;;  %v4241_v52 = vmul.f32 %v3938_v10, %v3938_v10  ;;  %v5775_v41 = vpop.f32.mrb[209].mxu1  ;;  %v5665_v61 = vpop.f32.mrb[210].mxu0 }
 0x29d   : > { %v5664_v21 = vadd.f32 %v5663_v49, %v5662_v37  ;;  %v5776_v54 = vadd.f32 %v5775_v41, %v5774_v24  ;;  %v5777_v58 = vpop.f32.mrb[210].mxu1  ;;  %v5666_v32 = vpop.f32.mrb[211].mxu0 }
 0x29e   : > { %4937 = vst [vmem:[%s6987_s19 + $0x18] sm:$0xff] %v4873_v23   ;;  %v4272_v22 = vadd.f32 %v4271_v48, %v4241_v52  ;;  %v5667_v30 = vadd.f32 %v5666_v32, %v5665_v61  ;;  %v5778_v56 = vpop.f32.mrb[211].mxu1 }
 0x29f   : > { %v3782_v12 = vadd.f32 %v5664_v21, %v6910_v60  ;;  %v5779_v20 = vadd.f32 %v5778_v56, %v5777_v58 }
 0x2a0   : > { %v3785_v15 = vadd.f32 %v5667_v30, %v6913_v35 }
 0x2a1   : > { %v3943_v44 = vadd.f32 %v5776_v54, %v3782_v12 }
 0x2a2   : > { %v3946_v46 = vadd.f32 %v5779_v20, %v3785_v15  ;;  %v5668_v0 = vpop.f32.mrb[212].mxu0 }
 0x2a3   : > { %v4204_v59 = vadd.f32 %v4203_v1, %v3943_v44  ;;  %v4242_v47 = vmul.f32 %v3943_v44, %v3943_v44  ;;  %v5780_v25 = vpop.f32.mrb[212].mxu1  ;;  %v5669_v63 = vpop.f32.mrb[213].mxu0 }
 0x2a4   : > { %v4878_v43 = vpack.c.bf16 %v3946_v46, %v3943_v44  ;;  %v4243_v19 = vmul.f32 %v3946_v46, %v3946_v46  ;;  %v5670_v57 = vadd.f32 %v5669_v63, %v5668_v0  ;;  %v5781_v14 = vpop.f32.mrb[213].mxu1  ;;  %v5671_v26 = vpop.f32.mrb[214].mxu0 }
 0x2a5   : > { %v4273_v11 = vadd.f32 %v4272_v22, %v4242_v47  ;;  %v4205_v45 = vadd.f32 %v4204_v59, %v3946_v46  ;;  %v5782_v31 = vadd.f32 %v5781_v14, %v5780_v25  ;;  %v5783_v60 = vpop.f32.mrb[214].mxu1  ;;  %v5672_v8 = vpop.f32.mrb[215].mxu0 }
 0x2a6   : > { %4938 = vst [vmem:[%s6987_s19 + $0x20] sm:$0xff] %v4878_v43   ;;  %v3790_v35 = vadd.f32 %v5670_v57, %v6916_v13  ;;  %v5673_v17 = vadd.f32 %v5672_v8, %v5671_v26  ;;  %v5784_v18 = vpop.f32.mrb[215].mxu1 }
 0x2a7   : > { %v4274_v36 = vadd.f32 %v4273_v11, %v4243_v19  ;;  %v5785_v6 = vadd.f32 %v5784_v18, %v5783_v60 }
 0x2a8   : > { %v3951_v10 = vadd.f32 %v5782_v31, %v3790_v35  ;;  %v3793_v37 = vadd.f32 %v5673_v17, %v6919_v62 }
 0x2aa   : > { %v4206_v24 = vadd.f32 %v4205_v45, %v3951_v10  ;;  %v4244_v49 = vmul.f32 %v3951_v10, %v3951_v10  ;;  %v3954_v48 = vadd.f32 %v5785_v6, %v3793_v37  ;;  %v5674_v23 = vpop.f32.mrb[216].mxu0 }
 0x2ab   : > { %v5786_v1 = vpop.f32.mrb[216].mxu1  ;;  %v5675_v52 = vpop.f32.mrb[217].mxu0 }
 0x2ac   : > { %v4275_v41 = vadd.f32 %v4274_v36, %v4244_v49  ;;  %v4883_v61 = vpack.c.bf16 %v3954_v48, %v3951_v10  ;;  %v4207_v21 = vadd.f32 %v4206_v24, %v3954_v48  ;;  %v4245_v54 = vmul.f32 %v3954_v48, %v3954_v48  ;;  %v5787_v58 = vpop.f32.mrb[217].mxu1  ;;  %v5677_v13 = vpop.f32.mrb[218].mxu0 }
 0x2ad   : > { %v5676_v32 = vadd.f32 %v5675_v52, %v5674_v23  ;;  %v5788_v22 = vadd.f32 %v5787_v58, %v5786_v1  ;;  %v5789_v30 = vpop.f32.mrb[218].mxu1  ;;  %v5678_v56 = vpop.f32.mrb[219].mxu0 }
 0x2ae   : > { %4939 = vst [vmem:[%s6987_s19 + $0x28] sm:$0xff] %v4883_v61   ;;  %v4276_v12 = vadd.f32 %v4275_v41, %v4245_v54  ;;  %v5679_v62 = vadd.f32 %v5678_v56, %v5677_v13  ;;  %v5790_v20 = vpop.f32.mrb[219].mxu1 }
 0x2af   : > { %v3798_v15 = vadd.f32 %v5676_v32, %v6922_v5  ;;  %v5791_v44 = vadd.f32 %v5790_v20, %v5789_v30 }
 0x2b0   : > { %v3801_v46 = vadd.f32 %v5679_v62, %v6925_v40 }
 0x2b1   : > { %v3959_v0 = vadd.f32 %v5788_v22, %v3798_v15 }
 0x2b2   : > { %v3962_v59 = vadd.f32 %v5791_v44, %v3801_v46  ;;  %v5680_v47 = vpop.f32.mrb[220].mxu0 }
 0x2b3   : > { %v4208_v25 = vadd.f32 %v4207_v21, %v3959_v0  ;;  %v4246_v63 = vmul.f32 %v3959_v0, %v3959_v0  ;;  %v5792_v43 = vpop.f32.mrb[220].mxu1  ;;  %v5681_v19 = vpop.f32.mrb[221].mxu0 }
 0x2b4   : > { %v4888_v57 = vpack.c.bf16 %v3962_v59, %v3959_v0  ;;  %v4247_v14 = vmul.f32 %v3962_v59, %v3962_v59  ;;  %v5682_v26 = vadd.f32 %v5681_v19, %v5680_v47  ;;  %v5793_v11 = vpop.f32.mrb[221].mxu1  ;;  %v5683_v45 = vpop.f32.mrb[222].mxu0 }
 0x2b5   : > { %v4277_v31 = vadd.f32 %v4276_v12, %v4246_v63  ;;  %v4209_v60 = vadd.f32 %v4208_v25, %v3962_v59  ;;  %v5794_v8 = vadd.f32 %v5793_v11, %v5792_v43  ;;  %v5795_v5 = vpop.f32.mrb[222].mxu1  ;;  %v5684_v35 = vpop.f32.mrb[223].mxu0 }
 0x2b6   : > { %4940 = vst [vmem:[%s6987_s19 + $0x30] sm:$0xff] %v4888_v57   ;;  %v3806_v40 = vadd.f32 %v5682_v26, %v6928_v3  ;;  %v5685_v17 = vadd.f32 %v5684_v35, %v5683_v45  ;;  %v5796_v18 = vpop.f32.mrb[223].mxu1 }
 0x2b7   : > { %v4278_v36 = vadd.f32 %v4277_v31, %v4247_v14  ;;  %v5797_v6 = vadd.f32 %v5796_v18, %v5795_v5 }
 0x2b8   : > { %v3967_v10 = vadd.f32 %v5794_v8, %v3806_v40  ;;  %v3809_v37 = vadd.f32 %v5685_v17, %v6931_v4 }
 0x2ba   : > { %v4210_v24 = vadd.f32 %v4209_v60, %v3967_v10  ;;  %v4248_v49 = vmul.f32 %v3967_v10, %v3967_v10  ;;  %v3970_v48 = vadd.f32 %v5797_v6, %v3809_v37  ;;  %v5686_v23 = vpop.f32.mrb[224].mxu0 }
 0x2bb   : > { %v5798_v1 = vpop.f32.mrb[224].mxu1  ;;  %v5687_v52 = vpop.f32.mrb[225].mxu0 }
 0x2bc   : > { %v4279_v41 = vadd.f32 %v4278_v36, %v4248_v49  ;;  %v4893_v61 = vpack.c.bf16 %v3970_v48, %v3967_v10  ;;  %v4211_v21 = vadd.f32 %v4210_v24, %v3970_v48  ;;  %v4249_v54 = vmul.f32 %v3970_v48, %v3970_v48  ;;  %v5799_v58 = vpop.f32.mrb[225].mxu1  ;;  %v5689_v3 = vpop.f32.mrb[226].mxu0 }
 0x2bd   : > { %v5688_v13 = vadd.f32 %v5687_v52, %v5686_v23  ;;  %v5800_v32 = vadd.f32 %v5799_v58, %v5798_v1  ;;  %v5801_v22 = vpop.f32.mrb[226].mxu1  ;;  %v5690_v30 = vpop.f32.mrb[227].mxu0 }
 0x2be   : > { %4941 = vst [vmem:[%s6987_s19 + $0x38] sm:$0xff] %v4893_v61   ;;  %v4280_v56 = vadd.f32 %v4279_v41, %v4249_v54  ;;  %v5691_v4 = vadd.f32 %v5690_v30, %v5689_v3  ;;  %v5802_v12 = vpop.f32.mrb[227].mxu1 }
 0x2bf   : > { %v3814_v62 = vadd.f32 %v5688_v13, %v6934_v27  ;;  %v5803_v20 = vadd.f32 %v5802_v12, %v5801_v22 }
 0x2c0   : > { %v3817_v15 = vadd.f32 %v5691_v4, %v6937_v33 }
 0x2c1   : > { %v3975_v44 = vadd.f32 %v5800_v32, %v3814_v62 }
 0x2c2   : > { %v3978_v46 = vadd.f32 %v5803_v20, %v3817_v15  ;;  %v5692_v0 = vpop.f32.mrb[228].mxu0 }
 0x2c3   : > { %v4212_v59 = vadd.f32 %v4211_v21, %v3975_v44  ;;  %v4250_v47 = vmul.f32 %v3975_v44, %v3975_v44  ;;  %v5804_v25 = vpop.f32.mrb[228].mxu1  ;;  %v5693_v63 = vpop.f32.mrb[229].mxu0 }
 0x2c4   : > { %v4898_v43 = vpack.c.bf16 %v3978_v46, %v3975_v44  ;;  %v4251_v19 = vmul.f32 %v3978_v46, %v3978_v46  ;;  %v5694_v57 = vadd.f32 %v5693_v63, %v5692_v0  ;;  %v5805_v14 = vpop.f32.mrb[229].mxu1  ;;  %v5695_v26 = vpop.f32.mrb[230].mxu0 }
 0x2c5   : > { %v4281_v11 = vadd.f32 %v4280_v56, %v4250_v47  ;;  %v4213_v45 = vadd.f32 %v4212_v59, %v3978_v46  ;;  %v5806_v31 = vadd.f32 %v5805_v14, %v5804_v25  ;;  %v5807_v27 = vpop.f32.mrb[230].mxu1  ;;  %v5696_v60 = vpop.f32.mrb[231].mxu0 }
 0x2c6   : > { %4942 = vst [vmem:[%s6987_s19 + $0x40] sm:$0xff] %v4898_v43   ;;  %v3822_v33 = vadd.f32 %v5694_v57, %v6940_v28  ;;  %v5697_v8 = vadd.f32 %v5696_v60, %v5695_v26  ;;  %v5808_v5 = vpop.f32.mrb[231].mxu1 }
 0x2c7   : > { %v4282_v35 = vadd.f32 %v4281_v11, %v4251_v19  ;;  %v5809_v40 = vadd.f32 %v5808_v5, %v5807_v27 }
 0x2c8   : > { %v3983_v17 = vadd.f32 %v5806_v31, %v3822_v33  ;;  %v3825_v18 = vadd.f32 %v5697_v8, %v6943_v42 }
 0x2ca   : > { %v4214_v36 = vadd.f32 %v4213_v45, %v3983_v17  ;;  %v4252_v6 = vmul.f32 %v3983_v17, %v3983_v17  ;;  %v3986_v10 = vadd.f32 %v5809_v40, %v3825_v18  ;;  %v5698_v37 = vpop.f32.mrb[232].mxu0 }
 0x2cb   : > { %v5810_v24 = vpop.f32.mrb[232].mxu1  ;;  %v5699_v49 = vpop.f32.mrb[233].mxu0 }
 0x2cc   : > { %v4283_v48 = vadd.f32 %v4282_v35, %v4252_v6  ;;  %v4903_v23 = vpack.c.bf16 %v3986_v10, %v3983_v17  ;;  %v4215_v1 = vadd.f32 %v4214_v36, %v3986_v10  ;;  %v4253_v52 = vmul.f32 %v3986_v10, %v3986_v10  ;;  %v5811_v41 = vpop.f32.mrb[233].mxu1  ;;  %v5701_v28 = vpop.f32.mrb[234].mxu0 }
 0x2cd   : > { %v5700_v61 = vadd.f32 %v5699_v49, %v5698_v37  ;;  %v5812_v21 = vadd.f32 %v5811_v41, %v5810_v24  ;;  %v5813_v54 = vpop.f32.mrb[234].mxu1  ;;  %v5702_v58 = vpop.f32.mrb[235].mxu0 }
 0x2ce   : > { %4943 = vst [vmem:[%s6987_s19 + $0x48] sm:$0xff] %v4903_v23   ;;  %v4284_v3 = vadd.f32 %v4283_v48, %v4253_v52  ;;  %v5703_v42 = vadd.f32 %v5702_v58, %v5701_v28  ;;  %v5814_v13 = vpop.f32.mrb[235].mxu1 }
 0x2cf   : > { %v3830_v32 = vadd.f32 %v5700_v61, %v6946_v39  ;;  %v5815_v22 = vadd.f32 %v5814_v13, %v5813_v54 }
 0x2d0   : > { %v3833_v30 = vadd.f32 %v5703_v42, %v6949_v29 }
 0x2d1   : > { %v3991_v56 = vadd.f32 %v5812_v21, %v3830_v32 }
 0x2d2   : > { %v3994_v4 = vadd.f32 %v5815_v22, %v3833_v30  ;;  %v5704_v12 = vpop.f32.mrb[236].mxu0 }
 0x2d3   : > { %v4216_v62 = vadd.f32 %v4215_v1, %v3991_v56  ;;  %v4254_v20 = vmul.f32 %v3991_v56, %v3991_v56  ;;  %v5816_v15 = vpop.f32.mrb[236].mxu1  ;;  %v5705_v44 = vpop.f32.mrb[237].mxu0 }
 0x2d4   : > { %v4908_v46 = vpack.c.bf16 %v3994_v4, %v3991_v56  ;;  %v4255_v0 = vmul.f32 %v3994_v4, %v3994_v4  ;;  %v5706_v59 = vadd.f32 %v5705_v44, %v5704_v12  ;;  %v5817_v47 = vpop.f32.mrb[237].mxu1  ;;  %v5707_v25 = vpop.f32.mrb[238].mxu0 }
 0x2d5   : > { %v4285_v63 = vadd.f32 %v4284_v3, %v4254_v20  ;;  %v4217_v43 = vadd.f32 %v4216_v62, %v3994_v4  ;;  %v5818_v19 = vadd.f32 %v5817_v47, %v5816_v15  ;;  %v5819_v39 = vpop.f32.mrb[238].mxu1  ;;  %v5708_v57 = vpop.f32.mrb[239].mxu0 }
 0x2d6   : > { %4944 = vst [vmem:[%s6987_s19 + $0x50] sm:$0xff] %v4908_v46   ;;  %v3838_v29 = vadd.f32 %v5706_v59, %v6952_v55  ;;  %v5709_v14 = vadd.f32 %v5708_v57, %v5707_v25  ;;  %v5820_v26 = vpop.f32.mrb[239].mxu1 }
 0x2d7   : > { %v4286_v11 = vadd.f32 %v4285_v63, %v4255_v0  ;;  %v5821_v45 = vadd.f32 %v5820_v26, %v5819_v39 }
 0x2d8   : > { %v3999_v31 = vadd.f32 %v5818_v19, %v3838_v29  ;;  %v3841_v27 = vadd.f32 %v5709_v14, %v6955_v7 }
 0x2da   : > { %v4218_v60 = vadd.f32 %v4217_v43, %v3999_v31  ;;  %v4256_v33 = vmul.f32 %v3999_v31, %v3999_v31  ;;  %v4002_v8 = vadd.f32 %v5821_v45, %v3841_v27  ;;  %v5710_v5 = vpop.f32.mrb[240].mxu0 }
 0x2db   : > { %v5822_v35 = vpop.f32.mrb[240].mxu1  ;;  %v5711_v40 = vpop.f32.mrb[241].mxu0 }
 0x2dc   : > { %v4287_v17 = vadd.f32 %v4286_v11, %v4256_v33  ;;  %v4913_v18 = vpack.c.bf16 %v4002_v8, %v3999_v31  ;;  %v4219_v36 = vadd.f32 %v4218_v60, %v4002_v8  ;;  %v4257_v6 = vmul.f32 %v4002_v8, %v4002_v8  ;;  %v5823_v10 = vpop.f32.mrb[241].mxu1  ;;  %v5713_v55 = vpop.f32.mrb[242].mxu0 }
 0x2dd   : > { %v5712_v37 = vadd.f32 %v5711_v40, %v5710_v5  ;;  %v5824_v24 = vadd.f32 %v5823_v10, %v5822_v35  ;;  %v5825_v49 = vpop.f32.mrb[242].mxu1  ;;  %v5714_v48 = vpop.f32.mrb[243].mxu0 }
 0x2de   : > { %4945 = vst [vmem:[%s6987_s19 + $0x58] sm:$0xff] %v4913_v18   ;;  %v4288_v23 = vadd.f32 %v4287_v17, %v4257_v6  ;;  %v5715_v7 = vadd.f32 %v5714_v48, %v5713_v55  ;;  %v5826_v1 = vpop.f32.mrb[243].mxu1 }
 0x2df   : > { %v3846_v52 = vadd.f32 %v5712_v37, %v6958_v38  ;;  %v5827_v41 = vadd.f32 %v5826_v1, %v5825_v49 }
 0x2e0   : > { %v3849_v28 = vadd.f32 %v5715_v7, %v6961_v53 }
 0x2e1   : > { %v4007_v61 = vadd.f32 %v5824_v24, %v3846_v52 }
 0x2e2   : > { %v4010_v21 = vadd.f32 %v5827_v41, %v3849_v28  ;;  %v5716_v54 = vpop.f32.mrb[244].mxu0 }
 0x2e3   : > { %v4220_v58 = vadd.f32 %v4219_v36, %v4007_v61  ;;  %v4258_v3 = vmul.f32 %v4007_v61, %v4007_v61  ;;  %v5828_v42 = vpop.f32.mrb[244].mxu1  ;;  %v5717_v13 = vpop.f32.mrb[245].mxu0 }
 0x2e4   : > { %v4918_v32 = vpack.c.bf16 %v4010_v21, %v4007_v61  ;;  %v4259_v22 = vmul.f32 %v4010_v21, %v4010_v21  ;;  %v5718_v30 = vadd.f32 %v5717_v13, %v5716_v54  ;;  %v5829_v56 = vpop.f32.mrb[245].mxu1  ;;  %v5719_v4 = vpop.f32.mrb[246].mxu0 }
 0x2e5   : > { %v4289_v12 = vadd.f32 %v4288_v23, %v4258_v3  ;;  %v4221_v62 = vadd.f32 %v4220_v58, %v4010_v21  ;;  %v5830_v20 = vadd.f32 %v5829_v56, %v5828_v42  ;;  %v5831_v38 = vpop.f32.mrb[246].mxu1  ;;  %v5720_v15 = vpop.f32.mrb[247].mxu0 }
 0x2e6   : > { %4946 = vst [vmem:[%s6987_s19 + $0x60] sm:$0xff] %v4918_v32   ;;  %v3854_v53 = vadd.f32 %v5718_v30, %v6964_v9  ;;  %v5721_v44 = vadd.f32 %v5720_v15, %v5719_v4  ;;  %v5832_v46 = vpop.f32.mrb[247].mxu1 }
 0x2e7   : > { %v4290_v0 = vadd.f32 %v4289_v12, %v4259_v22  ;;  %v5833_v59 = vadd.f32 %v5832_v46, %v5831_v38 }
 0x2e8   : > { %v4015_v47 = vadd.f32 %v5830_v20, %v3854_v53  ;;  %v3857_v25 = vadd.f32 %v5721_v44, %v6967_v34 }
 0x2ea   : > { %v4222_v63 = vadd.f32 %v4221_v62, %v4015_v47  ;;  %v4260_v43 = vmul.f32 %v4015_v47, %v4015_v47  ;;  %v4018_v19 = vadd.f32 %v5833_v59, %v3857_v25  ;;  %v5722_v39 = vpop.f32.mrb[248].mxu0 }
 0x2eb   : > { %v5834_v57 = vpop.f32.mrb[248].mxu1  ;;  %v5723_v29 = vpop.f32.mrb[249].mxu0 }
 0x2ec   : > { %v4291_v14 = vadd.f32 %v4290_v0, %v4260_v43  ;;  %v4923_v26 = vpack.c.bf16 %v4018_v19, %v4015_v47  ;;  %v4223_v11 = vadd.f32 %v4222_v63, %v4018_v19  ;;  %v4261_v45 = vmul.f32 %v4018_v19, %v4018_v19  ;;  %v5835_v31 = vpop.f32.mrb[249].mxu1  ;;  %v5725_v9 = vpop.f32.mrb[250].mxu0 }
 0x2ed   : > { %v5724_v27 = vadd.f32 %v5723_v29, %v5722_v39  ;;  %v5836_v60 = vadd.f32 %v5835_v31, %v5834_v57  ;;  %v5837_v33 = vpop.f32.mrb[250].mxu1  ;;  %v5726_v8 = vpop.f32.mrb[251].mxu0 }
 0x2ee   : > { %4947 = vst [vmem:[%s6987_s19 + $0x68] sm:$0xff] %v4923_v26   ;;  %v4292_v5 = vadd.f32 %v4291_v14, %v4261_v45  ;;  %v5727_v34 = vadd.f32 %v5726_v8, %v5725_v9  ;;  %v5838_v35 = vpop.f32.mrb[251].mxu1 }
 0x2ef   : > { %v3862_v40 = vadd.f32 %v5724_v27, %v6970_v50  ;;  %v5839_v17 = vadd.f32 %v5838_v35, %v5837_v33 }
 0x2f0   : > { %v3865_v18 = vadd.f32 %v5727_v34, %v6973_v16 }
 0x2f1   : > { %v4023_v36 = vadd.f32 %v5836_v60, %v3862_v40 }
 0x2f2   : > { %v4026_v6 = vadd.f32 %v5839_v17, %v3865_v18  ;;  %v5728_v10 = vpop.f32.mrb[252].mxu0 }
 0x2f3   : > { %v4224_v55 = vadd.f32 %v4223_v11, %v4023_v36  ;;  %v4262_v37 = vmul.f32 %v4023_v36, %v4023_v36  ;;  %v5840_v24 = vpop.f32.mrb[252].mxu1  ;;  %v5729_v49 = vpop.f32.mrb[253].mxu0 }
 0x2f4   : > { %v4928_v48 = vpack.c.bf16 %v4026_v6, %v4023_v36  ;;  %v4263_v23 = vmul.f32 %v4026_v6, %v4026_v6  ;;  %v5730_v7 = vadd.f32 %v5729_v49, %v5728_v10  ;;  %v5841_v1 = vpop.f32.mrb[253].mxu1  ;;  %v5731_v52 = vpop.f32.mrb[254].mxu0 }
 0x2f5   : > { %v4293_v41 = vadd.f32 %v4292_v5, %v4262_v37  ;;  %v4225_v28 = vadd.f32 %v4224_v55, %v4026_v6  ;;  %v5842_v61 = vadd.f32 %v5841_v1, %v5840_v24  ;;  %v5843_v50 = vpop.f32.mrb[254].mxu1  ;;  %v5732_v21 = vpop.f32.mrb[255].mxu0 }
 0x2f6   : > { %4948 = vst [vmem:[%s6987_s19 + $0x70] sm:$0xff] %v4928_v48   ;;  %v3870_v16 = vadd.f32 %v5730_v7, %v6976_v2  ;;  %v5733_v54 = vadd.f32 %v5732_v21, %v5731_v52  ;;  %v5844_v58 = vpop.f32.mrb[255].mxu1 }
 0x2f7   : > { %v4294_v3 = vadd.f32 %v4293_v41, %v4263_v23  ;;  %v5845_v42 = vadd.f32 %v5844_v58, %v5843_v50 }
 0x2f8   : > { %v4031_v13 = vadd.f32 %v5842_v61, %v3870_v16  ;;  %v3873_v32 = vadd.f32 %v5733_v54, %v6979_v51 }
 0x2fa   : > { %v4226_v22 = vadd.f32 %v4225_v28, %v4031_v13  ;;  %v4264_v30 = vmul.f32 %v4031_v13, %v4031_v13  ;;  %v4034_v56 = vadd.f32 %v5845_v42, %v3873_v32 }
 0x2fc   : > { %v4295_v4 = vadd.f32 %v4294_v3, %v4264_v30  ;;  %v4933_v12 = vpack.c.bf16 %v4034_v56, %v4031_v13  ;;  %v4227_v62 = vadd.f32 %v4226_v22, %v4034_v56  ;;  %v4265_v20 = vmul.f32 %v4034_v56, %v4034_v56 }
 0x2fe   : > { %4949 = vst [vmem:[%s6987_s19 + $0x78] sm:$0xff] %v4933_v12   ;;  %v4228_v38 = vrot.slane %v4227_v62, 4  ;;  %v4296_v15 = vadd.f32 %v4295_v4, %v4265_v20 }
 0x300   : > { %v4229_v2 = vadd.f32 %v4228_v38, %v4227_v62  ;;  %v4297_v53 = vrot.slane %v4296_v15, 4 }
 0x302   : > { %v4230_v44 = vrot.slane %v4229_v2, 2  ;;  %v4298_v46 = vadd.f32 %v4297_v53, %v4296_v15 }
 0x304   : > { %v4231_v0 = vadd.f32 %v4230_v44, %v4229_v2  ;;  %v4299_v59 = vrot.slane %v4298_v46, 2 }
 0x306   : > { %v4232_v51 = vrot.slane %v4231_v0, 1  ;;  %v4300_v47 = vadd.f32 %v4299_v59, %v4298_v46 }
 0x308   : > { %v4301_v25 = vrot.slane %v4300_v47, 1  ;;  %v4233_v63 = vadd.f32 %v4232_v51, %v4231_v0 }
 0x30a   : > { %v4302_v43 = vadd.f32 %v4301_v25, %v4300_v47 }
 0x30c   : > { %v4304_v19 = vsel %vm4303_vm0, %v4233_v63, %v4302_v43 }
 0x30d   : > { %4305 = vst [vmem:[%s187_s23] sm:$0x3] %v4304_v19 }
 0x30e PF: > { %s14_s12 = sadd.s32 1, %s5988_s12  }
 0x30f   : > { %p11_p5 = scmp.ge.s32.totalorder %s14_s12, 4  }
 0x311   :  { %13 = sbr.rel (!%p11_p5) target bundleno = 1 (0x1), region = 70 }

// kernel: netD_forward.10
= control target key start
LH: loop header
LB: loop body
LE: loop exit
PB: predicated region body
PF: predicated region fallthrough
CT: control target
= control target key end

     0   :  { %s883_s12 = smov 0   ;;  %s1017_s0 = inlined_call_operand.vmem [shape: bf16[512,128], index: 0, kind: input, shape index: {}]   ;;  %s1018_s1 = inlined_call_operand.vmem [shape: f32[1,128], index: 1, kind: input, shape index: {}]   ;;  %s1019_s2 = inlined_call_operand.vmem [shape: f32[1,128], index: 2, kind: input, shape index: {}]   ;;  %s1020_s3 = inlined_call_operand.vmem [shape: bf16[512,128], index: 3, kind: output, shape index: {}]  }
   0x1 LB: > { %s596_s13 = sadd.s32 4294967295, %s861_s12   ;;  %p600_p0 = scmp.ge.s32.totalorder %s861_s12, 1  ;;  %s861_s12 = sphi %s883_s12, %s13_s12  }
   0x2   : > { %p138_p1 = scmp.lt.s32.totalorder %s861_s12, 3 }
   0x4   : > { %p139_p2 = pnand %p600_p0, %p138_p1 }
   0x5   : > { %s601_s14 = sshll.u32 (!%p139_p2), %s596_s13, 5  ;;  %v904_v0 = vld [vmem:[%s1018_s1] ss:$0 sm:$0xff] (!%p139_p2) }
   0x6   : > { %142 = sbr.rel (%p139_p2) target bundleno = 68 (0x44), region = 32  ;;  %p163_p3 = scmp.lt.s32.totalorder (!%p139_p2), %s601_s14, 63  ;;  %v913_v9 = vld [vmem:[%s1019_s2] ss:$0 sm:$0xff] (!%p139_p2) }
   0xd   : > { %s1022_s14 = smov (!%p163_p3, %s601_s14), 63 }
   0xe   : > { %s602_s15 = sshll.u32 %s1022_s14, 2 }
   0xf   : > { %s899_s18 = scalar_lea.vmem %s1017_s0, %s602_s15  ;;  %s938_s25 = scalar_lea.vmem %s1020_s3, %s602_s15 }
  0x10   : > { %v674_v1 = vld [vmem:[%s899_s18] sm:$0xff]   ;;  %v817_v2 = vld [vmem:[%s899_s18 + $0x8] sm:$0xff]   ;;  %v818_v3 = vld [vmem:[%s899_s18 + $0x10] sm:$0xff]  }
  0x11   : > { %v675_v4 = vunpack.c.l.bf16 %v674_v1  ;;  %v676_v5 = vunpack.c.h.bf16 %v674_v1  ;;  %v679_v6 = vunpack.c.l.bf16 %v817_v2  ;;  %v680_v7 = vunpack.c.h.bf16 %v817_v2  ;;  %v819_v8 = vld [vmem:[%s899_s18 + $0x18] sm:$0xff]   ;;  %v820_v22 = vld [vmem:[%s899_s18 + $0x20] sm:$0xff]   ;;  %v821_v43 = vld [vmem:[%s899_s18 + $0x28] sm:$0xff]  }
  0x12   : > { %v683_v10 = vunpack.c.l.bf16 %v818_v3  ;;  %v684_v11 = vunpack.c.h.bf16 %v818_v3  ;;  %v687_v12 = vunpack.c.l.bf16 %v819_v8  ;;  %v688_v13 = vunpack.c.h.bf16 %v819_v8  ;;  %v822_v48 = vld [vmem:[%s899_s18 + $0x30] sm:$0xff]   ;;  %v823_v53 = vld [vmem:[%s899_s18 + $0x38] sm:$0xff]  }
  0x13   : > { %v245_v14 = vmul.f32 %v675_v4, %v904_v0  ;;  %v246_v15 = vmul.f32 %v676_v5, %v904_v0  ;;  %v247_v16 = vmul.f32 %v679_v6, %v904_v0  ;;  %v248_v17 = vmul.f32 %v680_v7, %v904_v0 }
  0x14   : > { %v249_v18 = vmul.f32 %v683_v10, %v904_v0  ;;  %v250_v19 = vmul.f32 %v684_v11, %v904_v0  ;;  %v251_v20 = vmul.f32 %v687_v12, %v904_v0  ;;  %v252_v21 = vmul.f32 %v688_v13, %v904_v0  ;;  %v824_v12 = vld [vmem:[%s899_s18 + $0x40] sm:$0xff]  }
  0x15   : > { %v284_v23 = vadd.f32 %v913_v9, %v245_v14  ;;  %v285_v24 = vadd.f32 %v913_v9, %v246_v15  ;;  %v286_v25 = vadd.f32 %v913_v9, %v247_v16  ;;  %v287_v26 = vadd.f32 %v913_v9, %v248_v17 }
  0x16   : > { %v288_v27 = vadd.f32 %v913_v9, %v249_v18  ;;  %v289_v28 = vadd.f32 %v913_v9, %v250_v19  ;;  %v290_v29 = vadd.f32 %v913_v9, %v251_v20  ;;  %v291_v30 = vadd.f32 %v913_v9, %v252_v21 }
  0x17   : > { %v316_v31 = vmul.f32 0.2, %v284_v23  ;;  %v317_v32 = vmul.f32 0.2, %v285_v24  ;;  %v318_v33 = vmul.f32 0.2, %v286_v25  ;;  %v691_v34 = vunpack.c.l.bf16 %v820_v22 }
  0x18   : > { %v319_v35 = vmul.f32 0.2, %v287_v26  ;;  %v320_v36 = vmul.f32 0.2, %v288_v27  ;;  %v321_v37 = vmul.f32 0.2, %v289_v28  ;;  %v692_v38 = vunpack.c.h.bf16 %v820_v22 }
  0x19   : > { %v348_v39 = vmax.f32 %v284_v23, %v316_v31  ;;  %v349_v40 = vmax.f32 %v285_v24, %v317_v32  ;;  %v350_v41 = vmax.f32 %v286_v25, %v318_v33  ;;  %v322_v42 = vmul.f32 0.2, %v290_v29  ;;  %v825_v25 = vld [vmem:[%s899_s18 + $0x48] sm:$0xff]  }
  0x1a   : > { %v351_v44 = vmax.f32 %v287_v26, %v319_v35  ;;  %v352_v45 = vmax.f32 %v288_v27, %v320_v36  ;;  %v353_v46 = vmax.f32 %v289_v28, %v321_v37  ;;  %v323_v47 = vmul.f32 0.2, %v291_v30 }
  0x1b   : > { %v740_v49 = vpack.c.bf16 %v349_v40, %v348_v39  ;;  %v354_v50 = vmax.f32 %v290_v29, %v322_v42  ;;  %v253_v51 = vmul.f32 %v691_v34, %v904_v0  ;;  %v254_v52 = vmul.f32 %v692_v38, %v904_v0  ;;  %v826_v34 = vld [vmem:[%s899_s18 + $0x50] sm:$0xff]  }
  0x1c   : > { %v745_v54 = vpack.c.bf16 %v351_v44, %v350_v41  ;;  %v750_v55 = vpack.c.bf16 %v353_v46, %v352_v45  ;;  %v355_v56 = vmax.f32 %v291_v30, %v323_v47  ;;  %v695_v57 = vunpack.c.l.bf16 %v821_v43 }
  0x1d   : > { %741 = vst [vmem:[%s938_s25] sm:$0xff] %v740_v49   ;;  %v292_v58 = vadd.f32 %v913_v9, %v253_v51  ;;  %v293_v59 = vadd.f32 %v913_v9, %v254_v52  ;;  %v696_v60 = vunpack.c.h.bf16 %v821_v43  ;;  %v699_v61 = vunpack.c.l.bf16 %v822_v48  ;;  %v827_v43 = vld [vmem:[%s899_s18 + $0x58] sm:$0xff]  }
  0x1e   : > { %832 = vst [vmem:[%s938_s25 + $0x8] sm:$0xff] %v745_v54   ;;  %833 = vst [vmem:[%s938_s25 + $0x10] sm:$0xff] %v750_v55   ;;  %v755_v62 = vpack.c.bf16 %v355_v56, %v354_v50  ;;  %v255_v63 = vmul.f32 %v695_v57, %v904_v0  ;;  %v700_v1 = vunpack.c.h.bf16 %v822_v48  ;;  %v703_v2 = vunpack.c.l.bf16 %v823_v53  ;;  %v828_v56 = vld [vmem:[%s899_s18 + $0x60] sm:$0xff]  }
  0x1f   : > { %v324_v3 = vmul.f32 0.2, %v292_v58  ;;  %v325_v4 = vmul.f32 0.2, %v293_v59  ;;  %v256_v5 = vmul.f32 %v696_v60, %v904_v0  ;;  %v257_v6 = vmul.f32 %v699_v61, %v904_v0 }
  0x20   : > { %834 = vst [vmem:[%s938_s25 + $0x18] sm:$0xff] %v755_v62   ;;  %v294_v7 = vadd.f32 %v913_v9, %v255_v63  ;;  %v258_v8 = vmul.f32 %v700_v1, %v904_v0  ;;  %v704_v10 = vunpack.c.h.bf16 %v823_v53  ;;  %v259_v11 = vmul.f32 %v703_v2, %v904_v0 }
  0x21   : > { %v356_v13 = vmax.f32 %v292_v58, %v324_v3  ;;  %v357_v14 = vmax.f32 %v293_v59, %v325_v4  ;;  %v295_v15 = vadd.f32 %v913_v9, %v256_v5  ;;  %v296_v16 = vadd.f32 %v913_v9, %v257_v6 }
  0x22   : > { %v326_v17 = vmul.f32 0.2, %v294_v7  ;;  %v297_v18 = vadd.f32 %v913_v9, %v258_v8  ;;  %v260_v19 = vmul.f32 %v704_v10, %v904_v0  ;;  %v298_v20 = vadd.f32 %v913_v9, %v259_v11  ;;  %v829_v11 = vld [vmem:[%s899_s18 + $0x68] sm:$0xff]  }
  0x23   : > { %v760_v21 = vpack.c.bf16 %v357_v14, %v356_v13  ;;  %v327_v22 = vmul.f32 0.2, %v295_v15  ;;  %v328_v23 = vmul.f32 0.2, %v296_v16  ;;  %v707_v24 = vunpack.c.l.bf16 %v824_v12 }
  0x24   : > { %v358_v26 = vmax.f32 %v294_v7, %v326_v17  ;;  %v329_v27 = vmul.f32 0.2, %v297_v18  ;;  %v299_v28 = vadd.f32 %v913_v9, %v260_v19  ;;  %v330_v29 = vmul.f32 0.2, %v298_v20 }
  0x25   : > { %835 = vst [vmem:[%s938_s25 + $0x20] sm:$0xff] %v760_v21   ;;  %v359_v30 = vmax.f32 %v295_v15, %v327_v22  ;;  %v360_v31 = vmax.f32 %v296_v16, %v328_v23  ;;  %v708_v32 = vunpack.c.h.bf16 %v824_v12  ;;  %v261_v33 = vmul.f32 %v707_v24, %v904_v0 }
  0x26   : > { %v361_v35 = vmax.f32 %v297_v18, %v329_v27  ;;  %v331_v36 = vmul.f32 0.2, %v299_v28  ;;  %v362_v37 = vmax.f32 %v298_v20, %v330_v29  ;;  %v711_v38 = vunpack.c.l.bf16 %v825_v25  ;;  %v830_v20 = vld [vmem:[%s899_s18 + $0x70] sm:$0xff]   ;;  %v831_v29 = vld [vmem:[%s899_s18 + $0x78] sm:$0xff]  }
  0x27   : > { %v765_v39 = vpack.c.bf16 %v359_v30, %v358_v26  ;;  %v262_v40 = vmul.f32 %v708_v32, %v904_v0  ;;  %v300_v41 = vadd.f32 %v913_v9, %v261_v33  ;;  %v712_v42 = vunpack.c.h.bf16 %v825_v25 }
  0x28   : > { %v770_v44 = vpack.c.bf16 %v361_v35, %v360_v31  ;;  %v363_v45 = vmax.f32 %v299_v28, %v331_v36  ;;  %v263_v46 = vmul.f32 %v711_v38, %v904_v0  ;;  %v715_v47 = vunpack.c.l.bf16 %v826_v34 }
  0x29   : > { %836 = vst [vmem:[%s938_s25 + $0x28] sm:$0xff] %v765_v39   ;;  %v301_v48 = vadd.f32 %v913_v9, %v262_v40  ;;  %v332_v49 = vmul.f32 0.2, %v300_v41  ;;  %v264_v50 = vmul.f32 %v712_v42, %v904_v0  ;;  %v716_v51 = vunpack.c.h.bf16 %v826_v34 }
  0x2a   : > { %837 = vst [vmem:[%s938_s25 + $0x30] sm:$0xff] %v770_v44   ;;  %v775_v52 = vpack.c.bf16 %v363_v45, %v362_v37  ;;  %v302_v53 = vadd.f32 %v913_v9, %v263_v46  ;;  %v265_v54 = vmul.f32 %v715_v47, %v904_v0  ;;  %v719_v55 = vunpack.c.l.bf16 %v827_v43 }
  0x2b   : > { %v333_v57 = vmul.f32 0.2, %v301_v48  ;;  %v364_v58 = vmax.f32 %v300_v41, %v332_v49  ;;  %v303_v59 = vadd.f32 %v913_v9, %v264_v50  ;;  %v266_v60 = vmul.f32 %v716_v51, %v904_v0 }
  0x2c   : > { %838 = vst [vmem:[%s938_s25 + $0x38] sm:$0xff] %v775_v52   ;;  %v334_v61 = vmul.f32 0.2, %v302_v53  ;;  %v304_v62 = vadd.f32 %v913_v9, %v265_v54  ;;  %v720_v63 = vunpack.c.h.bf16 %v827_v43  ;;  %v267_v1 = vmul.f32 %v719_v55, %v904_v0 }
  0x2d   : > { %v365_v2 = vmax.f32 %v301_v48, %v333_v57  ;;  %v335_v3 = vmul.f32 0.2, %v303_v59  ;;  %v305_v4 = vadd.f32 %v913_v9, %v266_v60  ;;  %v723_v5 = vunpack.c.l.bf16 %v828_v56 }
  0x2e   : > { %v366_v6 = vmax.f32 %v302_v53, %v334_v61  ;;  %v336_v7 = vmul.f32 0.2, %v304_v62  ;;  %v268_v8 = vmul.f32 %v720_v63, %v904_v0  ;;  %v306_v10 = vadd.f32 %v913_v9, %v267_v1 }
  0x2f   : > { %v780_v12 = vpack.c.bf16 %v365_v2, %v364_v58  ;;  %v367_v13 = vmax.f32 %v303_v59, %v335_v3  ;;  %v337_v14 = vmul.f32 0.2, %v305_v4  ;;  %v724_v15 = vunpack.c.h.bf16 %v828_v56 }
  0x30   : > { %v368_v16 = vmax.f32 %v304_v62, %v336_v7  ;;  %v307_v17 = vadd.f32 %v913_v9, %v268_v8  ;;  %v338_v18 = vmul.f32 0.2, %v306_v10  ;;  %v269_v19 = vmul.f32 %v723_v5, %v904_v0 }
  0x31   : > { %839 = vst [vmem:[%s938_s25 + $0x40] sm:$0xff] %v780_v12   ;;  %v785_v21 = vpack.c.bf16 %v367_v13, %v366_v6  ;;  %v369_v22 = vmax.f32 %v305_v4, %v337_v14  ;;  %v270_v23 = vmul.f32 %v724_v15, %v904_v0  ;;  %v727_v24 = vunpack.c.l.bf16 %v829_v11 }
  0x32   : > { %v339_v25 = vmul.f32 0.2, %v307_v17  ;;  %v370_v26 = vmax.f32 %v306_v10, %v338_v18  ;;  %v308_v27 = vadd.f32 %v913_v9, %v269_v19  ;;  %v728_v28 = vunpack.c.h.bf16 %v829_v11 }
  0x33   : > { %840 = vst [vmem:[%s938_s25 + $0x48] sm:$0xff] %v785_v21   ;;  %v790_v30 = vpack.c.bf16 %v369_v22, %v368_v16  ;;  %v309_v31 = vadd.f32 %v913_v9, %v270_v23  ;;  %v271_v32 = vmul.f32 %v727_v24, %v904_v0  ;;  %v731_v33 = vunpack.c.l.bf16 %v830_v20 }
  0x34   : > { %v371_v34 = vmax.f32 %v307_v17, %v339_v25  ;;  %v340_v35 = vmul.f32 0.2, %v308_v27  ;;  %v272_v36 = vmul.f32 %v728_v28, %v904_v0  ;;  %v732_v37 = vunpack.c.h.bf16 %v830_v20 }
  0x35   : > { %841 = vst [vmem:[%s938_s25 + $0x50] sm:$0xff] %v790_v30   ;;  %v341_v38 = vmul.f32 0.2, %v309_v31  ;;  %v310_v39 = vadd.f32 %v913_v9, %v271_v32  ;;  %v273_v40 = vmul.f32 %v731_v33, %v904_v0  ;;  %v735_v41 = vunpack.c.l.bf16 %v831_v29 }
  0x36   : > { %v795_v42 = vpack.c.bf16 %v371_v34, %v370_v26  ;;  %v372_v43 = vmax.f32 %v308_v27, %v340_v35  ;;  %v311_v44 = vadd.f32 %v913_v9, %v272_v36  ;;  %v274_v45 = vmul.f32 %v732_v37, %v904_v0 }
  0x37   : > { %v373_v46 = vmax.f32 %v309_v31, %v341_v38  ;;  %v342_v47 = vmul.f32 0.2, %v310_v39  ;;  %v312_v48 = vadd.f32 %v913_v9, %v273_v40  ;;  %v736_v49 = vunpack.c.h.bf16 %v831_v29 }
  0x38   : > { %842 = vst [vmem:[%s938_s25 + $0x58] sm:$0xff] %v795_v42   ;;  %v343_v50 = vmul.f32 0.2, %v311_v44  ;;  %v313_v51 = vadd.f32 %v913_v9, %v274_v45  ;;  %v275_v52 = vmul.f32 %v735_v41, %v904_v0 }
  0x39   : > { %v800_v53 = vpack.c.bf16 %v373_v46, %v372_v43  ;;  %v374_v54 = vmax.f32 %v310_v39, %v342_v47  ;;  %v344_v55 = vmul.f32 0.2, %v312_v48  ;;  %v276_v56 = vmul.f32 %v736_v49, %v904_v0 }
  0x3a   : > { %v375_v57 = vmax.f32 %v311_v44, %v343_v50  ;;  %v345_v58 = vmul.f32 0.2, %v313_v51  ;;  %v314_v59 = vadd.f32 %v913_v9, %v275_v52 }
  0x3b   : > { %843 = vst [vmem:[%s938_s25 + $0x60] sm:$0xff] %v800_v53   ;;  %v376_v60 = vmax.f32 %v312_v48, %v344_v55  ;;  %v315_v61 = vadd.f32 %v913_v9, %v276_v56 }
  0x3c   : > { %v805_v62 = vpack.c.bf16 %v375_v57, %v374_v54  ;;  %v377_v63 = vmax.f32 %v313_v51, %v345_v58  ;;  %v346_v1 = vmul.f32 0.2, %v314_v59 }
  0x3d   : > { %v347_v2 = vmul.f32 0.2, %v315_v61 }
  0x3e   : > { %844 = vst [vmem:[%s938_s25 + $0x68] sm:$0xff] %v805_v62   ;;  %v810_v3 = vpack.c.bf16 %v377_v63, %v376_v60  ;;  %v378_v4 = vmax.f32 %v314_v59, %v346_v1 }
  0x3f   : > { %v379_v5 = vmax.f32 %v315_v61, %v347_v2 }
  0x40   : > { %845 = vst [vmem:[%s938_s25 + $0x70] sm:$0xff] %v810_v3  }
  0x41   : > { %v815_v6 = vpack.c.bf16 %v379_v5, %v378_v4 }
  0x43   : > { %846 = vst [vmem:[%s938_s25 + $0x78] sm:$0xff] %v815_v6  }
  0x44 PF: > { %s13_s12 = sadd.s32 1, %s861_s12  }
  0x45   : > { %p10_p4 = scmp.ge.s32.totalorder %s13_s12, 4  }
  0x47   :  { %12 = sbr.rel (!%p10_p4) target bundleno = 1 (0x1), region = 62 }

// kernel: netD_forward.12
= control target key start
LH: loop header
LB: loop body
LE: loop exit
PB: predicated region body
PF: predicated region fallthrough
CT: control target
= control target key end

     0   :  { %s439_s12 = smov 0   ;;  %s469_s0 = inlined_call_operand.vmem [shape: bf16[128,128], index: 0, kind: input, shape index: {}]   ;;  %s470_s1 = inlined_call_operand.vmem [shape: f32[1,128], index: 1, kind: input, shape index: {}]   ;;  %s471_s2 = inlined_call_operand.vmem [shape: f32[1,128], index: 2, kind: input, shape index: {}]   ;;  %s472_s3 = inlined_call_operand.vmem [shape: bf16[128,128], index: 3, kind: output, shape index: {}]  }
   0x1 LB: > { %s332_s13 = sadd.s32 4294967295, %s417_s12   ;;  %p336_p0 = scmp.ge.s32.totalorder %s417_s12, 1  ;;  %s417_s12 = sphi %s439_s12, %s13_s12  }
   0x2   : > { %p138_p1 = scmp.lt.s32.totalorder %s417_s12, 3 }
   0x4   : > { %p139_p2 = pnand %p336_p0, %p138_p1 }
   0x5   : > { %s337_s14 = sshll.u32 (!%p139_p2), %s332_s13, 3  ;;  %v341_v0 = vld [vmem:[%s470_s1] ss:$0 sm:$0xff] (!%p139_p2) }
   0x6   : > { %142 = sbr.rel (%p139_p2) target bundleno = 33 (0x21), region = 32  ;;  %p163_p3 = scmp.lt.s32.totalorder (!%p139_p2), %s337_s14, 15  ;;  %v342_v9 = vld [vmem:[%s471_s2] ss:$0 sm:$0xff] (!%p139_p2) }
   0xd   : > { %s474_s14 = smov (!%p163_p3, %s337_s14), 15 }
   0xe   : > { %s338_s15 = sshll.u32 %s474_s14, 2 }
   0xf   : > { %s166_s18 = scalar_lea.vmem %s469_s0, %s338_s15  ;;  %s172_s25 = scalar_lea.vmem %s472_s3, %s338_s15 }
  0x10   : > { %v362_v1 = vld [vmem:[%s166_s18] sm:$0xff]   ;;  %v397_v2 = vld [vmem:[%s166_s18 + $0x8] sm:$0xff]   ;;  %v398_v3 = vld [vmem:[%s166_s18 + $0x10] sm:$0xff]  }
  0x11   : > { %v363_v4 = vunpack.c.l.bf16 %v362_v1  ;;  %v364_v5 = vunpack.c.h.bf16 %v362_v1  ;;  %v399_v6 = vld [vmem:[%s166_s18 + $0x18] sm:$0xff]   ;;  %v367_v7 = vunpack.c.l.bf16 %v397_v2  ;;  %v368_v8 = vunpack.c.h.bf16 %v397_v2 }
  0x12   : > { %v371_v10 = vunpack.c.l.bf16 %v398_v3  ;;  %v372_v11 = vunpack.c.h.bf16 %v398_v3  ;;  %v375_v12 = vunpack.c.l.bf16 %v399_v6  ;;  %v376_v13 = vunpack.c.h.bf16 %v399_v6 }
  0x13   : > { %v197_v14 = vmul.f32 %v363_v4, %v341_v0  ;;  %v198_v15 = vmul.f32 %v364_v5, %v341_v0  ;;  %v199_v16 = vmul.f32 %v367_v7, %v341_v0  ;;  %v200_v17 = vmul.f32 %v368_v8, %v341_v0 }
  0x14   : > { %v201_v18 = vmul.f32 %v371_v10, %v341_v0  ;;  %v202_v19 = vmul.f32 %v372_v11, %v341_v0  ;;  %v203_v20 = vmul.f32 %v375_v12, %v341_v0  ;;  %v204_v21 = vmul.f32 %v376_v13, %v341_v0 }
  0x15   : > { %v212_v22 = vadd.f32 %v342_v9, %v197_v14  ;;  %v213_v23 = vadd.f32 %v342_v9, %v198_v15  ;;  %v214_v24 = vadd.f32 %v342_v9, %v199_v16  ;;  %v215_v25 = vadd.f32 %v342_v9, %v200_v17 }
  0x16   : > { %v216_v26 = vadd.f32 %v342_v9, %v201_v18  ;;  %v217_v27 = vadd.f32 %v342_v9, %v202_v19  ;;  %v218_v28 = vadd.f32 %v342_v9, %v203_v20  ;;  %v219_v29 = vadd.f32 %v342_v9, %v204_v21 }
  0x17   : > { %v220_v30 = vmul.f32 0.2, %v212_v22  ;;  %v221_v31 = vmul.f32 0.2, %v213_v23  ;;  %v222_v32 = vmul.f32 0.2, %v214_v24 }
  0x18   : > { %v223_v33 = vmul.f32 0.2, %v215_v25  ;;  %v224_v34 = vmul.f32 0.2, %v216_v26  ;;  %v225_v35 = vmul.f32 0.2, %v217_v27 }
  0x19   : > { %v228_v36 = vmax.f32 %v212_v22, %v220_v30  ;;  %v229_v37 = vmax.f32 %v213_v23, %v221_v31  ;;  %v230_v38 = vmax.f32 %v214_v24, %v222_v32  ;;  %v226_v39 = vmul.f32 0.2, %v218_v28 }
  0x1a   : > { %v231_v40 = vmax.f32 %v215_v25, %v223_v33  ;;  %v232_v41 = vmax.f32 %v216_v26, %v224_v34  ;;  %v233_v42 = vmax.f32 %v217_v27, %v225_v35  ;;  %v227_v43 = vmul.f32 0.2, %v219_v29 }
  0x1b   : > { %v380_v44 = vpack.c.bf16 %v229_v37, %v228_v36  ;;  %v234_v45 = vmax.f32 %v218_v28, %v226_v39 }
  0x1c   : > { %v385_v46 = vpack.c.bf16 %v231_v40, %v230_v38  ;;  %v390_v47 = vpack.c.bf16 %v233_v42, %v232_v41  ;;  %v235_v48 = vmax.f32 %v219_v29, %v227_v43 }
  0x1d   : > { %381 = vst [vmem:[%s172_s25] sm:$0xff] %v380_v44  }
  0x1e   : > { %400 = vst [vmem:[%s172_s25 + $0x8] sm:$0xff] %v385_v46   ;;  %401 = vst [vmem:[%s172_s25 + $0x10] sm:$0xff] %v390_v47   ;;  %v395_v49 = vpack.c.bf16 %v235_v48, %v234_v45 }
  0x20   : > { %402 = vst [vmem:[%s172_s25 + $0x18] sm:$0xff] %v395_v49  }
  0x21 PF: > { %s13_s12 = sadd.s32 1, %s417_s12  }
  0x22   : > { %p10_p4 = scmp.ge.s32.totalorder %s13_s12, 4  }
  0x24   :  { %12 = sbr.rel (!%p10_p4) target bundleno = 1 (0x1), region = 62 }

// kernel: netD_forward.11
= control target key start
LH: loop header
LB: loop body
LE: loop exit
PB: predicated region body
PF: predicated region fallthrough
CT: control target
= control target key end

     0   :  { %s3010_s12 = smov 0   ;;  %s3531_s0 = inlined_call_operand.vmem [shape: bf16[128,2048], index: 0, kind: input, shape index: {}]   ;;  %s3532_s1 = inlined_call_operand.vmem [shape: bf16[2048,128], index: 1, kind: input, shape index: {}]   ;;  %s3533_s2 = inlined_call_operand.vmem [shape: bf16[128,128], index: 2, kind: output, shape index: {0}]   ;;  %s3534_s3 = inlined_call_operand.vmem [shape: f32[2,2,128], index: 3, kind: output, shape index: {1}]  }
   0x1 LB: > { %s3016_s13 = sadd.s32 4294967295, %s2988_s12   ;;  %p2285_p0 = scmp.ge.s32.totalorder %s2988_s12, 1  ;;  %s2988_s12 = sphi %s3010_s12, %s14_s12  }
   0x2   : > { %p142_p1 = scmp.lt.s32.totalorder %s2988_s12, 3 }
   0x4   : > { %p143_p2 = pnand %p2285_p0, %p142_p1 }
   0x5   : > { %v2854_v0 = vld [vmem:[%s3532_s1 + $0x40] sm:$0xff] (!%p143_p2)   ;;  %v2858_v4 = vld [vmem:[%s3532_s1 + $0x48] sm:$0xff] (!%p143_p2)   ;;  %v2862_v8 = vld [vmem:[%s3532_s1 + $0x50] sm:$0xff] (!%p143_p2)   ;;  %s2286_s21 = sshll.u32 (!%p143_p2), %s3016_s13, 3  ;;  %p184_p4 = scmp.lt.s32.totalorder (!%p143_p2), %s3016_s13, 1  ;;  %vm2191_vm0 = vcmask (!%p143_p2), 1040384  }
   0x6   : > { %146 = sbr.rel (%p143_p2) target bundleno = 398 (0x18e), region = 28  ;;  %v2855_v1 = vld [vmem:[%s3532_s1 + $0xc0] sm:$0xff] (!%p143_p2)   ;;  %2526 = vmatprep.subr.bf16.mxu0 (!%p143_p2), %v2854_v0  ;;  %v2859_v5 = vld [vmem:[%s3532_s1 + $0xc8] sm:$0xff] (!%p143_p2)   ;;  %v2863_v9 = vld [vmem:[%s3532_s1 + $0xd0] sm:$0xff] (!%p143_p2)   ;;  %p172_p3 = scmp.lt.s32.totalorder (!%p143_p2), %s2286_s21, 15 }
   0x7   : > { %v2856_v2 = vld [vmem:[%s3532_s1] sm:$0xff] (!%p143_p2)   ;;  %2566 = vmatprep.subr.bf16.mxu1 (!%p143_p2), %v2855_v1  ;;  %v2860_v6 = vld [vmem:[%s3532_s1 + $0x8] sm:$0xff] (!%p143_p2)   ;;  %v2864_v10 = vld [vmem:[%s3532_s1 + $0x10] sm:$0xff] (!%p143_p2)  }
   0x8   : > { %v2857_v3 = vld [vmem:[%s3532_s1 + $0x80] sm:$0xff] (!%p143_p2)   ;;  %2527 = vmatpush3.bf16.msra.mxu0 (!%p143_p2), %v2856_v2  ;;  %v2861_v7 = vld [vmem:[%s3532_s1 + $0x88] sm:$0xff] (!%p143_p2)   ;;  %v2865_v11 = vld [vmem:[%s3532_s1 + $0x90] sm:$0xff] (!%p143_p2)  }
   0x9   : > { %2567 = vmatpush3.bf16.msra.mxu1 (!%p143_p2), %v2857_v3  ;;  %2528 = vmatprep.subr.bf16.mxu0 (!%p143_p2), %v2858_v4  ;;  %v2866_v12 = vld [vmem:[%s3532_s1 + $0x58] sm:$0xff] (!%p143_p2)   ;;  %v2870_v16 = vld [vmem:[%s3532_s1 + $0x60] sm:$0xff] (!%p143_p2)   ;;  %v2874_v20 = vld [vmem:[%s3532_s1 + $0x68] sm:$0xff] (!%p143_p2)  }
   0xa   : > { %2568 = vmatprep.subr.bf16.mxu1 (!%p143_p2), %v2859_v5  ;;  %v2867_v13 = vld [vmem:[%s3532_s1 + $0xd8] sm:$0xff] (!%p143_p2)   ;;  %v2871_v17 = vld [vmem:[%s3532_s1 + $0xe0] sm:$0xff] (!%p143_p2)   ;;  %v2875_v21 = vld [vmem:[%s3532_s1 + $0xe8] sm:$0xff] (!%p143_p2)  }
   0xb   : > { %v2868_v14 = vld [vmem:[%s3532_s1 + $0x18] sm:$0xff] (!%p143_p2)   ;;  %v2872_v18 = vld [vmem:[%s3532_s1 + $0x20] sm:$0xff] (!%p143_p2)   ;;  %v2876_v22 = vld [vmem:[%s3532_s1 + $0x28] sm:$0xff] (!%p143_p2)  }
   0xc   : > { %2529 = vmatpush3.bf16.msra.mxu0 (!%p143_p2), %v2860_v6  ;;  %v2869_v15 = vld [vmem:[%s3532_s1 + $0x98] sm:$0xff] (!%p143_p2)   ;;  %v2873_v19 = vld [vmem:[%s3532_s1 + $0xa0] sm:$0xff] (!%p143_p2)   ;;  %v2877_v23 = vld [vmem:[%s3532_s1 + $0xa8] sm:$0xff] (!%p143_p2)  }
   0xd   : > { %2569 = vmatpush3.bf16.msra.mxu1 %v2861_v7  ;;  %2530 = vmatprep.subr.bf16.mxu0 %v2862_v8  ;;  %s3536_s21 = smov (!%p172_p3, %s2286_s21), 15  ;;  %v2878_v24 = vld [vmem:[%s3532_s1 + $0x70] sm:$0xff]   ;;  %v2882_v28 = vld [vmem:[%s3532_s1 + $0x78] sm:$0xff]   ;;  %v2886_v40 = vld [vmem:[%s3532_s1 + $0x140] sm:$0xff]   ;;  %s3538_s13 = smov (!%p184_p4, %s3016_s13), 1 }
   0xe   : > { %2570 = vmatprep.subr.bf16.mxu1 %v2863_v9  ;;  %v2879_v25 = vld [vmem:[%s3532_s1 + $0xf0] sm:$0xff]   ;;  %s2494_s19 = sshll.u32 %s3536_s21, 6  ;;  %v2883_v29 = vld [vmem:[%s3532_s1 + $0xf8] sm:$0xff]   ;;  %v2887_v41 = vld [vmem:[%s3532_s1 + $0x1c0] sm:$0xff]  }
   0xf   : > { %v2880_v26 = vld [vmem:[%s3532_s1 + $0x30] sm:$0xff]   ;;  %s3117_s29 = scalar_lea.vmem %s3531_s0, %s2494_s19  ;;  %v2884_v30 = vld [vmem:[%s3532_s1 + $0x38] sm:$0xff]   ;;  %v2888_v42 = vld [vmem:[%s3532_s1 + $0x100] sm:$0xff]  }
  0x10   : > { %2531 = vmatpush3.bf16.msra.mxu0 %v2864_v10  ;;  %v2881_v27 = vld [vmem:[%s3532_s1 + $0xb0] sm:$0xff]   ;;  %v2885_v31 = vld [vmem:[%s3532_s1 + $0xb8] sm:$0xff]   ;;  %v189_v32 = vld [vmem:[%s3117_s29] sm:$0xff] }
  0x11   : > { %2571 = vmatpush3.bf16.msra.mxu1 %v2865_v11  ;;  %2532 = vmatprep.subr.bf16.mxu0 %v2866_v12  ;;  %v197_v33 = vld [vmem:[%s3117_s29 + $0x40] sm:$0xff]  ;;  %v190_v34 = vld [vmem:[%s3117_s29 + $0x8] sm:$0xff]  ;;  %v2894_v56 = vld [vmem:[%s3532_s1 + $0x150] sm:$0xff]  }
  0x12   : > { %2572 = vmatprep.subr.bf16.mxu1 %v2867_v13  ;;  %v2292_v35 = vcombine.low %v189_v32, %v197_v33  ;;  %v2293_v36 = vcombine.high %v189_v32, %v197_v33  ;;  %v198_v37 = vld [vmem:[%s3117_s29 + $0x48] sm:$0xff]  ;;  %v2889_v43 = vld [vmem:[%s3532_s1 + $0x180] sm:$0xff]   ;;  %v2895_v57 = vld [vmem:[%s3532_s1 + $0x1d0] sm:$0xff]  }
  0x13   : > { %v2294_v38 = vcombine.low %v190_v34, %v198_v37  ;;  %v2295_v39 = vcombine.high %v190_v34, %v198_v37  ;;  %v2890_v44 = vld [vmem:[%s3532_s1 + $0x148] sm:$0xff]   ;;  %v205_v48 = vld [vmem:[%s3117_s29 + $0x80] sm:$0xff]  ;;  %v2896_v58 = vld [vmem:[%s3532_s1 + $0x110] sm:$0xff]  }
  0x14   : > { %2533 = vmatpush3.bf16.msra.mxu0 %v2868_v14  ;;  %1629 = vmatprep.mubr.bf16.mxu0 %v2293_v36  ;;  %v2891_v45 = vld [vmem:[%s3532_s1 + $0x1c8] sm:$0xff]   ;;  %v213_v49 = vld [vmem:[%s3117_s29 + $0xc0] sm:$0xff]  ;;  %v2897_v59 = vld [vmem:[%s3532_s1 + $0x190] sm:$0xff]  }
  0x15   : > { %2573 = vmatpush3.bf16.msra.mxu1 %v2869_v15  ;;  %2534 = vmatprep.subr.bf16.mxu0 %v2870_v16  ;;  %v2892_v46 = vld [vmem:[%s3532_s1 + $0x108] sm:$0xff]   ;;  %v2309_v50 = vcombine.high %v205_v48, %v213_v49  ;;  %v2308_v53 = vcombine.low %v205_v48, %v213_v49  ;;  %v2898_v60 = vld [vmem:[%s3532_s1 + $0x158] sm:$0xff]   ;;  %v221_v0 = vld [vmem:[%s3117_s29 + $0x100] sm:$0xff] }
  0x16   : > { %2574 = vmatprep.subr.bf16.mxu1 %v2871_v17  ;;  %1694 = vmatprep.mubr.bf16.mxu1 %v2295_v39  ;;  %v2893_v47 = vld [vmem:[%s3532_s1 + $0x188] sm:$0xff]   ;;  %v2899_v61 = vld [vmem:[%s3532_s1 + $0x1d8] sm:$0xff]   ;;  %v229_v1 = vld [vmem:[%s3117_s29 + $0x140] sm:$0xff] }
  0x17   : > { %v206_v51 = vld [vmem:[%s3117_s29 + $0x88] sm:$0xff]  ;;  %v2900_v62 = vld [vmem:[%s3532_s1 + $0x118] sm:$0xff]   ;;  %v2325_v4 = vcombine.high %v221_v0, %v229_v1  ;;  %v2324_v6 = vcombine.low %v221_v0, %v229_v1  ;;  %v2902_v8 = vld [vmem:[%s3532_s1 + $0x160] sm:$0xff]  }
  0x18   : > { %2535 = vmatpush3.bf16.msra.mxu0 %v2872_v18  ;;  %v214_v52 = vld [vmem:[%s3117_s29 + $0xc8] sm:$0xff]  ;;  %v2901_v63 = vld [vmem:[%s3532_s1 + $0x198] sm:$0xff]   ;;  %v2903_v9 = vld [vmem:[%s3532_s1 + $0x1e0] sm:$0xff]  }
  0x19   : > { %2575 = vmatpush3.bf16.msra.mxu1 %v2873_v19  ;;  %2536 = vmatprep.subr.bf16.mxu0 %v2874_v20  ;;  %v2311_v54 = vcombine.high %v206_v51, %v214_v52  ;;  %v2310_v55 = vcombine.low %v206_v51, %v214_v52  ;;  %v222_v2 = vld [vmem:[%s3117_s29 + $0x108] sm:$0xff]  ;;  %v2904_v10 = vld [vmem:[%s3532_s1 + $0x120] sm:$0xff]   ;;  %v191_v32 = vld [vmem:[%s3117_s29 + $0x10] sm:$0xff] }
  0x1a   : > { %2576 = vmatprep.subr.bf16.mxu1 %v2875_v21  ;;  %v230_v3 = vld [vmem:[%s3117_s29 + $0x148] sm:$0xff]  ;;  %v2905_v11 = vld [vmem:[%s3532_s1 + $0x1a0] sm:$0xff]   ;;  %v199_v33 = vld [vmem:[%s3117_s29 + $0x50] sm:$0xff] }
  0x1b   : > { %v2327_v5 = vcombine.high %v222_v2, %v230_v3  ;;  %v2326_v7 = vcombine.low %v222_v2, %v230_v3  ;;  %v2906_v12 = vld [vmem:[%s3532_s1 + $0x168] sm:$0xff]   ;;  %v237_v16 = vld [vmem:[%s3117_s29 + $0x180] sm:$0xff]  ;;  %v2296_v34 = vcombine.low %v191_v32, %v199_v33  ;;  %v192_v36 = vld [vmem:[%s3117_s29 + $0x18] sm:$0xff] }
  0x1c   : > { %2537 = vmatpush3.bf16.msra.mxu0 %v2876_v22  ;;  %v2907_v13 = vld [vmem:[%s3532_s1 + $0x1e8] sm:$0xff]   ;;  %v245_v17 = vld [vmem:[%s3117_s29 + $0x1c0] sm:$0xff]  ;;  %v200_v37 = vld [vmem:[%s3117_s29 + $0x58] sm:$0xff] }
  0x1d   : > { %2577 = vmatpush3.bf16.msra.mxu1 %v2877_v23  ;;  %2538 = vmatprep.subr.bf16.mxu0 %v2878_v24  ;;  %v2908_v14 = vld [vmem:[%s3532_s1 + $0x128] sm:$0xff]   ;;  %v2341_v19 = vcombine.high %v237_v16, %v245_v17  ;;  %v2340_v21 = vcombine.low %v237_v16, %v245_v17  ;;  %v2910_v24 = vld [vmem:[%s3532_s1 + $0x170] sm:$0xff]   ;;  %v2299_v39 = vcombine.high %v192_v36, %v200_v37  ;;  %v216_v51 = vld [vmem:[%s3117_s29 + $0xd8] sm:$0xff] }
  0x1e   : > { %2578 = vmatprep.subr.bf16.mxu1 %v2879_v25  ;;  %v2909_v15 = vld [vmem:[%s3532_s1 + $0x1a8] sm:$0xff]   ;;  %v2911_v25 = vld [vmem:[%s3532_s1 + $0x1f0] sm:$0xff]   ;;  %v224_v2 = vld [vmem:[%s3117_s29 + $0x118] sm:$0xff] }
  0x1f   : > { %v238_v18 = vld [vmem:[%s3117_s29 + $0x188] sm:$0xff]  ;;  %v207_v48 = vld [vmem:[%s3117_s29 + $0x90] sm:$0xff] }
  0x20   : > { %2539 = vmatpush3.bf16.msra.mxu0 %v2880_v26  ;;  %v246_v20 = vld [vmem:[%s3117_s29 + $0x1c8] sm:$0xff]  ;;  %v2912_v26 = vld [vmem:[%s3532_s1 + $0x130] sm:$0xff]  }
  0x21   : > { %2579 = vmatpush3.bf16.msra.mxu1 %v2881_v27  ;;  %2540 = vmatprep.subr.bf16.mxu0 %v2882_v28  ;;  %v2343_v22 = vcombine.high %v238_v18, %v246_v20  ;;  %v2342_v23 = vcombine.low %v238_v18, %v246_v20  ;;  %v2913_v27 = vld [vmem:[%s3532_s1 + $0x1b0] sm:$0xff]   ;;  %v2914_v28 = vld [vmem:[%s3532_s1 + $0x178] sm:$0xff]  }
  0x22   : > { %2580 = vmatprep.subr.bf16.mxu1 %v2883_v29  ;;  %v2915_v29 = vld [vmem:[%s3532_s1 + $0x1f8] sm:$0xff]   ;;  %v215_v49 = vld [vmem:[%s3117_s29 + $0xd0] sm:$0xff] }
  0x23   : > { %v2313_v52 = vcombine.high %v207_v48, %v215_v49  ;;  %v223_v0 = vld [vmem:[%s3117_s29 + $0x110] sm:$0xff]  ;;  %v248_v20 = vld [vmem:[%s3117_s29 + $0x1d8] sm:$0xff] }
  0x24   : > { %2541 = vmatpush3.bf16.msra.mxu0 %v2884_v30  ;;  %v2916_v30 = vld [vmem:[%s3532_s1 + $0x138] sm:$0xff]   ;;  %v231_v1 = vld [vmem:[%s3117_s29 + $0x150] sm:$0xff] }
  0x25   : > { %2581 = vmatpush3.bf16.msra.mxu1 %v2885_v31  ;;  %2606 = vmatprep.subr.bf16.mxu0 %v2886_v40  ;;  %v2917_v31 = vld [vmem:[%s3532_s1 + $0x1b8] sm:$0xff]   ;;  %v2918_v40 = vld [vmem:[%s3532_s1 + $0x240] sm:$0xff]   ;;  %v2329_v3 = vcombine.high %v223_v0, %v231_v1  ;;  %v239_v16 = vld [vmem:[%s3117_s29 + $0x190] sm:$0xff] }
  0x26   : > { %2646 = vmatprep.subr.bf16.mxu1 %v2887_v41  ;;  %v2919_v41 = vld [vmem:[%s3532_s1 + $0x2c0] sm:$0xff]   ;;  %v247_v17 = vld [vmem:[%s3117_s29 + $0x1d0] sm:$0xff] }
  0x27   : > { %1630 = vmatmul.mubr.bf16.vlgmr.msra.gmra.mrb[0].mxu0 %v2292_v35  ;;  %v2297_v35 = vcombine.high %v191_v32, %v199_v33  ;;  %v2345_v18 = vcombine.high %v239_v16, %v247_v17  ;;  %v193_v32 = vld [vmem:[%s3117_s29 + $0x20] sm:$0xff] }
  0x28   : > { %1695 = vmatmul.mubr.bf16.vlgmr.msra.gmra.mrb[0].mxu1 %v2294_v38  ;;  %2607 = vmatpush3.bf16.msra.mxu0 %v2888_v42  ;;  %v2298_v38 = vcombine.low %v192_v36, %v200_v37  ;;  %v2920_v42 = vld [vmem:[%s3532_s1 + $0x200] sm:$0xff]  }
  0x29   : > { %2647 = vmatpush3.bf16.msra.mxu1 %v2889_v43  ;;  %2608 = vmatprep.subr.bf16.mxu0 %v2890_v44  ;;  %v2921_v43 = vld [vmem:[%s3532_s1 + $0x280] sm:$0xff]   ;;  %v2922_v44 = vld [vmem:[%s3532_s1 + $0x248] sm:$0xff]  }
  0x2a   : > { %2648 = vmatprep.subr.bf16.mxu1 %v2891_v45  ;;  %1637 = vmatprep.mubr.bf16.mxu0 %v2309_v50  ;;  %v2923_v45 = vld [vmem:[%s3532_s1 + $0x2c8] sm:$0xff]   ;;  %v208_v50 = vld [vmem:[%s3117_s29 + $0x98] sm:$0xff]  ;;  %v201_v33 = vld [vmem:[%s3117_s29 + $0x60] sm:$0xff] }
  0x2b   : > { %1702 = vmatprep.mubr.bf16.mxu1 %v2311_v54  ;;  %v2312_v54 = vcombine.low %v207_v48, %v215_v49  ;;  %v2300_v36 = vcombine.low %v193_v32, %v201_v33  ;;  %v2301_v37 = vcombine.high %v193_v32, %v201_v33  ;;  %v209_v48 = vld [vmem:[%s3117_s29 + $0xa0] sm:$0xff]  ;;  %v195_v32 = vld [vmem:[%s3117_s29 + $0x30] sm:$0xff] }
  0x2c   : > { %2609 = vmatpush3.bf16.msra.mxu0 %v2892_v46  ;;  %v2924_v46 = vld [vmem:[%s3532_s1 + $0x208] sm:$0xff]   ;;  %v217_v49 = vld [vmem:[%s3117_s29 + $0xe0] sm:$0xff]  ;;  %v203_v33 = vld [vmem:[%s3117_s29 + $0x70] sm:$0xff] }
  0x2d   : > { %2649 = vmatpush3.bf16.msra.mxu1 %v2893_v47  ;;  %2610 = vmatprep.subr.bf16.mxu0 %v2894_v56  ;;  %v2925_v47 = vld [vmem:[%s3532_s1 + $0x288] sm:$0xff]   ;;  %v2926_v56 = vld [vmem:[%s3532_s1 + $0x250] sm:$0xff]  }
  0x2e   : > { %2650 = vmatprep.subr.bf16.mxu1 %v2895_v57  ;;  %v2927_v57 = vld [vmem:[%s3532_s1 + $0x2d0] sm:$0xff]  }
  0x2f   : > { %1638 = vmatmul.mubr.bf16.gmra.mrb[4].mxu0 %v2308_v53  ;;  %v2315_v53 = vcombine.high %v208_v50, %v216_v51 }
  0x30   : > { %1703 = vmatmul.mubr.bf16.gmra.mrb[4].mxu1 %v2310_v55  ;;  %2611 = vmatpush3.bf16.msra.mxu0 %v2896_v58  ;;  %v2314_v55 = vcombine.low %v208_v50, %v216_v51  ;;  %v2928_v58 = vld [vmem:[%s3532_s1 + $0x210] sm:$0xff]   ;;  %v210_v50 = vld [vmem:[%s3117_s29 + $0xa8] sm:$0xff]  ;;  %v2317_v51 = vcombine.high %v209_v48, %v217_v49 }
  0x31   : > { %2651 = vmatpush3.bf16.msra.mxu1 %v2897_v59  ;;  %2612 = vmatprep.subr.bf16.mxu0 %v2898_v60  ;;  %v2929_v59 = vld [vmem:[%s3532_s1 + $0x290] sm:$0xff]   ;;  %v2930_v60 = vld [vmem:[%s3532_s1 + $0x258] sm:$0xff]  }
  0x32   : > { %2652 = vmatprep.subr.bf16.mxu1 %v2899_v61  ;;  %1645 = vmatprep.mubr.bf16.mxu0 %v2325_v4  ;;  %v2931_v61 = vld [vmem:[%s3532_s1 + $0x2d8] sm:$0xff]  }
  0x33   : > { %1710 = vmatprep.mubr.bf16.mxu1 %v2327_v5  ;;  %v232_v4 = vld [vmem:[%s3117_s29 + $0x158] sm:$0xff]  ;;  %v2328_v5 = vcombine.low %v223_v0, %v231_v1  ;;  %v225_v0 = vld [vmem:[%s3117_s29 + $0x120] sm:$0xff] }
  0x34   : > { %2613 = vmatpush3.bf16.msra.mxu0 %v2900_v62  ;;  %v2932_v62 = vld [vmem:[%s3532_s1 + $0x218] sm:$0xff]   ;;  %v233_v1 = vld [vmem:[%s3117_s29 + $0x160] sm:$0xff] }
  0x35   : > { %2653 = vmatpush3.bf16.msra.mxu1 %v2901_v63  ;;  %2614 = vmatprep.subr.bf16.mxu0 %v2902_v8  ;;  %v2933_v63 = vld [vmem:[%s3532_s1 + $0x298] sm:$0xff]   ;;  %v2934_v8 = vld [vmem:[%s3532_s1 + $0x260] sm:$0xff]  }
  0x36   : > { %2654 = vmatprep.subr.bf16.mxu1 %v2903_v9  ;;  %v2935_v9 = vld [vmem:[%s3532_s1 + $0x2e0] sm:$0xff]  }
  0x37   : > { %1646 = vmatmul.mubr.bf16.gmra.mrb[8].mxu0 %v2324_v6  ;;  %v2331_v6 = vcombine.high %v224_v2, %v232_v4 }
  0x38   : > { %1711 = vmatmul.mubr.bf16.gmra.mrb[8].mxu1 %v2326_v7  ;;  %2615 = vmatpush3.bf16.msra.mxu0 %v2904_v10  ;;  %v2330_v7 = vcombine.low %v224_v2, %v232_v4  ;;  %v2936_v10 = vld [vmem:[%s3532_s1 + $0x220] sm:$0xff]   ;;  %v2333_v2 = vcombine.high %v225_v0, %v233_v1  ;;  %v234_v4 = vld [vmem:[%s3117_s29 + $0x168] sm:$0xff] }
  0x39   : > { %2655 = vmatpush3.bf16.msra.mxu1 %v2905_v11  ;;  %2616 = vmatprep.subr.bf16.mxu0 %v2906_v12  ;;  %v2937_v11 = vld [vmem:[%s3532_s1 + $0x2a0] sm:$0xff]   ;;  %v2938_v12 = vld [vmem:[%s3532_s1 + $0x268] sm:$0xff]  }
  0x3a   : > { %2656 = vmatprep.subr.bf16.mxu1 %v2907_v13  ;;  %1653 = vmatprep.mubr.bf16.mxu0 %v2341_v19  ;;  %v2939_v13 = vld [vmem:[%s3532_s1 + $0x2e8] sm:$0xff]   ;;  %v240_v19 = vld [vmem:[%s3117_s29 + $0x198] sm:$0xff] }
  0x3b   : > { %1718 = vmatprep.mubr.bf16.mxu1 %v2343_v22  ;;  %v2347_v22 = vcombine.high %v240_v19, %v248_v20 }
  0x3c   : > { %2617 = vmatpush3.bf16.msra.mxu0 %v2908_v14  ;;  %v2940_v14 = vld [vmem:[%s3532_s1 + $0x228] sm:$0xff]  }
  0x3d   : > { %2657 = vmatpush3.bf16.msra.mxu1 %v2909_v15  ;;  %2618 = vmatprep.subr.bf16.mxu0 %v2910_v24  ;;  %v2941_v15 = vld [vmem:[%s3532_s1 + $0x2a8] sm:$0xff]   ;;  %v2942_v24 = vld [vmem:[%s3532_s1 + $0x270] sm:$0xff]  }
  0x3e   : > { %2658 = vmatprep.subr.bf16.mxu1 %v2911_v25  ;;  %v2943_v25 = vld [vmem:[%s3532_s1 + $0x2f0] sm:$0xff]  }
  0x3f   : > { %1654 = vmatmul.mubr.bf16.gmra.mrb[12].mxu0 %v2340_v21  ;;  %v2344_v21 = vcombine.low %v239_v16, %v247_v17  ;;  %v241_v16 = vld [vmem:[%s3117_s29 + $0x1a0] sm:$0xff] }
  0x40   : > { %1719 = vmatmul.mubr.bf16.gmra.mrb[12].mxu1 %v2342_v23  ;;  %2619 = vmatpush3.bf16.msra.mxu0 %v2912_v26  ;;  %v2346_v23 = vcombine.low %v240_v19, %v248_v20  ;;  %v2944_v26 = vld [vmem:[%s3532_s1 + $0x230] sm:$0xff]   ;;  %v249_v17 = vld [vmem:[%s3117_s29 + $0x1e0] sm:$0xff]  ;;  %v250_v19 = vld [vmem:[%s3117_s29 + $0x1e8] sm:$0xff] }
  0x41   : > { %2659 = vmatpush3.bf16.msra.mxu1 %v2913_v27  ;;  %2620 = vmatprep.subr.bf16.mxu0 %v2914_v28  ;;  %v2945_v27 = vld [vmem:[%s3532_s1 + $0x2b0] sm:$0xff]   ;;  %v2946_v28 = vld [vmem:[%s3532_s1 + $0x278] sm:$0xff]   ;;  %v2349_v20 = vcombine.high %v241_v16, %v249_v17 }
  0x42   : > { %2660 = vmatprep.subr.bf16.mxu1 %v2915_v29  ;;  %1759 = vmatprep.mubr.bf16.mxu0 %v2297_v35  ;;  %v2947_v29 = vld [vmem:[%s3532_s1 + $0x2f8] sm:$0xff]   ;;  %v202_v35 = vld [vmem:[%s3117_s29 + $0x68] sm:$0xff] }
  0x43   : > { %1824 = vmatprep.mubr.bf16.mxu1 %v2299_v39 }
  0x44   : > { %2621 = vmatpush3.bf16.msra.mxu0 %v2916_v30  ;;  %v2948_v30 = vld [vmem:[%s3532_s1 + $0x238] sm:$0xff]  }
  0x45   : > { %2661 = vmatpush3.bf16.msra.mxu1 %v2917_v31  ;;  %2686 = vmatprep.subr.bf16.mxu0 %v2918_v40  ;;  %v2949_v31 = vld [vmem:[%s3532_s1 + $0x2b8] sm:$0xff]   ;;  %v2950_v40 = vld [vmem:[%s3532_s1 + $0x340] sm:$0xff]  }
  0x46   : > { %2726 = vmatprep.subr.bf16.mxu1 %v2919_v41  ;;  %v2951_v41 = vld [vmem:[%s3532_s1 + $0x3c0] sm:$0xff]  }
  0x47   : > { %1760 = vmatmul.mubr.bf16.vlgmr.msra.gmra.mrb[16].mxu0 %v2296_v34  ;;  %v194_v34 = vld [vmem:[%s3117_s29 + $0x28] sm:$0xff] }
  0x48   : > { %1825 = vmatmul.mubr.bf16.vlgmr.msra.gmra.mrb[16].mxu1 %v2298_v38  ;;  %2687 = vmatpush3.bf16.msra.mxu0 %v2920_v42  ;;  %v2302_v38 = vcombine.low %v194_v34, %v202_v35  ;;  %v2303_v39 = vcombine.high %v194_v34, %v202_v35  ;;  %v2952_v42 = vld [vmem:[%s3532_s1 + $0x300] sm:$0xff]   ;;  %v196_v34 = vld [vmem:[%s3117_s29 + $0x38] sm:$0xff]  ;;  %v2304_v35 = vcombine.low %v195_v32, %v203_v33 }
  0x49   : > { %2727 = vmatpush3.bf16.msra.mxu1 %v2921_v43  ;;  %2688 = vmatprep.subr.bf16.mxu0 %v2922_v44  ;;  %v2953_v43 = vld [vmem:[%s3532_s1 + $0x380] sm:$0xff]   ;;  %v2954_v44 = vld [vmem:[%s3532_s1 + $0x348] sm:$0xff]  }
  0x4a   : > { %2728 = vmatprep.subr.bf16.mxu1 %v2923_v45  ;;  %1767 = vmatprep.mubr.bf16.mxu0 %v2313_v52  ;;  %v2955_v45 = vld [vmem:[%s3532_s1 + $0x3c8] sm:$0xff]  }
  0x4b   : > { %1832 = vmatprep.mubr.bf16.mxu1 %v2315_v53  ;;  %v218_v52 = vld [vmem:[%s3117_s29 + $0xe8] sm:$0xff]  ;;  %v2316_v53 = vcombine.low %v209_v48, %v217_v49  ;;  %v228_v48 = vld [vmem:[%s3117_s29 + $0x138] sm:$0xff] }
  0x4c   : > { %2689 = vmatpush3.bf16.msra.mxu0 %v2924_v46  ;;  %v2956_v46 = vld [vmem:[%s3532_s1 + $0x308] sm:$0xff]   ;;  %v236_v49 = vld [vmem:[%s3117_s29 + $0x178] sm:$0xff] }
  0x4d   : > { %2729 = vmatpush3.bf16.msra.mxu1 %v2925_v47  ;;  %2690 = vmatprep.subr.bf16.mxu0 %v2926_v56  ;;  %v2957_v47 = vld [vmem:[%s3532_s1 + $0x388] sm:$0xff]   ;;  %v2958_v56 = vld [vmem:[%s3532_s1 + $0x350] sm:$0xff]  }
  0x4e   : > { %2730 = vmatprep.subr.bf16.mxu1 %v2927_v57  ;;  %v2959_v57 = vld [vmem:[%s3532_s1 + $0x3d0] sm:$0xff]  }
  0x4f   : > { %1768 = vmatmul.mubr.bf16.gmra.mrb[20].mxu0 %v2312_v54  ;;  %v2319_v54 = vcombine.high %v210_v50, %v218_v52 }
  0x50   : > { %1833 = vmatmul.mubr.bf16.gmra.mrb[20].mxu1 %v2314_v55  ;;  %2691 = vmatpush3.bf16.msra.mxu0 %v2928_v58  ;;  %v2318_v55 = vcombine.low %v210_v50, %v218_v52  ;;  %v2960_v58 = vld [vmem:[%s3532_s1 + $0x310] sm:$0xff]  }
  0x51   : > { %2731 = vmatpush3.bf16.msra.mxu1 %v2929_v59  ;;  %2692 = vmatprep.subr.bf16.mxu0 %v2930_v60  ;;  %v2961_v59 = vld [vmem:[%s3532_s1 + $0x390] sm:$0xff]   ;;  %v2962_v60 = vld [vmem:[%s3532_s1 + $0x358] sm:$0xff]  }
  0x52   : > { %2732 = vmatprep.subr.bf16.mxu1 %v2931_v61  ;;  %1775 = vmatprep.mubr.bf16.mxu0 %v2329_v3  ;;  %v2963_v61 = vld [vmem:[%s3532_s1 + $0x3d8] sm:$0xff]   ;;  %v226_v3 = vld [vmem:[%s3117_s29 + $0x128] sm:$0xff] }
  0x53   : > { %1840 = vmatprep.mubr.bf16.mxu1 %v2331_v6  ;;  %v2335_v6 = vcombine.high %v226_v3, %v234_v4 }
  0x54   : > { %2693 = vmatpush3.bf16.msra.mxu0 %v2932_v62  ;;  %v2964_v62 = vld [vmem:[%s3532_s1 + $0x318] sm:$0xff]  }
  0x55   : > { %2733 = vmatpush3.bf16.msra.mxu1 %v2933_v63  ;;  %2694 = vmatprep.subr.bf16.mxu0 %v2934_v8  ;;  %v2965_v63 = vld [vmem:[%s3532_s1 + $0x398] sm:$0xff]   ;;  %v2966_v8 = vld [vmem:[%s3532_s1 + $0x360] sm:$0xff]  }
  0x56   : > { %2734 = vmatprep.subr.bf16.mxu1 %v2935_v9  ;;  %v2967_v9 = vld [vmem:[%s3532_s1 + $0x3e0] sm:$0xff]  }
  0x57   : > { %1776 = vmatmul.mubr.bf16.gmra.mrb[24].mxu0 %v2328_v5  ;;  %v2332_v5 = vcombine.low %v225_v0, %v233_v1 }
  0x58   : > { %1841 = vmatmul.mubr.bf16.gmra.mrb[24].mxu1 %v2330_v7  ;;  %2695 = vmatpush3.bf16.msra.mxu0 %v2936_v10  ;;  %v2334_v7 = vcombine.low %v226_v3, %v234_v4  ;;  %v2968_v10 = vld [vmem:[%s3532_s1 + $0x320] sm:$0xff]  }
  0x59   : > { %2735 = vmatpush3.bf16.msra.mxu1 %v2937_v11  ;;  %2696 = vmatprep.subr.bf16.mxu0 %v2938_v12  ;;  %v2969_v11 = vld [vmem:[%s3532_s1 + $0x3a0] sm:$0xff]   ;;  %v2970_v12 = vld [vmem:[%s3532_s1 + $0x368] sm:$0xff]  }
  0x5a   : > { %2736 = vmatprep.subr.bf16.mxu1 %v2939_v13  ;;  %1783 = vmatprep.mubr.bf16.mxu0 %v2345_v18  ;;  %v2971_v13 = vld [vmem:[%s3532_s1 + $0x3e8] sm:$0xff]  }
  0x5b   : > { %1848 = vmatprep.mubr.bf16.mxu1 %v2347_v22  ;;  %v242_v18 = vld [vmem:[%s3117_s29 + $0x1a8] sm:$0xff]  ;;  %v2348_v22 = vcombine.low %v241_v16, %v249_v17 }
  0x5c   : > { %2697 = vmatpush3.bf16.msra.mxu0 %v2940_v14  ;;  %v2972_v14 = vld [vmem:[%s3532_s1 + $0x328] sm:$0xff]  }
  0x5d   : > { %2737 = vmatpush3.bf16.msra.mxu1 %v2941_v15  ;;  %2698 = vmatprep.subr.bf16.mxu0 %v2942_v24  ;;  %v2973_v15 = vld [vmem:[%s3532_s1 + $0x3a8] sm:$0xff]   ;;  %v2974_v24 = vld [vmem:[%s3532_s1 + $0x370] sm:$0xff]  }
  0x5e   : > { %2738 = vmatprep.subr.bf16.mxu1 %v2943_v25  ;;  %v2975_v25 = vld [vmem:[%s3532_s1 + $0x3f0] sm:$0xff]  }
  0x5f   : > { %1784 = vmatmul.mubr.bf16.gmra.mrb[28].mxu0 %v2344_v21  ;;  %v2351_v21 = vcombine.high %v242_v18, %v250_v19 }
  0x60   : > { %1849 = vmatmul.mubr.bf16.gmra.mrb[28].mxu1 %v2346_v23  ;;  %2699 = vmatpush3.bf16.msra.mxu0 %v2944_v26  ;;  %v2350_v23 = vcombine.low %v242_v18, %v250_v19  ;;  %v2976_v26 = vld [vmem:[%s3532_s1 + $0x330] sm:$0xff]  }
  0x61   : > { %2739 = vmatpush3.bf16.msra.mxu1 %v2945_v27  ;;  %2700 = vmatprep.subr.bf16.mxu0 %v2946_v28  ;;  %v2977_v27 = vld [vmem:[%s3532_s1 + $0x3b0] sm:$0xff]   ;;  %v2978_v28 = vld [vmem:[%s3532_s1 + $0x378] sm:$0xff]  }
  0x62   : > { %2740 = vmatprep.subr.bf16.mxu1 %v2947_v29  ;;  %1889 = vmatprep.mubr.bf16.mxu0 %v2301_v37  ;;  %v2979_v29 = vld [vmem:[%s3532_s1 + $0x3f8] sm:$0xff]  }
  0x63   : > { %1954 = vmatprep.mubr.bf16.mxu1 %v2303_v39  ;;  %v204_v37 = vld [vmem:[%s3117_s29 + $0x78] sm:$0xff]  ;;  %v219_v39 = vld [vmem:[%s3117_s29 + $0xf0] sm:$0xff] }
  0x64   : > { %2701 = vmatpush3.bf16.msra.mxu0 %v2948_v30  ;;  %v2980_v30 = vld [vmem:[%s3532_s1 + $0x338] sm:$0xff]  }
  0x65   : > { %2741 = vmatpush3.bf16.msra.mxu1 %v2949_v31  ;;  %2766 = vmatprep.subr.bf16.mxu0 %v2950_v40  ;;  %v2981_v31 = vld [vmem:[%s3532_s1 + $0x3b8] sm:$0xff]   ;;  %v2306_v40 = vcombine.low %v196_v34, %v204_v37 }
  0x66   : > { %2806 = vmatprep.subr.bf16.mxu1 %v2951_v41  ;;  %v2307_v41 = vcombine.high %v196_v34, %v204_v37 }
  0x67   : > { %1890 = vmatmul.mubr.bf16.vlgmr.msra.gmra.mrb[32].mxu0 %v2300_v36  ;;  %v2305_v36 = vcombine.high %v195_v32, %v203_v33 }
  0x68   : > { %1955 = vmatmul.mubr.bf16.vlgmr.msra.gmra.mrb[32].mxu1 %v2302_v38  ;;  %2767 = vmatpush3.bf16.msra.mxu0 %v2952_v42  ;;  %v211_v38 = vld [vmem:[%s3117_s29 + $0xb0] sm:$0xff] }
  0x69   : > { %2807 = vmatpush3.bf16.msra.mxu1 %v2953_v43  ;;  %2768 = vmatprep.subr.bf16.mxu0 %v2954_v44  ;;  %v2321_v42 = vcombine.high %v211_v38, %v219_v39  ;;  %v212_v43 = vld [vmem:[%s3117_s29 + $0xb8] sm:$0xff]  ;;  %v2320_v50 = vcombine.low %v211_v38, %v219_v39 }
  0x6a   : > { %2808 = vmatprep.subr.bf16.mxu1 %v2955_v45  ;;  %1897 = vmatprep.mubr.bf16.mxu0 %v2317_v51  ;;  %v220_v44 = vld [vmem:[%s3117_s29 + $0xf8] sm:$0xff] }
  0x6b   : > { %1962 = vmatprep.mubr.bf16.mxu1 %v2319_v54  ;;  %v2323_v45 = vcombine.high %v212_v43, %v220_v44  ;;  %v2322_v51 = vcombine.low %v212_v43, %v220_v44  ;;  %v243_v54 = vld [vmem:[%s3117_s29 + $0x1b0] sm:$0xff] }
  0x6c   : > { %2769 = vmatpush3.bf16.msra.mxu0 %v2956_v46  ;;  %v227_v46 = vld [vmem:[%s3117_s29 + $0x130] sm:$0xff] }
  0x6d   : > { %2809 = vmatpush3.bf16.msra.mxu1 %v2957_v47  ;;  %2770 = vmatprep.subr.bf16.mxu0 %v2958_v56  ;;  %v235_v47 = vld [vmem:[%s3117_s29 + $0x170] sm:$0xff]  ;;  %v244_v56 = vld [vmem:[%s3117_s29 + $0x1b8] sm:$0xff] }
  0x6e   : > { %2810 = vmatprep.subr.bf16.mxu1 %v2959_v57  ;;  %v2337_v52 = vcombine.high %v227_v46, %v235_v47  ;;  %v252_v57 = vld [vmem:[%s3117_s29 + $0x1f8] sm:$0xff] }
  0x6f   : > { %1898 = vmatmul.mubr.bf16.gmra.mrb[36].mxu0 %v2316_v53  ;;  %v2339_v53 = vcombine.high %v228_v48, %v236_v49 }
  0x70   : > { %1963 = vmatmul.mubr.bf16.gmra.mrb[36].mxu1 %v2318_v55  ;;  %2771 = vmatpush3.bf16.msra.mxu0 %v2960_v58  ;;  %v251_v55 = vld [vmem:[%s3117_s29 + $0x1f0] sm:$0xff]  ;;  %v2336_v58 = vcombine.low %v227_v46, %v235_v47  ;;  %s2290_s29 = sshll.u32 %s3536_s21, 2  ;;  %s2291_s21 = sshll.u32 %s3538_s13, 1 }
  0x71   : > { %2811 = vmatpush3.bf16.msra.mxu1 %v2961_v59  ;;  %2772 = vmatprep.subr.bf16.mxu0 %v2962_v60  ;;  %v2338_v59 = vcombine.low %v228_v48, %v236_v49  ;;  %v2353_v60 = vcombine.high %v243_v54, %v251_v55  ;;  %s3511_s19 = scalar_lea.vmem %s3533_s2, %s2290_s29  ;;  %s187_s23 = scalar_lea.vmem %s3534_s3, %s2291_s21 }
  0x72   : > { %2812 = vmatprep.subr.bf16.mxu1 %v2963_v61  ;;  %1905 = vmatprep.mubr.bf16.mxu0 %v2333_v2  ;;  %v2355_v61 = vcombine.high %v244_v56, %v252_v57 }
  0x73   : > { %1970 = vmatprep.mubr.bf16.mxu1 %v2335_v6 }
  0x74   : > { %2773 = vmatpush3.bf16.msra.mxu0 %v2964_v62  ;;  %v2352_v62 = vcombine.low %v243_v54, %v251_v55 }
  0x75   : > { %2813 = vmatpush3.bf16.msra.mxu1 %v2965_v63  ;;  %2774 = vmatprep.subr.bf16.mxu0 %v2966_v8  ;;  %v2354_v63 = vcombine.low %v244_v56, %v252_v57 }
  0x76   : > { %2814 = vmatprep.subr.bf16.mxu1 %v2967_v9 }
  0x77   : > { %1906 = vmatmul.mubr.bf16.gmra.mrb[40].mxu0 %v2332_v5 }
  0x78   : > { %1971 = vmatmul.mubr.bf16.gmra.mrb[40].mxu1 %v2334_v7  ;;  %2775 = vmatpush3.bf16.msra.mxu0 %v2968_v10 }
  0x79   : > { %2815 = vmatpush3.bf16.msra.mxu1 %v2969_v11  ;;  %2776 = vmatprep.subr.bf16.mxu0 %v2970_v12 }
  0x7a   : > { %2816 = vmatprep.subr.bf16.mxu1 %v2971_v13  ;;  %1913 = vmatprep.mubr.bf16.mxu0 %v2349_v20 }
  0x7b   : > { %1978 = vmatprep.mubr.bf16.mxu1 %v2351_v21 }
  0x7c   : > { %2777 = vmatpush3.bf16.msra.mxu0 %v2972_v14 }
  0x7d   : > { %2817 = vmatpush3.bf16.msra.mxu1 %v2973_v15  ;;  %2778 = vmatprep.subr.bf16.mxu0 %v2974_v24 }
  0x7e   : > { %2818 = vmatprep.subr.bf16.mxu1 %v2975_v25 }
  0x7f   : > { %1914 = vmatmul.mubr.bf16.gmra.mrb[44].mxu0 %v2348_v22 }
  0x80   : > { %1979 = vmatmul.mubr.bf16.gmra.mrb[44].mxu1 %v2350_v23  ;;  %2779 = vmatpush3.bf16.msra.mxu0 %v2976_v26 }
  0x81   : > { %2819 = vmatpush3.bf16.msra.mxu1 %v2977_v27  ;;  %2780 = vmatprep.subr.bf16.mxu0 %v2978_v28 }
  0x82   : > { %2820 = vmatprep.subr.bf16.mxu1 %v2979_v29  ;;  %2019 = vmatprep.mubr.bf16.mxu0 %v2305_v36 }
  0x83   : > { %2084 = vmatprep.mubr.bf16.mxu1 %v2307_v41 }
  0x84   : > { %2781 = vmatpush3.bf16.msra.mxu0 %v2980_v30 }
  0x85   : > { %2821 = vmatpush3.bf16.msra.mxu1 %v2981_v31 }
  0x87   : > { %2020 = vmatmul.mubr.bf16.vlgmr.msra.gmra.mrb[48].mxu0 %v2304_v35 }
  0x88   : > { %2085 = vmatmul.mubr.bf16.vlgmr.msra.gmra.mrb[48].mxu1 %v2306_v40  ;;  %2027 = vmatprep.mubr.bf16.mxu0 %v2321_v42 }
  0x89   : > { %2092 = vmatprep.mubr.bf16.mxu1 %v2323_v45 }
  0x8f   : > { %2028 = vmatmul.mubr.bf16.gmra.mrb[52].mxu0 %v2320_v50 }
  0x90   : > { %2093 = vmatmul.mubr.bf16.gmra.mrb[52].mxu1 %v2322_v51  ;;  %2035 = vmatprep.mubr.bf16.mxu0 %v2337_v52 }
  0x91   : > { %2100 = vmatprep.mubr.bf16.mxu1 %v2339_v53 }
  0x97   : > { %2036 = vmatmul.mubr.bf16.gmra.mrb[56].mxu0 %v2336_v58 }
  0x98   : > { %2101 = vmatmul.mubr.bf16.gmra.mrb[56].mxu1 %v2338_v59  ;;  %2043 = vmatprep.mubr.bf16.mxu0 %v2353_v60 }
  0x99   : > { %2108 = vmatprep.mubr.bf16.mxu1 %v2355_v61 }
  0x9f   : > { %2044 = vmatmul.mubr.bf16.gmra.mrb[60].mxu0 %v2352_v62 }
  0xa0   : > { %2109 = vmatmul.mubr.bf16.gmra.mrb[60].mxu1 %v2354_v63 }
  0xfa   : > { %v2542_v0 = vpop.f32.mrb[0].mxu0 }
  0xfb   : > { %v2582_v1 = vpop.f32.mrb[0].mxu1  ;;  %v2543_v2 = vpop.f32.mrb[1].mxu0 }
  0xfc   : > { %v2544_v3 = vadd.f32 %v2543_v2, %v2542_v0  ;;  %v2583_v4 = vpop.f32.mrb[1].mxu1  ;;  %v2545_v5 = vpop.f32.mrb[2].mxu0 }
  0xfd   : > { %v2584_v6 = vadd.f32 %v2583_v4, %v2582_v1  ;;  %v2585_v7 = vpop.f32.mrb[2].mxu1  ;;  %v2546_v8 = vpop.f32.mrb[3].mxu0 }
  0xfe   : > { %v2547_v9 = vadd.f32 %v2546_v8, %v2545_v5  ;;  %v2586_v10 = vpop.f32.mrb[3].mxu1 }
  0xff   : > { %v1697_v11 = vadd.f32 %v2584_v6, %v2544_v3  ;;  %v2587_v12 = vadd.f32 %v2586_v10, %v2585_v7 }
 0x101   : > { %v1700_v13 = vadd.f32 %v2587_v12, %v2547_v9 }
 0x102   : > { %v2548_v14 = vpop.f32.mrb[4].mxu0 }
 0x103   : > { %v2588_v15 = vpop.f32.mrb[4].mxu1  ;;  %v2549_v16 = vpop.f32.mrb[5].mxu0 }
 0x104   : > { %v2550_v17 = vadd.f32 %v2549_v16, %v2548_v14  ;;  %v2589_v18 = vpop.f32.mrb[5].mxu1  ;;  %v2551_v19 = vpop.f32.mrb[6].mxu0 }
 0x105   : > { %v2590_v20 = vadd.f32 %v2589_v18, %v2588_v15  ;;  %v2591_v21 = vpop.f32.mrb[6].mxu1  ;;  %v2552_v22 = vpop.f32.mrb[7].mxu0 }
 0x106   : > { %v2553_v23 = vadd.f32 %v2552_v22, %v2551_v19  ;;  %v2592_v24 = vpop.f32.mrb[7].mxu1 }
 0x107   : > { %v1705_v25 = vadd.f32 %v2590_v20, %v2550_v17  ;;  %v2593_v26 = vadd.f32 %v2592_v24, %v2591_v21 }
 0x109   : > { %v1708_v27 = vadd.f32 %v2593_v26, %v2553_v23 }
 0x10a   : > { %v2554_v28 = vpop.f32.mrb[8].mxu0 }
 0x10b   : > { %v2594_v29 = vpop.f32.mrb[8].mxu1  ;;  %v2555_v30 = vpop.f32.mrb[9].mxu0 }
 0x10c   : > { %v2595_v31 = vpop.f32.mrb[9].mxu1  ;;  %v2556_v32 = vadd.f32 %v2555_v30, %v2554_v28  ;;  %v2557_v34 = vpop.f32.mrb[10].mxu0 }
 0x10d   : > { %v2596_v33 = vadd.f32 %v2595_v31, %v2594_v29  ;;  %v2597_v35 = vpop.f32.mrb[10].mxu1  ;;  %v2558_v36 = vpop.f32.mrb[11].mxu0 }
 0x10e   : > { %v2598_v37 = vpop.f32.mrb[11].mxu1  ;;  %v2559_v39 = vadd.f32 %v2558_v36, %v2557_v34 }
 0x10f   : > { %v1713_v38 = vadd.f32 %v2596_v33, %v2556_v32  ;;  %v2599_v40 = vadd.f32 %v2598_v37, %v2597_v35 }
 0x111   : > { %v1716_v41 = vadd.f32 %v2599_v40, %v2559_v39 }
 0x112   : > { %v2560_v42 = vpop.f32.mrb[12].mxu0 }
 0x113   : > { %v2600_v43 = vpop.f32.mrb[12].mxu1  ;;  %v2561_v44 = vpop.f32.mrb[13].mxu0 }
 0x114   : > { %v2562_v45 = vadd.f32 %v2561_v44, %v2560_v42  ;;  %v2601_v46 = vpop.f32.mrb[13].mxu1  ;;  %v2563_v47 = vpop.f32.mrb[14].mxu0 }
 0x115   : > { %v2602_v48 = vadd.f32 %v2601_v46, %v2600_v43  ;;  %v2603_v49 = vpop.f32.mrb[14].mxu1  ;;  %v2564_v50 = vpop.f32.mrb[15].mxu0 }
 0x116   : > { %v2565_v51 = vadd.f32 %v2564_v50, %v2563_v47  ;;  %v2604_v52 = vpop.f32.mrb[15].mxu1 }
 0x117   : > { %v1721_v53 = vadd.f32 %v2602_v48, %v2562_v45  ;;  %v2605_v54 = vadd.f32 %v2604_v52, %v2603_v49 }
 0x119   : > { %v3477_v55 = vadd.f32 %v2605_v54, %v2565_v51 }
 0x11a   : > { %v2622_v56 = vpop.f32.mrb[16].mxu0 }
 0x11b   : > { %v2662_v57 = vpop.f32.mrb[16].mxu1  ;;  %v2623_v58 = vpop.f32.mrb[17].mxu0 }
 0x11c   : > { %v2624_v59 = vadd.f32 %v2623_v58, %v2622_v56  ;;  %v2663_v60 = vpop.f32.mrb[17].mxu1  ;;  %v2625_v61 = vpop.f32.mrb[18].mxu0 }
 0x11d   : > { %v2664_v62 = vadd.f32 %v2663_v60, %v2662_v57  ;;  %v2665_v63 = vpop.f32.mrb[18].mxu1  ;;  %v2626_v0 = vpop.f32.mrb[19].mxu0 }
 0x11e   : > { %v1762_v1 = vadd.f32 %v2624_v59, %v1697_v11  ;;  %v2627_v2 = vadd.f32 %v2626_v0, %v2625_v61  ;;  %v2666_v3 = vpop.f32.mrb[19].mxu1 }
 0x11f   : > { %v2667_v4 = vadd.f32 %v2666_v3, %v2665_v63 }
 0x120   : > { %v1827_v5 = vadd.f32 %v2664_v62, %v1762_v1  ;;  %v1765_v6 = vadd.f32 %v2627_v2, %v1700_v13 }
 0x122   : > { %v3479_v7 = vadd.f32 %v2667_v4, %v1765_v6  ;;  %v2628_v8 = vpop.f32.mrb[20].mxu0 }
 0x123   : > { %v2668_v9 = vpop.f32.mrb[20].mxu1  ;;  %v2629_v10 = vpop.f32.mrb[21].mxu0 }
 0x124   : > { %v2669_v12 = vpop.f32.mrb[21].mxu1  ;;  %v2630_v14 = vadd.f32 %v2629_v10, %v2628_v8  ;;  %v2631_v16 = vpop.f32.mrb[22].mxu0 }
 0x125   : > { %v2670_v15 = vadd.f32 %v2669_v12, %v2668_v9  ;;  %v2671_v17 = vpop.f32.mrb[22].mxu1  ;;  %v2632_v18 = vpop.f32.mrb[23].mxu0 }
 0x126   : > { %v2672_v19 = vpop.f32.mrb[23].mxu1  ;;  %v1770_v20 = vadd.f32 %v2630_v14, %v1705_v25  ;;  %v2633_v21 = vadd.f32 %v2632_v18, %v2631_v16 }
 0x127   : > { %v2673_v11 = vadd.f32 %v2672_v19, %v2671_v17 }
 0x128   : > { %v1835_v22 = vadd.f32 %v2670_v15, %v1770_v20  ;;  %v1773_v23 = vadd.f32 %v2633_v21, %v1708_v27 }
 0x12a   : > { %v3481_v24 = vadd.f32 %v2673_v11, %v1773_v23  ;;  %v2634_v13 = vpop.f32.mrb[24].mxu0 }
 0x12b   : > { %v2674_v26 = vpop.f32.mrb[24].mxu1  ;;  %v2635_v28 = vpop.f32.mrb[25].mxu0 }
 0x12c   : > { %v2636_v29 = vadd.f32 %v2635_v28, %v2634_v13  ;;  %v2675_v30 = vpop.f32.mrb[25].mxu1  ;;  %v2637_v31 = vpop.f32.mrb[26].mxu0 }
 0x12d   : > { %v2676_v32 = vadd.f32 %v2675_v30, %v2674_v26  ;;  %v2677_v33 = vpop.f32.mrb[26].mxu1  ;;  %v2638_v34 = vpop.f32.mrb[27].mxu0 }
 0x12e   : > { %v1778_v35 = vadd.f32 %v2636_v29, %v1713_v38  ;;  %v2639_v36 = vadd.f32 %v2638_v34, %v2637_v31  ;;  %v2678_v37 = vpop.f32.mrb[27].mxu1 }
 0x12f   : > { %v2679_v39 = vadd.f32 %v2678_v37, %v2677_v33 }
 0x130   : > { %v1843_v25 = vadd.f32 %v2676_v32, %v1778_v35  ;;  %v1781_v40 = vadd.f32 %v2639_v36, %v1716_v41 }
 0x132   : > { %v3483_v42 = vadd.f32 %v2679_v39, %v1781_v40  ;;  %v2640_v27 = vpop.f32.mrb[28].mxu0 }
 0x133   : > { %v2680_v43 = vpop.f32.mrb[28].mxu1  ;;  %v2641_v44 = vpop.f32.mrb[29].mxu0 }
 0x134   : > { %v2642_v45 = vadd.f32 %v2641_v44, %v2640_v27  ;;  %v2681_v46 = vpop.f32.mrb[29].mxu1  ;;  %v2643_v47 = vpop.f32.mrb[30].mxu0 }
 0x135   : > { %v2682_v48 = vadd.f32 %v2681_v46, %v2680_v43  ;;  %v2683_v49 = vpop.f32.mrb[30].mxu1  ;;  %v2644_v50 = vpop.f32.mrb[31].mxu0 }
 0x136   : > { %v1786_v51 = vadd.f32 %v2642_v45, %v1721_v53  ;;  %v2645_v52 = vadd.f32 %v2644_v50, %v2643_v47  ;;  %v2684_v54 = vpop.f32.mrb[31].mxu1 }
 0x137   : > { %v2685_v38 = vadd.f32 %v2684_v54, %v2683_v49 }
 0x138   : > { %v1851_v56 = vadd.f32 %v2682_v48, %v1786_v51  ;;  %v1789_v57 = vadd.f32 %v2645_v52, %v3477_v55 }
 0x13a   : > { %v3486_v58 = vadd.f32 %v2685_v38, %v1789_v57  ;;  %v2702_v41 = vpop.f32.mrb[32].mxu0 }
 0x13b   : > { %v2742_v59 = vpop.f32.mrb[32].mxu1  ;;  %v2703_v60 = vpop.f32.mrb[33].mxu0 }
 0x13c   : > { %v2743_v61 = vpop.f32.mrb[33].mxu1  ;;  %v2704_v62 = vadd.f32 %v2703_v60, %v2702_v41  ;;  %v2705_v0 = vpop.f32.mrb[34].mxu0 }
 0x13d   : > { %v2744_v63 = vadd.f32 %v2743_v61, %v2742_v59  ;;  %v2745_v1 = vpop.f32.mrb[34].mxu1  ;;  %v2706_v2 = vpop.f32.mrb[35].mxu0 }
 0x13e   : > { %v2746_v3 = vpop.f32.mrb[35].mxu1  ;;  %v1892_v4 = vadd.f32 %v2704_v62, %v1827_v5  ;;  %v2707_v53 = vadd.f32 %v2706_v2, %v2705_v0 }
 0x13f   : > { %v2747_v6 = vadd.f32 %v2746_v3, %v2745_v1 }
 0x140   : > { %v1957_v8 = vadd.f32 %v2744_v63, %v1892_v4  ;;  %v1895_v9 = vadd.f32 %v2707_v53, %v3479_v7 }
 0x142   : > { %v3489_v10 = vadd.f32 %v2747_v6, %v1895_v9  ;;  %v2708_v55 = vpop.f32.mrb[36].mxu0 }
 0x143   : > { %v2748_v12 = vpop.f32.mrb[36].mxu1  ;;  %v2709_v14 = vpop.f32.mrb[37].mxu0 }
 0x144   : > { %v2710_v15 = vadd.f32 %v2709_v14, %v2708_v55  ;;  %v2749_v16 = vpop.f32.mrb[37].mxu1  ;;  %v2711_v17 = vpop.f32.mrb[38].mxu0 }
 0x145   : > { %v2750_v18 = vadd.f32 %v2749_v16, %v2748_v12  ;;  %v2751_v19 = vpop.f32.mrb[38].mxu1  ;;  %v2712_v20 = vpop.f32.mrb[39].mxu0 }
 0x146   : > { %v1900_v21 = vadd.f32 %v2710_v15, %v1835_v22  ;;  %v2713_v11 = vadd.f32 %v2712_v20, %v2711_v17  ;;  %v2752_v23 = vpop.f32.mrb[39].mxu1 }
 0x147   : > { %v2753_v5 = vadd.f32 %v2752_v23, %v2751_v19 }
 0x148   : > { %v3491_v13 = vadd.f32 %v2750_v18, %v1900_v21  ;;  %v1903_v26 = vadd.f32 %v2713_v11, %v3481_v24 }
 0x14a   : > { %v3494_v7 = vadd.f32 %v2753_v5, %v1903_v26  ;;  %v2714_v28 = vpop.f32.mrb[40].mxu0 }
 0x14b   : > { %v2754_v29 = vpop.f32.mrb[40].mxu1  ;;  %v2715_v30 = vpop.f32.mrb[41].mxu0 }
 0x14c   : > { %v2716_v31 = vadd.f32 %v2715_v30, %v2714_v28  ;;  %v2755_v32 = vpop.f32.mrb[41].mxu1  ;;  %v2717_v33 = vpop.f32.mrb[42].mxu0 }
 0x14d   : > { %v2756_v34 = vadd.f32 %v2755_v32, %v2754_v29  ;;  %v2757_v35 = vpop.f32.mrb[42].mxu1  ;;  %v2718_v36 = vpop.f32.mrb[43].mxu0 }
 0x14e   : > { %v1908_v37 = vadd.f32 %v2716_v31, %v1843_v25  ;;  %v2719_v22 = vadd.f32 %v2718_v36, %v2717_v33  ;;  %v2758_v39 = vpop.f32.mrb[43].mxu1 }
 0x14f   : > { %v2759_v40 = vadd.f32 %v2758_v39, %v2757_v35 }
 0x150   : > { %v3496_v27 = vadd.f32 %v2756_v34, %v1908_v37  ;;  %v1911_v43 = vadd.f32 %v2719_v22, %v3483_v42 }
 0x152   : > { %v3499_v24 = vadd.f32 %v2759_v40, %v1911_v43  ;;  %v2720_v44 = vpop.f32.mrb[44].mxu0 }
 0x153   : > { %v2760_v45 = vpop.f32.mrb[44].mxu1  ;;  %v2721_v46 = vpop.f32.mrb[45].mxu0 }
 0x154   : > { %v2761_v47 = vpop.f32.mrb[45].mxu1  ;;  %v2722_v48 = vadd.f32 %v2721_v46, %v2720_v44  ;;  %v2723_v50 = vpop.f32.mrb[46].mxu0 }
 0x155   : > { %v2762_v49 = vadd.f32 %v2761_v47, %v2760_v45  ;;  %v2763_v51 = vpop.f32.mrb[46].mxu1  ;;  %v2724_v52 = vpop.f32.mrb[47].mxu0 }
 0x156   : > { %v2764_v54 = vpop.f32.mrb[47].mxu1  ;;  %v1916_v25 = vadd.f32 %v2722_v48, %v1851_v56  ;;  %v2725_v38 = vadd.f32 %v2724_v52, %v2723_v50 }
 0x157   : > { %v2765_v57 = vadd.f32 %v2764_v54, %v2763_v51 }
 0x158   : > { %v3501_v41 = vadd.f32 %v2762_v49, %v1916_v25  ;;  %v1919_v59 = vadd.f32 %v2725_v38, %v3486_v58 }
 0x15a   : > { %v3504_v42 = vadd.f32 %v2765_v57, %v1919_v59  ;;  %v2782_v60 = vpop.f32.mrb[48].mxu0 }
 0x15b   : > { %v2822_v61 = vpop.f32.mrb[48].mxu1  ;;  %v2783_v62 = vpop.f32.mrb[49].mxu0 }
 0x15c   : > { %v2784_v63 = vadd.f32 %v2783_v62, %v2782_v60  ;;  %v2823_v0 = vpop.f32.mrb[49].mxu1  ;;  %v2785_v1 = vpop.f32.mrb[50].mxu0 }
 0x15d   : > { %v2824_v2 = vadd.f32 %v2823_v0, %v2822_v61  ;;  %v2825_v3 = vpop.f32.mrb[50].mxu1  ;;  %v2786_v4 = vpop.f32.mrb[51].mxu0 }
 0x15e   : > { %v2022_v53 = vadd.f32 %v2784_v63, %v1957_v8  ;;  %v2787_v56 = vadd.f32 %v2786_v4, %v2785_v1  ;;  %v2826_v6 = vpop.f32.mrb[51].mxu1 }
 0x15f   : > { %v2827_v9 = vadd.f32 %v2826_v6, %v2825_v3 }
 0x160   : > { %v2087_v55 = vadd.f32 %v2824_v2, %v2022_v53  ;;  %v2025_v12 = vadd.f32 %v2787_v56, %v3489_v10 }
 0x162   : > { %v2090_v58 = vadd.f32 %v2827_v9, %v2025_v12  ;;  %v2788_v14 = vpop.f32.mrb[52].mxu0  ;;  %v2170_v15 = vmul.f32 %v2087_v55, %v2087_v55 }
 0x163   : > { %v2828_v16 = vpop.f32.mrb[52].mxu1  ;;  %v2789_v17 = vpop.f32.mrb[53].mxu0 }
 0x164   : > { %v2506_v18 = vpack.c.bf16 %v2090_v58, %v2087_v55  ;;  %v2157_v8 = vadd.f32 %v2090_v58, %v2087_v55  ;;  %v2171_v19 = vmul.f32 %v2090_v58, %v2090_v58  ;;  %v2790_v20 = vadd.f32 %v2789_v17, %v2788_v14  ;;  %v2829_v21 = vpop.f32.mrb[53].mxu1  ;;  %v2791_v11 = vpop.f32.mrb[54].mxu0 }
 0x165   : > { %v2830_v23 = vadd.f32 %v2829_v21, %v2828_v16  ;;  %v2831_v10 = vpop.f32.mrb[54].mxu1  ;;  %v2792_v5 = vpop.f32.mrb[55].mxu0 }
 0x166   : > { %2507 = vst [vmem:[%s3511_s19] sm:$0xff] %v2506_v18   ;;  %v2178_v26 = vadd.f32 %v2171_v19, %v2170_v15  ;;  %v2030_v28 = vadd.f32 %v2790_v20, %v3491_v13  ;;  %v2793_v29 = vadd.f32 %v2792_v5, %v2791_v11  ;;  %v2832_v30 = vpop.f32.mrb[55].mxu1 }
 0x167   : > { %v2833_v31 = vadd.f32 %v2832_v30, %v2831_v10 }
 0x168   : > { %v2095_v32 = vadd.f32 %v2830_v23, %v2030_v28  ;;  %v2033_v33 = vadd.f32 %v2793_v29, %v3494_v7 }
 0x16a   : > { %v2158_v34 = vadd.f32 %v2157_v8, %v2095_v32  ;;  %v2172_v35 = vmul.f32 %v2095_v32, %v2095_v32  ;;  %v2098_v36 = vadd.f32 %v2833_v31, %v2033_v33  ;;  %v2794_v37 = vpop.f32.mrb[56].mxu0 }
 0x16b   : > { %v2834_v22 = vpop.f32.mrb[56].mxu1  ;;  %v2795_v39 = vpop.f32.mrb[57].mxu0 }
 0x16c   : > { %v2179_v40 = vadd.f32 %v2178_v26, %v2172_v35  ;;  %v2511_v43 = vpack.c.bf16 %v2098_v36, %v2095_v32  ;;  %v2159_v44 = vadd.f32 %v2158_v34, %v2098_v36  ;;  %v2173_v45 = vmul.f32 %v2098_v36, %v2098_v36  ;;  %v2835_v46 = vpop.f32.mrb[57].mxu1  ;;  %v2797_v47 = vpop.f32.mrb[58].mxu0 }
 0x16d   : > { %v2796_v13 = vadd.f32 %v2795_v39, %v2794_v37  ;;  %v2836_v48 = vadd.f32 %v2835_v46, %v2834_v22  ;;  %v2837_v49 = vpop.f32.mrb[58].mxu1  ;;  %v2798_v50 = vpop.f32.mrb[59].mxu0 }
 0x16e   : > { %2523 = vst [vmem:[%s3511_s19 + $0x8] sm:$0xff] %v2511_v43   ;;  %v2180_v51 = vadd.f32 %v2179_v40, %v2173_v45  ;;  %v2799_v7 = vadd.f32 %v2798_v50, %v2797_v47  ;;  %v2838_v52 = vpop.f32.mrb[59].mxu1 }
 0x16f   : > { %v2038_v54 = vadd.f32 %v2796_v13, %v3496_v27  ;;  %v2839_v25 = vadd.f32 %v2838_v52, %v2837_v49 }
 0x170   : > { %v2041_v38 = vadd.f32 %v2799_v7, %v3499_v24 }
 0x171   : > { %v2103_v57 = vadd.f32 %v2836_v48, %v2038_v54 }
 0x172   : > { %v2106_v59 = vadd.f32 %v2839_v25, %v2041_v38  ;;  %v2800_v60 = vpop.f32.mrb[60].mxu0 }
 0x173   : > { %v2160_v61 = vadd.f32 %v2159_v44, %v2103_v57  ;;  %v2174_v62 = vmul.f32 %v2103_v57, %v2103_v57  ;;  %v2840_v63 = vpop.f32.mrb[60].mxu1  ;;  %v2801_v0 = vpop.f32.mrb[61].mxu0 }
 0x174   : > { %v2516_v1 = vpack.c.bf16 %v2106_v59, %v2103_v57  ;;  %v2175_v2 = vmul.f32 %v2106_v59, %v2106_v59  ;;  %v2802_v3 = vadd.f32 %v2801_v0, %v2800_v60  ;;  %v2841_v4 = vpop.f32.mrb[61].mxu1  ;;  %v2803_v53 = vpop.f32.mrb[62].mxu0 }
 0x175   : > { %v2181_v56 = vadd.f32 %v2180_v51, %v2174_v62  ;;  %v2161_v6 = vadd.f32 %v2160_v61, %v2106_v59  ;;  %v2842_v9 = vadd.f32 %v2841_v4, %v2840_v63  ;;  %v2843_v27 = vpop.f32.mrb[62].mxu1  ;;  %v2804_v55 = vpop.f32.mrb[63].mxu0 }
 0x176   : > { %2524 = vst [vmem:[%s3511_s19 + $0x10] sm:$0xff] %v2516_v1   ;;  %v2046_v24 = vadd.f32 %v2802_v3, %v3501_v41  ;;  %v2805_v12 = vadd.f32 %v2804_v55, %v2803_v53  ;;  %v2844_v58 = vpop.f32.mrb[63].mxu1 }
 0x177   : > { %v2182_v14 = vadd.f32 %v2181_v56, %v2175_v2  ;;  %v2845_v15 = vadd.f32 %v2844_v58, %v2843_v27 }
 0x178   : > { %v2111_v16 = vadd.f32 %v2842_v9, %v2046_v24  ;;  %v2049_v17 = vadd.f32 %v2805_v12, %v3504_v42 }
 0x17a   : > { %v2162_v18 = vadd.f32 %v2161_v6, %v2111_v16  ;;  %v2176_v8 = vmul.f32 %v2111_v16, %v2111_v16  ;;  %v2114_v19 = vadd.f32 %v2845_v15, %v2049_v17 }
 0x17c   : > { %v2183_v20 = vadd.f32 %v2182_v14, %v2176_v8  ;;  %v2521_v21 = vpack.c.bf16 %v2114_v19, %v2111_v16  ;;  %v2163_v11 = vadd.f32 %v2162_v18, %v2114_v19  ;;  %v2177_v23 = vmul.f32 %v2114_v19, %v2114_v19 }
 0x17e   : > { %2525 = vst [vmem:[%s3511_s19 + $0x18] sm:$0xff] %v2521_v21   ;;  %v2164_v10 = vrot.slane %v2163_v11, 4  ;;  %v2184_v5 = vadd.f32 %v2183_v20, %v2177_v23 }
 0x180   : > { %v2165_v41 = vadd.f32 %v2164_v10, %v2163_v11  ;;  %v2185_v26 = vrot.slane %v2184_v5, 4 }
 0x182   : > { %v2166_v28 = vrot.slane %v2165_v41, 2  ;;  %v2186_v29 = vadd.f32 %v2185_v26, %v2184_v5 }
 0x184   : > { %v2167_v30 = vadd.f32 %v2166_v28, %v2165_v41  ;;  %v2187_v31 = vrot.slane %v2186_v29, 2 }
 0x186   : > { %v2168_v42 = vrot.slane %v2167_v30, 1  ;;  %v2188_v32 = vadd.f32 %v2187_v31, %v2186_v29 }
 0x188   : > { %v2189_v33 = vrot.slane %v2188_v32, 1  ;;  %v2169_v34 = vadd.f32 %v2168_v42, %v2167_v30 }
 0x18a   : > { %v2190_v35 = vadd.f32 %v2189_v33, %v2188_v32 }
 0x18c   : > { %v2192_v36 = vsel %vm2191_vm0, %v2169_v34, %v2190_v35 }
 0x18d   : > { %2193 = vst [vmem:[%s187_s23] sm:$0x3] %v2192_v36 }
 0x18e PF: > { %s14_s12 = sadd.s32 1, %s2988_s12  }
 0x18f   : > { %p11_p5 = scmp.ge.s32.totalorder %s14_s12, 4  }
 0x191   :  { %13 = sbr.rel (!%p11_p5) target bundleno = 1 (0x1), region = 70 }

// kernel: netD_forward.14
= control target key start
LH: loop header
LB: loop body
LE: loop exit
PB: predicated region body
PF: predicated region fallthrough
CT: control target
= control target key end

     0   :  { %s328_s12 = smov 0   ;;  %s351_s0 = inlined_call_operand.vmem [shape: bf16[32,128], index: 0, kind: input, shape index: {}]   ;;  %s352_s1 = inlined_call_operand.vmem [shape: f32[1,128], index: 1, kind: input, shape index: {}]   ;;  %s353_s2 = inlined_call_operand.vmem [shape: f32[1,128], index: 2, kind: input, shape index: {}]   ;;  %s354_s3 = inlined_call_operand.vmem [shape: bf16[32,128], index: 3, kind: output, shape index: {}]  }
   0x1 LB: > { %s266_s13 = sadd.s32 4294967295, %s306_s12   ;;  %p270_p0 = scmp.ge.s32.totalorder %s306_s12, 1  ;;  %s306_s12 = sphi %s328_s12, %s13_s12  }
   0x2   : > { %p138_p1 = scmp.lt.s32.totalorder %s306_s12, 3 }
   0x4   : > { %p139_p2 = pnand %p270_p0, %p138_p1 }
   0x5   : > { %s271_s14 = sshll.u32 (!%p139_p2), %s266_s13, 1  ;;  %v275_v1 = vld [vmem:[%s352_s1] ss:$0 sm:$0xff] (!%p139_p2) }
   0x6   : > { %142 = sbr.rel (%p139_p2) target bundleno = 30 (0x1e), region = 32  ;;  %p163_p3 = scmp.lt.s32.totalorder (!%p139_p2), %s271_s14, 3  ;;  %v276_v4 = vld [vmem:[%s353_s2] ss:$0 sm:$0xff] (!%p139_p2) }
   0xd   : > { %s356_s14 = smov (!%p163_p3, %s271_s14), 3 }
   0xe   : > { %s272_s15 = sshll.u32 %s356_s14, 2 }
   0xf   : > { %s166_s18 = scalar_lea.vmem %s351_s0, %s272_s15  ;;  %s172_s25 = scalar_lea.vmem %s354_s3, %s272_s15 }
  0x10   : > { %v284_v0 = vld [vmem:[%s166_s18] sm:$0xff]  }
  0x11   : > { %v285_v2 = vunpack.c.l.bf16 %v284_v0  ;;  %v286_v3 = vunpack.c.h.bf16 %v284_v0 }
  0x13   : > { %v185_v5 = vmul.f32 %v285_v2, %v275_v1  ;;  %v186_v6 = vmul.f32 %v286_v3, %v275_v1 }
  0x15   : > { %v194_v7 = vadd.f32 %v276_v4, %v185_v5  ;;  %v195_v8 = vadd.f32 %v276_v4, %v186_v6 }
  0x17   : > { %v196_v9 = vmul.f32 0.2, %v194_v7  ;;  %v197_v10 = vmul.f32 0.2, %v195_v8 }
  0x19   : > { %v198_v11 = vmax.f32 %v194_v7, %v196_v9  ;;  %v199_v12 = vmax.f32 %v195_v8, %v197_v10 }
  0x1b   : > { %v290_v13 = vpack.c.bf16 %v199_v12, %v198_v11 }
  0x1d   : > { %291 = vst [vmem:[%s172_s25] sm:$0xff] %v290_v13  }
  0x1e PF: > { %s13_s12 = sadd.s32 1, %s306_s12  }
  0x1f   : > { %p10_p4 = scmp.ge.s32.totalorder %s13_s12, 4  }
  0x21   :  { %12 = sbr.rel (!%p10_p4) target bundleno = 1 (0x1), region = 62 }

// kernel: netD_forward.13
= control target key start
LH: loop header
LB: loop body
LE: loop exit
PB: predicated region body
PF: predicated region fallthrough
CT: control target
= control target key end

     0   :  { %s2260_s12 = smov 0   ;;  %s2691_s0 = inlined_call_operand.vmem [shape: bf16[32,2048], index: 0, kind: input, shape index: {}]   ;;  %s2692_s1 = inlined_call_operand.vmem [shape: bf16[2048,128], index: 1, kind: input, shape index: {}]   ;;  %s2693_s2 = inlined_call_operand.vmem [shape: bf16[32,128], index: 2, kind: output, shape index: {0}]   ;;  %s2694_s3 = inlined_call_operand.vmem [shape: f32[2,2,128], index: 3, kind: output, shape index: {1}]  }
   0x1 LB: > { %s2266_s13 = sadd.s32 4294967295, %s2238_s12   ;;  %p1757_p0 = scmp.ge.s32.totalorder %s2238_s12, 1  ;;  %s2238_s12 = sphi %s2260_s12, %s14_s12  }
   0x2   : > { %p142_p1 = scmp.lt.s32.totalorder %s2238_s12, 3 }
   0x4   : > { %p143_p2 = pnand %p1757_p0, %p142_p1 }
   0x5   : > { %v2104_v0 = vld [vmem:[%s2692_s1 + $0x40] sm:$0xff] (!%p143_p2)   ;;  %v2108_v4 = vld [vmem:[%s2692_s1 + $0x48] sm:$0xff] (!%p143_p2)   ;;  %v2112_v8 = vld [vmem:[%s2692_s1 + $0x50] sm:$0xff] (!%p143_p2)   ;;  %s1758_s21 = sshll.u32 (!%p143_p2), %s2266_s13, 1  ;;  %p184_p4 = scmp.lt.s32.totalorder (!%p143_p2), %s2266_s13, 1  ;;  %vm1663_vm0 = vcmask (!%p143_p2), 1040384  }
   0x6   : > { %146 = sbr.rel (%p143_p2) target bundleno = 374 (0x176), region = 28  ;;  %v2105_v1 = vld [vmem:[%s2692_s1 + $0xc0] sm:$0xff] (!%p143_p2)   ;;  %1920 = vmatprep.subr.bf16.mxu0 (!%p143_p2), %v2104_v0  ;;  %v2109_v5 = vld [vmem:[%s2692_s1 + $0xc8] sm:$0xff] (!%p143_p2)   ;;  %v2113_v9 = vld [vmem:[%s2692_s1 + $0xd0] sm:$0xff] (!%p143_p2)   ;;  %p172_p3 = scmp.lt.s32.totalorder (!%p143_p2), %s1758_s21, 3 }
   0x7   : > { %v2106_v2 = vld [vmem:[%s2692_s1] sm:$0xff] (!%p143_p2)   ;;  %1942 = vmatprep.subr.bf16.mxu1 (!%p143_p2), %v2105_v1  ;;  %v2110_v6 = vld [vmem:[%s2692_s1 + $0x8] sm:$0xff] (!%p143_p2)   ;;  %v2114_v10 = vld [vmem:[%s2692_s1 + $0x10] sm:$0xff] (!%p143_p2)  }
   0x8   : > { %v2107_v3 = vld [vmem:[%s2692_s1 + $0x80] sm:$0xff] (!%p143_p2)   ;;  %1921 = vmatpush3.bf16.msra.mxu0 (!%p143_p2), %v2106_v2  ;;  %v2111_v7 = vld [vmem:[%s2692_s1 + $0x88] sm:$0xff] (!%p143_p2)   ;;  %v2115_v11 = vld [vmem:[%s2692_s1 + $0x90] sm:$0xff] (!%p143_p2)  }
   0x9   : > { %1943 = vmatpush3.bf16.msra.mxu1 (!%p143_p2), %v2107_v3  ;;  %1922 = vmatprep.subr.bf16.mxu0 (!%p143_p2), %v2108_v4  ;;  %v2116_v12 = vld [vmem:[%s2692_s1 + $0x58] sm:$0xff] (!%p143_p2)   ;;  %v2120_v16 = vld [vmem:[%s2692_s1 + $0x60] sm:$0xff] (!%p143_p2)   ;;  %v2124_v20 = vld [vmem:[%s2692_s1 + $0x68] sm:$0xff] (!%p143_p2)  }
   0xa   : > { %1944 = vmatprep.subr.bf16.mxu1 (!%p143_p2), %v2109_v5  ;;  %v2117_v13 = vld [vmem:[%s2692_s1 + $0xd8] sm:$0xff] (!%p143_p2)   ;;  %v2121_v17 = vld [vmem:[%s2692_s1 + $0xe0] sm:$0xff] (!%p143_p2)   ;;  %v2125_v21 = vld [vmem:[%s2692_s1 + $0xe8] sm:$0xff] (!%p143_p2)  }
   0xb   : > { %v2118_v14 = vld [vmem:[%s2692_s1 + $0x18] sm:$0xff] (!%p143_p2)   ;;  %v2122_v18 = vld [vmem:[%s2692_s1 + $0x20] sm:$0xff] (!%p143_p2)   ;;  %v2126_v22 = vld [vmem:[%s2692_s1 + $0x28] sm:$0xff] (!%p143_p2)  }
   0xc   : > { %1923 = vmatpush3.bf16.msra.mxu0 (!%p143_p2), %v2110_v6  ;;  %v2119_v15 = vld [vmem:[%s2692_s1 + $0x98] sm:$0xff] (!%p143_p2)   ;;  %v2123_v19 = vld [vmem:[%s2692_s1 + $0xa0] sm:$0xff] (!%p143_p2)   ;;  %v2127_v23 = vld [vmem:[%s2692_s1 + $0xa8] sm:$0xff] (!%p143_p2)  }
   0xd   : > { %1945 = vmatpush3.bf16.msra.mxu1 %v2111_v7  ;;  %1924 = vmatprep.subr.bf16.mxu0 %v2112_v8  ;;  %s2696_s21 = smov (!%p172_p3, %s1758_s21), 3  ;;  %v2128_v24 = vld [vmem:[%s2692_s1 + $0x70] sm:$0xff]   ;;  %v2132_v28 = vld [vmem:[%s2692_s1 + $0x78] sm:$0xff]   ;;  %v2136_v40 = vld [vmem:[%s2692_s1 + $0x140] sm:$0xff]   ;;  %s2698_s13 = smov (!%p184_p4, %s2266_s13), 1 }
   0xe   : > { %1946 = vmatprep.subr.bf16.mxu1 %v2113_v9  ;;  %v2129_v25 = vld [vmem:[%s2692_s1 + $0xf0] sm:$0xff]   ;;  %s1912_s19 = sshll.u32 %s2696_s21, 6  ;;  %v2133_v29 = vld [vmem:[%s2692_s1 + $0xf8] sm:$0xff]   ;;  %v2137_v41 = vld [vmem:[%s2692_s1 + $0x1c0] sm:$0xff]  }
   0xf   : > { %v2130_v26 = vld [vmem:[%s2692_s1 + $0x30] sm:$0xff]   ;;  %s2367_s29 = scalar_lea.vmem %s2691_s0, %s1912_s19  ;;  %v2134_v30 = vld [vmem:[%s2692_s1 + $0x38] sm:$0xff]   ;;  %v2138_v42 = vld [vmem:[%s2692_s1 + $0x100] sm:$0xff]  }
  0x10   : > { %1925 = vmatpush3.bf16.msra.mxu0 %v2114_v10  ;;  %v2131_v27 = vld [vmem:[%s2692_s1 + $0xb0] sm:$0xff]   ;;  %v2135_v31 = vld [vmem:[%s2692_s1 + $0xb8] sm:$0xff]   ;;  %v189_v32 = vld [vmem:[%s2367_s29] sm:$0xff] }
  0x11   : > { %1947 = vmatpush3.bf16.msra.mxu1 %v2115_v11  ;;  %1926 = vmatprep.subr.bf16.mxu0 %v2116_v12  ;;  %v197_v33 = vld [vmem:[%s2367_s29 + $0x40] sm:$0xff]  ;;  %v190_v34 = vld [vmem:[%s2367_s29 + $0x8] sm:$0xff]  ;;  %v2144_v48 = vld [vmem:[%s2692_s1 + $0x150] sm:$0xff]  }
  0x12   : > { %1948 = vmatprep.subr.bf16.mxu1 %v2117_v13  ;;  %v1764_v35 = vcombine.low %v189_v32, %v197_v33  ;;  %v1765_v36 = vcombine.high %v189_v32, %v197_v33  ;;  %v198_v37 = vld [vmem:[%s2367_s29 + $0x48] sm:$0xff]  ;;  %v2139_v43 = vld [vmem:[%s2692_s1 + $0x180] sm:$0xff]   ;;  %v2145_v49 = vld [vmem:[%s2692_s1 + $0x1d0] sm:$0xff]  }
  0x13   : > { %v1766_v38 = vcombine.low %v190_v34, %v198_v37  ;;  %v1767_v39 = vcombine.high %v190_v34, %v198_v37  ;;  %v2140_v44 = vld [vmem:[%s2692_s1 + $0x148] sm:$0xff]   ;;  %v2146_v50 = vld [vmem:[%s2692_s1 + $0x110] sm:$0xff]   ;;  %v2148_v52 = vld [vmem:[%s2692_s1 + $0x158] sm:$0xff]  }
  0x14   : > { %1927 = vmatpush3.bf16.msra.mxu0 %v2118_v14  ;;  %1341 = vmatprep.mubr.bf16.mxu0 %v1765_v36  ;;  %v2141_v45 = vld [vmem:[%s2692_s1 + $0x1c8] sm:$0xff]   ;;  %v2147_v51 = vld [vmem:[%s2692_s1 + $0x190] sm:$0xff]   ;;  %v2149_v53 = vld [vmem:[%s2692_s1 + $0x1d8] sm:$0xff]  }
  0x15   : > { %1949 = vmatpush3.bf16.msra.mxu1 %v2119_v15  ;;  %1928 = vmatprep.subr.bf16.mxu0 %v2120_v16  ;;  %v2142_v46 = vld [vmem:[%s2692_s1 + $0x108] sm:$0xff]   ;;  %v2150_v54 = vld [vmem:[%s2692_s1 + $0x118] sm:$0xff]   ;;  %v2152_v56 = vld [vmem:[%s2692_s1 + $0x160] sm:$0xff]  }
  0x16   : > { %1950 = vmatprep.subr.bf16.mxu1 %v2121_v17  ;;  %1382 = vmatprep.mubr.bf16.mxu1 %v1767_v39  ;;  %v2143_v47 = vld [vmem:[%s2692_s1 + $0x188] sm:$0xff]   ;;  %v2151_v55 = vld [vmem:[%s2692_s1 + $0x198] sm:$0xff]   ;;  %v2153_v57 = vld [vmem:[%s2692_s1 + $0x1e0] sm:$0xff]  }
  0x17   : > { %v2154_v58 = vld [vmem:[%s2692_s1 + $0x120] sm:$0xff]   ;;  %v2156_v60 = vld [vmem:[%s2692_s1 + $0x168] sm:$0xff]   ;;  %v2160_v0 = vld [vmem:[%s2692_s1 + $0x170] sm:$0xff]  }
  0x18   : > { %1929 = vmatpush3.bf16.msra.mxu0 %v2122_v18  ;;  %v2155_v59 = vld [vmem:[%s2692_s1 + $0x1a0] sm:$0xff]   ;;  %v2157_v61 = vld [vmem:[%s2692_s1 + $0x1e8] sm:$0xff]   ;;  %v2161_v1 = vld [vmem:[%s2692_s1 + $0x1f0] sm:$0xff]  }
  0x19   : > { %1951 = vmatpush3.bf16.msra.mxu1 %v2123_v19  ;;  %1930 = vmatprep.subr.bf16.mxu0 %v2124_v20  ;;  %v2158_v62 = vld [vmem:[%s2692_s1 + $0x128] sm:$0xff]   ;;  %v2162_v2 = vld [vmem:[%s2692_s1 + $0x130] sm:$0xff]   ;;  %v2164_v4 = vld [vmem:[%s2692_s1 + $0x178] sm:$0xff]  }
  0x1a   : > { %1952 = vmatprep.subr.bf16.mxu1 %v2125_v21  ;;  %v2159_v63 = vld [vmem:[%s2692_s1 + $0x1a8] sm:$0xff]   ;;  %v2163_v3 = vld [vmem:[%s2692_s1 + $0x1b0] sm:$0xff]   ;;  %v2165_v5 = vld [vmem:[%s2692_s1 + $0x1f8] sm:$0xff]  }
  0x1b   : > { %v2166_v6 = vld [vmem:[%s2692_s1 + $0x138] sm:$0xff]   ;;  %v191_v8 = vld [vmem:[%s2367_s29 + $0x10] sm:$0xff]  ;;  %v2168_v16 = vld [vmem:[%s2692_s1 + $0x240] sm:$0xff]  }
  0x1c   : > { %1931 = vmatpush3.bf16.msra.mxu0 %v2126_v22  ;;  %v2167_v7 = vld [vmem:[%s2692_s1 + $0x1b8] sm:$0xff]   ;;  %v199_v9 = vld [vmem:[%s2367_s29 + $0x50] sm:$0xff]  ;;  %v2169_v17 = vld [vmem:[%s2692_s1 + $0x2c0] sm:$0xff]  }
  0x1d   : > { %1953 = vmatpush3.bf16.msra.mxu1 %v2127_v23  ;;  %1932 = vmatprep.subr.bf16.mxu0 %v2128_v24  ;;  %v1768_v10 = vcombine.low %v191_v8, %v199_v9  ;;  %v1769_v11 = vcombine.high %v191_v8, %v199_v9  ;;  %v192_v12 = vld [vmem:[%s2367_s29 + $0x18] sm:$0xff]  ;;  %v2170_v18 = vld [vmem:[%s2692_s1 + $0x200] sm:$0xff]   ;;  %v2172_v20 = vld [vmem:[%s2692_s1 + $0x248] sm:$0xff]  }
  0x1e   : > { %1954 = vmatprep.subr.bf16.mxu1 %v2129_v25  ;;  %v200_v13 = vld [vmem:[%s2367_s29 + $0x58] sm:$0xff]  ;;  %v2171_v19 = vld [vmem:[%s2692_s1 + $0x280] sm:$0xff]   ;;  %v2173_v21 = vld [vmem:[%s2692_s1 + $0x2c8] sm:$0xff]  }
  0x1f   : > { %v1770_v14 = vcombine.low %v192_v12, %v200_v13  ;;  %v1771_v15 = vcombine.high %v192_v12, %v200_v13  ;;  %v2174_v22 = vld [vmem:[%s2692_s1 + $0x208] sm:$0xff]   ;;  %v2176_v24 = vld [vmem:[%s2692_s1 + $0x250] sm:$0xff]   ;;  %v2184_v32 = vld [vmem:[%s2692_s1 + $0x260] sm:$0xff]  }
  0x20   : > { %1933 = vmatpush3.bf16.msra.mxu0 %v2130_v26  ;;  %v2175_v23 = vld [vmem:[%s2692_s1 + $0x288] sm:$0xff]   ;;  %v2177_v25 = vld [vmem:[%s2692_s1 + $0x2d0] sm:$0xff]   ;;  %v2185_v33 = vld [vmem:[%s2692_s1 + $0x2e0] sm:$0xff]  }
  0x21   : > { %1955 = vmatpush3.bf16.msra.mxu1 %v2131_v27  ;;  %1934 = vmatprep.subr.bf16.mxu0 %v2132_v28  ;;  %v2178_v26 = vld [vmem:[%s2692_s1 + $0x210] sm:$0xff]   ;;  %v2180_v28 = vld [vmem:[%s2692_s1 + $0x258] sm:$0xff]   ;;  %v2186_v34 = vld [vmem:[%s2692_s1 + $0x220] sm:$0xff]  }
  0x22   : > { %1956 = vmatprep.subr.bf16.mxu1 %v2133_v29  ;;  %v2179_v27 = vld [vmem:[%s2692_s1 + $0x290] sm:$0xff]   ;;  %v2181_v29 = vld [vmem:[%s2692_s1 + $0x2d8] sm:$0xff]   ;;  %v2188_v36 = vld [vmem:[%s2692_s1 + $0x268] sm:$0xff]  }
  0x23   : > { %v2189_v37 = vld [vmem:[%s2692_s1 + $0x2e8] sm:$0xff]   ;;  %v2216_v8 = vld [vmem:[%s2692_s1 + $0x360] sm:$0xff]  }
  0x24   : > { %1935 = vmatpush3.bf16.msra.mxu0 %v2134_v30  ;;  %v2182_v30 = vld [vmem:[%s2692_s1 + $0x218] sm:$0xff]   ;;  %v2191_v39 = vld [vmem:[%s2692_s1 + $0x2a8] sm:$0xff]   ;;  %v2217_v9 = vld [vmem:[%s2692_s1 + $0x3e0] sm:$0xff]  }
  0x25   : > { %1957 = vmatpush3.bf16.msra.mxu1 %v2135_v31  ;;  %1964 = vmatprep.subr.bf16.mxu0 %v2136_v40  ;;  %v2183_v31 = vld [vmem:[%s2692_s1 + $0x298] sm:$0xff]   ;;  %v2192_v40 = vld [vmem:[%s2692_s1 + $0x270] sm:$0xff]   ;;  %v2220_v12 = vld [vmem:[%s2692_s1 + $0x368] sm:$0xff]  }
  0x26   : > { %1986 = vmatprep.subr.bf16.mxu1 %v2137_v41  ;;  %v2193_v41 = vld [vmem:[%s2692_s1 + $0x2f0] sm:$0xff]   ;;  %v2221_v13 = vld [vmem:[%s2692_s1 + $0x3e8] sm:$0xff]  }
  0x27   : > { %1342 = vmatmul.mubr.bf16.vlgmr.msra.gmra.mrb[0].mxu0 %v1764_v35  ;;  %v2187_v35 = vld [vmem:[%s2692_s1 + $0x2a0] sm:$0xff]  }
  0x28   : > { %1383 = vmatmul.mubr.bf16.vlgmr.msra.gmra.mrb[0].mxu1 %v1766_v38  ;;  %1965 = vmatpush3.bf16.msra.mxu0 %v2138_v42  ;;  %v2190_v38 = vld [vmem:[%s2692_s1 + $0x228] sm:$0xff]   ;;  %v2194_v42 = vld [vmem:[%s2692_s1 + $0x230] sm:$0xff]  }
  0x29   : > { %1987 = vmatpush3.bf16.msra.mxu1 %v2139_v43  ;;  %1966 = vmatprep.subr.bf16.mxu0 %v2140_v44  ;;  %v2195_v43 = vld [vmem:[%s2692_s1 + $0x2b0] sm:$0xff]   ;;  %v2196_v44 = vld [vmem:[%s2692_s1 + $0x278] sm:$0xff]  }
  0x2a   : > { %1988 = vmatprep.subr.bf16.mxu1 %v2141_v45  ;;  %1423 = vmatprep.mubr.bf16.mxu0 %v1769_v11  ;;  %v2197_v45 = vld [vmem:[%s2692_s1 + $0x2f8] sm:$0xff]   ;;  %v2219_v11 = vld [vmem:[%s2692_s1 + $0x3a0] sm:$0xff]  }
  0x2b   : > { %1464 = vmatprep.mubr.bf16.mxu1 %v1771_v15  ;;  %v2223_v15 = vld [vmem:[%s2692_s1 + $0x3a8] sm:$0xff]  }
  0x2c   : > { %1967 = vmatpush3.bf16.msra.mxu0 %v2142_v46  ;;  %v2198_v46 = vld [vmem:[%s2692_s1 + $0x238] sm:$0xff]  }
  0x2d   : > { %1989 = vmatpush3.bf16.msra.mxu1 %v2143_v47  ;;  %1968 = vmatprep.subr.bf16.mxu0 %v2144_v48  ;;  %v2199_v47 = vld [vmem:[%s2692_s1 + $0x2b8] sm:$0xff]   ;;  %v193_v48 = vld [vmem:[%s2367_s29 + $0x20] sm:$0xff] }
  0x2e   : > { %1990 = vmatprep.subr.bf16.mxu1 %v2145_v49  ;;  %v201_v49 = vld [vmem:[%s2367_s29 + $0x60] sm:$0xff] }
  0x30   : > { %1969 = vmatpush3.bf16.msra.mxu0 %v2146_v50  ;;  %v194_v50 = vld [vmem:[%s2367_s29 + $0x28] sm:$0xff] }
  0x31   : > { %1991 = vmatpush3.bf16.msra.mxu1 %v2147_v51  ;;  %1970 = vmatprep.subr.bf16.mxu0 %v2148_v52  ;;  %v202_v51 = vld [vmem:[%s2367_s29 + $0x68] sm:$0xff]  ;;  %v1772_v52 = vcombine.low %v193_v48, %v201_v49 }
  0x32   : > { %1992 = vmatprep.subr.bf16.mxu1 %v2149_v53  ;;  %v1773_v53 = vcombine.high %v193_v48, %v201_v49 }
  0x34   : > { %1971 = vmatpush3.bf16.msra.mxu0 %v2150_v54  ;;  %v1774_v54 = vcombine.low %v194_v50, %v202_v51 }
  0x35   : > { %1993 = vmatpush3.bf16.msra.mxu1 %v2151_v55  ;;  %1972 = vmatprep.subr.bf16.mxu0 %v2152_v56  ;;  %v1775_v55 = vcombine.high %v194_v50, %v202_v51  ;;  %v2200_v56 = vld [vmem:[%s2692_s1 + $0x340] sm:$0xff]  }
  0x36   : > { %1994 = vmatprep.subr.bf16.mxu1 %v2153_v57  ;;  %v2201_v57 = vld [vmem:[%s2692_s1 + $0x3c0] sm:$0xff]  }
  0x38   : > { %1973 = vmatpush3.bf16.msra.mxu0 %v2154_v58  ;;  %v2202_v58 = vld [vmem:[%s2692_s1 + $0x300] sm:$0xff]  }
  0x39   : > { %1995 = vmatpush3.bf16.msra.mxu1 %v2155_v59  ;;  %1974 = vmatprep.subr.bf16.mxu0 %v2156_v60  ;;  %v2203_v59 = vld [vmem:[%s2692_s1 + $0x380] sm:$0xff]   ;;  %v2204_v60 = vld [vmem:[%s2692_s1 + $0x348] sm:$0xff]  }
  0x3a   : > { %1996 = vmatprep.subr.bf16.mxu1 %v2157_v61  ;;  %v2205_v61 = vld [vmem:[%s2692_s1 + $0x3c8] sm:$0xff]  }
  0x3c   : > { %1975 = vmatpush3.bf16.msra.mxu0 %v2158_v62  ;;  %v2206_v62 = vld [vmem:[%s2692_s1 + $0x308] sm:$0xff]  }
  0x3d   : > { %1997 = vmatpush3.bf16.msra.mxu1 %v2159_v63  ;;  %1976 = vmatprep.subr.bf16.mxu0 %v2160_v0  ;;  %v2207_v63 = vld [vmem:[%s2692_s1 + $0x388] sm:$0xff]   ;;  %v2208_v0 = vld [vmem:[%s2692_s1 + $0x350] sm:$0xff]  }
  0x3e   : > { %1998 = vmatprep.subr.bf16.mxu1 %v2161_v1  ;;  %v2209_v1 = vld [vmem:[%s2692_s1 + $0x3d0] sm:$0xff]  }
  0x40   : > { %1977 = vmatpush3.bf16.msra.mxu0 %v2162_v2  ;;  %v2210_v2 = vld [vmem:[%s2692_s1 + $0x310] sm:$0xff]  }
  0x41   : > { %1999 = vmatpush3.bf16.msra.mxu1 %v2163_v3  ;;  %1978 = vmatprep.subr.bf16.mxu0 %v2164_v4  ;;  %v2211_v3 = vld [vmem:[%s2692_s1 + $0x390] sm:$0xff]   ;;  %v2212_v4 = vld [vmem:[%s2692_s1 + $0x358] sm:$0xff]  }
  0x42   : > { %2000 = vmatprep.subr.bf16.mxu1 %v2165_v5  ;;  %v2213_v5 = vld [vmem:[%s2692_s1 + $0x3d8] sm:$0xff]  }
  0x44   : > { %1979 = vmatpush3.bf16.msra.mxu0 %v2166_v6  ;;  %v2214_v6 = vld [vmem:[%s2692_s1 + $0x318] sm:$0xff]  }
  0x45   : > { %2001 = vmatpush3.bf16.msra.mxu1 %v2167_v7  ;;  %2008 = vmatprep.subr.bf16.mxu0 %v2168_v16  ;;  %v2215_v7 = vld [vmem:[%s2692_s1 + $0x398] sm:$0xff]   ;;  %v2224_v16 = vld [vmem:[%s2692_s1 + $0x370] sm:$0xff]  }
  0x46   : > { %2030 = vmatprep.subr.bf16.mxu1 %v2169_v17  ;;  %v2225_v17 = vld [vmem:[%s2692_s1 + $0x3f0] sm:$0xff]  }
  0x47   : > { %1424 = vmatmul.mubr.bf16.vlgmr.msra.gmra.mrb[4].mxu0 %v1768_v10  ;;  %v2218_v10 = vld [vmem:[%s2692_s1 + $0x320] sm:$0xff]  }
  0x48   : > { %1465 = vmatmul.mubr.bf16.vlgmr.msra.gmra.mrb[4].mxu1 %v1770_v14  ;;  %2009 = vmatpush3.bf16.msra.mxu0 %v2170_v18  ;;  %v2222_v14 = vld [vmem:[%s2692_s1 + $0x328] sm:$0xff]   ;;  %v2226_v18 = vld [vmem:[%s2692_s1 + $0x330] sm:$0xff]  }
  0x49   : > { %2031 = vmatpush3.bf16.msra.mxu1 %v2171_v19  ;;  %2010 = vmatprep.subr.bf16.mxu0 %v2172_v20  ;;  %v2227_v19 = vld [vmem:[%s2692_s1 + $0x3b0] sm:$0xff]   ;;  %v2228_v20 = vld [vmem:[%s2692_s1 + $0x378] sm:$0xff]  }
  0x4a   : > { %2032 = vmatprep.subr.bf16.mxu1 %v2173_v21  ;;  %1505 = vmatprep.mubr.bf16.mxu0 %v1773_v53  ;;  %v2229_v21 = vld [vmem:[%s2692_s1 + $0x3f8] sm:$0xff]  }
  0x4b   : > { %1546 = vmatprep.mubr.bf16.mxu1 %v1775_v55 }
  0x4c   : > { %2011 = vmatpush3.bf16.msra.mxu0 %v2174_v22  ;;  %v2230_v22 = vld [vmem:[%s2692_s1 + $0x338] sm:$0xff]  }
  0x4d   : > { %2033 = vmatpush3.bf16.msra.mxu1 %v2175_v23  ;;  %2012 = vmatprep.subr.bf16.mxu0 %v2176_v24  ;;  %v2231_v23 = vld [vmem:[%s2692_s1 + $0x3b8] sm:$0xff]   ;;  %v195_v24 = vld [vmem:[%s2367_s29 + $0x30] sm:$0xff] }
  0x4e   : > { %2034 = vmatprep.subr.bf16.mxu1 %v2177_v25  ;;  %v203_v25 = vld [vmem:[%s2367_s29 + $0x70] sm:$0xff] }
  0x50   : > { %2013 = vmatpush3.bf16.msra.mxu0 %v2178_v26  ;;  %v196_v26 = vld [vmem:[%s2367_s29 + $0x38] sm:$0xff] }
  0x51   : > { %2035 = vmatpush3.bf16.msra.mxu1 %v2179_v27  ;;  %2014 = vmatprep.subr.bf16.mxu0 %v2180_v28  ;;  %v1776_v27 = vcombine.low %v195_v24, %v203_v25  ;;  %v1777_v28 = vcombine.high %v195_v24, %v203_v25 }
  0x52   : > { %2036 = vmatprep.subr.bf16.mxu1 %v2181_v29  ;;  %v204_v29 = vld [vmem:[%s2367_s29 + $0x78] sm:$0xff]  ;;  %s1762_s29 = sshll.u32 %s2696_s21, 2  ;;  %s1763_s21 = sshll.u32 %s2698_s13, 1 }
  0x53   : > { %s182_s19 = scalar_lea.vmem %s2693_s2, %s1762_s29  ;;  %s187_s23 = scalar_lea.vmem %s2694_s3, %s1763_s21 }
  0x54   : > { %2015 = vmatpush3.bf16.msra.mxu0 %v2182_v30  ;;  %v1778_v30 = vcombine.low %v196_v26, %v204_v29 }
  0x55   : > { %2037 = vmatpush3.bf16.msra.mxu1 %v2183_v31  ;;  %2016 = vmatprep.subr.bf16.mxu0 %v2184_v32  ;;  %v1779_v31 = vcombine.high %v196_v26, %v204_v29 }
  0x56   : > { %2038 = vmatprep.subr.bf16.mxu1 %v2185_v33 }
  0x58   : > { %2017 = vmatpush3.bf16.msra.mxu0 %v2186_v34 }
  0x59   : > { %2039 = vmatpush3.bf16.msra.mxu1 %v2187_v35  ;;  %2018 = vmatprep.subr.bf16.mxu0 %v2188_v36 }
  0x5a   : > { %2040 = vmatprep.subr.bf16.mxu1 %v2189_v37 }
  0x5c   : > { %2019 = vmatpush3.bf16.msra.mxu0 %v2190_v38 }
  0x5d   : > { %2041 = vmatpush3.bf16.msra.mxu1 %v2191_v39  ;;  %2020 = vmatprep.subr.bf16.mxu0 %v2192_v40 }
  0x5e   : > { %2042 = vmatprep.subr.bf16.mxu1 %v2193_v41 }
  0x60   : > { %2021 = vmatpush3.bf16.msra.mxu0 %v2194_v42 }
  0x61   : > { %2043 = vmatpush3.bf16.msra.mxu1 %v2195_v43  ;;  %2022 = vmatprep.subr.bf16.mxu0 %v2196_v44 }
  0x62   : > { %2044 = vmatprep.subr.bf16.mxu1 %v2197_v45 }
  0x64   : > { %2023 = vmatpush3.bf16.msra.mxu0 %v2198_v46 }
  0x65   : > { %2045 = vmatpush3.bf16.msra.mxu1 %v2199_v47  ;;  %2052 = vmatprep.subr.bf16.mxu0 %v2200_v56 }
  0x66   : > { %2074 = vmatprep.subr.bf16.mxu1 %v2201_v57 }
  0x67   : > { %1506 = vmatmul.mubr.bf16.vlgmr.msra.gmra.mrb[8].mxu0 %v1772_v52 }
  0x68   : > { %1547 = vmatmul.mubr.bf16.vlgmr.msra.gmra.mrb[8].mxu1 %v1774_v54  ;;  %2053 = vmatpush3.bf16.msra.mxu0 %v2202_v58 }
  0x69   : > { %2075 = vmatpush3.bf16.msra.mxu1 %v2203_v59  ;;  %2054 = vmatprep.subr.bf16.mxu0 %v2204_v60 }
  0x6a   : > { %2076 = vmatprep.subr.bf16.mxu1 %v2205_v61  ;;  %1587 = vmatprep.mubr.bf16.mxu0 %v1777_v28 }
  0x6b   : > { %1628 = vmatprep.mubr.bf16.mxu1 %v1779_v31 }
  0x6c   : > { %2055 = vmatpush3.bf16.msra.mxu0 %v2206_v62 }
  0x6d   : > { %2077 = vmatpush3.bf16.msra.mxu1 %v2207_v63  ;;  %2056 = vmatprep.subr.bf16.mxu0 %v2208_v0 }
  0x6e   : > { %2078 = vmatprep.subr.bf16.mxu1 %v2209_v1 }
  0x70   : > { %2057 = vmatpush3.bf16.msra.mxu0 %v2210_v2 }
  0x71   : > { %2079 = vmatpush3.bf16.msra.mxu1 %v2211_v3  ;;  %2058 = vmatprep.subr.bf16.mxu0 %v2212_v4 }
  0x72   : > { %2080 = vmatprep.subr.bf16.mxu1 %v2213_v5 }
  0x74   : > { %2059 = vmatpush3.bf16.msra.mxu0 %v2214_v6 }
  0x75   : > { %2081 = vmatpush3.bf16.msra.mxu1 %v2215_v7  ;;  %2060 = vmatprep.subr.bf16.mxu0 %v2216_v8 }
  0x76   : > { %2082 = vmatprep.subr.bf16.mxu1 %v2217_v9 }
  0x78   : > { %2061 = vmatpush3.bf16.msra.mxu0 %v2218_v10 }
  0x79   : > { %2083 = vmatpush3.bf16.msra.mxu1 %v2219_v11  ;;  %2062 = vmatprep.subr.bf16.mxu0 %v2220_v12 }
  0x7a   : > { %2084 = vmatprep.subr.bf16.mxu1 %v2221_v13 }
  0x7c   : > { %2063 = vmatpush3.bf16.msra.mxu0 %v2222_v14 }
  0x7d   : > { %2085 = vmatpush3.bf16.msra.mxu1 %v2223_v15  ;;  %2064 = vmatprep.subr.bf16.mxu0 %v2224_v16 }
  0x7e   : > { %2086 = vmatprep.subr.bf16.mxu1 %v2225_v17 }
  0x80   : > { %2065 = vmatpush3.bf16.msra.mxu0 %v2226_v18 }
  0x81   : > { %2087 = vmatpush3.bf16.msra.mxu1 %v2227_v19  ;;  %2066 = vmatprep.subr.bf16.mxu0 %v2228_v20 }
  0x82   : > { %2088 = vmatprep.subr.bf16.mxu1 %v2229_v21 }
  0x84   : > { %2067 = vmatpush3.bf16.msra.mxu0 %v2230_v22 }
  0x85   : > { %2089 = vmatpush3.bf16.msra.mxu1 %v2231_v23 }
  0x87   : > { %1588 = vmatmul.mubr.bf16.vlgmr.msra.gmra.mrb[12].mxu0 %v1776_v27 }
  0x88   : > { %1629 = vmatmul.mubr.bf16.vlgmr.msra.gmra.mrb[12].mxu1 %v1778_v30 }
  0xfa   : > { %v1936_v32 = vpop.f32.mrb[0].mxu0 }
  0xfb   : > { %v1958_v33 = vpop.f32.mrb[0].mxu1  ;;  %v1937_v34 = vpop.f32.mrb[1].mxu0 }
  0xfc   : > { %v1938_v35 = vadd.f32 %v1937_v34, %v1936_v32  ;;  %v1959_v36 = vpop.f32.mrb[1].mxu1  ;;  %v1939_v37 = vpop.f32.mrb[2].mxu0 }
  0xfd   : > { %v1960_v38 = vadd.f32 %v1959_v36, %v1958_v33  ;;  %v1961_v39 = vpop.f32.mrb[2].mxu1  ;;  %v1940_v40 = vpop.f32.mrb[3].mxu0 }
  0xfe   : > { %v1941_v41 = vadd.f32 %v1940_v40, %v1939_v37  ;;  %v1962_v42 = vpop.f32.mrb[3].mxu1 }
  0xff   : > { %v1385_v43 = vadd.f32 %v1960_v38, %v1938_v35  ;;  %v1963_v44 = vadd.f32 %v1962_v42, %v1961_v39 }
 0x101   : > { %v1388_v45 = vadd.f32 %v1963_v44, %v1941_v41 }
 0x11a   : > { %v1980_v46 = vpop.f32.mrb[4].mxu0 }
 0x11b   : > { %v2002_v47 = vpop.f32.mrb[4].mxu1  ;;  %v1981_v48 = vpop.f32.mrb[5].mxu0 }
 0x11c   : > { %v1982_v49 = vadd.f32 %v1981_v48, %v1980_v46  ;;  %v2003_v50 = vpop.f32.mrb[5].mxu1  ;;  %v1983_v51 = vpop.f32.mrb[6].mxu0 }
 0x11d   : > { %v2004_v52 = vadd.f32 %v2003_v50, %v2002_v47  ;;  %v2005_v53 = vpop.f32.mrb[6].mxu1  ;;  %v1984_v54 = vpop.f32.mrb[7].mxu0 }
 0x11e   : > { %v1426_v55 = vadd.f32 %v1982_v49, %v1385_v43  ;;  %v1985_v56 = vadd.f32 %v1984_v54, %v1983_v51  ;;  %v2006_v57 = vpop.f32.mrb[7].mxu1 }
 0x11f   : > { %v2007_v58 = vadd.f32 %v2006_v57, %v2005_v53 }
 0x120   : > { %v1467_v59 = vadd.f32 %v2004_v52, %v1426_v55  ;;  %v1429_v60 = vadd.f32 %v1985_v56, %v1388_v45 }
 0x122   : > { %v1470_v61 = vadd.f32 %v2007_v58, %v1429_v60 }
 0x13a   : > { %v2024_v62 = vpop.f32.mrb[8].mxu0 }
 0x13b   : > { %v2046_v63 = vpop.f32.mrb[8].mxu1  ;;  %v2025_v0 = vpop.f32.mrb[9].mxu0 }
 0x13c   : > { %v2047_v1 = vpop.f32.mrb[9].mxu1  ;;  %v2026_v2 = vadd.f32 %v2025_v0, %v2024_v62  ;;  %v2027_v4 = vpop.f32.mrb[10].mxu0 }
 0x13d   : > { %v2048_v3 = vadd.f32 %v2047_v1, %v2046_v63  ;;  %v2049_v5 = vpop.f32.mrb[10].mxu1  ;;  %v2028_v6 = vpop.f32.mrb[11].mxu0 }
 0x13e   : > { %v2050_v7 = vpop.f32.mrb[11].mxu1  ;;  %v1508_v8 = vadd.f32 %v2026_v2, %v1467_v59  ;;  %v2029_v9 = vadd.f32 %v2028_v6, %v2027_v4 }
 0x13f   : > { %v2051_v10 = vadd.f32 %v2050_v7, %v2049_v5 }
 0x140   : > { %v1549_v11 = vadd.f32 %v2048_v3, %v1508_v8  ;;  %v1511_v12 = vadd.f32 %v2029_v9, %v1470_v61 }
 0x142   : > { %v1552_v13 = vadd.f32 %v2051_v10, %v1511_v12 }
 0x15a   : > { %v2068_v14 = vpop.f32.mrb[12].mxu0 }
 0x15b   : > { %v2090_v15 = vpop.f32.mrb[12].mxu1  ;;  %v2069_v16 = vpop.f32.mrb[13].mxu0 }
 0x15c   : > { %v2070_v17 = vadd.f32 %v2069_v16, %v2068_v14  ;;  %v2091_v18 = vpop.f32.mrb[13].mxu1  ;;  %v2071_v19 = vpop.f32.mrb[14].mxu0 }
 0x15d   : > { %v2092_v20 = vadd.f32 %v2091_v18, %v2090_v15  ;;  %v2093_v21 = vpop.f32.mrb[14].mxu1  ;;  %v2072_v22 = vpop.f32.mrb[15].mxu0 }
 0x15e   : > { %v1590_v23 = vadd.f32 %v2070_v17, %v1549_v11  ;;  %v2073_v24 = vadd.f32 %v2072_v22, %v2071_v19  ;;  %v2094_v25 = vpop.f32.mrb[15].mxu1 }
 0x15f   : > { %v2095_v26 = vadd.f32 %v2094_v25, %v2093_v21 }
 0x160   : > { %v1631_v27 = vadd.f32 %v2092_v20, %v1590_v23  ;;  %v1593_v28 = vadd.f32 %v2073_v24, %v1552_v13 }
 0x162   : > { %v1634_v29 = vadd.f32 %v2095_v26, %v1593_v28  ;;  %v1654_v30 = vmul.f32 %v1631_v27, %v1631_v27 }
 0x164   : > { %v1918_v31 = vpack.c.bf16 %v1634_v29, %v1631_v27  ;;  %v1647_v32 = vadd.f32 %v1634_v29, %v1631_v27  ;;  %v1655_v33 = vmul.f32 %v1634_v29, %v1634_v29 }
 0x166   : > { %1919 = vst [vmem:[%s182_s19] sm:$0xff] %v1918_v31   ;;  %v1648_v34 = vrot.slane %v1647_v32, 4  ;;  %v1656_v35 = vadd.f32 %v1655_v33, %v1654_v30 }
 0x168   : > { %v1649_v36 = vadd.f32 %v1648_v34, %v1647_v32  ;;  %v1657_v37 = vrot.slane %v1656_v35, 4 }
 0x16a   : > { %v1650_v38 = vrot.slane %v1649_v36, 2  ;;  %v1658_v39 = vadd.f32 %v1657_v37, %v1656_v35 }
 0x16c   : > { %v1651_v40 = vadd.f32 %v1650_v38, %v1649_v36  ;;  %v1659_v41 = vrot.slane %v1658_v39, 2 }
 0x16e   : > { %v1652_v42 = vrot.slane %v1651_v40, 1  ;;  %v1660_v43 = vadd.f32 %v1659_v41, %v1658_v39 }
 0x170   : > { %v1661_v44 = vrot.slane %v1660_v43, 1  ;;  %v1653_v45 = vadd.f32 %v1652_v42, %v1651_v40 }
 0x172   : > { %v1662_v46 = vadd.f32 %v1661_v44, %v1660_v43 }
 0x174   : > { %v1664_v47 = vsel %vm1663_vm0, %v1653_v45, %v1662_v46 }
 0x175   : > { %1665 = vst [vmem:[%s187_s23] sm:$0x3] %v1664_v47 }
 0x176 PF: > { %s14_s12 = sadd.s32 1, %s2238_s12  }
 0x177   : > { %p11_p5 = scmp.ge.s32.totalorder %s14_s12, 4  }
 0x179   :  { %13 = sbr.rel (!%p11_p5) target bundleno = 1 (0x1), region = 70 }

// kernel: netD_forward.15
= control target key start
LH: loop header
LB: loop body
LE: loop exit
PB: predicated region body
PF: predicated region fallthrough
CT: control target
= control target key end

     0   :  { %v277_v28 = vlaneseq  ;;  %v1950_v36 = vmov 1966171168   ;;  %s2393_s0 = inlined_call_operand.vmem [shape: bf16[2,2048], index: 0, kind: input, shape index: {}]   ;;  %s2394_s1 = inlined_call_operand.vmem [shape: bf16[2048,128], index: 1, kind: input, shape index: {}]   ;;  %s2395_s2 = inlined_call_operand.hbm [shape: f32[2,128], index: 2, kind: output, shape index: {}]  }
   0x1   :  { %v1796_v0 = vld [vmem:[%s2394_s1 + $0x40] sm:$0xff]   ;;  %v1800_v4 = vld [vmem:[%s2394_s1 + $0x48] sm:$0xff]   ;;  %v1804_v8 = vld [vmem:[%s2394_s1 + $0x50] sm:$0xff]   ;;  %v275_v37 = vunpack.c.l.s4 %v1950_v36 }
   0x2   :  { %v1797_v1 = vld [vmem:[%s2394_s1 + $0xc0] sm:$0xff]   ;;  %1618 = vmatprep.subr.bf16.mxu0 %v1796_v0  ;;  %v1801_v5 = vld [vmem:[%s2394_s1 + $0xc8] sm:$0xff]   ;;  %v1805_v9 = vld [vmem:[%s2394_s1 + $0xd0] sm:$0xff]   ;;  %v278_v33 = vshrl.u32 %v277_v28, 7 }
   0x3   :  { %v1798_v2 = vld [vmem:[%s2394_s1] sm:$0xff]   ;;  %1640 = vmatprep.subr.bf16.mxu1 %v1797_v1  ;;  %v1802_v6 = vld [vmem:[%s2394_s1 + $0x8] sm:$0xff]   ;;  %v1806_v10 = vld [vmem:[%s2394_s1 + $0x10] sm:$0xff]   ;;  %v276_v40 = vunpack.c.0.s8 %v275_v37 }
   0x4   :  { %v1799_v3 = vld [vmem:[%s2394_s1 + $0x80] sm:$0xff]   ;;  %1619 = vmatpush3.bf16.msra.mxu0 %v1798_v2  ;;  %v1803_v7 = vld [vmem:[%s2394_s1 + $0x88] sm:$0xff]   ;;  %v1807_v11 = vld [vmem:[%s2394_s1 + $0x90] sm:$0xff]  }
   0x5   :  { %1641 = vmatpush3.bf16.msra.mxu1 %v1799_v3  ;;  %1620 = vmatprep.subr.bf16.mxu0 %v1800_v4  ;;  %v1808_v12 = vld [vmem:[%s2394_s1 + $0x58] sm:$0xff]   ;;  %v1812_v16 = vld [vmem:[%s2394_s1 + $0x60] sm:$0xff]   ;;  %v1816_v20 = vld [vmem:[%s2394_s1 + $0x68] sm:$0xff]   ;;  %v2072_v41 = vsub.s32 %v276_v40, %v278_v33 }
   0x6   :  { %1642 = vmatprep.subr.bf16.mxu1 %v1801_v5  ;;  %v1809_v13 = vld [vmem:[%s2394_s1 + $0xd8] sm:$0xff]   ;;  %v1813_v17 = vld [vmem:[%s2394_s1 + $0xe0] sm:$0xff]   ;;  %v1817_v21 = vld [vmem:[%s2394_s1 + $0xe8] sm:$0xff]  }
   0x7   :  { %v1810_v14 = vld [vmem:[%s2394_s1 + $0x18] sm:$0xff]   ;;  %v1814_v18 = vld [vmem:[%s2394_s1 + $0x20] sm:$0xff]   ;;  %v1818_v22 = vld [vmem:[%s2394_s1 + $0x28] sm:$0xff]  }
   0x8   :  { %1621 = vmatpush3.bf16.msra.mxu0 %v1802_v6  ;;  %v1811_v15 = vld [vmem:[%s2394_s1 + $0x98] sm:$0xff]   ;;  %v1815_v19 = vld [vmem:[%s2394_s1 + $0xa0] sm:$0xff]   ;;  %v1819_v23 = vld [vmem:[%s2394_s1 + $0xa8] sm:$0xff]  }
   0x9   :  { %1643 = vmatpush3.bf16.msra.mxu1 %v1803_v7  ;;  %1622 = vmatprep.subr.bf16.mxu0 %v1804_v8  ;;  %v1820_v24 = vld [vmem:[%s2394_s1 + $0x70] sm:$0xff]   ;;  %v1824_v29 = vld [vmem:[%s2394_s1 + $0x78] sm:$0xff]   ;;  %v13_v34 = vld [vmem:[%s2393_s0] sm:$0xff] }
   0xa   :  { %1644 = vmatprep.subr.bf16.mxu1 %v1805_v9  ;;  %v1821_v25 = vld [vmem:[%s2394_s1 + $0xf0] sm:$0xff]   ;;  %v1825_v30 = vld [vmem:[%s2394_s1 + $0xf8] sm:$0xff]   ;;  %v1829_v35 = vld [vmem:[%s2394_s1 + $0x140] sm:$0xff]   ;;  %v273_v39 = vcombine.high %v13_v34, %v13_v34  ;;  %v280_v42 = vrot.slane %v13_v34, %v2072_v41 }
   0xb   :  { %v1822_v26 = vld [vmem:[%s2394_s1 + $0x30] sm:$0xff]   ;;  %v1826_v31 = vld [vmem:[%s2394_s1 + $0x38] sm:$0xff]   ;;  %v1830_v38 = vld [vmem:[%s2394_s1 + $0x1c0] sm:$0xff]  }
   0xc   :  { %1623 = vmatpush3.bf16.msra.mxu0 %v1806_v10  ;;  %v1823_v27 = vld [vmem:[%s2394_s1 + $0xb0] sm:$0xff]   ;;  %v1827_v32 = vld [vmem:[%s2394_s1 + $0xb8] sm:$0xff]   ;;  %v2076_v43 = vrot.slane %v273_v39, %v2072_v41  ;;  %v288_v44 = vcombine.high %v280_v42, %v280_v42  ;;  %v296_v45 = vrot.slane %v280_v42, %v2072_v41  ;;  %v1831_v48 = vld [vmem:[%s2394_s1 + $0x100] sm:$0xff]  }
   0xd   :  { %1645 = vmatpush3.bf16.msra.mxu1 %v1807_v11  ;;  %1624 = vmatprep.subr.bf16.mxu0 %v1808_v12  ;;  %v1833_v51 = vld [vmem:[%s2394_s1 + $0x148] sm:$0xff]   ;;  %v1832_v53 = vld [vmem:[%s2394_s1 + $0x180] sm:$0xff]   ;;  %v1837_v57 = vld [vmem:[%s2394_s1 + $0x150] sm:$0xff]  }
   0xe   :  { %1646 = vmatprep.subr.bf16.mxu1 %v1809_v13  ;;  %v289_v46 = vcombine.high %v2076_v43, %v2076_v43  ;;  %v310_v47 = vrot.slane %v288_v44, %v2072_v41  ;;  %v318_v50 = vcombine.high %v296_v45, %v296_v45  ;;  %v1834_v54 = vld [vmem:[%s2394_s1 + $0x1c8] sm:$0xff]   ;;  %v1838_v59 = vld [vmem:[%s2394_s1 + $0x1d0] sm:$0xff]   ;;  %v1841_v61 = vld [vmem:[%s2394_s1 + $0x158] sm:$0xff]  }
   0xf   :  { %v1835_v56 = vld [vmem:[%s2394_s1 + $0x108] sm:$0xff]   ;;  %v1839_v60 = vld [vmem:[%s2394_s1 + $0x110] sm:$0xff]   ;;  %v1842_v63 = vld [vmem:[%s2394_s1 + $0x1d8] sm:$0xff]  }
  0x10   :  { %1625 = vmatpush3.bf16.msra.mxu0 %v1810_v14  ;;  %v317_v49 = vrot.slane %v289_v46, %v2072_v41  ;;  %1187 = vmatprep.mubr.bf16.mxu0 %v310_v47  ;;  %v320_v52 = vcombine.high %v310_v47, %v310_v47  ;;  %v1836_v58 = vld [vmem:[%s2394_s1 + $0x188] sm:$0xff]   ;;  %v1840_v62 = vld [vmem:[%s2394_s1 + $0x190] sm:$0xff]   ;;  %v1843_v0 = vld [vmem:[%s2394_s1 + $0x118] sm:$0xff]  }
  0x11   :  { %1647 = vmatpush3.bf16.msra.mxu1 %v1811_v15  ;;  %1626 = vmatprep.subr.bf16.mxu0 %v1812_v16  ;;  %v1845_v1 = vld [vmem:[%s2394_s1 + $0x160] sm:$0xff]   ;;  %v1844_v2 = vld [vmem:[%s2394_s1 + $0x198] sm:$0xff]   ;;  %v1849_v5 = vld [vmem:[%s2394_s1 + $0x168] sm:$0xff]  }
  0x12   :  { %1648 = vmatprep.subr.bf16.mxu1 %v1813_v17  ;;  %v321_v55 = vcombine.high %v317_v49, %v317_v49  ;;  %1227 = vmatprep.mubr.bf16.mxu1 %v320_v52  ;;  %v1846_v3 = vld [vmem:[%s2394_s1 + $0x1e0] sm:$0xff]   ;;  %v1850_v7 = vld [vmem:[%s2394_s1 + $0x1e8] sm:$0xff]   ;;  %v1853_v9 = vld [vmem:[%s2394_s1 + $0x170] sm:$0xff]   ;;  %v303_v17 = vrot.slane %v2076_v43, %v2072_v41 }
  0x13   :  { %v1847_v4 = vld [vmem:[%s2394_s1 + $0x120] sm:$0xff]   ;;  %v1851_v8 = vld [vmem:[%s2394_s1 + $0x128] sm:$0xff]   ;;  %v1854_v11 = vld [vmem:[%s2394_s1 + $0x1f0] sm:$0xff]  }
  0x14   :  { %1627 = vmatpush3.bf16.msra.mxu0 %v1814_v18  ;;  %v1848_v6 = vld [vmem:[%s2394_s1 + $0x1a0] sm:$0xff]   ;;  %v1852_v10 = vld [vmem:[%s2394_s1 + $0x1a8] sm:$0xff]   ;;  %v1855_v12 = vld [vmem:[%s2394_s1 + $0x130] sm:$0xff]  }
  0x15   :  { %1649 = vmatpush3.bf16.msra.mxu1 %v1815_v19  ;;  %1628 = vmatprep.subr.bf16.mxu0 %v1816_v20  ;;  %v1857_v13 = vld [vmem:[%s2394_s1 + $0x178] sm:$0xff]   ;;  %v1856_v14 = vld [vmem:[%s2394_s1 + $0x1b0] sm:$0xff]   ;;  %v1861_v18 = vld [vmem:[%s2394_s1 + $0x240] sm:$0xff]  }
  0x16   :  { %1650 = vmatprep.subr.bf16.mxu1 %v1817_v21  ;;  %v1858_v15 = vld [vmem:[%s2394_s1 + $0x1f8] sm:$0xff]   ;;  %v1862_v20 = vld [vmem:[%s2394_s1 + $0x2c0] sm:$0xff]   ;;  %v1868_v28 = vld [vmem:[%s2394_s1 + $0x288] sm:$0xff]  }
  0x17   :  { %v1859_v16 = vld [vmem:[%s2394_s1 + $0x138] sm:$0xff]   ;;  %v1863_v21 = vld [vmem:[%s2394_s1 + $0x200] sm:$0xff]   ;;  %v1881_v39 = vld [vmem:[%s2394_s1 + $0x268] sm:$0xff]  }
  0x18   :  { %1629 = vmatpush3.bf16.msra.mxu0 %v1818_v22  ;;  %v1860_v19 = vld [vmem:[%s2394_s1 + $0x1b8] sm:$0xff]   ;;  %v319_v22 = vcombine.high %v303_v17, %v303_v17  ;;  %v1878_v37 = vld [vmem:[%s2394_s1 + $0x2e0] sm:$0xff]   ;;  %v1882_v42 = vld [vmem:[%s2394_s1 + $0x2e8] sm:$0xff]  }
  0x19   :  { %1651 = vmatpush3.bf16.msra.mxu1 %v1819_v23  ;;  %1630 = vmatprep.subr.bf16.mxu0 %v1820_v24  ;;  %v1865_v23 = vld [vmem:[%s2394_s1 + $0x248] sm:$0xff]   ;;  %v1864_v24 = vld [vmem:[%s2394_s1 + $0x280] sm:$0xff]   ;;  %v1874_v33 = vld [vmem:[%s2394_s1 + $0x2d8] sm:$0xff]  }
  0x1a   :  { %1652 = vmatprep.subr.bf16.mxu1 %v1821_v25  ;;  %v1866_v25 = vld [vmem:[%s2394_s1 + $0x2c8] sm:$0xff]   ;;  %v1875_v34 = vld [vmem:[%s2394_s1 + $0x218] sm:$0xff]   ;;  %v1880_v40 = vld [vmem:[%s2394_s1 + $0x2a0] sm:$0xff]  }
  0x1b   :  { %v1876_v36 = vld [vmem:[%s2394_s1 + $0x298] sm:$0xff]   ;;  %v1883_v43 = vld [vmem:[%s2394_s1 + $0x228] sm:$0xff]   ;;  %v1885_v44 = vld [vmem:[%s2394_s1 + $0x270] sm:$0xff]  }
  0x1c   :  { %1631 = vmatpush3.bf16.msra.mxu0 %v1822_v26  ;;  %v1867_v26 = vld [vmem:[%s2394_s1 + $0x208] sm:$0xff]  }
  0x1d   :  { %1653 = vmatpush3.bf16.msra.mxu1 %v1823_v27  ;;  %1632 = vmatprep.subr.bf16.mxu0 %v1824_v29  ;;  %v1869_v27 = vld [vmem:[%s2394_s1 + $0x250] sm:$0xff]   ;;  %v1884_v46 = vld [vmem:[%s2394_s1 + $0x2a8] sm:$0xff]  }
  0x1e   :  { %1654 = vmatprep.subr.bf16.mxu1 %v1825_v30  ;;  %v1870_v29 = vld [vmem:[%s2394_s1 + $0x2d0] sm:$0xff]  }
  0x1f   :  { %v1871_v30 = vld [vmem:[%s2394_s1 + $0x210] sm:$0xff]  }
  0x20   :  { %1633 = vmatpush3.bf16.msra.mxu0 %v1826_v31  ;;  %v1873_v31 = vld [vmem:[%s2394_s1 + $0x258] sm:$0xff]  }
  0x21   :  { %1655 = vmatpush3.bf16.msra.mxu1 %v1827_v32  ;;  %1662 = vmatprep.subr.bf16.mxu0 %v1829_v35  ;;  %v1872_v32 = vld [vmem:[%s2394_s1 + $0x290] sm:$0xff]   ;;  %v1877_v35 = vld [vmem:[%s2394_s1 + $0x260] sm:$0xff]  }
  0x22   :  { %1684 = vmatprep.subr.bf16.mxu1 %v1830_v38  ;;  %v1879_v38 = vld [vmem:[%s2394_s1 + $0x220] sm:$0xff]  }
  0x23   :  { %1188 = vmatmul.mubr.bf16.vlgmr.msra.gmra.mrb[0].mxu0 %v296_v45  ;;  %v14_v45 = vld [vmem:[%s2393_s0 + $0x8] sm:$0xff] }
  0x24   :  { %1663 = vmatpush3.bf16.msra.mxu0 %v1831_v48  ;;  %1228 = vmatmul.mubr.bf16.vlgmr.msra.gmra.mrb[0].mxu1 %v318_v50  ;;  %v329_v47 = vrot.slane %v14_v45, %v2072_v41  ;;  %v322_v48 = vcombine.high %v14_v45, %v14_v45  ;;  %v1887_v50 = vld [vmem:[%s2394_s1 + $0x230] sm:$0xff]  }
  0x25   :  { %1664 = vmatprep.subr.bf16.mxu0 %v1833_v51  ;;  %1685 = vmatpush3.bf16.msra.mxu1 %v1832_v53  ;;  %v1889_v53 = vld [vmem:[%s2394_s1 + $0x278] sm:$0xff]  }
  0x26   :  { %1267 = vmatprep.mubr.bf16.mxu0 %v317_v49  ;;  %1686 = vmatprep.subr.bf16.mxu1 %v1834_v54  ;;  %v1886_v49 = vld [vmem:[%s2394_s1 + $0x2f0] sm:$0xff]   ;;  %v337_v51 = vcombine.high %v329_v47, %v329_v47  ;;  %v2261_v52 = vrot.slane %v322_v48, %v2072_v41 }
  0x27   :  { %1307 = vmatprep.mubr.bf16.mxu1 %v321_v55  ;;  %v1888_v54 = vld [vmem:[%s2394_s1 + $0x2b0] sm:$0xff]  }
  0x28   :  { %1665 = vmatpush3.bf16.msra.mxu0 %v1835_v56  ;;  %v359_v55 = vrot.slane %v337_v51, %v2072_v41  ;;  %v338_v56 = vcombine.high %v2261_v52, %v2261_v52 }
  0x29   :  { %1666 = vmatprep.subr.bf16.mxu0 %v1837_v57  ;;  %1687 = vmatpush3.bf16.msra.mxu1 %v1836_v58  ;;  %v1890_v57 = vld [vmem:[%s2394_s1 + $0x2f8] sm:$0xff]  }
  0x2a   :  { %1688 = vmatprep.subr.bf16.mxu1 %v1838_v59  ;;  %v1891_v58 = vld [vmem:[%s2394_s1 + $0x238] sm:$0xff]   ;;  %v369_v59 = vcombine.high %v359_v55, %v359_v55 }
  0x2c   :  { %1667 = vmatpush3.bf16.msra.mxu0 %v1839_v60  ;;  %v345_v60 = vrot.slane %v329_v47, %v2072_v41 }
  0x2d   :  { %1668 = vmatprep.subr.bf16.mxu0 %v1841_v61  ;;  %1689 = vmatpush3.bf16.msra.mxu1 %v1840_v62  ;;  %v1893_v61 = vld [vmem:[%s2394_s1 + $0x340] sm:$0xff]   ;;  %v1892_v62 = vld [vmem:[%s2394_s1 + $0x2b8] sm:$0xff]  }
  0x2e   :  { %1690 = vmatprep.subr.bf16.mxu1 %v1842_v63  ;;  %v366_v63 = vrot.slane %v338_v56, %v2072_v41 }
  0x30   :  { %1669 = vmatpush3.bf16.msra.mxu0 %v1843_v0  ;;  %v1894_v0 = vld [vmem:[%s2394_s1 + $0x3c0] sm:$0xff]  }
  0x31   :  { %1670 = vmatprep.subr.bf16.mxu0 %v1845_v1  ;;  %1691 = vmatpush3.bf16.msra.mxu1 %v1844_v2  ;;  %v1895_v1 = vld [vmem:[%s2394_s1 + $0x300] sm:$0xff]   ;;  %v367_v2 = vcombine.high %v345_v60, %v345_v60 }
  0x32   :  { %1692 = vmatprep.subr.bf16.mxu1 %v1846_v3  ;;  %v1897_v3 = vld [vmem:[%s2394_s1 + $0x348] sm:$0xff]  }
  0x34   :  { %1671 = vmatpush3.bf16.msra.mxu0 %v1847_v4  ;;  %v1896_v4 = vld [vmem:[%s2394_s1 + $0x380] sm:$0xff]  }
  0x35   :  { %1672 = vmatprep.subr.bf16.mxu0 %v1849_v5  ;;  %1693 = vmatpush3.bf16.msra.mxu1 %v1848_v6  ;;  %v370_v5 = vcombine.high %v366_v63, %v366_v63  ;;  %v1898_v6 = vld [vmem:[%s2394_s1 + $0x3c8] sm:$0xff]  }
  0x36   :  { %1694 = vmatprep.subr.bf16.mxu1 %v1850_v7  ;;  %v1899_v7 = vld [vmem:[%s2394_s1 + $0x308] sm:$0xff]  }
  0x38   :  { %1673 = vmatpush3.bf16.msra.mxu0 %v1851_v8  ;;  %v1901_v8 = vld [vmem:[%s2394_s1 + $0x350] sm:$0xff]  }
  0x39   :  { %1674 = vmatprep.subr.bf16.mxu0 %v1853_v9  ;;  %1695 = vmatpush3.bf16.msra.mxu1 %v1852_v10  ;;  %v1900_v9 = vld [vmem:[%s2394_s1 + $0x388] sm:$0xff]   ;;  %v1902_v10 = vld [vmem:[%s2394_s1 + $0x3d0] sm:$0xff]  }
  0x3a   :  { %1696 = vmatprep.subr.bf16.mxu1 %v1854_v11  ;;  %v1903_v11 = vld [vmem:[%s2394_s1 + $0x310] sm:$0xff]  }
  0x3c   :  { %1675 = vmatpush3.bf16.msra.mxu0 %v1855_v12  ;;  %v1905_v12 = vld [vmem:[%s2394_s1 + $0x358] sm:$0xff]  }
  0x3d   :  { %1676 = vmatprep.subr.bf16.mxu0 %v1857_v13  ;;  %1697 = vmatpush3.bf16.msra.mxu1 %v1856_v14  ;;  %v1904_v13 = vld [vmem:[%s2394_s1 + $0x390] sm:$0xff]   ;;  %v1906_v14 = vld [vmem:[%s2394_s1 + $0x3d8] sm:$0xff]  }
  0x3e   :  { %1698 = vmatprep.subr.bf16.mxu1 %v1858_v15  ;;  %v1907_v15 = vld [vmem:[%s2394_s1 + $0x318] sm:$0xff]  }
  0x40   :  { %1677 = vmatpush3.bf16.msra.mxu0 %v1859_v16  ;;  %v1909_v16 = vld [vmem:[%s2394_s1 + $0x360] sm:$0xff]  }
  0x41   :  { %1706 = vmatprep.subr.bf16.mxu0 %v1861_v18  ;;  %1699 = vmatpush3.bf16.msra.mxu1 %v1860_v19  ;;  %v1910_v18 = vld [vmem:[%s2394_s1 + $0x3e0] sm:$0xff]  }
  0x42   :  { %1728 = vmatprep.subr.bf16.mxu1 %v1862_v20  ;;  %v1911_v19 = vld [vmem:[%s2394_s1 + $0x320] sm:$0xff]   ;;  %v1913_v20 = vld [vmem:[%s2394_s1 + $0x368] sm:$0xff]  }
  0x43   :  { %1268 = vmatmul.mubr.bf16.vlgmr.msra.gmra.mrb[4].mxu0 %v303_v17  ;;  %v1908_v17 = vld [vmem:[%s2394_s1 + $0x398] sm:$0xff]  }
  0x44   :  { %1707 = vmatpush3.bf16.msra.mxu0 %v1863_v21  ;;  %1308 = vmatmul.mubr.bf16.vlgmr.msra.gmra.mrb[4].mxu1 %v319_v22  ;;  %v1912_v21 = vld [vmem:[%s2394_s1 + $0x3a0] sm:$0xff]   ;;  %v1914_v22 = vld [vmem:[%s2394_s1 + $0x3e8] sm:$0xff]  }
  0x45   :  { %1708 = vmatprep.subr.bf16.mxu0 %v1865_v23  ;;  %1729 = vmatpush3.bf16.msra.mxu1 %v1864_v24  ;;  %v1915_v23 = vld [vmem:[%s2394_s1 + $0x328] sm:$0xff]   ;;  %v1917_v24 = vld [vmem:[%s2394_s1 + $0x370] sm:$0xff]  }
  0x46   :  { %1730 = vmatprep.subr.bf16.mxu1 %v1866_v25  ;;  %1347 = vmatprep.mubr.bf16.mxu0 %v359_v55 }
  0x47   :  { %1387 = vmatprep.mubr.bf16.mxu1 %v369_v59 }
  0x48   :  { %1709 = vmatpush3.bf16.msra.mxu0 %v1867_v26 }
  0x49   :  { %1710 = vmatprep.subr.bf16.mxu0 %v1869_v27  ;;  %1731 = vmatpush3.bf16.msra.mxu1 %v1868_v28 }
  0x4a   :  { %1732 = vmatprep.subr.bf16.mxu1 %v1870_v29 }
  0x4c   :  { %1711 = vmatpush3.bf16.msra.mxu0 %v1871_v30 }
  0x4d   :  { %1712 = vmatprep.subr.bf16.mxu0 %v1873_v31  ;;  %1733 = vmatpush3.bf16.msra.mxu1 %v1872_v32 }
  0x4e   :  { %1734 = vmatprep.subr.bf16.mxu1 %v1874_v33 }
  0x50   :  { %1713 = vmatpush3.bf16.msra.mxu0 %v1875_v34 }
  0x51   :  { %1714 = vmatprep.subr.bf16.mxu0 %v1877_v35  ;;  %1735 = vmatpush3.bf16.msra.mxu1 %v1876_v36 }
  0x52   :  { %1736 = vmatprep.subr.bf16.mxu1 %v1878_v37 }
  0x54   :  { %1715 = vmatpush3.bf16.msra.mxu0 %v1879_v38 }
  0x55   :  { %1716 = vmatprep.subr.bf16.mxu0 %v1881_v39  ;;  %1737 = vmatpush3.bf16.msra.mxu1 %v1880_v40 }
  0x56   :  { %1738 = vmatprep.subr.bf16.mxu1 %v1882_v42 }
  0x58   :  { %1717 = vmatpush3.bf16.msra.mxu0 %v1883_v43 }
  0x59   :  { %1718 = vmatprep.subr.bf16.mxu0 %v1885_v44  ;;  %1739 = vmatpush3.bf16.msra.mxu1 %v1884_v46 }
  0x5a   :  { %1740 = vmatprep.subr.bf16.mxu1 %v1886_v49 }
  0x5c   :  { %1719 = vmatpush3.bf16.msra.mxu0 %v1887_v50 }
  0x5d   :  { %1720 = vmatprep.subr.bf16.mxu0 %v1889_v53  ;;  %1741 = vmatpush3.bf16.msra.mxu1 %v1888_v54 }
  0x5e   :  { %1742 = vmatprep.subr.bf16.mxu1 %v1890_v57 }
  0x60   :  { %1721 = vmatpush3.bf16.msra.mxu0 %v1891_v58 }
  0x61   :  { %1750 = vmatprep.subr.bf16.mxu0 %v1893_v61  ;;  %1743 = vmatpush3.bf16.msra.mxu1 %v1892_v62 }
  0x62   :  { %1772 = vmatprep.subr.bf16.mxu1 %v1894_v0 }
  0x63   :  { %1348 = vmatmul.mubr.bf16.vlgmr.msra.gmra.mrb[8].mxu0 %v345_v60 }
  0x64   :  { %1751 = vmatpush3.bf16.msra.mxu0 %v1895_v1  ;;  %1427 = vmatprep.mubr.bf16.mxu0 %v366_v63 }
  0x65   :  { %1388 = vmatmul.mubr.bf16.vlgmr.msra.gmra.mrb[8].mxu1 %v367_v2  ;;  %1752 = vmatprep.subr.bf16.mxu0 %v1897_v3 }
  0x66   :  { %1773 = vmatpush3.bf16.msra.mxu1 %v1896_v4  ;;  %1467 = vmatprep.mubr.bf16.mxu1 %v370_v5 }
  0x67   :  { %1774 = vmatprep.subr.bf16.mxu1 %v1898_v6 }
  0x68   :  { %1753 = vmatpush3.bf16.msra.mxu0 %v1899_v7 }
  0x69   :  { %1754 = vmatprep.subr.bf16.mxu0 %v1901_v8 }
  0x6a   :  { %1775 = vmatpush3.bf16.msra.mxu1 %v1900_v9 }
  0x6b   :  { %1776 = vmatprep.subr.bf16.mxu1 %v1902_v10 }
  0x6c   :  { %1755 = vmatpush3.bf16.msra.mxu0 %v1903_v11 }
  0x6d   :  { %1756 = vmatprep.subr.bf16.mxu0 %v1905_v12 }
  0x6e   :  { %1777 = vmatpush3.bf16.msra.mxu1 %v1904_v13 }
  0x6f   :  { %1778 = vmatprep.subr.bf16.mxu1 %v1906_v14 }
  0x70   :  { %1757 = vmatpush3.bf16.msra.mxu0 %v1907_v15 }
  0x71   :  { %1758 = vmatprep.subr.bf16.mxu0 %v1909_v16 }
  0x72   :  { %1779 = vmatpush3.bf16.msra.mxu1 %v1908_v17 }
  0x73   :  { %1780 = vmatprep.subr.bf16.mxu1 %v1910_v18 }
  0x74   :  { %1759 = vmatpush3.bf16.msra.mxu0 %v1911_v19 }
  0x75   :  { %1760 = vmatprep.subr.bf16.mxu0 %v1913_v20 }
  0x76   :  { %7 = vsyncpa [#allocation3], 0  ;;  %1781 = vmatpush3.bf16.msra.mxu1 %v1912_v21  ;;  %v1916_v25 = vld [vmem:[%s2394_s1 + $0x3a8] sm:$0xff]   ;;  %v1918_v26 = vld [vmem:[%s2394_s1 + $0x3f0] sm:$0xff]   ;;  %v352_v32 = vrot.slane %v2261_v52, %v2072_v41 }
  0x77   :  { %1782 = vmatprep.subr.bf16.mxu1 %v1914_v22  ;;  %v1919_v27 = vld [vmem:[%s2394_s1 + $0x330] sm:$0xff]   ;;  %v1921_v28 = vld [vmem:[%s2394_s1 + $0x378] sm:$0xff]  }
  0x78   :  { %1761 = vmatpush3.bf16.msra.mxu0 %v1915_v23  ;;  %v1920_v29 = vld [vmem:[%s2394_s1 + $0x3b0] sm:$0xff]   ;;  %v1922_v30 = vld [vmem:[%s2394_s1 + $0x3f8] sm:$0xff]   ;;  %v368_v34 = vcombine.high %v352_v32, %v352_v32 }
  0x79   :  { %1762 = vmatprep.subr.bf16.mxu0 %v1917_v24  ;;  %v1923_v31 = vld [vmem:[%s2394_s1 + $0x338] sm:$0xff]  }
  0x7a   :  { %1783 = vmatpush3.bf16.msra.mxu1 %v1916_v25  ;;  %v1924_v33 = vld [vmem:[%s2394_s1 + $0x3b8] sm:$0xff]   ;;  %s1951_s1 = smov [#allocation2]  }
  0x7b   :  { %1784 = vmatprep.subr.bf16.mxu1 %v1918_v26  ;;  %s1482_s14 = sshll.u32 %s1951_s1, 4  ;;  %s1483_s14 = int_to_ptr.vmem [resolvable:$true] %s1482_s14 }
  0x7c   :  { %1763 = vmatpush3.bf16.msra.mxu0 %v1919_v27  ;;  %s1926_s15 = scalar_lea.vmem %s1483_s14, 32  ;;  %p1931_p1 = scmp.lt.s32.totalorder %s1483_s14, %s1483_s14 }
  0x7d   :  { %1764 = vmatprep.subr.bf16.mxu0 %v1921_v28  ;;  %p1927_p0 = scmp.ne.s32.totalorder %s1483_s14, %s1926_s15  ;;  %p1932_p2 = scmp.lt.s32.totalorder %s1926_s15, %s1926_s15 }
  0x7e   :  { %1785 = vmatpush3.bf16.msra.mxu1 %v1920_v29 }
  0x7f   :  { %1786 = vmatprep.subr.bf16.mxu1 %v1922_v30  ;;  %p1933_p3 = por %p1932_p2, %p1931_p1 }
  0x80   :  { %1765 = vmatpush3.bf16.msra.mxu0 %v1923_v31 }
  0x81   :  { %p1934_p4 = pnand %p1933_p3, %p1927_p0 }
  0x82   :  { %1787 = vmatpush3.bf16.msra.mxu1 %v1924_v33 }
  0x83   :  { %1428 = vmatmul.mubr.bf16.vlgmr.msra.gmra.mrb[12].mxu0 %v352_v32 }
  0x85   :  { %1468 = vmatmul.mubr.bf16.vlgmr.msra.gmra.mrb[12].mxu1 %v368_v34 }
  0xf6   :  { %v1634_v35 = vpop.f32.mrb[0].mxu0 }
  0xf7   :  { %v1635_v36 = vpop.f32.mrb[1].mxu0  ;;  %v1656_v37 = vpop.f32.mrb[0].mxu1 }
  0xf8   :  { %v1636_v38 = vadd.f32 %v1635_v36, %v1634_v35  ;;  %v1637_v39 = vpop.f32.mrb[2].mxu0  ;;  %v1657_v40 = vpop.f32.mrb[1].mxu1 }
  0xf9   :  { %v1638_v42 = vpop.f32.mrb[3].mxu0  ;;  %v1658_v43 = vadd.f32 %v1657_v40, %v1656_v37  ;;  %v1659_v41 = vpop.f32.mrb[2].mxu1 }
  0xfa   :  { %v1660_v44 = vpop.f32.mrb[3].mxu1 }
  0xfb   :  { %v1230_v45 = vadd.f32 %v1658_v43, %v1636_v38 }
 0x116   :  { %v1678_v46 = vpop.f32.mrb[4].mxu0 }
 0x117   :  { %v1679_v47 = vpop.f32.mrb[5].mxu0  ;;  %v1700_v48 = vpop.f32.mrb[4].mxu1 }
 0x118   :  { %v1680_v49 = vadd.f32 %v1679_v47, %v1678_v46  ;;  %v1681_v50 = vpop.f32.mrb[6].mxu0  ;;  %v1701_v51 = vpop.f32.mrb[5].mxu1 }
 0x119   :  { %v1682_v52 = vpop.f32.mrb[7].mxu0  ;;  %v1702_v54 = vadd.f32 %v1701_v51, %v1700_v48  ;;  %v1703_v55 = vpop.f32.mrb[6].mxu1 }
 0x11a   :  { %v1270_v53 = vadd.f32 %v1680_v49, %v1230_v45  ;;  %v1704_v56 = vpop.f32.mrb[7].mxu1 }
 0x11c   :  { %v1310_v57 = vadd.f32 %v1702_v54, %v1270_v53 }
 0x136   :  { %v1722_v58 = vpop.f32.mrb[8].mxu0 }
 0x137   :  { %v1723_v59 = vpop.f32.mrb[9].mxu0 }
 0x138   :  { %v1744_v60 = vpop.f32.mrb[8].mxu1  ;;  %v1724_v61 = vadd.f32 %v1723_v59, %v1722_v58  ;;  %v1725_v62 = vpop.f32.mrb[10].mxu0 }
 0x139   :  { %v1745_v63 = vpop.f32.mrb[9].mxu1  ;;  %v1726_v0 = vpop.f32.mrb[11].mxu0 }
 0x13a   :  { %v1350_v1 = vadd.f32 %v1724_v61, %v1310_v57  ;;  %v1746_v2 = vadd.f32 %v1745_v63, %v1744_v60  ;;  %v1747_v3 = vpop.f32.mrb[10].mxu1 }
 0x13b   :  { %v1748_v4 = vpop.f32.mrb[11].mxu1 }
 0x13c   :  { %v1390_v5 = vadd.f32 %v1746_v2, %v1350_v1 }
 0x156   :  { %v1766_v6 = vpop.f32.mrb[12].mxu0 }
 0x157   :  { %v1767_v7 = vpop.f32.mrb[13].mxu0 }
 0x158   :  { %v1788_v8 = vpop.f32.mrb[12].mxu1  ;;  %v1768_v9 = vadd.f32 %v1767_v7, %v1766_v6  ;;  %v1769_v10 = vpop.f32.mrb[14].mxu0 }
 0x159   :  { %v1789_v11 = vpop.f32.mrb[13].mxu1  ;;  %v1770_v12 = vpop.f32.mrb[15].mxu0 }
 0x15a   :  { %v1430_v13 = vadd.f32 %v1768_v9, %v1390_v5  ;;  %v1790_v14 = vadd.f32 %v1789_v11, %v1788_v8  ;;  %v1791_v15 = vpop.f32.mrb[14].mxu1 }
 0x15b   :  { %v1792_v16 = vpop.f32.mrb[15].mxu1 }
 0x15c   :  { %v1470_v17 = vadd.f32 %v1790_v14, %v1430_v13 }
 0x15e   :  { %1475 = vst [vmem:[#allocation2] sm:$0x3] %v1470_v17 }
 0x15f   :  { %1937 = shalt.err (!%p1934_p4)
}
 0x160   :  { %s1938_s18 = scalar_lea.hbm %s2395_s2, 32 }
 0x161   :  { %p1939_p5 = scmp.ne.s32.totalorder %s2395_s2, %s1938_s18  ;;  %p1942_p6 = scmp.lt.u32.totalorder %s1938_s18, %s2395_s2 }
 0x163   :  { %p1944_p7 = pnand %p1942_p6, %p1939_p5 }
 0x165   :  { %1947 = shalt.err (!%p1944_p7)
}
 0x166   :  { %1485 = dma.vmem_to_hbm [thread:$0]  %s1483_s14, 32, %s2395_s2, [#allocation3]  }
 0x167   :  { %1948 = dma.done.wait [#allocation3], 32  }
 0x168   :  { %1949 = vsyncadd [#allocation3], 4294967264 }
 0x169   :  { %1489 = vsyncpa [#allocation3], 1 }

</bundles_post_ra>
